<compile_context>
chip_gen: v7x
topology: tpu7x:2x2x1
jax: 0.10.0
libtpu: 0.0.40
codegen_flags: <defaults>
</compile_context>

<pallas_src>
import jax
import jax.numpy as jnp
from jax import lax
from jax.experimental import pallas as pl
from jax.experimental.pallas import tpu as pltpu


def _round_up(x, m):
    return (x + m - 1) // m * m


# --------------------------- Pallas kernels ---------------------------------

def _matmul_bias_relu_kernel(a_ref, b_ref, bias_ref, o_ref):
    # One M-tile: o = relu(a @ b + bias), bf16 inputs, f32 MXU accumulation.
    acc = jnp.dot(a_ref[...], b_ref[...], preferred_element_type=jnp.float32)
    acc = acc + bias_ref[...]                 # (1, Np) broadcasts over (TM, Np)
    o_ref[...] = jnp.maximum(acc, 0.0).astype(o_ref.dtype)


def pallas_conv_matmul_bias_relu(col, w_pad, b_pad):
    """relu(col @ w_pad + b_pad).

    col:   (M, K)  bf16 im2col activations (K possibly unpadded)
    w_pad: (Kp, Np) bf16 pre-padded weights (Kp, Np multiples of 128)
    b_pad: (1, Np)  f32 pre-padded bias
    Returns padded (Mp, Np) bf16; caller slices the valid region.
    """
    M, K = col.shape
    Kp, Np = w_pad.shape
    if M > 256:
        TM = 256
        Mp = _round_up(M, TM)
    else:
        TM = Mp = _round_up(M, 8)
    if Mp != M or Kp != K:
        col = jnp.pad(col, ((0, Mp - M), (0, Kp - K)))
    grid_m = Mp // TM
    return pl.pallas_call(
        _matmul_bias_relu_kernel,
        out_shape=jax.ShapeDtypeStruct((Mp, Np), jnp.bfloat16),
        grid=(grid_m,),
        in_specs=[pl.BlockSpec((TM, Kp), lambda i: (i, 0)),
                  pl.BlockSpec((Kp, Np), lambda i: (0, 0)),
                  pl.BlockSpec((1, Np), lambda i: (0, 0))],
        out_specs=pl.BlockSpec((TM, Np), lambda i: (i, 0)),
        compiler_params=pltpu.CompilerParams(
            dimension_semantics=("parallel",)),
    )(col, w_pad, b_pad)


CMAX = 384      # max AlexNet feature channels (already a multiple of 128)
TR = 128        # head row-tile


def _lpips_head_kernel(lid_ref, fx_ref, fy_ref, w_ref, o_ref):
    # Fused LPIPS head over ALL layers: per spatial location L2-normalize
    # features over channels (lpips v0.1 normalize_tensor eps placement),
    # squared difference, weighted channel sum with the per-layer lin weights
    # (pre-scaled by 1/(H*W)), accumulated into a single (1,1) scalar.
    @pl.when(pl.program_id(0) == 0)
    def _():
        o_ref[...] = jnp.zeros_like(o_ref)

    eps = 1e-10
    fx = fx_ref[...].astype(jnp.float32)
    fy = fy_ref[...].astype(jnp.float32)
    inv_x = pl.reciprocal(
        jnp.sqrt(jnp.sum(fx * fx, axis=1, keepdims=True)) + eps, approx=True)
    inv_y = pl.reciprocal(
        jnp.sqrt(jnp.sum(fy * fy, axis=1, keepdims=True)) + eps, approx=True)
    d = (fx * inv_x - fy * inv_y) ** 2
    w = w_ref[0:1, :]                                  # (1, CMAX), f32
    per_row = jnp.sum(d * w, axis=1, keepdims=True)    # (TR, 1)
    o_ref[...] += jnp.sum(per_row, axis=0, keepdims=True)


def pallas_lpips_head(feats_x, feats_y, lin_w_scaled):
    """Single fused head over all layers.

    feats_x/feats_y: lists of (R_l, C_l) bf16 feature rows (R_l = N*H_l*W_l).
    lin_w_scaled:    list of (C_l,) f32 lin weights already scaled by 1/(H_l*W_l).
    Returns (1, 1) f32 = sum over layers and batch of spatial means.
    """
    fx_blocks, fy_blocks, layer_ids = [], [], []
    for l, (fx, fy) in enumerate(zip(feats_x, feats_y)):
        R, C = fx.shape
        Rp = _round_up(R, TR)
        fx_blocks.append(jnp.pad(fx, ((0, Rp - R), (0, CMAX - C))))
        fy_blocks.append(jnp.pad(fy, ((0, Rp - R), (0, CMAX - C))))
        layer_ids.extend([l] * (Rp // TR))
    fx_all = jnp.concatenate(fx_blocks, axis=0)        # (R_tot, CMAX) bf16
    fy_all = jnp.concatenate(fy_blocks, axis=0)
    n_tiles = fx_all.shape[0] // TR
    lids = jnp.array(layer_ids, dtype=jnp.int32)       # (n_tiles,)

    # Weight table: 8 rows per layer (sublane-aligned block), weights in row 0.
    w_rows = []
    for w in lin_w_scaled:
        row = jnp.pad(w.astype(jnp.float32), (0, CMAX - w.shape[0]))
        w_rows.append(jnp.concatenate(
            [row.reshape(1, CMAX), jnp.zeros((7, CMAX), jnp.float32)], axis=0))
    w_tab = jnp.concatenate(w_rows, axis=0)            # (n_layers*8, CMAX)

    return pl.pallas_call(
        _lpips_head_kernel,
        out_shape=jax.ShapeDtypeStruct((1, 1), jnp.float32),
        grid_spec=pltpu.PrefetchScalarGridSpec(
            num_scalar_prefetch=1,
            grid=(n_tiles,),
            in_specs=[pl.BlockSpec((TR, CMAX), lambda i, lid: (i, 0)),
                      pl.BlockSpec((TR, CMAX), lambda i, lid: (i, 0)),
                      pl.BlockSpec((8, CMAX), lambda i, lid: (lid[i], 0))],
            out_specs=pl.BlockSpec((1, 1), lambda i, lid: (0, 0)),
        ),
        compiler_params=pltpu.CompilerParams(
            dimension_semantics=("arbitrary",)),
    )(lids, fx_all, fy_all, w_tab)


# ------------------------- conv / pool glue (NHWC) ---------------------------

def conv2d_relu_nhwc(h, layer):
    """NHWC conv + ReLU: channel-concat im2col + tiled Pallas bf16 matmul."""
    B, H, W, Cin = h.shape
    kh, kw, s, p = layer['kh'], layer['kw'], layer['stride'], layer['pad']
    cout = layer['cout']
    hp = jnp.pad(h, ((0, 0), (p, p), (p, p), (0, 0)))
    Ho = (H + 2 * p - kh) // s + 1
    Wo = (W + 2 * p - kw) // s + 1
    patches = []
    for ki in range(kh):
        for kj in range(kw):
            patches.append(hp[:, ki:ki + s * (Ho - 1) + 1:s,
                                 kj:kj + s * (Wo - 1) + 1:s, :])   # (B,Ho,Wo,Cin)
    col = jnp.concatenate(patches, axis=-1)            # (B,Ho,Wo,kh*kw*Cin)
    col = col.reshape(B * Ho * Wo, kh * kw * Cin)      # contiguous, no transpose
    out = pallas_conv_matmul_bias_relu(col, layer['w_pad'], layer['b_pad'])
    return out[:B * Ho * Wo, :cout].reshape(B, Ho, Wo, cout)


def maxpool3x3s2_nhwc(h):
    # small, non-hot-path reduction; kept in plain JAX (NHWC, no transposes)
    return lax.reduce_window(h, jnp.array(-jnp.inf, dtype=h.dtype), lax.max,
                             window_dimensions=(1, 3, 3, 1),
                             window_strides=(1, 2, 2, 1),
                             padding='VALID')


# ----------------------------- LPIPS model -----------------------------------

N_CHANNELS = [64, 192, 384, 256, 256]                # AlexNet n_channels_list
CONV_CFG = [                                         # (Cout, Cin, kh, kw, stride, pad)
    (64, 3, 11, 11, 4, 2),
    (192, 64, 5, 5, 1, 2),
    (384, 192, 3, 3, 1, 1),
    (256, 384, 3, 3, 1, 1),
    (256, 256, 3, 3, 1, 1),
]

_ZSCORE_MEAN = jnp.array([-0.030, -0.088, -0.188], jnp.float32).reshape(1, 1, 1, 3)
_ZSCORE_INV_STD = 1.0 / jnp.array([0.458, 0.448, 0.450], jnp.float32).reshape(1, 1, 1, 3)


def init_params(key):
    keys = jax.random.split(key, 2 * len(CONV_CFG) + len(N_CHANNELS))
    convs = []
    for i, (co, ci, kh, kw, s, p) in enumerate(CONV_CFG):
        scale = 1.0 / float(ci * kh * kw) ** 0.5
        w = jax.random.normal(keys[2 * i], (co, ci, kh, kw), jnp.float32) * scale
        b = jax.random.normal(keys[2 * i + 1], (co,), jnp.float32) * 0.01
        K = kh * kw * ci
        Kp, Np = _round_up(K, 128), _round_up(co, 128)
        # (Cout,Cin,kh,kw) -> (kh,kw,Cin,Cout) -> (K,Cout): matches NHWC im2col
        # column order ((ki*kw+kj)*Cin + ci). Pre-padded + bf16 once here.
        w2 = jnp.transpose(w, (2, 3, 1, 0)).reshape(K, co)
        w_pad = jnp.pad(w2, ((0, Kp - K), (0, Np - co))).astype(jnp.bfloat16)
        b_pad = jnp.pad(b.reshape(1, co), ((0, 0), (0, Np - co)))        # f32
        convs.append(dict(w_pad=w_pad, b_pad=b_pad, kh=kh, kw=kw,
                          stride=s, pad=p, cout=co))
    lin = []
    for j, c in enumerate(N_CHANNELS):
        # LPIPS v0.1 lin layers: Conv2d(c, 1, 1, bias=False), non-negative weights
        lin.append(jnp.abs(jax.random.normal(keys[2 * len(CONV_CFG) + j], (c,),
                                             jnp.float32)) * 0.1)
    return {'convs': convs, 'lin': lin}


def lpips_forward(x, y, params):
    """Matches torch module: sum over layers & batch of spatial means of
    lin((norm(fx)-norm(fy))^2). Returns shape (1, 1, 1, 1)."""
    N = x.shape[0]
    xy = jnp.concatenate([x, y], axis=0)                 # (2N, 3, H, W)
    h = jnp.transpose(xy, (0, 2, 3, 1))                  # NHWC once, at entry
    h = ((h - _ZSCORE_MEAN) * _ZSCORE_INV_STD).astype(jnp.bfloat16)

    feats = []
    for i, layer in enumerate(params['convs']):
        if i in (1, 2):                                  # maxpool before conv2/conv3
            h = maxpool3x3s2_nhwc(h)
        h = conv2d_relu_nhwc(h, layer)
        feats.append(h)

    feats_x, feats_y, lin_scaled = [], [], []
    for f, lw in zip(feats, params['lin']):
        B2, H, W, C = f.shape
        fr = f.reshape(B2 * H * W, C)                    # rows x channels, no transpose
        split = N * H * W
        feats_x.append(fr[:split])
        feats_y.append(fr[split:])
        lin_scaled.append(lw / float(H * W))             # fold spatial mean into weight

    total = pallas_lpips_head(feats_x, feats_y, lin_scaled)
    return total.reshape(1, 1, 1, 1)


if __name__ == "__main__":
    key = jax.random.PRNGKey(0)
    kx, ky, kp = jax.random.split(key, 3)
    # 64x64 is the smallest convenient spatial size that survives AlexNet's
    # stride-4 conv + two 3x3/s2 maxpools (16x16 collapses to zero-size maps).
    x = jax.random.uniform(kx, (2, 3, 64, 64), jnp.float32) * 2.0 - 1.0
    y = jax.random.uniform(ky, (2, 3, 64, 64), jnp.float32) * 2.0 - 1.0
    params = init_params(kp)

    forward = jax.jit(lambda a, b: lpips_forward(a, b, params))
    out = forward(x, y)
    out = jax.block_until_ready(out)
    assert out.shape == (1, 1, 1, 1) and out.dtype == jnp.float32
    assert bool(jnp.isfinite(out).all())
    print("KERNEL_OK")
</pallas_src>

<mosaic_0001>
module attributes {stable_mosaic.version = 11 : i64} {
  func.func @_matmul_bias_relu_kernel(%arg0: i32, %arg1: memref<256x384xbf16, #tpu.memory_space<vmem>>, %arg2: memref<384x128xbf16, #tpu.memory_space<vmem>>, %arg3: memref<1x128xf32, #tpu.memory_space<vmem>>, %arg4: memref<256x128xbf16, #tpu.memory_space<vmem>>) attributes {dimension_semantics = [#tpu.dimension_semantics<parallel>], iteration_bounds = array<i64: 4>, scalar_prefetch = 0 : i64, scratch_operands = 0 : i64, tpu.core_type = #tpu.core_type<tc>, window_params = [{transform_indices = @transform_0, window_bounds = array<i64: 256, 384>}, {pipeline_mode = #tpu.pipeline_mode<synchronous>, transform_indices = @transform_1, window_bounds = array<i64: 384, 128>}, {pipeline_mode = #tpu.pipeline_mode<synchronous>, transform_indices = @transform_2, window_bounds = array<i64: 1, 128>}, {transform_indices = @transform_3, window_bounds = array<i64: 256, 128>}]} {
    %c0 = arith.constant 0 : index
    %c0_0 = arith.constant 0 : index
    %0 = vector.load %arg1[%c0, %c0_0] : memref<256x384xbf16, #tpu.memory_space<vmem>>, vector<256x384xbf16>
    %c0_1 = arith.constant 0 : index
    %c0_2 = arith.constant 0 : index
    %1 = vector.load %arg2[%c0_1, %c0_2] : memref<384x128xbf16, #tpu.memory_space<vmem>>, vector<384x128xbf16>
    %cst = arith.constant dense<0.000000e+00> : vector<256x128xf32>
    %2 = tpu.matmul %0, %1, %cst {dimension_numbers = #tpu.dot_dimension_numbers<[1], [0], [0], [1], [0, 0, 1, 1], [], []>} : vector<256x384xbf16>, vector<384x128xbf16>, vector<256x128xf32> -> vector<256x128xf32>
    %c0_3 = arith.constant 0 : index
    %c0_4 = arith.constant 0 : index
    %3 = vector.load %arg3[%c0_3, %c0_4] : memref<1x128xf32, #tpu.memory_space<vmem>>, vector<1x128xf32>
    %4 = vector.broadcast %3 : vector<1x128xf32> to vector<256x128xf32>
    %5 = arith.addf %2, %4 : vector<256x128xf32>
    %cst_5 = arith.constant 0.000000e+00 : f32
    %6 = vector.broadcast %cst_5 : f32 to vector<256x128xf32>
    %7 = arith.maximumf %5, %6 : vector<256x128xf32>
    %8 = arith.truncf %7 : vector<256x128xf32> to vector<256x128xbf16>
    %c0_6 = arith.constant 0 : index
    %c0_7 = arith.constant 0 : index
    %9 = vector.load %arg4[%c0_6, %c0_7] : memref<256x128xbf16, #tpu.memory_space<vmem>>, vector<256x128xbf16>
    tpu.vector_store %arg4[%c0_6, %c0_7], %8 {strides = array<i32>} : memref<256x128xbf16, #tpu.memory_space<vmem>>, vector<256x128xbf16>,
    return
  }
  func.func @transform_0(%arg0: i32) -> (i32, i32) {
    %c0_i32 = arith.constant 0 : i32
    %c0_i32_0 = arith.constant 0 : i32
    return %arg0, %c0_i32 : i32, i32
  }
  func.func @transform_1(%arg0: i32) -> (i32, i32) {
    %c0_i32 = arith.constant 0 : i32
    %c0_i32_0 = arith.constant 0 : i32
    %c0_i32_1 = arith.constant 0 : i32
    return %c0_i32, %c0_i32_0 : i32, i32
  }
  func.func @transform_2(%arg0: i32) -> (i32, i32) {
    %c0_i32 = arith.constant 0 : i32
    %c0_i32_0 = arith.constant 0 : i32
    %c0_i32_1 = arith.constant 0 : i32
    return %c0_i32, %c0_i32_0 : i32, i32
  }
  func.func @transform_3(%arg0: i32) -> (i32, i32) {
    %c0_i32 = arith.constant 0 : i32
    %c0_i32_0 = arith.constant 0 : i32
    return %arg0, %c0_i32 : i32, i32
  }
}

module attributes {stable_mosaic.version = 11 : i64} {
  func.func @_matmul_bias_relu_kernel(%arg0: i32, %arg1: memref<200x1664xbf16, #tpu.memory_space<vmem>>, %arg2: memref<1664x256xbf16, #tpu.memory_space<vmem>>, %arg3: memref<1x256xf32, #tpu.memory_space<vmem>>, %arg4: memref<200x256xbf16, #tpu.memory_space<vmem>>) attributes {dimension_semantics = [#tpu.dimension_semantics<parallel>], iteration_bounds = array<i64: 1>, scalar_prefetch = 0 : i64, scratch_operands = 0 : i64, tpu.core_type = #tpu.core_type<tc>, window_params = [{transform_indices = @transform_0, window_bounds = array<i64: 200, 1664>}, {pipeline_mode = #tpu.pipeline_mode<synchronous>, transform_indices = @transform_1, window_bounds = array<i64: 1664, 256>}, {pipeline_mode = #tpu.pipeline_mode<synchronous>, transform_indices = @transform_2, window_bounds = array<i64: 1, 256>}, {transform_indices = @transform_3, window_bounds = array<i64: 200, 256>}]} {
    %c0 = arith.constant 0 : index
    %c0_0 = arith.constant 0 : index
    %0 = vector.load %arg1[%c0, %c0_0] : memref<200x1664xbf16, #tpu.memory_space<vmem>>, vector<200x1664xbf16>
    %c0_1 = arith.constant 0 : index
    %c0_2 = arith.constant 0 : index
    %1 = vector.load %arg2[%c0_1, %c0_2] : memref<1664x256xbf16, #tpu.memory_space<vmem>>, vector<1664x256xbf16>
    %cst = arith.constant dense<0.000000e+00> : vector<200x256xf32>
    %2 = tpu.matmul %0, %1, %cst {dimension_numbers = #tpu.dot_dimension_numbers<[1], [0], [0], [1], [0, 0, 1, 1], [], []>} : vector<200x1664xbf16>, vector<1664x256xbf16>, vector<200x256xf32> -> vector<200x256xf32>
    %c0_3 = arith.constant 0 : index
    %c0_4 = arith.constant 0 : index
    %3 = vector.load %arg3[%c0_3, %c0_4] : memref<1x256xf32, #tpu.memory_space<vmem>>, vector<1x256xf32>
    %4 = vector.broadcast %3 : vector<1x256xf32> to vector<200x256xf32>
    %5 = arith.addf %2, %4 : vector<200x256xf32>
    %cst_5 = arith.constant 0.000000e+00 : f32
    %6 = vector.broadcast %cst_5 : f32 to vector<200x256xf32>
    %7 = arith.maximumf %5, %6 : vector<200x256xf32>
    %8 = arith.truncf %7 : vector<200x256xf32> to vector<200x256xbf16>
    %c0_6 = arith.constant 0 : index
    %c0_7 = arith.constant 0 : index
    %9 = vector.load %arg4[%c0_6, %c0_7] : memref<200x256xbf16, #tpu.memory_space<vmem>>, vector<200x256xbf16>
    tpu.vector_store %arg4[%c0_6, %c0_7], %8 {strides = array<i32>} : memref<200x256xbf16, #tpu.memory_space<vmem>>, vector<200x256xbf16>,
    return
  }
  func.func @transform_0(%arg0: i32) -> (i32, i32) {
    %c0_i32 = arith.constant 0 : i32
    %c0_i32_0 = arith.constant 0 : i32
    return %arg0, %c0_i32 : i32, i32
  }
  func.func @transform_1(%arg0: i32) -> (i32, i32) {
    %c0_i32 = arith.constant 0 : i32
    %c0_i32_0 = arith.constant 0 : i32
    %c0_i32_1 = arith.constant 0 : i32
    return %c0_i32, %c0_i32_0 : i32, i32
  }
  func.func @transform_2(%arg0: i32) -> (i32, i32) {
    %c0_i32 = arith.constant 0 : i32
    %c0_i32_0 = arith.constant 0 : i32
    %c0_i32_1 = arith.constant 0 : i32
    return %c0_i32, %c0_i32_0 : i32, i32
  }
  func.func @transform_3(%arg0: i32) -> (i32, i32) {
    %c0_i32 = arith.constant 0 : i32
    %c0_i32_0 = arith.constant 0 : i32
    return %arg0, %c0_i32 : i32, i32
  }
}

module attributes {stable_mosaic.version = 11 : i64} {
  func.func @_matmul_bias_relu_kernel(%arg0: i32, %arg1: memref<40x1792xbf16, #tpu.memory_space<vmem>>, %arg2: memref<1792x384xbf16, #tpu.memory_space<vmem>>, %arg3: memref<1x384xf32, #tpu.memory_space<vmem>>, %arg4: memref<40x384xbf16, #tpu.memory_space<vmem>>) attributes {dimension_semantics = [#tpu.dimension_semantics<parallel>], iteration_bounds = array<i64: 1>, scalar_prefetch = 0 : i64, scratch_operands = 0 : i64, tpu.core_type = #tpu.core_type<tc>, window_params = [{transform_indices = @transform_0, window_bounds = array<i64: 40, 1792>}, {pipeline_mode = #tpu.pipeline_mode<synchronous>, transform_indices = @transform_1, window_bounds = array<i64: 1792, 384>}, {pipeline_mode = #tpu.pipeline_mode<synchronous>, transform_indices = @transform_2, window_bounds = array<i64: 1, 384>}, {transform_indices = @transform_3, window_bounds = array<i64: 40, 384>}]} {
    %c0 = arith.constant 0 : index
    %c0_0 = arith.constant 0 : index
    %0 = vector.load %arg1[%c0, %c0_0] : memref<40x1792xbf16, #tpu.memory_space<vmem>>, vector<40x1792xbf16>
    %c0_1 = arith.constant 0 : index
    %c0_2 = arith.constant 0 : index
    %1 = vector.load %arg2[%c0_1, %c0_2] : memref<1792x384xbf16, #tpu.memory_space<vmem>>, vector<1792x384xbf16>
    %cst = arith.constant dense<0.000000e+00> : vector<40x384xf32>
    %2 = tpu.matmul %0, %1, %cst {dimension_numbers = #tpu.dot_dimension_numbers<[1], [0], [0], [1], [0, 0, 1, 1], [], []>} : vector<40x1792xbf16>, vector<1792x384xbf16>, vector<40x384xf32> -> vector<40x384xf32>
    %c0_3 = arith.constant 0 : index
    %c0_4 = arith.constant 0 : index
    %3 = vector.load %arg3[%c0_3, %c0_4] : memref<1x384xf32, #tpu.memory_space<vmem>>, vector<1x384xf32>
    %4 = vector.broadcast %3 : vector<1x384xf32> to vector<40x384xf32>
    %5 = arith.addf %2, %4 : vector<40x384xf32>
    %cst_5 = arith.constant 0.000000e+00 : f32
    %6 = vector.broadcast %cst_5 : f32 to vector<40x384xf32>
    %7 = arith.maximumf %5, %6 : vector<40x384xf32>
    %8 = arith.truncf %7 : vector<40x384xf32> to vector<40x384xbf16>
    %c0_6 = arith.constant 0 : index
    %c0_7 = arith.constant 0 : index
    %9 = vector.load %arg4[%c0_6, %c0_7] : memref<40x384xbf16, #tpu.memory_space<vmem>>, vector<40x384xbf16>
    tpu.vector_store %arg4[%c0_6, %c0_7], %8 {strides = array<i32>} : memref<40x384xbf16, #tpu.memory_space<vmem>>, vector<40x384xbf16>,
    return
  }
  func.func @transform_0(%arg0: i32) -> (i32, i32) {
    %c0_i32 = arith.constant 0 : i32
    %c0_i32_0 = arith.constant 0 : i32
    return %arg0, %c0_i32 : i32, i32
  }
  func.func @transform_1(%arg0: i32) -> (i32, i32) {
    %c0_i32 = arith.constant 0 : i32
    %c0_i32_0 = arith.constant 0 : i32
    %c0_i32_1 = arith.constant 0 : i32
    return %c0_i32, %c0_i32_0 : i32, i32
  }
  func.func @transform_2(%arg0: i32) -> (i32, i32) {
    %c0_i32 = arith.constant 0 : i32
    %c0_i32_0 = arith.constant 0 : i32
    %c0_i32_1 = arith.constant 0 : i32
    return %c0_i32, %c0_i32_0 : i32, i32
  }
  func.func @transform_3(%arg0: i32) -> (i32, i32) {
    %c0_i32 = arith.constant 0 : i32
    %c0_i32_0 = arith.constant 0 : i32
    return %arg0, %c0_i32 : i32, i32
  }
}

module attributes {stable_mosaic.version = 11 : i64} {
  func.func @_matmul_bias_relu_kernel(%arg0: i32, %arg1: memref<40x3456xbf16, #tpu.memory_space<vmem>>, %arg2: memref<3456x256xbf16, #tpu.memory_space<vmem>>, %arg3: memref<1x256xf32, #tpu.memory_space<vmem>>, %arg4: memref<40x256xbf16, #tpu.memory_space<vmem>>) attributes {dimension_semantics = [#tpu.dimension_semantics<parallel>], iteration_bounds = array<i64: 1>, scalar_prefetch = 0 : i64, scratch_operands = 0 : i64, tpu.core_type = #tpu.core_type<tc>, window_params = [{transform_indices = @transform_0, window_bounds = array<i64: 40, 3456>}, {pipeline_mode = #tpu.pipeline_mode<synchronous>, transform_indices = @transform_1, window_bounds = array<i64: 3456, 256>}, {pipeline_mode = #tpu.pipeline_mode<synchronous>, transform_indices = @transform_2, window_bounds = array<i64: 1, 256>}, {transform_indices = @transform_3, window_bounds = array<i64: 40, 256>}]} {
    %c0 = arith.constant 0 : index
    %c0_0 = arith.constant 0 : index
    %0 = vector.load %arg1[%c0, %c0_0] : memref<40x3456xbf16, #tpu.memory_space<vmem>>, vector<40x3456xbf16>
    %c0_1 = arith.constant 0 : index
    %c0_2 = arith.constant 0 : index
    %1 = vector.load %arg2[%c0_1, %c0_2] : memref<3456x256xbf16, #tpu.memory_space<vmem>>, vector<3456x256xbf16>
    %cst = arith.constant dense<0.000000e+00> : vector<40x256xf32>
    %2 = tpu.matmul %0, %1, %cst {dimension_numbers = #tpu.dot_dimension_numbers<[1], [0], [0], [1], [0, 0, 1, 1], [], []>} : vector<40x3456xbf16>, vector<3456x256xbf16>, vector<40x256xf32> -> vector<40x256xf32>
    %c0_3 = arith.constant 0 : index
    %c0_4 = arith.constant 0 : index
    %3 = vector.load %arg3[%c0_3, %c0_4] : memref<1x256xf32, #tpu.memory_space<vmem>>, vector<1x256xf32>
    %4 = vector.broadcast %3 : vector<1x256xf32> to vector<40x256xf32>
    %5 = arith.addf %2, %4 : vector<40x256xf32>
    %cst_5 = arith.constant 0.000000e+00 : f32
    %6 = vector.broadcast %cst_5 : f32 to vector<40x256xf32>
    %7 = arith.maximumf %5, %6 : vector<40x256xf32>
    %8 = arith.truncf %7 : vector<40x256xf32> to vector<40x256xbf16>
    %c0_6 = arith.constant 0 : index
    %c0_7 = arith.constant 0 : index
    %9 = vector.load %arg4[%c0_6, %c0_7] : memref<40x256xbf16, #tpu.memory_space<vmem>>, vector<40x256xbf16>
    tpu.vector_store %arg4[%c0_6, %c0_7], %8 {strides = array<i32>} : memref<40x256xbf16, #tpu.memory_space<vmem>>, vector<40x256xbf16>,
    return
  }
  func.func @transform_0(%arg0: i32) -> (i32, i32) {
    %c0_i32 = arith.constant 0 : i32
    %c0_i32_0 = arith.constant 0 : i32
    return %arg0, %c0_i32 : i32, i32
  }
  func.func @transform_1(%arg0: i32) -> (i32, i32) {
    %c0_i32 = arith.constant 0 : i32
    %c0_i32_0 = arith.constant 0 : i32
    %c0_i32_1 = arith.constant 0 : i32
    return %c0_i32, %c0_i32_0 : i32, i32
  }
  func.func @transform_2(%arg0: i32) -> (i32, i32) {
    %c0_i32 = arith.constant 0 : i32
    %c0_i32_0 = arith.constant 0 : i32
    %c0_i32_1 = arith.constant 0 : i32
    return %c0_i32, %c0_i32_0 : i32, i32
  }
  func.func @transform_3(%arg0: i32) -> (i32, i32) {
    %c0_i32 = arith.constant 0 : i32
    %c0_i32_0 = arith.constant 0 : i32
    return %arg0, %c0_i32 : i32, i32
  }
}

module attributes {stable_mosaic.version = 11 : i64} {
  func.func @_matmul_bias_relu_kernel(%arg0: i32, %arg1: memref<40x2304xbf16, #tpu.memory_space<vmem>>, %arg2: memref<2304x256xbf16, #tpu.memory_space<vmem>>, %arg3: memref<1x256xf32, #tpu.memory_space<vmem>>, %arg4: memref<40x256xbf16, #tpu.memory_space<vmem>>) attributes {dimension_semantics = [#tpu.dimension_semantics<parallel>], iteration_bounds = array<i64: 1>, scalar_prefetch = 0 : i64, scratch_operands = 0 : i64, tpu.core_type = #tpu.core_type<tc>, window_params = [{transform_indices = @transform_0, window_bounds = array<i64: 40, 2304>}, {pipeline_mode = #tpu.pipeline_mode<synchronous>, transform_indices = @transform_1, window_bounds = array<i64: 2304, 256>}, {pipeline_mode = #tpu.pipeline_mode<synchronous>, transform_indices = @transform_2, window_bounds = array<i64: 1, 256>}, {transform_indices = @transform_3, window_bounds = array<i64: 40, 256>}]} {
    %c0 = arith.constant 0 : index
    %c0_0 = arith.constant 0 : index
    %0 = vector.load %arg1[%c0, %c0_0] : memref<40x2304xbf16, #tpu.memory_space<vmem>>, vector<40x2304xbf16>
    %c0_1 = arith.constant 0 : index
    %c0_2 = arith.constant 0 : index
    %1 = vector.load %arg2[%c0_1, %c0_2] : memref<2304x256xbf16, #tpu.memory_space<vmem>>, vector<2304x256xbf16>
    %cst = arith.constant dense<0.000000e+00> : vector<40x256xf32>
    %2 = tpu.matmul %0, %1, %cst {dimension_numbers = #tpu.dot_dimension_numbers<[1], [0], [0], [1], [0, 0, 1, 1], [], []>} : vector<40x2304xbf16>, vector<2304x256xbf16>, vector<40x256xf32> -> vector<40x256xf32>
    %c0_3 = arith.constant 0 : index
    %c0_4 = arith.constant 0 : index
    %3 = vector.load %arg3[%c0_3, %c0_4] : memref<1x256xf32, #tpu.memory_space<vmem>>, vector<1x256xf32>
    %4 = vector.broadcast %3 : vector<1x256xf32> to vector<40x256xf32>
    %5 = arith.addf %2, %4 : vector<40x256xf32>
    %cst_5 = arith.constant 0.000000e+00 : f32
    %6 = vector.broadcast %cst_5 : f32 to vector<40x256xf32>
    %7 = arith.maximumf %5, %6 : vector<40x256xf32>
    %8 = arith.truncf %7 : vector<40x256xf32> to vector<40x256xbf16>
    %c0_6 = arith.constant 0 : index
    %c0_7 = arith.constant 0 : index
    %9 = vector.load %arg4[%c0_6, %c0_7] : memref<40x256xbf16, #tpu.memory_space<vmem>>, vector<40x256xbf16>
    tpu.vector_store %arg4[%c0_6, %c0_7], %8 {strides = array<i32>} : memref<40x256xbf16, #tpu.memory_space<vmem>>, vector<40x256xbf16>,
    return
  }
  func.func @transform_0(%arg0: i32) -> (i32, i32) {
    %c0_i32 = arith.constant 0 : i32
    %c0_i32_0 = arith.constant 0 : i32
    return %arg0, %c0_i32 : i32, i32
  }
  func.func @transform_1(%arg0: i32) -> (i32, i32) {
    %c0_i32 = arith.constant 0 : i32
    %c0_i32_0 = arith.constant 0 : i32
    %c0_i32_1 = arith.constant 0 : i32
    return %c0_i32, %c0_i32_0 : i32, i32
  }
  func.func @transform_2(%arg0: i32) -> (i32, i32) {
    %c0_i32 = arith.constant 0 : i32
    %c0_i32_0 = arith.constant 0 : i32
    %c0_i32_1 = arith.constant 0 : i32
    return %c0_i32, %c0_i32_0 : i32, i32
  }
  func.func @transform_3(%arg0: i32) -> (i32, i32) {
    %c0_i32 = arith.constant 0 : i32
    %c0_i32_0 = arith.constant 0 : i32
    return %arg0, %c0_i32 : i32, i32
  }
}

module attributes {stable_mosaic.version = 11 : i64} {
  func.func @_lpips_head_kernel(%arg0: i32, %arg1: memref<8xi32, #tpu.memory_space<smem>>, %arg2: memref<128x384xbf16, #tpu.memory_space<vmem>>, %arg3: memref<128x384xbf16, #tpu.memory_space<vmem>>, %arg4: memref<8x384xf32, #tpu.memory_space<vmem>>, %arg5: memref<1x1xf32, #tpu.memory_space<vmem>>) attributes {dimension_semantics = [#tpu.dimension_semantics<arbitrary>], iteration_bounds = array<i64: 8>, scalar_prefetch = 1 : i64, scratch_operands = 0 : i64, tpu.core_type = #tpu.core_type<tc>, window_params = [{transform_indices = @transform_0, window_bounds = array<i64: 128, 384>}, {transform_indices = @transform_1, window_bounds = array<i64: 128, 384>}, {transform_indices = @transform_2, window_bounds = array<i64: 8, 384>}, {pipeline_mode = #tpu.pipeline_mode<synchronous>, transform_indices = @transform_3, window_bounds = array<i64: 1, 1>}]} {
    %c0_i32 = arith.constant 0 : i32
    %0 = arith.cmpi eq, %arg0, %c0_i32 : i32
    %1 = arith.extui %0 : i1 to i32
    %c0_i32_0 = arith.constant 0 : i32
    %2 = arith.cmpi ne, %1, %c0_i32_0 : i32
    scf.if %2 {
      %cst_15 = arith.constant 0.000000e+00 : f32
      %37 = vector.broadcast %cst_15 : f32 to vector<1x1xf32>
      %c0_16 = arith.constant 0 : index
      %c0_17 = arith.constant 0 : index
      %38 = vector.load %arg5[%c0_16, %c0_17] : memref<1x1xf32, #tpu.memory_space<vmem>>, vector<1x1xf32>
      tpu.vector_store %arg5[%c0_16, %c0_17], %37 {strides = array<i32>} : memref<1x1xf32, #tpu.memory_space<vmem>>, vector<1x1xf32>,
    } else {
    }
    %c0 = arith.constant 0 : index
    %c0_1 = arith.constant 0 : index
    %3 = vector.load %arg2[%c0, %c0_1] : memref<128x384xbf16, #tpu.memory_space<vmem>>, vector<128x384xbf16>
    %4 = arith.extf %3 : vector<128x384xbf16> to vector<128x384xf32>
    %c0_2 = arith.constant 0 : index
    %c0_3 = arith.constant 0 : index
    %5 = vector.load %arg3[%c0_2, %c0_3] : memref<128x384xbf16, #tpu.memory_space<vmem>>, vector<128x384xbf16>
    %6 = arith.extf %5 : vector<128x384xbf16> to vector<128x384xf32>
    %7 = arith.mulf %4, %4 : vector<128x384xf32>
    %cst = arith.constant dense<0.000000e+00> : vector<128xf32>
    %8 = vector.multi_reduction <add>, %7, %cst [1] : vector<128x384xf32> to vector<128xf32>
    %9 = vector.shape_cast %8 : vector<128xf32> to vector<128x1xf32>
    %10 = math.sqrt %9 : vector<128x1xf32>
    %cst_4 = arith.constant 1.000000e-10 : f32
    %11 = vector.broadcast %cst_4 : f32 to vector<128x1xf32>
    %12 = arith.addf %10, %11 : vector<128x1xf32>
    %13 = tpu.reciprocal %12 {approx = true} : vector<128x1xf32> -> vector<128x1xf32>
    %14 = arith.mulf %6, %6 : vector<128x384xf32>
    %cst_5 = arith.constant dense<0.000000e+00> : vector<128xf32>
    %15 = vector.multi_reduction <add>, %14, %cst_5 [1] : vector<128x384xf32> to vector<128xf32>
    %16 = vector.shape_cast %15 : vector<128xf32> to vector<128x1xf32>
    %17 = math.sqrt %16 : vector<128x1xf32>
    %cst_6 = arith.constant 1.000000e-10 : f32
    %18 = vector.broadcast %cst_6 : f32 to vector<128x1xf32>
    %19 = arith.addf %17, %18 : vector<128x1xf32>
    %20 = tpu.reciprocal %19 {approx = true} : vector<128x1xf32> -> vector<128x1xf32>
    %21 = vector.broadcast %13 : vector<128x1xf32> to vector<128x384xf32>
    %22 = arith.mulf %4, %21 : vector<128x384xf32>
    %23 = vector.broadcast %20 : vector<128x1xf32> to vector<128x384xf32>
    %24 = arith.mulf %6, %23 : vector<128x384xf32>
    %25 = arith.subf %22, %24 : vector<128x384xf32>
    %26 = arith.mulf %25, %25 : vector<128x384xf32>
    %c0_7 = arith.constant 0 : index
    %c0_8 = arith.constant 0 : index
    %27 = vector.load %arg4[%c0_7, %c0_8] : memref<8x384xf32, #tpu.memory_space<vmem>>, vector<1x384xf32>
    %28 = vector.broadcast %27 : vector<1x384xf32> to vector<128x384xf32>
    %29 = arith.mulf %26, %28 : vector<128x384xf32>
    %cst_9 = arith.constant dense<0.000000e+00> : vector<128xf32>
    %30 = vector.multi_reduction <add>, %29, %cst_9 [1] : vector<128x384xf32> to vector<128xf32>
    %31 = vector.shape_cast %30 : vector<128xf32> to vector<128x1xf32>
    %c0_10 = arith.constant 0 : index
    %c0_11 = arith.constant 0 : index
    %32 = vector.load %arg5[%c0_10, %c0_11] : memref<1x1xf32, #tpu.memory_space<vmem>>, vector<1x1xf32>
    %cst_12 = arith.constant dense<0.000000e+00> : vector<1xf32>
    %33 = vector.multi_reduction <add>, %31, %cst_12 [0] : vector<128x1xf32> to vector<1xf32>
    %34 = vector.shape_cast %33 : vector<1xf32> to vector<1x1xf32>
    %35 = arith.addf %32, %34 : vector<1x1xf32>
    %c0_13 = arith.constant 0 : index
    %c0_14 = arith.constant 0 : index
    %36 = vector.load %arg5[%c0_13, %c0_14] : memref<1x1xf32, #tpu.memory_space<vmem>>, vector<1x1xf32>
    tpu.vector_store %arg5[%c0_13, %c0_14], %35 {strides = array<i32>} : memref<1x1xf32, #tpu.memory_space<vmem>>, vector<1x1xf32>,
    return
  }
  func.func @transform_0(%arg0: i32, %arg1: memref<8xi32, #tpu.memory_space<smem>>) -> (i32, i32) {
    %c0_i32 = arith.constant 0 : i32
    %c0_i32_0 = arith.constant 0 : i32
    return %arg0, %c0_i32 : i32, i32
  }
  func.func @transform_1(%arg0: i32, %arg1: memref<8xi32, #tpu.memory_space<smem>>) -> (i32, i32) {
    %c0_i32 = arith.constant 0 : i32
    %c0_i32_0 = arith.constant 0 : i32
    return %arg0, %c0_i32 : i32, i32
  }
  func.func @transform_2(%arg0: i32, %arg1: memref<8xi32, #tpu.memory_space<smem>>) -> (i32, i32) {
    %0 = arith.index_cast %arg0 : i32 to index
    %1 = memref.load %arg1[%0] : memref<8xi32, #tpu.memory_space<smem>>
    %c0_i32 = arith.constant 0 : i32
    %c0_i32_0 = arith.constant 0 : i32
    return %1, %c0_i32 : i32, i32
  }
  func.func @transform_3(%arg0: i32, %arg1: memref<8xi32, #tpu.memory_space<smem>>) -> (i32, i32) {
    %c0_i32 = arith.constant 0 : i32
    %c0_i32_0 = arith.constant 0 : i32
    %c0_i32_1 = arith.constant 0 : i32
    return %c0_i32, %c0_i32_0 : i32, i32
  }
}

</mosaic_0001>

<bundles_post_ra>
// kernel: _lambda_.6
= control target key start
LH: loop header
LB: loop body
LE: loop exit
PB: predicated region body
PF: predicated region fallthrough
CT: control target
= control target key end

     0   :  { %s1835_s12 = smov 0   ;;  %s2063_s0 = inlined_call_operand.vmem [shape: bf16[1024,384], index: 0, kind: input, shape index: {}]   ;;  %s2064_s1 = inlined_call_operand.vmem [shape: bf16[384,128], index: 1, kind: input, shape index: {}]   ;;  %s2065_s2 = inlined_call_operand.vmem [shape: f32[1,128], index: 2, kind: input, shape index: {}]   ;;  %s2066_s3 = inlined_call_operand.vmem [shape: bf16[1024,128], index: 3, kind: output, shape index: {}]  }
   0x1 LB: > { %s1267_s13 = sadd.s32 4294967295, %s1813_s12   ;;  %p1271_p0 = scmp.ge.s32.totalorder %s1813_s12, 1  ;;  %s1813_s12 = sphi %s1835_s12, %s13_s12  }
   0x2   : > { %p139_p1 = scmp.lt.s32.totalorder %s1813_s12, 5 }
   0x4   : > { %p140_p2 = pnand %p1271_p0, %p139_p1 }
   0x5   : > { %v1719_v0 = vld [vmem:[%s2064_s1 + $0x40] sm:$0xff] (!%p140_p2)   ;;  %s1272_s16 = sshll.u32 (!%p140_p2), %s1267_s13, 5  ;;  %v1721_v2 = vld [vmem:[%s2064_s1 + $0x48] sm:$0xff] (!%p140_p2)   ;;  %v1723_v4 = vld [vmem:[%s2064_s1 + $0x50] sm:$0xff] (!%p140_p2)  }
   0x6   : > { %143 = sbr.rel (%p140_p2) target bundleno = 352 (0x160), region = 32  ;;  %v1720_v1 = vld [vmem:[%s2064_s1] sm:$0xff] (!%p140_p2)   ;;  %1510 = vmatprep.subr.bf16.mxu0 (!%p140_p2), %v1719_v0  ;;  %1694 = vmatprep.subr.bf16.mxu1 (!%p140_p2), %v1719_v0  ;;  %p165_p3 = scmp.lt.s32.totalorder (!%p140_p2), %s1272_s16, 127  ;;  %v1722_v3 = vld [vmem:[%s2064_s1 + $0x8] sm:$0xff] (!%p140_p2)   ;;  %v1724_v5 = vld [vmem:[%s2064_s1 + $0x10] sm:$0xff] (!%p140_p2)  }
   0x7   : > { %1511 = vmatpush3.bf16.msra.mxu0 (!%p140_p2), %v1720_v1  ;;  %1702 = vmatpush3.bf16.msra.mxu1 (!%p140_p2), %v1720_v1  ;;  %v1725_v6 = vld [vmem:[%s2064_s1 + $0x58] sm:$0xff] (!%p140_p2)   ;;  %v1727_v8 = vld [vmem:[%s2064_s1 + $0x60] sm:$0xff] (!%p140_p2)   ;;  %v1729_v10 = vld [vmem:[%s2064_s1 + $0x68] sm:$0xff] (!%p140_p2)  }
   0x8   : > { %1512 = vmatprep.subr.bf16.mxu0 (!%p140_p2), %v1721_v2  ;;  %1695 = vmatprep.subr.bf16.mxu1 (!%p140_p2), %v1721_v2  ;;  %v1726_v7 = vld [vmem:[%s2064_s1 + $0x18] sm:$0xff] (!%p140_p2)   ;;  %v1728_v9 = vld [vmem:[%s2064_s1 + $0x20] sm:$0xff] (!%p140_p2)   ;;  %v1730_v13 = vld [vmem:[%s2064_s1 + $0x28] sm:$0xff] (!%p140_p2)  }
   0x9   : > { %v1731_v14 = vld [vmem:[%s2064_s1 + $0x70] sm:$0xff] (!%p140_p2)   ;;  %v1733_v16 = vld [vmem:[%s2064_s1 + $0x78] sm:$0xff] (!%p140_p2)   ;;  %v1741_v18 = vld [vmem:[%s2064_s1 + $0x80] sm:$0xff] (!%p140_p2)  }
   0xa   : > { %v1732_v15 = vld [vmem:[%s2064_s1 + $0x30] sm:$0xff] (!%p140_p2)   ;;  %v1734_v17 = vld [vmem:[%s2064_s1 + $0x38] sm:$0xff] (!%p140_p2)   ;;  %v1742_v22 = vld [vmem:[%s2064_s1 + $0x88] sm:$0xff] (!%p140_p2)  }
   0xb   : > { %1513 = vmatpush3.bf16.msra.mxu0 (!%p140_p2), %v1722_v3  ;;  %1703 = vmatpush3.bf16.msra.mxu1 (!%p140_p2), %v1722_v3  ;;  %v1749_v25 = vld [vmem:[%s2064_s1 + $0x90] sm:$0xff] (!%p140_p2)   ;;  %v1750_v27 = vld [vmem:[%s2064_s1 + $0x98] sm:$0xff] (!%p140_p2)   ;;  %v1757_v30 = vld [vmem:[%s2064_s1 + $0xa0] sm:$0xff] (!%p140_p2)  }
   0xc   : > { %1514 = vmatprep.subr.bf16.mxu0 (!%p140_p2), %v1723_v4  ;;  %1696 = vmatprep.subr.bf16.mxu1 (!%p140_p2), %v1723_v4  ;;  %v1758_v33 = vld [vmem:[%s2064_s1 + $0xa8] sm:$0xff] (!%p140_p2)   ;;  %v1765_v36 = vld [vmem:[%s2064_s1 + $0xb0] sm:$0xff] (!%p140_p2)   ;;  %v1766_v40 = vld [vmem:[%s2064_s1 + $0xb8] sm:$0xff] (!%p140_p2)  }
   0xd   : > { %s2068_s16 = smov (!%p165_p3, %s1272_s16), 127 }
   0xe   : > { %s1710_s29 = smul.u32 12, %s2068_s16  ;;  %s1275_s19 = sshll.u32 %s2068_s16, 2 }
   0xf   : > { %1515 = vmatpush3.bf16.msra.mxu0 %v1724_v5  ;;  %1704 = vmatpush3.bf16.msra.mxu1 %v1724_v5  ;;  %s2000_s22 = scalar_lea.vmem %s2066_s3, %s1275_s19 }
  0x10   : > { %1516 = vmatprep.subr.bf16.mxu0 %v1725_v6  ;;  %1697 = vmatprep.subr.bf16.mxu1 %v1725_v6  ;;  %s1876_s9 = scalar_lea.vmem %s2063_s0, %s1710_s29 }
  0x11   : > { %v1737_v11 = vld [vmem:[%s1876_s9 + $0x4] ss:$12 sps:$4 sm:$0xff]   ;;  %v1735_v19 = vld [vmem:[%s1876_s9] ss:$12 sps:$4 sm:$0xff]   ;;  %v1743_v21 = vld [vmem:[%s1876_s9 + $0x1c] ss:$12 sps:$4 sm:$0xff]  }
  0x12   : > { %v1740_v12 = vld [vmem:[%s1876_s9 + $0x124] ss:$12 sps:$4 sm:$0xff]   ;;  %729 = vmatprep.mubr.bf16.mxu0 %v1737_v11  ;;  %v1738_v20 = vld [vmem:[%s1876_s9 + $0x120] ss:$12 sps:$4 sm:$0xff]   ;;  %v1745_v23 = vld [vmem:[%s1876_s9 + $0x13c] ss:$12 sps:$4 sm:$0xff]  }
  0x13   : > { %1517 = vmatpush3.bf16.msra.mxu0 %v1726_v7  ;;  %1705 = vmatpush3.bf16.msra.mxu1 %v1726_v7  ;;  %v1747_v24 = vld [vmem:[%s1876_s9 + $0x18] ss:$12 sps:$4 sm:$0xff]   ;;  %v1751_v28 = vld [vmem:[%s1876_s9 + $0x34] ss:$12 sps:$4 sm:$0xff]   ;;  %v1755_v31 = vld [vmem:[%s1876_s9 + $0x30] ss:$12 sps:$4 sm:$0xff]  }
  0x14   : > { %1518 = vmatprep.subr.bf16.mxu0 %v1727_v8  ;;  %1698 = vmatprep.subr.bf16.mxu1 %v1727_v8  ;;  %v1748_v26 = vld [vmem:[%s1876_s9 + $0x138] ss:$12 sps:$4 sm:$0xff]   ;;  %v1753_v29 = vld [vmem:[%s1876_s9 + $0x154] ss:$12 sps:$4 sm:$0xff]   ;;  %v1756_v32 = vld [vmem:[%s1876_s9 + $0x150] ss:$12 sps:$4 sm:$0xff]  }
  0x15   : > { %825 = vmatprep.mubr.bf16.mxu1 %v1740_v12  ;;  %v1759_v34 = vld [vmem:[%s1876_s9 + $0x4c] ss:$12 sps:$4 sm:$0xff]   ;;  %v1763_v37 = vld [vmem:[%s1876_s9 + $0x48] ss:$12 sps:$4 sm:$0xff]   ;;  %v1767_v39 = vld [vmem:[%s1876_s9 + $0x64] ss:$12 sps:$4 sm:$0xff]  }
  0x16   : > { %v1761_v35 = vld [vmem:[%s1876_s9 + $0x16c] ss:$12 sps:$4 sm:$0xff]   ;;  %v1764_v38 = vld [vmem:[%s1876_s9 + $0x168] ss:$12 sps:$4 sm:$0xff]   ;;  %v1776_v47 = vld [vmem:[%s1876_s9 + $0x50] ss:$12 sps:$4 sm:$0xff]  }
  0x17   : > { %1519 = vmatpush3.bf16.msra.mxu0 %v1728_v9  ;;  %1706 = vmatpush3.bf16.msra.mxu1 %v1728_v9  ;;  %v1769_v41 = vld [vmem:[%s1876_s9 + $0x8] ss:$12 sps:$4 sm:$0xff]   ;;  %v1770_v42 = vld [vmem:[%s1876_s9 + $0x60] ss:$12 sps:$4 sm:$0xff]   ;;  %v1774_v45 = vld [vmem:[%s1876_s9 + $0x38] ss:$12 sps:$4 sm:$0xff]  }
  0x18   : > { %1520 = vmatprep.subr.bf16.mxu0 %v1729_v10  ;;  %1699 = vmatprep.subr.bf16.mxu1 %v1729_v10  ;;  %v1771_v43 = vld [vmem:[%s1876_s9 + $0x20] ss:$12 sps:$4 sm:$0xff]   ;;  %v1772_v44 = vld [vmem:[%s1876_s9 + $0x7c] ss:$12 sps:$4 sm:$0xff]   ;;  %v1775_v46 = vld [vmem:[%s1876_s9 + $0x78] ss:$12 sps:$4 sm:$0xff]  }
  0x19   : > { %v1777_v48 = vld [vmem:[%s1876_s9 + $0x94] ss:$12 sps:$4 sm:$0xff]   ;;  %v1780_v50 = vld [vmem:[%s1876_s9 + $0x90] ss:$12 sps:$4 sm:$0xff]   ;;  %v1782_v52 = vld [vmem:[%s1876_s9 + $0xac] ss:$12 sps:$4 sm:$0xff]  }
  0x1a   : > { %v1779_v49 = vld [vmem:[%s1876_s9 + $0x68] ss:$12 sps:$4 sm:$0xff]   ;;  %v1781_v51 = vld [vmem:[%s1876_s9 + $0x80] ss:$12 sps:$4 sm:$0xff]   ;;  %v1784_v53 = vld [vmem:[%s1876_s9 + $0x98] ss:$12 sps:$4 sm:$0xff]  }
  0x1b   : > { %1521 = vmatpush3.bf16.msra.mxu0 %v1730_v13  ;;  %1707 = vmatpush3.bf16.msra.mxu1 %v1730_v13  ;;  %v1785_v54 = vld [vmem:[%s1876_s9 + $0xa8] ss:$12 sps:$4 sm:$0xff]   ;;  %v1786_v55 = vld [vmem:[%s1876_s9 + $0xb0] ss:$12 sps:$4 sm:$0xff]   ;;  %v1790_v58 = vld [vmem:[%s1876_s9 + $0xc0] ss:$12 sps:$4 sm:$0xff]  }
  0x1c   : > { %1522 = vmatprep.subr.bf16.mxu0 %v1731_v14  ;;  %1700 = vmatprep.subr.bf16.mxu1 %v1731_v14  ;;  %v1787_v56 = vld [vmem:[%s1876_s9 + $0xc4] ss:$12 sps:$4 sm:$0xff]   ;;  %v1789_v57 = vld [vmem:[%s1876_s9 + $0xc8] ss:$12 sps:$4 sm:$0xff]   ;;  %v1791_v59 = vld [vmem:[%s1876_s9 + $0xe0] ss:$12 sps:$4 sm:$0xff]  }
  0x1d   : > { %v1792_v60 = vld [vmem:[%s1876_s9 + $0xdc] ss:$12 sps:$4 sm:$0xff]   ;;  %v1794_v61 = vld [vmem:[%s1876_s9 + $0xf8] ss:$12 sps:$4 sm:$0xff]   ;;  %v1797_v0 = vld [vmem:[%s1876_s9 + $0xf4] ss:$12 sps:$4 sm:$0xff]  }
  0x1e   : > { %v1795_v62 = vld [vmem:[%s1876_s9 + $0xd8] ss:$12 sps:$4 sm:$0xff]   ;;  %v1796_v63 = vld [vmem:[%s1876_s9 + $0x110] ss:$12 sps:$4 sm:$0xff]   ;;  %v1799_v1 = vld [vmem:[%s1876_s9 + $0x128] ss:$12 sps:$4 sm:$0xff]  }
  0x1f   : > { %1523 = vmatpush3.bf16.msra.mxu0 %v1732_v15  ;;  %1708 = vmatpush3.bf16.msra.mxu1 %v1732_v15  ;;  %v1800_v2 = vld [vmem:[%s1876_s9 + $0xf0] ss:$12 sps:$4 sm:$0xff]   ;;  %v1801_v3 = vld [vmem:[%s1876_s9 + $0x140] ss:$12 sps:$4 sm:$0xff]   ;;  %v1804_v5 = vld [vmem:[%s1876_s9 + $0x158] ss:$12 sps:$4 sm:$0xff]  }
  0x20   : > { %1524 = vmatprep.subr.bf16.mxu0 %v1733_v16  ;;  %1701 = vmatprep.subr.bf16.mxu1 %v1733_v16  ;;  %v1802_v4 = vld [vmem:[%s1876_s9 + $0x10c] ss:$12 sps:$4 sm:$0xff]   ;;  %v1805_v6 = vld [vmem:[%s1876_s9 + $0x108] ss:$12 sps:$4 sm:$0xff]   ;;  %v1806_v7 = vld [vmem:[%s1876_s9 + $0x170] ss:$12 sps:$4 sm:$0xff]  }
  0x23   : > { %1525 = vmatpush3.bf16.msra.mxu0 %v1734_v17  ;;  %1709 = vmatpush3.bf16.msra.mxu1 %v1734_v17 }
  0x24   : > { %1646 = vmatprep.subr.bf16.mxu1 %v1741_v18 }
  0x26   : > { %730 = vmatmul.mubr.bf16.vlgmr.msra.gmra.mrb[0].mxu0 %v1735_v19  ;;  %826 = vmatmul.mubr.bf16.vlgmr.msra.gmra.mrb[0].mxu1 %v1738_v20 }
  0x27   : > { %1647 = vmatpush3.bf16.msra.mxu1 %v1741_v18  ;;  %737 = vmatprep.mubr.bf16.mxu0 %v1743_v21 }
  0x28   : > { %1648 = vmatprep.subr.bf16.mxu1 %v1742_v22  ;;  %833 = vmatprep.mubr.bf16.mxu1 %v1745_v23 }
  0x2b   : > { %1649 = vmatpush3.bf16.msra.mxu1 %v1742_v22 }
  0x2c   : > { %1650 = vmatprep.subr.bf16.mxu1 %v1749_v25 }
  0x2e   : > { %738 = vmatmul.mubr.bf16.gmra.mrb[4].mxu0 %v1747_v24  ;;  %834 = vmatmul.mubr.bf16.gmra.mrb[4].mxu1 %v1748_v26 }
  0x2f   : > { %1651 = vmatpush3.bf16.msra.mxu1 %v1749_v25  ;;  %745 = vmatprep.mubr.bf16.mxu0 %v1751_v28 }
  0x30   : > { %1652 = vmatprep.subr.bf16.mxu1 %v1750_v27  ;;  %841 = vmatprep.mubr.bf16.mxu1 %v1753_v29 }
  0x33   : > { %1653 = vmatpush3.bf16.msra.mxu1 %v1750_v27 }
  0x34   : > { %1654 = vmatprep.subr.bf16.mxu1 %v1757_v30 }
  0x36   : > { %746 = vmatmul.mubr.bf16.gmra.mrb[8].mxu0 %v1755_v31  ;;  %842 = vmatmul.mubr.bf16.gmra.mrb[8].mxu1 %v1756_v32 }
  0x37   : > { %1655 = vmatpush3.bf16.msra.mxu1 %v1757_v30  ;;  %753 = vmatprep.mubr.bf16.mxu0 %v1759_v34 }
  0x38   : > { %1656 = vmatprep.subr.bf16.mxu1 %v1758_v33  ;;  %849 = vmatprep.mubr.bf16.mxu1 %v1761_v35 }
  0x3b   : > { %1657 = vmatpush3.bf16.msra.mxu1 %v1758_v33 }
  0x3c   : > { %1658 = vmatprep.subr.bf16.mxu1 %v1765_v36 }
  0x3e   : > { %754 = vmatmul.mubr.bf16.gmra.mrb[12].mxu0 %v1763_v37  ;;  %850 = vmatmul.mubr.bf16.gmra.mrb[12].mxu1 %v1764_v38 }
  0x3f   : > { %1659 = vmatpush3.bf16.msra.mxu1 %v1765_v36  ;;  %761 = vmatprep.mubr.bf16.mxu0 %v1767_v39 }
  0x40   : > { %1660 = vmatprep.subr.bf16.mxu1 %v1766_v40  ;;  %1662 = vmatprep.mubr.bf16.mxu1 %v1769_v41 }
  0x43   : > { %1661 = vmatpush3.bf16.msra.mxu1 %v1766_v40 }
  0x46   : > { %762 = vmatmul.mubr.bf16.gmra.mrb[16].mxu0 %v1770_v42  ;;  %1663 = vmatmul.mubr.bf16.vlgmr.msra.gmra.mrb[16].mxu1 %v1771_v43 }
  0x47   : > { %769 = vmatprep.mubr.bf16.mxu0 %v1772_v44  ;;  %1666 = vmatprep.mubr.bf16.mxu1 %v1774_v45 }
  0x4e   : > { %770 = vmatmul.mubr.bf16.gmra.mrb[20].mxu0 %v1775_v46  ;;  %1667 = vmatmul.mubr.bf16.gmra.mrb[20].mxu1 %v1776_v47 }
  0x4f   : > { %777 = vmatprep.mubr.bf16.mxu0 %v1777_v48  ;;  %1670 = vmatprep.mubr.bf16.mxu1 %v1779_v49 }
  0x56   : > { %778 = vmatmul.mubr.bf16.gmra.mrb[24].mxu0 %v1780_v50  ;;  %1671 = vmatmul.mubr.bf16.gmra.mrb[24].mxu1 %v1781_v51 }
  0x57   : > { %785 = vmatprep.mubr.bf16.mxu0 %v1782_v52  ;;  %1674 = vmatprep.mubr.bf16.mxu1 %v1784_v53 }
  0x5e   : > { %786 = vmatmul.mubr.bf16.gmra.mrb[28].mxu0 %v1785_v54  ;;  %1675 = vmatmul.mubr.bf16.gmra.mrb[28].mxu1 %v1786_v55 }
  0x5f   : > { %793 = vmatprep.mubr.bf16.mxu0 %v1787_v56  ;;  %1678 = vmatprep.mubr.bf16.mxu1 %v1789_v57  ;;  %v1990_v56 = vld [vmem:[%s2065_s2] ss:$0 sm:$0xff] }
  0x66   : > { %794 = vmatmul.mubr.bf16.gmra.mrb[32].mxu0 %v1790_v58  ;;  %1679 = vmatmul.mubr.bf16.gmra.mrb[32].mxu1 %v1791_v59 }
  0x67   : > { %801 = vmatprep.mubr.bf16.mxu0 %v1792_v60  ;;  %1682 = vmatprep.mubr.bf16.mxu1 %v1794_v61 }
  0x6e   : > { %802 = vmatmul.mubr.bf16.gmra.mrb[36].mxu0 %v1795_v62  ;;  %1683 = vmatmul.mubr.bf16.gmra.mrb[36].mxu1 %v1796_v63 }
  0x6f   : > { %809 = vmatprep.mubr.bf16.mxu0 %v1797_v0  ;;  %1686 = vmatprep.mubr.bf16.mxu1 %v1799_v1 }
  0x76   : > { %810 = vmatmul.mubr.bf16.gmra.mrb[40].mxu0 %v1800_v2  ;;  %1687 = vmatmul.mubr.bf16.gmra.mrb[40].mxu1 %v1801_v3 }
  0x77   : > { %817 = vmatprep.mubr.bf16.mxu0 %v1802_v4  ;;  %1690 = vmatprep.mubr.bf16.mxu1 %v1804_v5 }
  0x7e   : > { %818 = vmatmul.mubr.bf16.gmra.mrb[44].mxu0 %v1805_v6  ;;  %1691 = vmatmul.mubr.bf16.gmra.mrb[44].mxu1 %v1806_v7 }
  0xf9   : > { %v1526_v8 = vpop.f32.mrb[0].mxu0  ;;  %v1598_v9 = vpop.f32.mrb[0].mxu1 }
  0xfa   : > { %v1527_v10 = vpop.f32.mrb[1].mxu0  ;;  %v1599_v11 = vpop.f32.mrb[1].mxu1 }
  0xfb   : > { %v1528_v12 = vadd.f32 %v1527_v10, %v1526_v8  ;;  %v1529_v13 = vpop.f32.mrb[2].mxu0  ;;  %v1971_v14 = vadd.f32 %v1599_v11, %v1598_v9  ;;  %v1601_v15 = vpop.f32.mrb[2].mxu1 }
  0xfc   : > { %v1530_v16 = vpop.f32.mrb[3].mxu0  ;;  %v1602_v17 = vpop.f32.mrb[3].mxu1 }
  0xfd   : > { %v1531_v18 = vadd.f32 %v1530_v16, %v1529_v13  ;;  %v1973_v19 = vadd.f32 %v1602_v17, %v1601_v15  ;;  %v732_v60 = vadd.f32 %v1528_v12, %v1990_v56 }
  0xff   : > { %v735_v5 = vadd.f32 %v1531_v18, %v1990_v56 }
 0x101   : > { %v1532_v20 = vpop.f32.mrb[4].mxu0  ;;  %v1604_v21 = vpop.f32.mrb[4].mxu1 }
 0x102   : > { %v1533_v22 = vpop.f32.mrb[5].mxu0  ;;  %v1605_v23 = vpop.f32.mrb[5].mxu1 }
 0x103   : > { %v1534_v24 = vadd.f32 %v1533_v22, %v1532_v20  ;;  %v1535_v25 = vpop.f32.mrb[6].mxu0  ;;  %v1975_v26 = vadd.f32 %v1605_v23, %v1604_v21  ;;  %v1607_v27 = vpop.f32.mrb[6].mxu1 }
 0x104   : > { %v1536_v28 = vpop.f32.mrb[7].mxu0  ;;  %v1608_v29 = vpop.f32.mrb[7].mxu1 }
 0x105   : > { %v1537_v30 = vadd.f32 %v1536_v28, %v1535_v25  ;;  %v1977_v31 = vadd.f32 %v1608_v29, %v1607_v27  ;;  %v740_v57 = vadd.f32 %v1534_v24, %v1990_v56 }
 0x107   : > { %v743_v0 = vadd.f32 %v1537_v30, %v1990_v56 }
 0x109   : > { %v1538_v32 = vpop.f32.mrb[8].mxu0  ;;  %v1610_v33 = vpop.f32.mrb[8].mxu1 }
 0x10a   : > { %v1539_v34 = vpop.f32.mrb[9].mxu0  ;;  %v1611_v35 = vpop.f32.mrb[9].mxu1 }
 0x10b   : > { %v1540_v36 = vadd.f32 %v1539_v34, %v1538_v32  ;;  %v1541_v37 = vpop.f32.mrb[10].mxu0  ;;  %v1979_v38 = vadd.f32 %v1611_v35, %v1610_v33  ;;  %v1613_v39 = vpop.f32.mrb[10].mxu1 }
 0x10c   : > { %v1542_v40 = vpop.f32.mrb[11].mxu0  ;;  %v1614_v41 = vpop.f32.mrb[11].mxu1 }
 0x10d   : > { %v1543_v42 = vadd.f32 %v1542_v40, %v1541_v37  ;;  %v1981_v43 = vadd.f32 %v1614_v41, %v1613_v39  ;;  %v748_v22 = vadd.f32 %v1540_v36, %v1990_v56 }
 0x10f   : > { %v751_v33 = vadd.f32 %v1543_v42, %v1990_v56 }
 0x111   : > { %v1544_v44 = vpop.f32.mrb[12].mxu0  ;;  %v1616_v45 = vpop.f32.mrb[12].mxu1 }
 0x112   : > { %v1545_v46 = vpop.f32.mrb[13].mxu0  ;;  %v1617_v47 = vpop.f32.mrb[13].mxu1 }
 0x113   : > { %v1546_v48 = vadd.f32 %v1545_v46, %v1544_v44  ;;  %v1547_v49 = vpop.f32.mrb[14].mxu0  ;;  %v1983_v50 = vadd.f32 %v1617_v47, %v1616_v45  ;;  %v1619_v51 = vpop.f32.mrb[14].mxu1 }
 0x114   : > { %v1548_v52 = vpop.f32.mrb[15].mxu0  ;;  %v1620_v53 = vpop.f32.mrb[15].mxu1 }
 0x115   : > { %v1549_v54 = vadd.f32 %v1548_v52, %v1547_v49  ;;  %v1985_v55 = vadd.f32 %v1620_v53, %v1619_v51  ;;  %v756_v17 = vadd.f32 %v1546_v48, %v1990_v56 }
 0x117   : > { %v759_v27 = vadd.f32 %v1549_v54, %v1990_v56 }
 0x119   : > { %v1550_v58 = vpop.f32.mrb[16].mxu0  ;;  %v1664_v59 = vpop.f32.mrb[16].mxu1 }
 0x11a   : > { %v901_v61 = vadd.f32 %v1664_v59, %v740_v57  ;;  %v1551_v62 = vpop.f32.mrb[17].mxu0  ;;  %v892_v63 = vpop.f32.mrb[17].mxu1 }
 0x11b   : > { %v1552_v1 = vadd.f32 %v1551_v62, %v1550_v58  ;;  %v893_v2 = vadd.f32 %v892_v63, %v732_v60  ;;  %v1553_v3 = vpop.f32.mrb[18].mxu0  ;;  %v1665_v4 = vpop.f32.mrb[18].mxu1 }
 0x11c   : > { %v904_v6 = vadd.f32 %v1665_v4, %v743_v0  ;;  %v1554_v7 = vpop.f32.mrb[19].mxu0  ;;  %v895_v8 = vpop.f32.mrb[19].mxu1  ;;  %v1021_v11 = vmax.f32 %v901_v61, 0.0 }
 0x11d   : > { %v1555_v9 = vadd.f32 %v1554_v7, %v1553_v3  ;;  %v896_v10 = vadd.f32 %v895_v8, %v735_v5  ;;  %v1019_v12 = vmax.f32 %v893_v2, 0.0  ;;  %v764_v52 = vadd.f32 %v1552_v1, %v1990_v56 }
 0x11e   : > { %v1022_v13 = vmax.f32 %v904_v6, 0.0 }
 0x11f   : > { %v1020_v15 = vmax.f32 %v896_v10, 0.0  ;;  %v767_v62 = vadd.f32 %v1555_v9, %v1990_v56 }
 0x120   : > { %v1423_v16 = vpack.c.bf16 %v1022_v13, %v1021_v11 }
 0x121   : > { %v1418_v18 = vpack.c.bf16 %v1020_v15, %v1019_v12  ;;  %v1556_v20 = vpop.f32.mrb[20].mxu0  ;;  %v1668_v21 = vpop.f32.mrb[20].mxu1 }
 0x122   : > { %1495 = vst [vmem:[%s2000_s22 + $0x8] sm:$0xff] %v1423_v16   ;;  %v917_v23 = vadd.f32 %v1668_v21, %v756_v17  ;;  %v1557_v24 = vpop.f32.mrb[21].mxu0  ;;  %v908_v25 = vpop.f32.mrb[21].mxu1 }
 0x123   : > { %1419 = vst [vmem:[%s2000_s22] sm:$0xff] %v1418_v18   ;;  %v1558_v28 = vadd.f32 %v1557_v24, %v1556_v20  ;;  %v909_v29 = vadd.f32 %v908_v25, %v748_v22  ;;  %v1559_v30 = vpop.f32.mrb[22].mxu0  ;;  %v1669_v32 = vpop.f32.mrb[22].mxu1 }
 0x124   : > { %v920_v34 = vadd.f32 %v1669_v32, %v759_v27  ;;  %v1560_v35 = vpop.f32.mrb[23].mxu0  ;;  %v911_v37 = vpop.f32.mrb[23].mxu1  ;;  %v1025_v36 = vmax.f32 %v917_v23, 0.0 }
 0x125   : > { %v1561_v39 = vadd.f32 %v1560_v35, %v1559_v30  ;;  %v912_v40 = vadd.f32 %v911_v37, %v751_v33  ;;  %v1023_v44 = vmax.f32 %v909_v29, 0.0  ;;  %v772_v47 = vadd.f32 %v1558_v28, %v1990_v56 }
 0x126   : > { %v1026_v41 = vmax.f32 %v920_v34, 0.0 }
 0x127   : > { %v1024_v45 = vmax.f32 %v912_v40, 0.0  ;;  %v775_v57 = vadd.f32 %v1561_v39, %v1990_v56 }
 0x128   : > { %v1433_v46 = vpack.c.bf16 %v1026_v41, %v1025_v36 }
 0x129   : > { %v1428_v48 = vpack.c.bf16 %v1024_v45, %v1023_v44  ;;  %v1562_v49 = vpop.f32.mrb[24].mxu0  ;;  %v1672_v51 = vpop.f32.mrb[24].mxu1 }
 0x12a   : > { %1497 = vst [vmem:[%s2000_s22 + $0x18] sm:$0xff] %v1433_v46   ;;  %v933_v42 = vadd.f32 %v1672_v51, %v772_v47  ;;  %v1563_v53 = vpop.f32.mrb[25].mxu0  ;;  %v924_v54 = vpop.f32.mrb[25].mxu1 }
 0x12b   : > { %1496 = vst [vmem:[%s2000_s22 + $0x10] sm:$0xff] %v1428_v48   ;;  %v1564_v58 = vadd.f32 %v1563_v53, %v1562_v49  ;;  %v925_v59 = vadd.f32 %v924_v54, %v764_v52  ;;  %v1565_v60 = vpop.f32.mrb[26].mxu0  ;;  %v1673_v61 = vpop.f32.mrb[26].mxu1 }
 0x12c   : > { %v936_v63 = vadd.f32 %v1673_v61, %v775_v57  ;;  %v1566_v0 = vpop.f32.mrb[27].mxu0  ;;  %v927_v2 = vpop.f32.mrb[27].mxu1  ;;  %v1029_v4 = vmax.f32 %v933_v42, 0.0 }
 0x12d   : > { %v1567_v3 = vadd.f32 %v1566_v0, %v1565_v60  ;;  %v928_v1 = vadd.f32 %v927_v2, %v767_v62  ;;  %v1027_v6 = vmax.f32 %v925_v59, 0.0  ;;  %v780_v12 = vadd.f32 %v1564_v58, %v1990_v56 }
 0x12e   : > { %v1030_v5 = vmax.f32 %v936_v63, 0.0 }
 0x12f   : > { %v1028_v7 = vmax.f32 %v928_v1, 0.0  ;;  %v783_v21 = vadd.f32 %v1567_v3, %v1990_v56 }
 0x130   : > { %v1443_v8 = vpack.c.bf16 %v1030_v5, %v1029_v4 }
 0x131   : > { %v1438_v10 = vpack.c.bf16 %v1028_v7, %v1027_v6  ;;  %v1568_v11 = vpop.f32.mrb[28].mxu0  ;;  %v1676_v13 = vpop.f32.mrb[28].mxu1 }
 0x132   : > { %1499 = vst [vmem:[%s2000_s22 + $0x28] sm:$0xff] %v1443_v8   ;;  %v1569_v15 = vpop.f32.mrb[29].mxu0  ;;  %v940_v16 = vpop.f32.mrb[29].mxu1 }
 0x133   : > { %1498 = vst [vmem:[%s2000_s22 + $0x20] sm:$0xff] %v1438_v10   ;;  %v1570_v9 = vadd.f32 %v1569_v15, %v1568_v11  ;;  %v941_v17 = vadd.f32 %v940_v16, %v780_v12  ;;  %v1571_v18 = vpop.f32.mrb[30].mxu0  ;;  %v1677_v20 = vpop.f32.mrb[30].mxu1  ;;  %v836_v10 = vadd.f32 %v1975_v26, %v1990_v56  ;;  %v828_v15 = vadd.f32 %v1971_v14, %v1990_v56 }
 0x134   : > { %v1572_v22 = vpop.f32.mrb[31].mxu0  ;;  %v943_v23 = vpop.f32.mrb[31].mxu1 }
 0x135   : > { %v788_v24 = vadd.f32 %v1570_v9, %v1990_v56  ;;  %v1573_v25 = vadd.f32 %v1572_v22, %v1571_v18  ;;  %v944_v27 = vadd.f32 %v943_v23, %v783_v21  ;;  %v1031_v29 = vmax.f32 %v941_v17, 0.0 }
 0x136   : > { %v839_v18 = vadd.f32 %v1977_v31, %v1990_v56 }
 0x137   : > { %v949_v28 = vadd.f32 %v1676_v13, %v788_v24  ;;  %v791_v30 = vadd.f32 %v1573_v25, %v1990_v56  ;;  %v1032_v32 = vmax.f32 %v944_v27, 0.0 }
 0x139   : > { %v952_v33 = vadd.f32 %v1677_v20, %v791_v30  ;;  %v1448_v34 = vpack.c.bf16 %v1032_v32, %v1031_v29  ;;  %v1574_v35 = vpop.f32.mrb[32].mxu0  ;;  %v1680_v37 = vpop.f32.mrb[32].mxu1  ;;  %v1033_v36 = vmax.f32 %v949_v28, 0.0  ;;  %v831_v28 = vadd.f32 %v1973_v19, %v1990_v56 }
 0x13a   : > { %v1575_v39 = vpop.f32.mrb[33].mxu0  ;;  %v956_v40 = vpop.f32.mrb[33].mxu1 }
 0x13b   : > { %v1034_v41 = vmax.f32 %v952_v33, 0.0  ;;  %1500 = vst [vmem:[%s2000_s22 + $0x30] sm:$0xff] %v1448_v34   ;;  %v1576_v44 = vadd.f32 %v1575_v39, %v1574_v35  ;;  %v1577_v45 = vpop.f32.mrb[34].mxu0  ;;  %v1681_v46 = vpop.f32.mrb[34].mxu1 }
 0x13c   : > { %v1578_v47 = vpop.f32.mrb[35].mxu0  ;;  %v959_v48 = vpop.f32.mrb[35].mxu1 }
 0x13d   : > { %v1453_v49 = vpack.c.bf16 %v1034_v41, %v1033_v36  ;;  %v796_v51 = vadd.f32 %v1576_v44, %v1990_v56  ;;  %v1579_v52 = vadd.f32 %v1578_v47, %v1577_v45  ;;  %v852_v41 = vadd.f32 %v1983_v50, %v1990_v56 }
 0x13f   : > { %1501 = vst [vmem:[%s2000_s22 + $0x38] sm:$0xff] %v1453_v49   ;;  %v957_v42 = vadd.f32 %v956_v40, %v796_v51  ;;  %v799_v53 = vadd.f32 %v1579_v52, %v1990_v56  ;;  %v855_v52 = vadd.f32 %v1985_v55, %v1990_v56 }
 0x141   : > { %v960_v54 = vadd.f32 %v959_v48, %v799_v53  ;;  %v1580_v57 = vpop.f32.mrb[36].mxu0  ;;  %v2024_v58 = vpop.f32.mrb[36].mxu1  ;;  %v1035_v61 = vmax.f32 %v957_v42, 0.0 }
 0x142   : > { %v1581_v59 = vpop.f32.mrb[37].mxu0  ;;  %v972_v60 = vpop.f32.mrb[37].mxu1 }
 0x143   : > { %v1036_v62 = vmax.f32 %v960_v54, 0.0  ;;  %v1582_v63 = vadd.f32 %v1581_v59, %v1580_v57  ;;  %v1583_v0 = vpop.f32.mrb[38].mxu0  ;;  %v2026_v2 = vpop.f32.mrb[38].mxu1 }
 0x144   : > { %v1584_v3 = vpop.f32.mrb[39].mxu0  ;;  %v975_v1 = vpop.f32.mrb[39].mxu1 }
 0x145   : > { %v1458_v4 = vpack.c.bf16 %v1036_v62, %v1035_v61  ;;  %v804_v5 = vadd.f32 %v1582_v63, %v1990_v56  ;;  %v1585_v6 = vadd.f32 %v1584_v3, %v1583_v0 }
 0x147   : > { %1502 = vst [vmem:[%s2000_s22 + $0x40] sm:$0xff] %v1458_v4   ;;  %v965_v7 = vadd.f32 %v1680_v37, %v804_v5  ;;  %v807_v8 = vadd.f32 %v1585_v6, %v1990_v56 }
 0x149   : > { %v968_v11 = vadd.f32 %v1681_v46, %v807_v8  ;;  %v1586_v13 = vpop.f32.mrb[40].mxu0  ;;  %v1688_v12 = vpop.f32.mrb[40].mxu1  ;;  %v1037_v20 = vmax.f32 %v965_v7, 0.0  ;;  %v844_v46 = vadd.f32 %v1979_v38, %v1990_v56  ;;  %v847_v38 = vadd.f32 %v1981_v43, %v1990_v56 }
 0x14a   : > { %v997_v16 = vadd.f32 %v1688_v12, %v836_v10  ;;  %v1587_v9 = vpop.f32.mrb[41].mxu0  ;;  %v988_v17 = vpop.f32.mrb[41].mxu1 }
 0x14b   : > { %v1038_v21 = vmax.f32 %v968_v11, 0.0  ;;  %v1588_v22 = vadd.f32 %v1587_v9, %v1586_v13  ;;  %v989_v23 = vadd.f32 %v988_v17, %v828_v15  ;;  %v1589_v24 = vpop.f32.mrb[42].mxu0  ;;  %v1689_v25 = vpop.f32.mrb[42].mxu1 }
 0x14c   : > { %v1000_v26 = vadd.f32 %v1689_v25, %v839_v18  ;;  %v1590_v27 = vpop.f32.mrb[43].mxu0  ;;  %v991_v29 = vpop.f32.mrb[43].mxu1  ;;  %v1045_v33 = vmax.f32 %v997_v16, 0.0 }
 0x14d   : > { %v1463_v14 = vpack.c.bf16 %v1038_v21, %v1037_v20  ;;  %v812_v30 = vadd.f32 %v1588_v22, %v1990_v56  ;;  %v1591_v32 = vadd.f32 %v1590_v27, %v1589_v24  ;;  %v992_v34 = vadd.f32 %v991_v29, %v831_v28 }
 0x14e   : > { %v1046_v31 = vmax.f32 %v1000_v26, 0.0  ;;  %v1043_v39 = vmax.f32 %v989_v23, 0.0 }
 0x14f   : > { %1503 = vst [vmem:[%s2000_s22 + $0x48] sm:$0xff] %v1463_v14   ;;  %v973_v35 = vadd.f32 %v972_v60, %v812_v30  ;;  %v815_v37 = vadd.f32 %v1591_v32, %v1990_v56  ;;  %v1044_v36 = vmax.f32 %v992_v34, 0.0 }
 0x150   : > { %v1483_v40 = vpack.c.bf16 %v1046_v31, %v1045_v33 }
 0x151   : > { %v976_v19 = vadd.f32 %v975_v1, %v815_v37  ;;  %v1592_v44 = vpop.f32.mrb[44].mxu0  ;;  %v1692_v45 = vpop.f32.mrb[44].mxu1  ;;  %v1478_v47 = vpack.c.bf16 %v1044_v36, %v1043_v39  ;;  %v1039_v42 = vmax.f32 %v973_v35, 0.0 }
 0x152   : > { %1507 = vst [vmem:[%s2000_s22 + $0x68] sm:$0xff] %v1483_v40   ;;  %v1013_v48 = vadd.f32 %v1692_v45, %v852_v41  ;;  %v1593_v49 = vpop.f32.mrb[45].mxu0  ;;  %v1004_v51 = vpop.f32.mrb[45].mxu1 }
 0x153   : > { %v1040_v53 = vmax.f32 %v976_v19, 0.0  ;;  %v1594_v54 = vadd.f32 %v1593_v49, %v1592_v44  ;;  %v1005_v50 = vadd.f32 %v1004_v51, %v844_v46  ;;  %v1595_v57 = vpop.f32.mrb[46].mxu0  ;;  %v1693_v59 = vpop.f32.mrb[46].mxu1  ;;  %1506 = vst [vmem:[%s2000_s22 + $0x60] sm:$0xff] %v1478_v47  }
 0x154   : > { %v1016_v60 = vadd.f32 %v1693_v59, %v855_v52  ;;  %v1596_v61 = vpop.f32.mrb[47].mxu0  ;;  %v1007_v62 = vpop.f32.mrb[47].mxu1  ;;  %v1049_v3 = vmax.f32 %v1013_v48, 0.0 }
 0x155   : > { %v1468_v63 = vpack.c.bf16 %v1040_v53, %v1039_v42  ;;  %v820_v0 = vadd.f32 %v1594_v54, %v1990_v56  ;;  %v1597_v55 = vadd.f32 %v1596_v61, %v1595_v57  ;;  %v1008_v4 = vadd.f32 %v1007_v62, %v847_v38 }
 0x156   : > { %v1050_v1 = vmax.f32 %v1016_v60, 0.0  ;;  %v1047_v7 = vmax.f32 %v1005_v50, 0.0 }
 0x157   : > { %1504 = vst [vmem:[%s2000_s22 + $0x50] sm:$0xff] %v1468_v63   ;;  %v981_v5 = vadd.f32 %v2024_v58, %v820_v0  ;;  %v823_v6 = vadd.f32 %v1597_v55, %v1990_v56  ;;  %v1048_v10 = vmax.f32 %v1008_v4, 0.0 }
 0x158   : > { %v1493_v8 = vpack.c.bf16 %v1050_v1, %v1049_v3 }
 0x159   : > { %v984_v43 = vadd.f32 %v2026_v2, %v823_v6  ;;  %v1488_v11 = vpack.c.bf16 %v1048_v10, %v1047_v7  ;;  %v1041_v13 = vmax.f32 %v981_v5, 0.0 }
 0x15a   : > { %1509 = vst [vmem:[%s2000_s22 + $0x78] sm:$0xff] %v1493_v8  }
 0x15b   : > { %v1042_v12 = vmax.f32 %v984_v43, 0.0  ;;  %1508 = vst [vmem:[%s2000_s22 + $0x70] sm:$0xff] %v1488_v11  }
 0x15d   : > { %v1473_v15 = vpack.c.bf16 %v1042_v12, %v1041_v13 }
 0x15f   : > { %1505 = vst [vmem:[%s2000_s22 + $0x58] sm:$0xff] %v1473_v15  }
 0x160 PF: > { %s13_s12 = sadd.s32 1, %s1813_s12  }
 0x161   : > { %p10_p4 = scmp.ge.s32.totalorder %s13_s12, 6  }
 0x163   :  { %12 = sbr.rel (!%p10_p4) target bundleno = 1 (0x1), region = 62 }

// kernel: _lambda_.7
= control target key start
LH: loop header
LB: loop body
LE: loop exit
PB: predicated region body
PF: predicated region fallthrough
CT: control target
= control target key end

     0   :  { %s6620_s1 = inlined_call_operand.vmem [shape: bf16[1664,256], index: 1, kind: input, shape index: {}]   ;;  %s6621_s0 = inlined_call_operand.vmem [shape: bf16[200,1664], index: 0, kind: input, shape index: {}]   ;;  %s6622_s2 = inlined_call_operand.vmem [shape: f32[1,256], index: 2, kind: input, shape index: {}]   ;;  %s6623_s3 = inlined_call_operand.vmem [shape: bf16[200,256], index: 3, kind: output, shape index: {}]  }
   0x1   :  { %v4462_v0 = vld [vmem:[%s6620_s1 + $0x4] ss:$8 sps:$4 sm:$0xff]   ;;  %v4466_v2 = vld [vmem:[%s6620_s1] ss:$8 sps:$4 sm:$0xff]   ;;  %v4468_v4 = vld [vmem:[%s6620_s1 + $0x14] ss:$8 sps:$4 sm:$0xff]  }
   0x2   :  { %v4464_v1 = vld [vmem:[%s6620_s1 + $0x304] ss:$8 sps:$4 sm:$0xff]   ;;  %2288 = vmatprep.subr.bf16.mxu1 %v4462_v0  ;;  %v4467_v3 = vld [vmem:[%s6620_s1 + $0x300] ss:$8 sps:$4 sm:$0xff]   ;;  %v4470_v5 = vld [vmem:[%s6620_s1 + $0x314] ss:$8 sps:$4 sm:$0xff]  }
   0x3   :  { %2771 = vmatprep.subr.bf16.mxu0 %v4464_v1  ;;  %2289 = vmatpush1.bf16.msra.mxu1 %v4466_v2  ;;  %v4472_v6 = vld [vmem:[%s6620_s1 + $0x10] ss:$8 sps:$4 sm:$0xff]   ;;  %v4474_v8 = vld [vmem:[%s6620_s1 + $0x24] ss:$8 sps:$4 sm:$0xff]   ;;  %v4478_v10 = vld [vmem:[%s6620_s1 + $0x20] ss:$8 sps:$4 sm:$0xff]  }
   0x4   :  { %2772 = vmatpush1.bf16.msra.mxu0 %v4467_v3  ;;  %2290 = vmatprep.subr.bf16.mxu1 %v4468_v4  ;;  %v4473_v7 = vld [vmem:[%s6620_s1 + $0x310] ss:$8 sps:$4 sm:$0xff]   ;;  %v4476_v9 = vld [vmem:[%s6620_s1 + $0x324] ss:$8 sps:$4 sm:$0xff]   ;;  %v4479_v11 = vld [vmem:[%s6620_s1 + $0x320] ss:$8 sps:$4 sm:$0xff]  }
   0x5   :  { %2773 = vmatprep.subr.bf16.mxu0 %v4470_v5  ;;  %v4480_v12 = vld [vmem:[%s6620_s1 + $0x34] ss:$8 sps:$4 sm:$0xff]   ;;  %v4484_v14 = vld [vmem:[%s6620_s1 + $0x30] ss:$8 sps:$4 sm:$0xff]   ;;  %v4486_v16 = vld [vmem:[%s6620_s1 + $0x44] ss:$8 sps:$4 sm:$0xff]  }
   0x6   :  { %v4482_v13 = vld [vmem:[%s6620_s1 + $0x334] ss:$8 sps:$4 sm:$0xff]   ;;  %v4485_v15 = vld [vmem:[%s6620_s1 + $0x330] ss:$8 sps:$4 sm:$0xff]   ;;  %v4488_v17 = vld [vmem:[%s6620_s1 + $0x344] ss:$8 sps:$4 sm:$0xff]  }
   0x7   :  { %2291 = vmatpush1.bf16.msra.mxu1 %v4472_v6  ;;  %v4490_v18 = vld [vmem:[%s6620_s1 + $0x40] ss:$8 sps:$4 sm:$0xff]   ;;  %v4492_v20 = vld [vmem:[%s6620_s1 + $0x54] ss:$8 sps:$4 sm:$0xff]   ;;  %v4496_v22 = vld [vmem:[%s6620_s1 + $0x50] ss:$8 sps:$4 sm:$0xff]  }
   0x8   :  { %2774 = vmatpush1.bf16.msra.mxu0 %v4473_v7  ;;  %2292 = vmatprep.subr.bf16.mxu1 %v4474_v8  ;;  %v4491_v19 = vld [vmem:[%s6620_s1 + $0x340] ss:$8 sps:$4 sm:$0xff]   ;;  %v4494_v21 = vld [vmem:[%s6620_s1 + $0x354] ss:$8 sps:$4 sm:$0xff]   ;;  %v4497_v23 = vld [vmem:[%s6620_s1 + $0x350] ss:$8 sps:$4 sm:$0xff]  }
   0x9   :  { %2775 = vmatprep.subr.bf16.mxu0 %v4476_v9  ;;  %v4498_v24 = vld [vmem:[%s6620_s1 + $0x64] ss:$8 sps:$4 sm:$0xff]   ;;  %v4502_v26 = vld [vmem:[%s6620_s1 + $0x60] ss:$8 sps:$4 sm:$0xff]   ;;  %v4504_v28 = vld [vmem:[%s6620_s1 + $0x74] ss:$8 sps:$4 sm:$0xff]  }
   0xa   :  { %v4500_v25 = vld [vmem:[%s6620_s1 + $0x364] ss:$8 sps:$4 sm:$0xff]   ;;  %v4503_v27 = vld [vmem:[%s6620_s1 + $0x360] ss:$8 sps:$4 sm:$0xff]   ;;  %v4506_v29 = vld [vmem:[%s6620_s1 + $0x374] ss:$8 sps:$4 sm:$0xff]  }
   0xb   :  { %2293 = vmatpush1.bf16.msra.mxu1 %v4478_v10  ;;  %v4508_v30 = vld [vmem:[%s6620_s1 + $0x70] ss:$8 sps:$4 sm:$0xff]   ;;  %v4510_v32 = vld [vmem:[%s6620_s1 + $0x84] ss:$8 sps:$4 sm:$0xff]   ;;  %v4514_v34 = vld [vmem:[%s6620_s1 + $0x80] ss:$8 sps:$4 sm:$0xff]  }
   0xc   :  { %2776 = vmatpush1.bf16.msra.mxu0 %v4479_v11  ;;  %2294 = vmatprep.subr.bf16.mxu1 %v4480_v12  ;;  %v4509_v31 = vld [vmem:[%s6620_s1 + $0x370] ss:$8 sps:$4 sm:$0xff]   ;;  %v4512_v33 = vld [vmem:[%s6620_s1 + $0x384] ss:$8 sps:$4 sm:$0xff]   ;;  %v4515_v35 = vld [vmem:[%s6620_s1 + $0x380] ss:$8 sps:$4 sm:$0xff]  }
   0xd   :  { %2777 = vmatprep.subr.bf16.mxu0 %v4482_v13  ;;  %v4516_v36 = vld [vmem:[%s6620_s1 + $0x94] ss:$8 sps:$4 sm:$0xff]   ;;  %v4520_v38 = vld [vmem:[%s6620_s1 + $0x90] ss:$8 sps:$4 sm:$0xff]   ;;  %v4522_v40 = vld [vmem:[%s6620_s1 + $0xa4] ss:$8 sps:$4 sm:$0xff]  }
   0xe   :  { %v4518_v37 = vld [vmem:[%s6620_s1 + $0x394] ss:$8 sps:$4 sm:$0xff]   ;;  %v4521_v39 = vld [vmem:[%s6620_s1 + $0x390] ss:$8 sps:$4 sm:$0xff]   ;;  %v4524_v41 = vld [vmem:[%s6620_s1 + $0x3a4] ss:$8 sps:$4 sm:$0xff]  }
   0xf   :  { %2295 = vmatpush1.bf16.msra.mxu1 %v4484_v14  ;;  %v4526_v42 = vld [vmem:[%s6620_s1 + $0xa0] ss:$8 sps:$4 sm:$0xff]   ;;  %v4528_v44 = vld [vmem:[%s6620_s1 + $0xb4] ss:$8 sps:$4 sm:$0xff]   ;;  %v4532_v46 = vld [vmem:[%s6620_s1 + $0xb0] ss:$8 sps:$4 sm:$0xff]  }
  0x10   :  { %2778 = vmatpush1.bf16.msra.mxu0 %v4485_v15  ;;  %2296 = vmatprep.subr.bf16.mxu1 %v4486_v16  ;;  %v4527_v43 = vld [vmem:[%s6620_s1 + $0x3a0] ss:$8 sps:$4 sm:$0xff]   ;;  %v4530_v45 = vld [vmem:[%s6620_s1 + $0x3b4] ss:$8 sps:$4 sm:$0xff]   ;;  %v4533_v47 = vld [vmem:[%s6620_s1 + $0x3b0] ss:$8 sps:$4 sm:$0xff]  }
  0x11   :  { %2779 = vmatprep.subr.bf16.mxu0 %v4488_v17  ;;  %v4534_v48 = vld [vmem:[%s6620_s1 + $0xc4] ss:$8 sps:$4 sm:$0xff]   ;;  %v4563_v51 = vld [vmem:[%s6621_s0 + $0x1c] ss:$52 sps:$4 sm:$0xff]   ;;  %v4538_v52 = vld [vmem:[%s6620_s1 + $0xc0] ss:$8 sps:$4 sm:$0xff]  }
  0x12   :  { %v4560_v49 = vld [vmem:[%s6621_s0 + $0x4] ss:$52 sps:$4 sm:$0xff]   ;;  %v4539_v53 = vld [vmem:[%s6620_s1 + $0x3c0] ss:$8 sps:$4 sm:$0xff]   ;;  %2803 = vmatprep.mubr.bf16.mxu0 %v4563_v51  ;;  %v4540_v54 = vld [vmem:[%s6620_s1 + $0xd4] ss:$8 sps:$4 sm:$0xff]  }
  0x13   :  { %2297 = vmatpush1.bf16.msra.mxu1 %v4490_v18  ;;  %v4536_v50 = vld [vmem:[%s6620_s1 + $0x3c4] ss:$8 sps:$4 sm:$0xff]   ;;  %2320 = vmatprep.mubr.bf16.mxu1 %v4560_v49  ;;  %v4542_v55 = vld [vmem:[%s6620_s1 + $0x3d4] ss:$8 sps:$4 sm:$0xff]   ;;  %v4544_v56 = vld [vmem:[%s6620_s1 + $0xd0] ss:$8 sps:$4 sm:$0xff]  }
  0x14   :  { %2780 = vmatpush1.bf16.msra.mxu0 %v4491_v19  ;;  %2298 = vmatprep.subr.bf16.mxu1 %v4492_v20  ;;  %v4545_v57 = vld [vmem:[%s6620_s1 + $0x3d0] ss:$8 sps:$4 sm:$0xff]   ;;  %v4546_v58 = vld [vmem:[%s6620_s1 + $0xe4] ss:$8 sps:$4 sm:$0xff]   ;;  %v4550_v60 = vld [vmem:[%s6620_s1 + $0xe0] ss:$8 sps:$4 sm:$0xff]  }
  0x15   :  { %2781 = vmatprep.subr.bf16.mxu0 %v4494_v21  ;;  %v4548_v59 = vld [vmem:[%s6620_s1 + $0x3e4] ss:$8 sps:$4 sm:$0xff]   ;;  %v4551_v61 = vld [vmem:[%s6620_s1 + $0x3e0] ss:$8 sps:$4 sm:$0xff]   ;;  %v4552_v62 = vld [vmem:[%s6620_s1 + $0xf4] ss:$8 sps:$4 sm:$0xff]  }
  0x16   :  { %v4554_v63 = vld [vmem:[%s6620_s1 + $0x3f4] ss:$8 sps:$4 sm:$0xff]   ;;  %v4556_v0 = vld [vmem:[%s6620_s1 + $0xf0] ss:$8 sps:$4 sm:$0xff]   ;;  %v4566_v2 = vld [vmem:[%s6620_s1 + $0x404] ss:$8 sps:$4 sm:$0xff]  }
  0x17   :  { %2299 = vmatpush1.bf16.msra.mxu1 %v4496_v22  ;;  %v4557_v1 = vld [vmem:[%s6620_s1 + $0x3f0] ss:$8 sps:$4 sm:$0xff]   ;;  %v4558_v3 = vld [vmem:[%s6621_s0] ss:$52 sps:$4 sm:$0xff]   ;;  %v4569_v4 = vld [vmem:[%s6620_s1 + $0x104] ss:$8 sps:$4 sm:$0xff]  }
  0x18   :  { %2782 = vmatpush1.bf16.msra.mxu0 %v4497_v23  ;;  %2300 = vmatprep.subr.bf16.mxu1 %v4498_v24  ;;  %v4561_v5 = vld [vmem:[%s6621_s0 + $0x18] ss:$52 sps:$4 sm:$0xff]   ;;  %v4564_v6 = vld [vmem:[%s6620_s1 + $0x400] ss:$8 sps:$4 sm:$0xff]   ;;  %v4576_v10 = vld [vmem:[%s6620_s1 + $0x414] ss:$8 sps:$4 sm:$0xff]  }
  0x19   :  { %2783 = vmatprep.subr.bf16.mxu0 %v4500_v25  ;;  %v4567_v7 = vld [vmem:[%s6620_s1 + $0x100] ss:$8 sps:$4 sm:$0xff]   ;;  %v4572_v9 = vld [vmem:[%s6621_s0 + $0x84] ss:$52 sps:$4 sm:$0xff]   ;;  %v4581_v11 = vld [vmem:[%s6620_s1 + $0x114] ss:$8 sps:$4 sm:$0xff]  }
  0x1a   :  { %v4570_v8 = vld [vmem:[%s6621_s0 + $0x6c] ss:$52 sps:$4 sm:$0xff]   ;;  %v4574_v12 = vld [vmem:[%s6620_s1 + $0x410] ss:$8 sps:$4 sm:$0xff]   ;;  %v4577_v14 = vld [vmem:[%s6621_s0 + $0x68] ss:$52 sps:$4 sm:$0xff]  }
  0x1b   :  { %2301 = vmatpush1.bf16.msra.mxu1 %v4502_v26  ;;  %v4579_v13 = vld [vmem:[%s6620_s1 + $0x110] ss:$8 sps:$4 sm:$0xff]   ;;  %v4578_v15 = vld [vmem:[%s6621_s0 + $0x80] ss:$52 sps:$4 sm:$0xff]   ;;  %v4584_v16 = vld [vmem:[%s6620_s1 + $0x424] ss:$8 sps:$4 sm:$0xff]  }
  0x1c   :  { %2784 = vmatpush1.bf16.msra.mxu0 %v4503_v27  ;;  %2302 = vmatprep.subr.bf16.mxu1 %v4504_v28  ;;  %v4582_v17 = vld [vmem:[%s6620_s1 + $0x420] ss:$8 sps:$4 sm:$0xff]   ;;  %v4593_v18 = vld [vmem:[%s6620_s1 + $0x124] ss:$8 sps:$4 sm:$0xff]   ;;  %v4596_v22 = vld [vmem:[%s6620_s1 + $0x434] ss:$8 sps:$4 sm:$0xff]  }
  0x1d   :  { %2785 = vmatprep.subr.bf16.mxu0 %v4506_v29  ;;  %v4585_v19 = vld [vmem:[%s6621_s0 + $0xd4] ss:$52 sps:$4 sm:$0xff]   ;;  %v4587_v20 = vld [vmem:[%s6621_s0 + $0xec] ss:$52 sps:$4 sm:$0xff]   ;;  %v4594_v24 = vld [vmem:[%s6620_s1 + $0x430] ss:$8 sps:$4 sm:$0xff]  }
  0x1e   :  { %v4591_v21 = vld [vmem:[%s6620_s1 + $0x120] ss:$8 sps:$4 sm:$0xff]   ;;  %v4605_v23 = vld [vmem:[%s6620_s1 + $0x134] ss:$8 sps:$4 sm:$0xff]   ;;  %v4603_v25 = vld [vmem:[%s6620_s1 + $0x130] ss:$8 sps:$4 sm:$0xff]  }
  0x1f   :  { %2303 = vmatpush1.bf16.msra.mxu1 %v4508_v30  ;;  %v4589_v26 = vld [vmem:[%s6621_s0 + $0xd0] ss:$52 sps:$4 sm:$0xff]   ;;  %v4590_v28 = vld [vmem:[%s6621_s0 + $0xe8] ss:$52 sps:$4 sm:$0xff]   ;;  %v4613_v49 = vld [vmem:[%s6621_s0 + $0x1a0] ss:$52 sps:$4 sm:$0xff]  }
  0x20   :  { %2786 = vmatpush1.bf16.msra.mxu0 %v4509_v31  ;;  %2304 = vmatprep.subr.bf16.mxu1 %v4510_v32  ;;  %v4608_v27 = vld [vmem:[%s6620_s1 + $0x444] ss:$8 sps:$4 sm:$0xff]   ;;  %v4597_v30 = vld [vmem:[%s6621_s0 + $0x13c] ss:$52 sps:$4 sm:$0xff]   ;;  %v4599_v31 = vld [vmem:[%s6621_s0 + $0x154] ss:$52 sps:$4 sm:$0xff]  }
  0x21   :  { %2787 = vmatprep.subr.bf16.mxu0 %v4512_v33  ;;  %v4616_v29 = vld [vmem:[%s6620_s1 + $0x144] ss:$8 sps:$4 sm:$0xff]   ;;  %v4606_v32 = vld [vmem:[%s6620_s1 + $0x440] ss:$8 sps:$4 sm:$0xff]   ;;  %v4645_v51 = vld [vmem:[%s6620_s1 + $0x170] ss:$8 sps:$4 sm:$0xff]  }
  0x22   :  { %v4614_v33 = vld [vmem:[%s6620_s1 + $0x140] ss:$8 sps:$4 sm:$0xff]  }
  0x23   :  { %2305 = vmatpush1.bf16.msra.mxu1 %v4514_v34  ;;  %v4620_v34 = vld [vmem:[%s6620_s1 + $0x454] ss:$8 sps:$4 sm:$0xff]  }
  0x24   :  { %2788 = vmatpush1.bf16.msra.mxu0 %v4515_v35  ;;  %2306 = vmatprep.subr.bf16.mxu1 %v4516_v36  ;;  %v4625_v35 = vld [vmem:[%s6620_s1 + $0x154] ss:$8 sps:$4 sm:$0xff]   ;;  %v4618_v36 = vld [vmem:[%s6620_s1 + $0x450] ss:$8 sps:$4 sm:$0xff]  }
  0x25   :  { %2789 = vmatprep.subr.bf16.mxu0 %v4518_v37  ;;  %v4601_v37 = vld [vmem:[%s6621_s0 + $0x138] ss:$52 sps:$4 sm:$0xff]  }
  0x27   :  { %2307 = vmatpush1.bf16.msra.mxu1 %v4520_v38  ;;  %v4602_v38 = vld [vmem:[%s6621_s0 + $0x150] ss:$52 sps:$4 sm:$0xff]  }
  0x28   :  { %2790 = vmatpush1.bf16.msra.mxu0 %v4521_v39  ;;  %2308 = vmatprep.subr.bf16.mxu1 %v4522_v40  ;;  %v4623_v39 = vld [vmem:[%s6620_s1 + $0x150] ss:$8 sps:$4 sm:$0xff]  }
  0x29   :  { %2791 = vmatprep.subr.bf16.mxu0 %v4524_v41  ;;  %v4609_v40 = vld [vmem:[%s6621_s0 + $0x1a4] ss:$52 sps:$4 sm:$0xff]  }
  0x2a   :  { %v4630_v41 = vld [vmem:[%s6620_s1 + $0x464] ss:$8 sps:$4 sm:$0xff]  }
  0x2b   :  { %2309 = vmatpush1.bf16.msra.mxu1 %v4526_v42  ;;  %v4635_v42 = vld [vmem:[%s6620_s1 + $0x164] ss:$8 sps:$4 sm:$0xff]  }
  0x2c   :  { %2792 = vmatpush1.bf16.msra.mxu0 %v4527_v43  ;;  %2310 = vmatprep.subr.bf16.mxu1 %v4528_v44  ;;  %v4611_v43 = vld [vmem:[%s6621_s0 + $0x1bc] ss:$52 sps:$4 sm:$0xff]   ;;  %v4628_v44 = vld [vmem:[%s6620_s1 + $0x460] ss:$8 sps:$4 sm:$0xff]  }
  0x2d   :  { %2793 = vmatprep.subr.bf16.mxu0 %v4530_v45  ;;  %v4633_v45 = vld [vmem:[%s6620_s1 + $0x160] ss:$8 sps:$4 sm:$0xff]  }
  0x2f   :  { %2311 = vmatpush1.bf16.msra.mxu1 %v4532_v46  ;;  %v4638_v46 = vld [vmem:[%s6620_s1 + $0x474] ss:$8 sps:$4 sm:$0xff]  }
  0x30   :  { %2794 = vmatpush1.bf16.msra.mxu0 %v4533_v47  ;;  %2312 = vmatprep.subr.bf16.mxu1 %v4534_v48  ;;  %v4647_v47 = vld [vmem:[%s6620_s1 + $0x174] ss:$8 sps:$4 sm:$0xff]   ;;  %v4636_v48 = vld [vmem:[%s6620_s1 + $0x470] ss:$8 sps:$4 sm:$0xff]  }
  0x31   :  { %2795 = vmatprep.subr.bf16.mxu0 %v4536_v50  ;;  %v4617_v50 = vld [vmem:[%s6621_s0 + $0x1b8] ss:$52 sps:$4 sm:$0xff]  }
  0x33   :  { %2313 = vmatpush1.bf16.msra.mxu1 %v4538_v52  ;;  %v4650_v52 = vld [vmem:[%s6620_s1 + $0x484] ss:$8 sps:$4 sm:$0xff]  }
  0x34   :  { %2796 = vmatpush1.bf16.msra.mxu0 %v4539_v53  ;;  %2314 = vmatprep.subr.bf16.mxu1 %v4540_v54  ;;  %v4659_v53 = vld [vmem:[%s6620_s1 + $0x184] ss:$8 sps:$4 sm:$0xff]  }
  0x35   :  { %2797 = vmatprep.subr.bf16.mxu0 %v4542_v55  ;;  %v4621_v54 = vld [vmem:[%s6621_s0 + $0x20c] ss:$52 sps:$4 sm:$0xff]   ;;  %v4626_v55 = vld [vmem:[%s6621_s0 + $0x224] ss:$52 sps:$4 sm:$0xff]  }
  0x37   :  { %2315 = vmatpush1.bf16.msra.mxu1 %v4544_v56  ;;  %v4648_v56 = vld [vmem:[%s6620_s1 + $0x480] ss:$8 sps:$4 sm:$0xff]  }
  0x38   :  { %2798 = vmatpush1.bf16.msra.mxu0 %v4545_v57  ;;  %2316 = vmatprep.subr.bf16.mxu1 %v4546_v58  ;;  %v4657_v57 = vld [vmem:[%s6620_s1 + $0x180] ss:$8 sps:$4 sm:$0xff]   ;;  %v4662_v58 = vld [vmem:[%s6620_s1 + $0x494] ss:$8 sps:$4 sm:$0xff]  }
  0x39   :  { %2799 = vmatprep.subr.bf16.mxu0 %v4548_v59  ;;  %v4671_v59 = vld [vmem:[%s6620_s1 + $0x194] ss:$8 sps:$4 sm:$0xff]  }
  0x3b   :  { %2317 = vmatpush1.bf16.msra.mxu1 %v4550_v60  ;;  %v4660_v60 = vld [vmem:[%s6620_s1 + $0x490] ss:$8 sps:$4 sm:$0xff]  }
  0x3c   :  { %2800 = vmatpush1.bf16.msra.mxu0 %v4551_v61  ;;  %2318 = vmatprep.subr.bf16.mxu1 %v4552_v62  ;;  %v4631_v61 = vld [vmem:[%s6621_s0 + $0x208] ss:$52 sps:$4 sm:$0xff]   ;;  %v4632_v62 = vld [vmem:[%s6621_s0 + $0x220] ss:$52 sps:$4 sm:$0xff]  }
  0x3d   :  { %2801 = vmatprep.subr.bf16.mxu0 %v4554_v63  ;;  %v4669_v63 = vld [vmem:[%s6620_s1 + $0x190] ss:$8 sps:$4 sm:$0xff]  }
  0x3f   :  { %2319 = vmatpush1.bf16.msra.mxu1 %v4556_v0  ;;  %v4674_v0 = vld [vmem:[%s6620_s1 + $0x4a4] ss:$8 sps:$4 sm:$0xff]  }
  0x40   :  { %2802 = vmatpush1.bf16.msra.mxu0 %v4557_v1  ;;  %2449 = vmatprep.subr.bf16.mxu1 %v4569_v4  ;;  %v4679_v1 = vld [vmem:[%s6620_s1 + $0x1a4] ss:$8 sps:$4 sm:$0xff]   ;;  %v4672_v4 = vld [vmem:[%s6620_s1 + $0x4a0] ss:$8 sps:$4 sm:$0xff]  }
  0x41   :  { %2932 = vmatprep.subr.bf16.mxu0 %v4566_v2  ;;  %v4639_v2 = vld [vmem:[%s6621_s0 + $0x274] ss:$52 sps:$4 sm:$0xff]  }
  0x42   :  { %2321 = vmatmul.mubr.bf16.vlgmr.msra.gmra.mrb[0].mxu1 %v4558_v3  ;;  %v4641_v3 = vld [vmem:[%s6621_s0 + $0x28c] ss:$52 sps:$4 sm:$0xff]  }
  0x43   :  { %2804 = vmatmul.mubr.bf16.vlgmr.msra.gmra.mrb[0].mxu0 %v4561_v5  ;;  %2330 = vmatprep.mubr.bf16.mxu1 %v4570_v8  ;;  %v4677_v5 = vld [vmem:[%s6620_s1 + $0x1a0] ss:$8 sps:$4 sm:$0xff]   ;;  %v4684_v8 = vld [vmem:[%s6620_s1 + $0x4b0] ss:$8 sps:$4 sm:$0xff]  }
  0x44   :  { %2933 = vmatpush1.bf16.msra.mxu0 %v4564_v6  ;;  %2450 = vmatpush1.bf16.msra.mxu1 %v4567_v7  ;;  %v4686_v6 = vld [vmem:[%s6620_s1 + $0x4b4] ss:$8 sps:$4 sm:$0xff]  }
  0x45   :  { %2813 = vmatprep.mubr.bf16.mxu0 %v4572_v9  ;;  %2934 = vmatprep.subr.bf16.mxu0 %v4576_v10  ;;  %v4689_v7 = vld [vmem:[%s6620_s1 + $0x1b4] ss:$8 sps:$4 sm:$0xff]   ;;  %v4643_v9 = vld [vmem:[%s6621_s0 + $0x270] ss:$52 sps:$4 sm:$0xff]  }
  0x46   :  { %2451 = vmatprep.subr.bf16.mxu1 %v4581_v11  ;;  %v4687_v10 = vld [vmem:[%s6620_s1 + $0x1b0] ss:$8 sps:$4 sm:$0xff]   ;;  %v4692_v11 = vld [vmem:[%s6620_s1 + $0x4c4] ss:$8 sps:$4 sm:$0xff]  }
  0x48   :  { %2935 = vmatpush1.bf16.msra.mxu0 %v4574_v12  ;;  %2452 = vmatpush1.bf16.msra.mxu1 %v4579_v13  ;;  %v4701_v12 = vld [vmem:[%s6620_s1 + $0x1c4] ss:$8 sps:$4 sm:$0xff]   ;;  %v4644_v13 = vld [vmem:[%s6621_s0 + $0x288] ss:$52 sps:$4 sm:$0xff]  }
  0x49   :  { %2936 = vmatprep.subr.bf16.mxu0 %v4584_v16  ;;  %2453 = vmatprep.subr.bf16.mxu1 %v4593_v18  ;;  %v4690_v16 = vld [vmem:[%s6620_s1 + $0x4c0] ss:$8 sps:$4 sm:$0xff]   ;;  %v4704_v18 = vld [vmem:[%s6620_s1 + $0x4d4] ss:$8 sps:$4 sm:$0xff]  }
  0x4a   :  { %2331 = vmatmul.mubr.bf16.gmra.mrb[4].mxu1 %v4577_v14  ;;  %v4651_v14 = vld [vmem:[%s6621_s0 + $0x2dc] ss:$52 sps:$4 sm:$0xff]  }
  0x4b   :  { %2814 = vmatmul.mubr.bf16.gmra.mrb[4].mxu0 %v4578_v15  ;;  %2340 = vmatprep.mubr.bf16.mxu1 %v4585_v19  ;;  %v4653_v15 = vld [vmem:[%s6621_s0 + $0x2f4] ss:$52 sps:$4 sm:$0xff]  }
  0x4c   :  { %2937 = vmatpush1.bf16.msra.mxu0 %v4582_v17  ;;  %2823 = vmatprep.mubr.bf16.mxu0 %v4587_v20  ;;  %v4699_v17 = vld [vmem:[%s6620_s1 + $0x1c0] ss:$8 sps:$4 sm:$0xff]   ;;  %v4713_v19 = vld [vmem:[%s6620_s1 + $0x1d4] ss:$8 sps:$4 sm:$0xff]   ;;  %v4702_v20 = vld [vmem:[%s6620_s1 + $0x4d0] ss:$8 sps:$4 sm:$0xff]  }
  0x4d   :  { %2454 = vmatpush1.bf16.msra.mxu1 %v4591_v21  ;;  %2938 = vmatprep.subr.bf16.mxu0 %v4596_v22  ;;  %v4655_v21 = vld [vmem:[%s6621_s0 + $0x2d8] ss:$52 sps:$4 sm:$0xff]   ;;  %v4656_v22 = vld [vmem:[%s6621_s0 + $0x2f0] ss:$52 sps:$4 sm:$0xff]  }
  0x4e   :  { %2455 = vmatprep.subr.bf16.mxu1 %v4605_v23  ;;  %v4711_v23 = vld [vmem:[%s6620_s1 + $0x1d0] ss:$8 sps:$4 sm:$0xff]  }
  0x50   :  { %2939 = vmatpush1.bf16.msra.mxu0 %v4594_v24  ;;  %v4716_v24 = vld [vmem:[%s6620_s1 + $0x4e4] ss:$8 sps:$4 sm:$0xff]  }
  0x51   :  { %2940 = vmatprep.subr.bf16.mxu0 %v4608_v27  ;;  %2456 = vmatpush1.bf16.msra.mxu1 %v4603_v25  ;;  %v4722_v25 = vld [vmem:[%s6620_s1 + $0x1e4] ss:$8 sps:$4 sm:$0xff]   ;;  %v4665_v27 = vld [vmem:[%s6621_s0 + $0x35c] ss:$52 sps:$4 sm:$0xff]  }
  0x52   :  { %2457 = vmatprep.subr.bf16.mxu1 %v4616_v29  ;;  %2341 = vmatmul.mubr.bf16.gmra.mrb[8].mxu1 %v4589_v26  ;;  %v4663_v26 = vld [vmem:[%s6621_s0 + $0x344] ss:$52 sps:$4 sm:$0xff]   ;;  %v4720_v29 = vld [vmem:[%s6620_s1 + $0x1e0] ss:$8 sps:$4 sm:$0xff]  }
  0x53   :  { %2824 = vmatmul.mubr.bf16.gmra.mrb[8].mxu0 %v4590_v28  ;;  %2350 = vmatprep.mubr.bf16.mxu1 %v4597_v30  ;;  %v4714_v28 = vld [vmem:[%s6620_s1 + $0x4e0] ss:$8 sps:$4 sm:$0xff]   ;;  %v4726_v30 = vld [vmem:[%s6620_s1 + $0x4f4] ss:$8 sps:$4 sm:$0xff]  }
  0x54   :  { %2833 = vmatprep.mubr.bf16.mxu0 %v4599_v31  ;;  %2941 = vmatpush1.bf16.msra.mxu0 %v4606_v32  ;;  %v4729_v31 = vld [vmem:[%s6620_s1 + $0x1f4] ss:$8 sps:$4 sm:$0xff]   ;;  %v4724_v32 = vld [vmem:[%s6620_s1 + $0x4f0] ss:$8 sps:$4 sm:$0xff]  }
  0x55   :  { %2458 = vmatpush1.bf16.msra.mxu1 %v4614_v33  ;;  %2942 = vmatprep.subr.bf16.mxu0 %v4620_v34  ;;  %v4727_v33 = vld [vmem:[%s6620_s1 + $0x1f0] ss:$8 sps:$4 sm:$0xff]   ;;  %v4667_v34 = vld [vmem:[%s6621_s0 + $0x340] ss:$52 sps:$4 sm:$0xff]  }
  0x56   :  { %2459 = vmatprep.subr.bf16.mxu1 %v4625_v35  ;;  %v5528_v35 = vld [vmem:[%s6620_s1 + $0x504] ss:$8 sps:$4 sm:$0xff]  }
  0x58   :  { %2943 = vmatpush1.bf16.msra.mxu0 %v4618_v36  ;;  %v4741_v36 = vld [vmem:[%s6620_s1 + $0x204] ss:$8 sps:$4 sm:$0xff]  }
  0x59   :  { %2460 = vmatpush1.bf16.msra.mxu1 %v4623_v39  ;;  %2944 = vmatprep.subr.bf16.mxu0 %v4630_v41  ;;  %v4680_v39 = vld [vmem:[%s6621_s0 + $0x3c4] ss:$52 sps:$4 sm:$0xff]   ;;  %v4683_v41 = vld [vmem:[%s6621_s0 + $0x3c0] ss:$52 sps:$4 sm:$0xff]  }
  0x5a   :  { %2461 = vmatprep.subr.bf16.mxu1 %v4635_v42  ;;  %2351 = vmatmul.mubr.bf16.gmra.mrb[12].mxu1 %v4601_v37  ;;  %v4668_v37 = vld [vmem:[%s6621_s0 + $0x358] ss:$52 sps:$4 sm:$0xff]   ;;  %v4693_v42 = vld [vmem:[%s6621_s0 + $0x414] ss:$52 sps:$4 sm:$0xff]  }
  0x5b   :  { %2834 = vmatmul.mubr.bf16.gmra.mrb[12].mxu0 %v4602_v38  ;;  %2360 = vmatprep.mubr.bf16.mxu1 %v4609_v40  ;;  %v4675_v38 = vld [vmem:[%s6621_s0 + $0x3ac] ss:$52 sps:$4 sm:$0xff]   ;;  %v4682_v40 = vld [vmem:[%s6621_s0 + $0x3a8] ss:$52 sps:$4 sm:$0xff]  }
  0x5c   :  { %2843 = vmatprep.mubr.bf16.mxu0 %v4611_v43  ;;  %2945 = vmatpush1.bf16.msra.mxu0 %v4628_v44  ;;  %v4695_v43 = vld [vmem:[%s6621_s0 + $0x42c] ss:$52 sps:$4 sm:$0xff]   ;;  %v4697_v44 = vld [vmem:[%s6621_s0 + $0x410] ss:$52 sps:$4 sm:$0xff]  }
  0x5d   :  { %2462 = vmatpush1.bf16.msra.mxu1 %v4633_v45  ;;  %2946 = vmatprep.subr.bf16.mxu0 %v4638_v46  ;;  %v4698_v45 = vld [vmem:[%s6621_s0 + $0x428] ss:$52 sps:$4 sm:$0xff]  }
  0x5e   :  { %2463 = vmatprep.subr.bf16.mxu1 %v4647_v47  ;;  %v4705_v46 = vld [vmem:[%s6621_s0 + $0x47c] ss:$52 sps:$4 sm:$0xff]   ;;  %v4707_v47 = vld [vmem:[%s6621_s0 + $0x494] ss:$52 sps:$4 sm:$0xff]  }
  0x60   :  { %2947 = vmatpush1.bf16.msra.mxu0 %v4636_v48  ;;  %v183_v48 = vld [vmem:[%s6621_s0 + $0x4e0] sm:$0xff] }
  0x61   :  { %2464 = vmatpush1.bf16.msra.mxu1 %v4645_v51  ;;  %2948 = vmatprep.subr.bf16.mxu0 %v4650_v52  ;;  %v4710_v51 = vld [vmem:[%s6621_s0 + $0x490] ss:$52 sps:$4 sm:$0xff]   ;;  %v3803_v52 = vcombine.high %v183_v48, %v183_v48 }
  0x62   :  { %2465 = vmatprep.subr.bf16.mxu1 %v4659_v53  ;;  %2361 = vmatmul.mubr.bf16.gmra.mrb[16].mxu1 %v4613_v49  ;;  %v186_v49 = vld [vmem:[%s6621_s0 + $0x4f8] sm:$0xff] }
  0x63   :  { %2844 = vmatmul.mubr.bf16.gmra.mrb[16].mxu0 %v4617_v50  ;;  %2370 = vmatprep.mubr.bf16.mxu1 %v4621_v54  ;;  %v4709_v50 = vld [vmem:[%s6621_s0 + $0x478] ss:$52 sps:$4 sm:$0xff]   ;;  %v3809_v53 = vcombine.high %v186_v49, %v186_v49  ;;  %v3802_v54 = vcombine.low %v183_v48, %v183_v48  ;;  %v4829_v48 = vld [vmem:[%s6620_s1 + $0x280] ss:$8 sps:$4 sm:$0xff]  }
  0x64   :  { %2853 = vmatprep.mubr.bf16.mxu0 %v4626_v55  ;;  %2949 = vmatpush1.bf16.msra.mxu0 %v4648_v56  ;;  %v3808_v55 = vcombine.low %v186_v49, %v186_v49  ;;  %v4732_v56 = vld [vmem:[%s6621_s0 + $0xc] ss:$52 sps:$4 sm:$0xff]   ;;  %v5800_v49 = vld [vmem:[%s6620_s1 + $0x594] ss:$8 sps:$4 sm:$0xff]  }
  0x65   :  { %2466 = vmatpush1.bf16.msra.mxu1 %v4657_v57  ;;  %2950 = vmatprep.subr.bf16.mxu0 %v4662_v58  ;;  %v4735_v57 = vld [vmem:[%s6621_s0 + $0x24] ss:$52 sps:$4 sm:$0xff]   ;;  %v4730_v58 = vld [vmem:[%s6621_s0 + $0x8] ss:$52 sps:$4 sm:$0xff]  }
  0x66   :  { %2467 = vmatprep.subr.bf16.mxu1 %v4671_v59  ;;  %v4733_v59 = vld [vmem:[%s6621_s0 + $0x20] ss:$52 sps:$4 sm:$0xff]  }
  0x68   :  { %2951 = vmatpush1.bf16.msra.mxu0 %v4660_v60  ;;  %v5594_v60 = vld [vmem:[%s6620_s1 + $0x500] ss:$8 sps:$4 sm:$0xff]  }
  0x69   :  { %2468 = vmatpush1.bf16.msra.mxu1 %v4669_v63  ;;  %2952 = vmatprep.subr.bf16.mxu0 %v4674_v0  ;;  %v4744_v63 = vld [vmem:[%s6621_s0 + $0x8c] ss:$52 sps:$4 sm:$0xff]   ;;  %v5608_v0 = vld [vmem:[%s6620_s1 + $0x514] ss:$8 sps:$4 sm:$0xff]  }
  0x6a   :  { %2469 = vmatprep.subr.bf16.mxu1 %v4679_v1  ;;  %2371 = vmatmul.mubr.bf16.gmra.mrb[20].mxu1 %v4631_v61  ;;  %v4739_v61 = vld [vmem:[%s6620_s1 + $0x200] ss:$8 sps:$4 sm:$0xff]   ;;  %v4753_v1 = vld [vmem:[%s6620_s1 + $0x214] ss:$8 sps:$4 sm:$0xff]  }
  0x6b   :  { %2854 = vmatmul.mubr.bf16.gmra.mrb[20].mxu0 %v4632_v62  ;;  %2380 = vmatprep.mubr.bf16.mxu1 %v4639_v2  ;;  %v4742_v62 = vld [vmem:[%s6621_s0 + $0x74] ss:$52 sps:$4 sm:$0xff]   ;;  %v5617_v2 = vld [vmem:[%s6620_s1 + $0x510] ss:$8 sps:$4 sm:$0xff]  }
  0x6c   :  { %2863 = vmatprep.mubr.bf16.mxu0 %v4641_v3  ;;  %2953 = vmatpush1.bf16.msra.mxu0 %v4672_v4  ;;  %v4749_v3 = vld [vmem:[%s6621_s0 + $0x70] ss:$52 sps:$4 sm:$0xff]   ;;  %v4750_v4 = vld [vmem:[%s6621_s0 + $0x88] ss:$52 sps:$4 sm:$0xff]  }
  0x6d   :  { %2470 = vmatpush1.bf16.msra.mxu1 %v4677_v5  ;;  %2954 = vmatprep.subr.bf16.mxu0 %v4686_v6  ;;  %v4751_v5 = vld [vmem:[%s6620_s1 + $0x210] ss:$8 sps:$4 sm:$0xff]   ;;  %v5631_v6 = vld [vmem:[%s6620_s1 + $0x524] ss:$8 sps:$4 sm:$0xff]  }
  0x6e   :  { %2471 = vmatprep.subr.bf16.mxu1 %v4689_v7  ;;  %v4765_v7 = vld [vmem:[%s6620_s1 + $0x224] ss:$8 sps:$4 sm:$0xff]  }
  0x70   :  { %2955 = vmatpush1.bf16.msra.mxu0 %v4684_v8  ;;  %v5640_v8 = vld [vmem:[%s6620_s1 + $0x520] ss:$8 sps:$4 sm:$0xff]  }
  0x71   :  { %2472 = vmatpush1.bf16.msra.mxu1 %v4687_v10  ;;  %2956 = vmatprep.subr.bf16.mxu0 %v4692_v11  ;;  %v4759_v10 = vld [vmem:[%s6621_s0 + $0xf4] ss:$52 sps:$4 sm:$0xff]  }
  0x72   :  { %2473 = vmatprep.subr.bf16.mxu1 %v4701_v12  ;;  %2381 = vmatmul.mubr.bf16.gmra.mrb[24].mxu1 %v4643_v9  ;;  %v4757_v9 = vld [vmem:[%s6621_s0 + $0xdc] ss:$52 sps:$4 sm:$0xff]   ;;  %v4763_v11 = vld [vmem:[%s6620_s1 + $0x220] ss:$8 sps:$4 sm:$0xff]  }
  0x73   :  { %2864 = vmatmul.mubr.bf16.gmra.mrb[24].mxu0 %v4644_v13  ;;  %2390 = vmatprep.mubr.bf16.mxu1 %v4651_v14  ;;  %v5656_v12 = vld [vmem:[%s6620_s1 + $0x534] ss:$8 sps:$4 sm:$0xff]   ;;  %v5665_v14 = vld [vmem:[%s6620_s1 + $0x530] ss:$8 sps:$4 sm:$0xff]  }
  0x74   :  { %2873 = vmatprep.mubr.bf16.mxu0 %v4653_v15  ;;  %2957 = vmatpush1.bf16.msra.mxu0 %v4690_v16  ;;  %v4777_v13 = vld [vmem:[%s6620_s1 + $0x234] ss:$8 sps:$4 sm:$0xff]   ;;  %v4761_v15 = vld [vmem:[%s6621_s0 + $0xd8] ss:$52 sps:$4 sm:$0xff]   ;;  %v4762_v16 = vld [vmem:[%s6621_s0 + $0xf0] ss:$52 sps:$4 sm:$0xff]  }
  0x75   :  { %2474 = vmatpush1.bf16.msra.mxu1 %v4699_v17  ;;  %2958 = vmatprep.subr.bf16.mxu0 %v4704_v18  ;;  %v4775_v17 = vld [vmem:[%s6620_s1 + $0x230] ss:$8 sps:$4 sm:$0xff]   ;;  %v5679_v18 = vld [vmem:[%s6620_s1 + $0x544] ss:$8 sps:$4 sm:$0xff]  }
  0x76   :  { %2475 = vmatprep.subr.bf16.mxu1 %v4713_v19  ;;  %v4788_v19 = vld [vmem:[%s6620_s1 + $0x244] ss:$8 sps:$4 sm:$0xff]  }
  0x78   :  { %2959 = vmatpush1.bf16.msra.mxu0 %v4702_v20  ;;  %v4769_v20 = vld [vmem:[%s6621_s0 + $0x144] ss:$52 sps:$4 sm:$0xff]  }
  0x79   :  { %2476 = vmatpush1.bf16.msra.mxu1 %v4711_v23  ;;  %2960 = vmatprep.subr.bf16.mxu0 %v4716_v24  ;;  %v4786_v23 = vld [vmem:[%s6620_s1 + $0x240] ss:$8 sps:$4 sm:$0xff]   ;;  %v5704_v24 = vld [vmem:[%s6620_s1 + $0x554] ss:$8 sps:$4 sm:$0xff]  }
  0x7a   :  { %2477 = vmatprep.subr.bf16.mxu1 %v4722_v25  ;;  %2391 = vmatmul.mubr.bf16.gmra.mrb[28].mxu1 %v4655_v21  ;;  %v4771_v21 = vld [vmem:[%s6621_s0 + $0x15c] ss:$52 sps:$4 sm:$0xff]  }
  0x7b   :  { %2874 = vmatmul.mubr.bf16.gmra.mrb[28].mxu0 %v4656_v22  ;;  %2400 = vmatprep.mubr.bf16.mxu1 %v4663_v26  ;;  %v5695_v22 = vld [vmem:[%s6620_s1 + $0x540] ss:$8 sps:$4 sm:$0xff]   ;;  %v4797_v25 = vld [vmem:[%s6620_s1 + $0x254] ss:$8 sps:$4 sm:$0xff]   ;;  %v5712_v26 = vld [vmem:[%s6620_s1 + $0x550] ss:$8 sps:$4 sm:$0xff]  }
  0x7c   :  { %2883 = vmatprep.mubr.bf16.mxu0 %v4665_v27  ;;  %2961 = vmatpush1.bf16.msra.mxu0 %v4714_v28  ;;  %v4773_v27 = vld [vmem:[%s6621_s0 + $0x140] ss:$52 sps:$4 sm:$0xff]   ;;  %v4774_v28 = vld [vmem:[%s6621_s0 + $0x158] ss:$52 sps:$4 sm:$0xff]  }
  0x7d   :  { %2478 = vmatpush1.bf16.msra.mxu1 %v4720_v29  ;;  %2962 = vmatprep.subr.bf16.mxu0 %v4726_v30  ;;  %v4795_v29 = vld [vmem:[%s6620_s1 + $0x250] ss:$8 sps:$4 sm:$0xff]   ;;  %v5728_v30 = vld [vmem:[%s6620_s1 + $0x564] ss:$8 sps:$4 sm:$0xff]  }
  0x7e   :  { %2479 = vmatprep.subr.bf16.mxu1 %v4729_v31  ;;  %v4807_v31 = vld [vmem:[%s6620_s1 + $0x264] ss:$8 sps:$4 sm:$0xff]  }
  0x80   :  { %2963 = vmatpush1.bf16.msra.mxu0 %v4724_v32  ;;  %v4781_v32 = vld [vmem:[%s6621_s0 + $0x1ac] ss:$52 sps:$4 sm:$0xff]  }
  0x81   :  { %2480 = vmatpush1.bf16.msra.mxu1 %v4727_v33  ;;  %3093 = vmatprep.subr.bf16.mxu0 %v5528_v35  ;;  %v4783_v33 = vld [vmem:[%s6621_s0 + $0x1c4] ss:$52 sps:$4 sm:$0xff]  }
  0x82   :  { %2610 = vmatprep.subr.bf16.mxu1 %v4741_v36  ;;  %2401 = vmatmul.mubr.bf16.gmra.mrb[32].mxu1 %v4667_v34  ;;  %v5742_v34 = vld [vmem:[%s6620_s1 + $0x560] ss:$8 sps:$4 sm:$0xff]  }
  0x83   :  { %2884 = vmatmul.mubr.bf16.gmra.mrb[32].mxu0 %v4668_v37  ;;  %2410 = vmatprep.mubr.bf16.mxu1 %v4675_v38  ;;  %v4805_v36 = vld [vmem:[%s6620_s1 + $0x260] ss:$8 sps:$4 sm:$0xff]   ;;  %v5752_v37 = vld [vmem:[%s6620_s1 + $0x574] ss:$8 sps:$4 sm:$0xff]  }
  0x84   :  { %2893 = vmatprep.mubr.bf16.mxu0 %v4680_v39  ;;  %v4819_v38 = vld [vmem:[%s6620_s1 + $0x274] ss:$8 sps:$4 sm:$0xff]   ;;  %v5760_v39 = vld [vmem:[%s6620_s1 + $0x570] ss:$8 sps:$4 sm:$0xff]  }
  0x8a   :  { %2411 = vmatmul.mubr.bf16.gmra.mrb[36].mxu1 %v4682_v40  ;;  %v4817_v40 = vld [vmem:[%s6620_s1 + $0x270] ss:$8 sps:$4 sm:$0xff]  }
  0x8b   :  { %2894 = vmatmul.mubr.bf16.gmra.mrb[36].mxu0 %v4683_v41  ;;  %2420 = vmatprep.mubr.bf16.mxu1 %v4693_v42  ;;  %v4785_v41 = vld [vmem:[%s6621_s0 + $0x1a8] ss:$52 sps:$4 sm:$0xff]   ;;  %v5772_v42 = vld [vmem:[%s6620_s1 + $0x584] ss:$8 sps:$4 sm:$0xff]  }
  0x8c   :  { %2903 = vmatprep.mubr.bf16.mxu0 %v4695_v43  ;;  %v4831_v43 = vld [vmem:[%s6620_s1 + $0x284] ss:$8 sps:$4 sm:$0xff]  }
  0x92   :  { %2421 = vmatmul.mubr.bf16.gmra.mrb[40].mxu1 %v4697_v44  ;;  %v4789_v44 = vld [vmem:[%s6621_s0 + $0x1c0] ss:$52 sps:$4 sm:$0xff]  }
  0x93   :  { %2904 = vmatmul.mubr.bf16.gmra.mrb[40].mxu0 %v4698_v45  ;;  %2430 = vmatprep.mubr.bf16.mxu1 %v4705_v46  ;;  %v4793_v45 = vld [vmem:[%s6621_s0 + $0x214] ss:$52 sps:$4 sm:$0xff]   ;;  %v4798_v46 = vld [vmem:[%s6621_s0 + $0x22c] ss:$52 sps:$4 sm:$0xff]  }
  0x94   :  { %2913 = vmatprep.mubr.bf16.mxu0 %v4707_v47  ;;  %v5790_v47 = vld [vmem:[%s6620_s1 + $0x580] ss:$8 sps:$4 sm:$0xff]  }
  0x9a   :  { %2431 = vmatmul.mubr.bf16.gmra.mrb[44].mxu1 %v4709_v50  ;;  %v4843_v50 = vld [vmem:[%s6620_s1 + $0x294] ss:$8 sps:$4 sm:$0xff]  }
  0x9b   :  { %2914 = vmatmul.mubr.bf16.gmra.mrb[44].mxu0 %v4710_v51  ;;  %2440 = vmatprep.mubr.bf16.mxu1 %v3803_v52  ;;  %v5808_v51 = vld [vmem:[%s6620_s1 + $0x590] ss:$8 sps:$4 sm:$0xff]  }
  0x9c   :  { %2923 = vmatprep.mubr.bf16.mxu0 %v3809_v53  ;;  %v4803_v52 = vld [vmem:[%s6621_s0 + $0x210] ss:$52 sps:$4 sm:$0xff]   ;;  %v4804_v53 = vld [vmem:[%s6621_s0 + $0x228] ss:$52 sps:$4 sm:$0xff]  }
  0xa2   :  { %2441 = vmatmul.mubr.bf16.gmra.mrb[48].mxu1 %v3802_v54  ;;  %v4841_v54 = vld [vmem:[%s6620_s1 + $0x290] ss:$8 sps:$4 sm:$0xff]  }
  0xa3   :  { %2924 = vmatmul.mubr.bf16.gmra.mrb[48].mxu0 %v3808_v55  ;;  %2481 = vmatprep.mubr.bf16.mxu1 %v4732_v56  ;;  %v5824_v55 = vld [vmem:[%s6620_s1 + $0x5a4] ss:$8 sps:$4 sm:$0xff]  }
  0xa4   :  { %2964 = vmatprep.mubr.bf16.mxu0 %v4735_v57  ;;  %v4851_v56 = vld [vmem:[%s6620_s1 + $0x2a4] ss:$8 sps:$4 sm:$0xff]   ;;  %v4811_v57 = vld [vmem:[%s6621_s0 + $0x27c] ss:$52 sps:$4 sm:$0xff]  }
  0xaa   :  { %2482 = vmatmul.mubr.bf16.vlgmr.msra.gmra.mrb[0].mxu1 %v4730_v58  ;;  %v4813_v58 = vld [vmem:[%s6621_s0 + $0x294] ss:$52 sps:$4 sm:$0xff]  }
  0xab   :  { %2965 = vmatmul.mubr.bf16.vlgmr.msra.gmra.mrb[0].mxu0 %v4733_v59  ;;  %2491 = vmatprep.mubr.bf16.mxu1 %v4742_v62  ;;  %v5838_v59 = vld [vmem:[%s6620_s1 + $0x5a0] ss:$8 sps:$4 sm:$0xff]   ;;  %v5848_v62 = vld [vmem:[%s6620_s1 + $0x5b4] ss:$8 sps:$4 sm:$0xff]  }
  0xac   :  { %3094 = vmatpush1.bf16.msra.mxu0 %v5594_v60  ;;  %2611 = vmatpush1.bf16.msra.mxu1 %v4739_v61  ;;  %v4849_v61 = vld [vmem:[%s6620_s1 + $0x2a0] ss:$8 sps:$4 sm:$0xff]  }
  0xad   :  { %2974 = vmatprep.mubr.bf16.mxu0 %v4744_v63  ;;  %3095 = vmatprep.subr.bf16.mxu0 %v5608_v0  ;;  %v4861_v63 = vld [vmem:[%s6620_s1 + $0x2b4] ss:$8 sps:$4 sm:$0xff]  }
  0xae   :  { %2612 = vmatprep.subr.bf16.mxu1 %v4753_v1  ;;  %v5856_v1 = vld [vmem:[%s6620_s1 + $0x5b0] ss:$8 sps:$4 sm:$0xff]  }
  0xb0   :  { %3096 = vmatpush1.bf16.msra.mxu0 %v5617_v2  ;;  %2613 = vmatpush1.bf16.msra.mxu1 %v4751_v5  ;;  %v4859_v5 = vld [vmem:[%s6620_s1 + $0x2b0] ss:$8 sps:$4 sm:$0xff]  }
  0xb1   :  { %3097 = vmatprep.subr.bf16.mxu0 %v5631_v6  ;;  %2614 = vmatprep.subr.bf16.mxu1 %v4765_v7  ;;  %v5872_v7 = vld [vmem:[%s6620_s1 + $0x5c4] ss:$8 sps:$4 sm:$0xff]  }
  0xb2   :  { %2492 = vmatmul.mubr.bf16.gmra.mrb[4].mxu1 %v4749_v3  ;;  %v4815_v3 = vld [vmem:[%s6621_s0 + $0x278] ss:$52 sps:$4 sm:$0xff]  }
  0xb3   :  { %2975 = vmatmul.mubr.bf16.gmra.mrb[4].mxu0 %v4750_v4  ;;  %2501 = vmatprep.mubr.bf16.mxu1 %v4757_v9  ;;  %v4816_v4 = vld [vmem:[%s6621_s0 + $0x290] ss:$52 sps:$4 sm:$0xff]  }
  0xb4   :  { %3098 = vmatpush1.bf16.msra.mxu0 %v5640_v8  ;;  %2984 = vmatprep.mubr.bf16.mxu0 %v4759_v10  ;;  %v4873_v9 = vld [vmem:[%s6620_s1 + $0x2c4] ss:$8 sps:$4 sm:$0xff]  }
  0xb5   :  { %2615 = vmatpush1.bf16.msra.mxu1 %v4763_v11  ;;  %3099 = vmatprep.subr.bf16.mxu0 %v5656_v12  ;;  %v4823_v10 = vld [vmem:[%s6621_s0 + $0x2e4] ss:$52 sps:$4 sm:$0xff]   ;;  %v4825_v11 = vld [vmem:[%s6621_s0 + $0x2fc] ss:$52 sps:$4 sm:$0xff]  }
  0xb6   :  { %2616 = vmatprep.subr.bf16.mxu1 %v4777_v13  ;;  %v5886_v13 = vld [vmem:[%s6620_s1 + $0x5c0] ss:$8 sps:$4 sm:$0xff]  }
  0xb8   :  { %3100 = vmatpush1.bf16.msra.mxu0 %v5665_v14 }
  0xb9   :  { %3101 = vmatprep.subr.bf16.mxu0 %v5679_v18  ;;  %2617 = vmatpush1.bf16.msra.mxu1 %v4775_v17  ;;  %v4885_v17 = vld [vmem:[%s6620_s1 + $0x2d4] ss:$8 sps:$4 sm:$0xff]  }
  0xba   :  { %2618 = vmatprep.subr.bf16.mxu1 %v4788_v19  ;;  %2502 = vmatmul.mubr.bf16.gmra.mrb[8].mxu1 %v4761_v15  ;;  %v4871_v15 = vld [vmem:[%s6620_s1 + $0x2c0] ss:$8 sps:$4 sm:$0xff]   ;;  %v5904_v19 = vld [vmem:[%s6620_s1 + $0x5d0] ss:$8 sps:$4 sm:$0xff]  }
  0xbb   :  { %2985 = vmatmul.mubr.bf16.gmra.mrb[8].mxu0 %v4762_v16  ;;  %2511 = vmatprep.mubr.bf16.mxu1 %v4769_v20  ;;  %v5896_v16 = vld [vmem:[%s6620_s1 + $0x5d4] ss:$8 sps:$4 sm:$0xff]  }
  0xbc   :  { %2994 = vmatprep.mubr.bf16.mxu0 %v4771_v21  ;;  %3102 = vmatpush1.bf16.msra.mxu0 %v5695_v22  ;;  %v4827_v20 = vld [vmem:[%s6621_s0 + $0x2e0] ss:$52 sps:$4 sm:$0xff]   ;;  %v4828_v21 = vld [vmem:[%s6621_s0 + $0x2f8] ss:$52 sps:$4 sm:$0xff]  }
  0xbd   :  { %2619 = vmatpush1.bf16.msra.mxu1 %v4786_v23  ;;  %3103 = vmatprep.subr.bf16.mxu0 %v5704_v24  ;;  %v4883_v23 = vld [vmem:[%s6620_s1 + $0x2d0] ss:$8 sps:$4 sm:$0xff]  }
  0xbe   :  { %2620 = vmatprep.subr.bf16.mxu1 %v4797_v25  ;;  %v4835_v25 = vld [vmem:[%s6621_s0 + $0x34c] ss:$52 sps:$4 sm:$0xff]  }
  0xc0   :  { %3104 = vmatpush1.bf16.msra.mxu0 %v5712_v26 }
  0xc1   :  { %2621 = vmatpush1.bf16.msra.mxu1 %v4795_v29  ;;  %3105 = vmatprep.subr.bf16.mxu0 %v5728_v30  ;;  %v4837_v29 = vld [vmem:[%s6621_s0 + $0x364] ss:$52 sps:$4 sm:$0xff]  }
  0xc2   :  { %2622 = vmatprep.subr.bf16.mxu1 %v4807_v31  ;;  %2512 = vmatmul.mubr.bf16.gmra.mrb[12].mxu1 %v4773_v27  ;;  %v5923_v27 = vld [vmem:[%s6620_s1 + $0x5e4] ss:$8 sps:$4 sm:$0xff]   ;;  %v5934_v31 = vld [vmem:[%s6620_s1 + $0x5e0] ss:$8 sps:$4 sm:$0xff]  }
  0xc3   :  { %2995 = vmatmul.mubr.bf16.gmra.mrb[12].mxu0 %v4774_v28  ;;  %2521 = vmatprep.mubr.bf16.mxu1 %v4781_v32  ;;  %v4894_v28 = vld [vmem:[%s6620_s1 + $0x2e4] ss:$8 sps:$4 sm:$0xff]   ;;  %v4892_v32 = vld [vmem:[%s6620_s1 + $0x2e0] ss:$8 sps:$4 sm:$0xff]  }
  0xc4   :  { %3004 = vmatprep.mubr.bf16.mxu0 %v4783_v33  ;;  %3106 = vmatpush1.bf16.msra.mxu0 %v5742_v34  ;;  %v5943_v33 = vld [vmem:[%s6620_s1 + $0x5f4] ss:$8 sps:$4 sm:$0xff]  }
  0xc5   :  { %2623 = vmatpush1.bf16.msra.mxu1 %v4805_v36  ;;  %3107 = vmatprep.subr.bf16.mxu0 %v5752_v37  ;;  %v4901_v36 = vld [vmem:[%s6620_s1 + $0x2f4] ss:$8 sps:$4 sm:$0xff]  }
  0xc6   :  { %2624 = vmatprep.subr.bf16.mxu1 %v4819_v38  ;;  %v5952_v38 = vld [vmem:[%s6620_s1 + $0x5f0] ss:$8 sps:$4 sm:$0xff]  }
  0xc8   :  { %3108 = vmatpush1.bf16.msra.mxu0 %v5760_v39 }
  0xc9   :  { %2625 = vmatpush1.bf16.msra.mxu1 %v4817_v40  ;;  %3109 = vmatprep.subr.bf16.mxu0 %v5772_v42  ;;  %v4839_v40 = vld [vmem:[%s6621_s0 + $0x348] ss:$52 sps:$4 sm:$0xff]  }
  0xca   :  { %2626 = vmatprep.subr.bf16.mxu1 %v4831_v43  ;;  %2522 = vmatmul.mubr.bf16.gmra.mrb[16].mxu1 %v4785_v41  ;;  %v4899_v41 = vld [vmem:[%s6620_s1 + $0x2f0] ss:$8 sps:$4 sm:$0xff]   ;;  %v4840_v43 = vld [vmem:[%s6621_s0 + $0x360] ss:$52 sps:$4 sm:$0xff]  }
  0xcb   :  { %3005 = vmatmul.mubr.bf16.gmra.mrb[16].mxu0 %v4789_v44  ;;  %2531 = vmatprep.mubr.bf16.mxu1 %v4793_v45  ;;  %v4910_v44 = vld [vmem:[%s6620_s1 + $0x604] ss:$8 sps:$4 sm:$0xff]   ;;  %v4847_v45 = vld [vmem:[%s6621_s0 + $0x3b4] ss:$52 sps:$4 sm:$0xff]  }
  0xcc   :  { %3014 = vmatprep.mubr.bf16.mxu0 %v4798_v46  ;;  %3110 = vmatpush1.bf16.msra.mxu0 %v5790_v47  ;;  %v4852_v46 = vld [vmem:[%s6621_s0 + $0x3cc] ss:$52 sps:$4 sm:$0xff]  }
  0xcd   :  { %2627 = vmatpush1.bf16.msra.mxu1 %v4829_v48  ;;  %3111 = vmatprep.subr.bf16.mxu0 %v5800_v49  ;;  %v4854_v48 = vld [vmem:[%s6621_s0 + $0x3b0] ss:$52 sps:$4 sm:$0xff]  }
  0xce   :  { %2628 = vmatprep.subr.bf16.mxu1 %v4843_v50  ;;  %v4855_v50 = vld [vmem:[%s6621_s0 + $0x3c8] ss:$52 sps:$4 sm:$0xff]  }
  0xd0   :  { %3112 = vmatpush1.bf16.msra.mxu0 %v5808_v51 }
  0xd1   :  { %2629 = vmatpush1.bf16.msra.mxu1 %v4841_v54  ;;  %3113 = vmatprep.subr.bf16.mxu0 %v5824_v55  ;;  %v4870_v54 = vld [vmem:[%s6621_s0 + $0x430] ss:$52 sps:$4 sm:$0xff]  }
  0xd2   :  { %2630 = vmatprep.subr.bf16.mxu1 %v4851_v56  ;;  %2532 = vmatmul.mubr.bf16.gmra.mrb[20].mxu1 %v4803_v52  ;;  %v4865_v52 = vld [vmem:[%s6621_s0 + $0x41c] ss:$52 sps:$4 sm:$0xff]   ;;  %v4877_v56 = vld [vmem:[%s6621_s0 + $0x484] ss:$52 sps:$4 sm:$0xff]  }
  0xd3   :  { %3015 = vmatmul.mubr.bf16.gmra.mrb[20].mxu0 %v4804_v53  ;;  %2541 = vmatprep.mubr.bf16.mxu1 %v4811_v57  ;;  %v4869_v53 = vld [vmem:[%s6621_s0 + $0x418] ss:$52 sps:$4 sm:$0xff]   ;;  %v4879_v57 = vld [vmem:[%s6621_s0 + $0x49c] ss:$52 sps:$4 sm:$0xff]  }
  0xd4   :  { %3024 = vmatprep.mubr.bf16.mxu0 %v4813_v58  ;;  %3114 = vmatpush1.bf16.msra.mxu0 %v5838_v59  ;;  %v184_v58 = vld [vmem:[%s6621_s0 + $0x4e8] sm:$0xff] }
  0xd5   :  { %2631 = vmatpush1.bf16.msra.mxu1 %v4849_v61  ;;  %3115 = vmatprep.subr.bf16.mxu0 %v5848_v62  ;;  %v187_v61 = vld [vmem:[%s6621_s0 + $0x500] sm:$0xff] }
  0xd6   :  { %2632 = vmatprep.subr.bf16.mxu1 %v4861_v63  ;;  %v4881_v63 = vld [vmem:[%s6621_s0 + $0x480] ss:$52 sps:$4 sm:$0xff]  }
  0xd8   :  { %3116 = vmatpush1.bf16.msra.mxu0 %v5856_v1 }
  0xd9   :  { %2633 = vmatpush1.bf16.msra.mxu1 %v4859_v5  ;;  %3117 = vmatprep.subr.bf16.mxu0 %v5872_v7  ;;  %v3811_v5 = vcombine.high %v187_v61, %v187_v61 }
  0xda   :  { %2634 = vmatprep.subr.bf16.mxu1 %v4873_v9  ;;  %2542 = vmatmul.mubr.bf16.gmra.mrb[24].mxu1 %v4815_v3  ;;  %v4882_v3 = vld [vmem:[%s6621_s0 + $0x498] ss:$52 sps:$4 sm:$0xff]   ;;  %v3804_v9 = vcombine.low %v184_v58, %v184_v58 }
  0xdb   :  { %3025 = vmatmul.mubr.bf16.gmra.mrb[24].mxu0 %v4816_v4  ;;  %2551 = vmatprep.mubr.bf16.mxu1 %v4823_v10  ;;  %v3805_v4 = vcombine.high %v184_v58, %v184_v58  ;;  %v3810_v10 = vcombine.low %v187_v61, %v187_v61  ;;  %v4984_v58 = vld [vmem:[%s6621_s0 + $0x48c] ss:$52 sps:$4 sm:$0xff]   ;;  %v185_v61 = vld [vmem:[%s6621_s0 + $0x4f0] sm:$0xff] }
  0xdc   :  { %3034 = vmatprep.mubr.bf16.mxu0 %v4825_v11  ;;  %3118 = vmatpush1.bf16.msra.mxu0 %v5886_v13  ;;  %v4904_v11 = vld [vmem:[%s6621_s0 + $0x14] ss:$52 sps:$4 sm:$0xff]  }
  0xdd   :  { %2635 = vmatpush1.bf16.msra.mxu1 %v4871_v15  ;;  %3119 = vmatprep.subr.bf16.mxu0 %v5896_v16  ;;  %v4907_v15 = vld [vmem:[%s6621_s0 + $0x2c] ss:$52 sps:$4 sm:$0xff]  }
  0xde   :  { %2636 = vmatprep.subr.bf16.mxu1 %v4885_v17  ;;  %v4902_v17 = vld [vmem:[%s6621_s0 + $0x10] ss:$52 sps:$4 sm:$0xff]  }
  0xe0   :  { %3120 = vmatpush1.bf16.msra.mxu0 %v5904_v19 }
  0xe1   :  { %2637 = vmatpush1.bf16.msra.mxu1 %v4883_v23  ;;  %3121 = vmatprep.subr.bf16.mxu0 %v5923_v27  ;;  %v4911_v23 = vld [vmem:[%s6621_s0 + $0x7c] ss:$52 sps:$4 sm:$0xff]  }
  0xe2   :  { %2638 = vmatprep.subr.bf16.mxu1 %v4894_v28  ;;  %2552 = vmatmul.mubr.bf16.gmra.mrb[28].mxu1 %v4827_v20  ;;  %v4905_v20 = vld [vmem:[%s6621_s0 + $0x28] ss:$52 sps:$4 sm:$0xff]  }
  0xe3   :  { %3035 = vmatmul.mubr.bf16.gmra.mrb[28].mxu0 %v4828_v21  ;;  %2561 = vmatprep.mubr.bf16.mxu1 %v4835_v25  ;;  %v4908_v21 = vld [vmem:[%s6620_s1 + $0x600] ss:$8 sps:$4 sm:$0xff]   ;;  %v4917_v28 = vld [vmem:[%s6620_s1 + $0x614] ss:$8 sps:$4 sm:$0xff]  }
  0xe4   :  { %3044 = vmatprep.mubr.bf16.mxu0 %v4837_v29  ;;  %3122 = vmatpush1.bf16.msra.mxu0 %v5934_v31  ;;  %v4913_v25 = vld [vmem:[%s6621_s0 + $0x94] ss:$52 sps:$4 sm:$0xff]   ;;  %v4915_v29 = vld [vmem:[%s6620_s1 + $0x610] ss:$8 sps:$4 sm:$0xff]  }
  0xe5   :  { %2639 = vmatpush1.bf16.msra.mxu1 %v4892_v32  ;;  %3123 = vmatprep.subr.bf16.mxu0 %v5943_v33  ;;  %v4922_v32 = vld [vmem:[%s6620_s1 + $0x624] ss:$8 sps:$4 sm:$0xff]  }
  0xe6   :  { %2640 = vmatprep.subr.bf16.mxu1 %v4901_v36  ;;  %v4918_v36 = vld [vmem:[%s6621_s0 + $0x78] ss:$52 sps:$4 sm:$0xff]  }
  0xe8   :  { %3124 = vmatpush1.bf16.msra.mxu0 %v5952_v38 }
  0xe9   :  { %2641 = vmatpush1.bf16.msra.mxu1 %v4899_v41  ;;  %3254 = vmatprep.subr.bf16.mxu0 %v4910_v44  ;;  %v4925_v41 = vld [vmem:[%s6621_s0 + $0xfc] ss:$52 sps:$4 sm:$0xff]   ;;  %v4927_v44 = vld [vmem:[%s6621_s0 + $0xe0] ss:$52 sps:$4 sm:$0xff]  }
  0xea   :  { %4073 = vmatprep.subr.bf16.mxu1 %v5528_v35  ;;  %2562 = vmatmul.mubr.bf16.gmra.mrb[32].mxu1 %v4839_v40  ;;  %v4867_v35 = vld [vmem:[%s6621_s0 + $0x434] ss:$52 sps:$4 sm:$0xff]   ;;  %v4919_v40 = vld [vmem:[%s6621_s0 + $0x90] ss:$52 sps:$4 sm:$0xff]  }
  0xeb   :  { %3045 = vmatmul.mubr.bf16.gmra.mrb[32].mxu0 %v4840_v43  ;;  %2571 = vmatprep.mubr.bf16.mxu1 %v4847_v45  ;;  %v4931_v43 = vld [vmem:[%s6620_s1 + $0x634] ss:$8 sps:$4 sm:$0xff]   ;;  %v4928_v45 = vld [vmem:[%s6621_s0 + $0xf8] ss:$52 sps:$4 sm:$0xff]  }
  0xec   :  { %3054 = vmatprep.mubr.bf16.mxu0 %v4852_v46  ;;  %v4938_v46 = vld [vmem:[%s6620_s1 + $0x640] ss:$8 sps:$4 sm:$0xff]  }
  0xf2   :  { %2572 = vmatmul.mubr.bf16.gmra.mrb[36].mxu1 %v4854_v48  ;;  %v4949_v48 = vld [vmem:[%s6620_s1 + $0x654] ss:$8 sps:$4 sm:$0xff]  }
  0xf3   :  { %3055 = vmatmul.mubr.bf16.gmra.mrb[36].mxu0 %v4855_v50  ;;  %2581 = vmatprep.mubr.bf16.mxu1 %v4865_v52  ;;  %v4936_v50 = vld [vmem:[%s6621_s0 + $0x148] ss:$52 sps:$4 sm:$0xff]   ;;  %v4937_v52 = vld [vmem:[%s6621_s0 + $0x160] ss:$52 sps:$4 sm:$0xff]  }
  0xf4   :  { %3064 = vmatprep.mubr.bf16.mxu0 %v4867_v35  ;;  %v4956_v35 = vld [vmem:[%s6620_s1 + $0x660] ss:$8 sps:$4 sm:$0xff]  }
  0xfa   :  { %2582 = vmatmul.mubr.bf16.gmra.mrb[40].mxu1 %v4869_v53  ;;  %v4967_v53 = vld [vmem:[%s6620_s1 + $0x674] ss:$8 sps:$4 sm:$0xff]  }
  0xfb   :  { %3065 = vmatmul.mubr.bf16.gmra.mrb[40].mxu0 %v4870_v54  ;;  %2591 = vmatprep.mubr.bf16.mxu1 %v4877_v56  ;;  %v4946_v54 = vld [vmem:[%s6621_s0 + $0x1c8] ss:$52 sps:$4 sm:$0xff]  }
  0xfc   :  { %3074 = vmatprep.mubr.bf16.mxu0 %v4879_v57  ;;  %v4950_v56 = vld [vmem:[%s6621_s0 + $0x21c] ss:$52 sps:$4 sm:$0xff]  }
  0xfd   :  { %v4955_v57 = vld [vmem:[%s6621_s0 + $0x230] ss:$52 sps:$4 sm:$0xff]  }
 0x102   :  { %2592 = vmatmul.mubr.bf16.gmra.mrb[44].mxu1 %v4881_v63  ;;  %v4986_v63 = vld [vmem:[%s6621_s0 + $0x488] ss:$52 sps:$4 sm:$0xff]  }
 0x103   :  { %3075 = vmatmul.mubr.bf16.gmra.mrb[44].mxu0 %v4882_v3  ;;  %2601 = vmatprep.mubr.bf16.mxu1 %v3805_v4  ;;  %v4987_v3 = vld [vmem:[%s6621_s0 + $0x1d0] ss:$52 sps:$4 sm:$0xff]   ;;  %v3807_v4 = vcombine.high %v185_v61, %v185_v61 }
 0x104   :  { %3084 = vmatprep.mubr.bf16.mxu0 %v3811_v5  ;;  %v3806_v5 = vcombine.low %v185_v61, %v185_v61 }
 0x10a   :  { %2602 = vmatmul.mubr.bf16.gmra.mrb[48].mxu1 %v3804_v9  ;;  %v4990_v9 = vld [vmem:[%s6621_s0 + $0x238] ss:$52 sps:$4 sm:$0xff]  }
 0x10b   :  { %3085 = vmatmul.mubr.bf16.gmra.mrb[48].mxu0 %v3810_v10  ;;  %2642 = vmatprep.mubr.bf16.mxu1 %v4904_v11  ;;  %v4993_v10 = vld [vmem:[%s6621_s0 + $0x304] ss:$52 sps:$4 sm:$0xff]   ;;  %v4991_v11 = vld [vmem:[%s6621_s0 + $0x300] ss:$52 sps:$4 sm:$0xff]  }
 0x10c   :  { %3125 = vmatprep.mubr.bf16.mxu0 %v4907_v15  ;;  %v4994_v15 = vld [vmem:[%s6621_s0 + $0x2a0] ss:$52 sps:$4 sm:$0xff]  }
 0x112   :  { %2643 = vmatmul.mubr.bf16.vlgmr.msra.gmra.mrb[0].mxu1 %v4902_v17  ;;  %v4995_v17 = vld [vmem:[%s6621_s0 + $0x36c] ss:$52 sps:$4 sm:$0xff]  }
 0x113   :  { %3126 = vmatmul.mubr.bf16.vlgmr.msra.gmra.mrb[0].mxu0 %v4905_v20  ;;  %2652 = vmatprep.mubr.bf16.mxu1 %v4911_v23  ;;  %v4997_v20 = vld [vmem:[%s6621_s0 + $0x368] ss:$52 sps:$4 sm:$0xff]  }
 0x114   :  { %3255 = vmatpush1.bf16.msra.mxu0 %v4908_v21  ;;  %4089 = vmatpush1.bf16.msra.mxu1 %v5594_v60  ;;  %v4923_v60 = vld [vmem:[%s6621_s0 + $0xe4] ss:$52 sps:$4 sm:$0xff]   ;;  %v4998_v21 = vld [vmem:[%s6621_s0 + $0x308] ss:$52 sps:$4 sm:$0xff]  }
 0x115   :  { %3135 = vmatprep.mubr.bf16.mxu0 %v4913_v25  ;;  %3256 = vmatprep.subr.bf16.mxu0 %v4917_v28  ;;  %v4999_v23 = vld [vmem:[%s6621_s0 + $0x3d4] ss:$52 sps:$4 sm:$0xff]   ;;  %v5001_v25 = vld [vmem:[%s6621_s0 + $0x3d0] ss:$52 sps:$4 sm:$0xff]  }
 0x116   :  { %4074 = vmatprep.subr.bf16.mxu1 %v5608_v0  ;;  %v4920_v0 = vld [vmem:[%s6620_s1 + $0x620] ss:$8 sps:$4 sm:$0xff]   ;;  %v5002_v28 = vld [vmem:[%s6621_s0 + $0x370] ss:$52 sps:$4 sm:$0xff]  }
 0x118   :  { %3257 = vmatpush1.bf16.msra.mxu0 %v4915_v29  ;;  %4090 = vmatpush1.bf16.msra.mxu1 %v5617_v2  ;;  %v4929_v2 = vld [vmem:[%s6620_s1 + $0x630] ss:$8 sps:$4 sm:$0xff]  }
 0x119   :  { %3258 = vmatprep.subr.bf16.mxu0 %v4922_v32  ;;  %4075 = vmatprep.subr.bf16.mxu1 %v5631_v6  ;;  %v4940_v6 = vld [vmem:[%s6620_s1 + $0x644] ss:$8 sps:$4 sm:$0xff]   ;;  %v5003_v29 = vld [vmem:[%s6621_s0 + $0x43c] ss:$52 sps:$4 sm:$0xff]  }
 0x11a   :  { %2653 = vmatmul.mubr.bf16.gmra.mrb[4].mxu1 %v4918_v36  ;;  %v5005_v32 = vld [vmem:[%s6621_s0 + $0x438] ss:$52 sps:$4 sm:$0xff]  }
 0x11b   :  { %3136 = vmatmul.mubr.bf16.gmra.mrb[4].mxu0 %v4919_v40  ;;  %2662 = vmatprep.mubr.bf16.mxu1 %v4923_v60  ;;  %v5006_v36 = vld [vmem:[%s6621_s0 + $0x3d8] ss:$52 sps:$4 sm:$0xff]  }
 0x11c   :  { %3145 = vmatprep.mubr.bf16.mxu0 %v4925_v41  ;;  %3259 = vmatpush1.bf16.msra.mxu0 %v4920_v0  ;;  %v5007_v40 = vld [vmem:[%s6621_s0 + $0x4a4] ss:$52 sps:$4 sm:$0xff]   ;;  %v188_v60 = vld [vmem:[%s6621_s0 + $0x508] sm:$0xff]  ;;  %v5009_v41 = vld [vmem:[%s6621_s0 + $0x4a0] ss:$52 sps:$4 sm:$0xff]  }
 0x11d   :  { %4091 = vmatpush1.bf16.msra.mxu1 %v5640_v8  ;;  %3260 = vmatprep.subr.bf16.mxu0 %v4931_v43  ;;  %v4932_v8 = vld [vmem:[%s6621_s0 + $0x14c] ss:$52 sps:$4 sm:$0xff]   ;;  %v3813_v43 = vcombine.high %v188_v60, %v188_v60 }
 0x11e   :  { %4076 = vmatprep.subr.bf16.mxu1 %v5656_v12  ;;  %v4934_v12 = vld [vmem:[%s6621_s0 + $0x164] ss:$52 sps:$4 sm:$0xff]   ;;  %v5010_v0 = vld [vmem:[%s6621_s0 + $0x440] ss:$52 sps:$4 sm:$0xff]  }
 0x120   :  { %3261 = vmatpush1.bf16.msra.mxu0 %v4929_v2  ;;  %v3812_v2 = vcombine.low %v188_v60, %v188_v60 }
 0x121   :  { %4092 = vmatpush1.bf16.msra.mxu1 %v5665_v14  ;;  %3262 = vmatprep.subr.bf16.mxu0 %v4940_v6  ;;  %v4947_v14 = vld [vmem:[%s6620_s1 + $0x650] ss:$8 sps:$4 sm:$0xff]   ;;  %v5013_v6 = vld [vmem:[%s6621_s0 + $0x4a8] ss:$52 sps:$4 sm:$0xff]  }
 0x122   :  { %4077 = vmatprep.subr.bf16.mxu1 %v5679_v18  ;;  %2663 = vmatmul.mubr.bf16.gmra.mrb[8].mxu1 %v4927_v44  ;;  %v4958_v18 = vld [vmem:[%s6620_s1 + $0x664] ss:$8 sps:$4 sm:$0xff]   ;;  %v5014_v44 = vld [vmem:[%s6621_s0 + $0x510] ss:$0 sps:$4 sm:$0xff]  }
 0x123   :  { %3146 = vmatmul.mubr.bf16.gmra.mrb[8].mxu0 %v4928_v45  ;;  %2672 = vmatprep.mubr.bf16.mxu1 %v4932_v8 }
 0x124   :  { %3155 = vmatprep.mubr.bf16.mxu0 %v4934_v12  ;;  %3263 = vmatpush1.bf16.msra.mxu0 %v4938_v46 }
 0x125   :  { %4093 = vmatpush1.bf16.msra.mxu1 %v5695_v22  ;;  %3264 = vmatprep.subr.bf16.mxu0 %v4949_v48  ;;  %v4941_v22 = vld [vmem:[%s6621_s0 + $0x1b4] ss:$52 sps:$4 sm:$0xff]  }
 0x126   :  { %4078 = vmatprep.subr.bf16.mxu1 %v5704_v24  ;;  %v4943_v24 = vld [vmem:[%s6621_s0 + $0x1cc] ss:$52 sps:$4 sm:$0xff]  }
 0x128   :  { %3265 = vmatpush1.bf16.msra.mxu0 %v4947_v14 }
 0x129   :  { %4094 = vmatpush1.bf16.msra.mxu1 %v5712_v26  ;;  %3266 = vmatprep.subr.bf16.mxu0 %v4958_v18  ;;  %v4965_v26 = vld [vmem:[%s6620_s1 + $0x670] ss:$8 sps:$4 sm:$0xff]  }
 0x12a   :  { %4079 = vmatprep.subr.bf16.mxu1 %v5728_v30  ;;  %2673 = vmatmul.mubr.bf16.gmra.mrb[12].mxu1 %v4936_v50  ;;  %v4945_v30 = vld [vmem:[%s6621_s0 + $0x1b0] ss:$52 sps:$4 sm:$0xff]  }
 0x12b   :  { %3156 = vmatmul.mubr.bf16.gmra.mrb[12].mxu0 %v4937_v52  ;;  %2682 = vmatprep.mubr.bf16.mxu1 %v4941_v22 }
 0x12c   :  { %3165 = vmatprep.mubr.bf16.mxu0 %v4943_v24  ;;  %3267 = vmatpush1.bf16.msra.mxu0 %v4956_v35 }
 0x12d   :  { %4095 = vmatpush1.bf16.msra.mxu1 %v5742_v34  ;;  %3268 = vmatprep.subr.bf16.mxu0 %v4967_v53  ;;  %v4952_v34 = vld [vmem:[%s6621_s0 + $0x234] ss:$52 sps:$4 sm:$0xff]  }
 0x12e   :  { %4080 = vmatprep.subr.bf16.mxu1 %v5752_v37  ;;  %v4954_v37 = vld [vmem:[%s6621_s0 + $0x218] ss:$52 sps:$4 sm:$0xff]  }
 0x130   :  { %3269 = vmatpush1.bf16.msra.mxu0 %v4965_v26 }
 0x131   :  { %4096 = vmatpush1.bf16.msra.mxu1 %v5760_v39  ;;  %v4959_v39 = vld [vmem:[%s6621_s0 + $0x284] ss:$52 sps:$4 sm:$0xff]  }
 0x132   :  { %4081 = vmatprep.subr.bf16.mxu1 %v5772_v42  ;;  %2683 = vmatmul.mubr.bf16.gmra.mrb[16].mxu1 %v4945_v30  ;;  %v4961_v42 = vld [vmem:[%s6621_s0 + $0x29c] ss:$52 sps:$4 sm:$0xff]  }
 0x133   :  { %3166 = vmatmul.mubr.bf16.gmra.mrb[16].mxu0 %v4946_v54  ;;  %2692 = vmatprep.mubr.bf16.mxu1 %v4950_v56 }
 0x134   :  { %3175 = vmatprep.mubr.bf16.mxu0 %v4952_v34 }
 0x135   :  { %4097 = vmatpush1.bf16.msra.mxu1 %v5790_v47  ;;  %v4963_v47 = vld [vmem:[%s6621_s0 + $0x280] ss:$52 sps:$4 sm:$0xff]  }
 0x136   :  { %4082 = vmatprep.subr.bf16.mxu1 %v5800_v49  ;;  %v4964_v49 = vld [vmem:[%s6621_s0 + $0x298] ss:$52 sps:$4 sm:$0xff]  }
 0x139   :  { %4098 = vmatpush1.bf16.msra.mxu1 %v5808_v51  ;;  %v4968_v51 = vld [vmem:[%s6621_s0 + $0x2ec] ss:$52 sps:$4 sm:$0xff]  }
 0x13a   :  { %4083 = vmatprep.subr.bf16.mxu1 %v5824_v55  ;;  %2693 = vmatmul.mubr.bf16.gmra.mrb[20].mxu1 %v4954_v37  ;;  %v5015_v55 = vmov 0  }
 0x13b   :  { %3176 = vmatmul.mubr.bf16.gmra.mrb[20].mxu0 %v4955_v57  ;;  %2702 = vmatprep.mubr.bf16.mxu1 %v4959_v39 }
 0x13c   :  { %3185 = vmatprep.mubr.bf16.mxu0 %v4961_v42 }
 0x13d   :  { %4099 = vmatpush1.bf16.msra.mxu1 %v5838_v59  ;;  %v4970_v59 = vld [vmem:[%s6621_s0 + $0x2e8] ss:$52 sps:$4 sm:$0xff]  }
 0x13e   :  { %4084 = vmatprep.subr.bf16.mxu1 %v5848_v62  ;;  %v4971_v62 = vld [vmem:[%s6621_s0 + $0x30] ss:$52 sps:$4 sm:$0xff]  }
 0x141   :  { %4100 = vmatpush1.bf16.msra.mxu1 %v5856_v1  ;;  %v4972_v1 = vld [vmem:[%s6621_s0 + $0x354] ss:$52 sps:$4 sm:$0xff]  }
 0x142   :  { %4085 = vmatprep.subr.bf16.mxu1 %v5872_v7  ;;  %2703 = vmatmul.mubr.bf16.gmra.mrb[24].mxu1 %v4963_v47  ;;  %v4974_v7 = vld [vmem:[%s6621_s0 + $0x350] ss:$52 sps:$4 sm:$0xff]  }
 0x143   :  { %3186 = vmatmul.mubr.bf16.gmra.mrb[24].mxu0 %v4964_v49  ;;  %2712 = vmatprep.mubr.bf16.mxu1 %v4968_v51 }
 0x144   :  { %3286 = vmatprep.mubr.bf16.mxu0 %v5015_v55 }
 0x145   :  { %4101 = vmatpush1.bf16.msra.mxu1 %v5886_v13  ;;  %v4975_v13 = vld [vmem:[%s6621_s0 + $0x98] ss:$52 sps:$4 sm:$0xff]  }
 0x146   :  { %4086 = vmatprep.subr.bf16.mxu1 %v5896_v16  ;;  %v4976_v16 = vld [vmem:[%s6621_s0 + $0x3bc] ss:$52 sps:$4 sm:$0xff]  }
 0x149   :  { %4102 = vmatpush1.bf16.msra.mxu1 %v5904_v19  ;;  %v4978_v19 = vld [vmem:[%s6621_s0 + $0x3b8] ss:$52 sps:$4 sm:$0xff]  }
 0x14a   :  { %4087 = vmatprep.subr.bf16.mxu1 %v5923_v27  ;;  %2713 = vmatmul.mubr.bf16.gmra.mrb[28].mxu1 %v4970_v59  ;;  %v4979_v27 = vld [vmem:[%s6621_s0 + $0x100] ss:$52 sps:$4 sm:$0xff]  }
 0x14b   :  { %3287 = vmatmul.mubr.bf16.vlgmr.msra.gmra.mrb[0].mxu0 %v4971_v62  ;;  %2722 = vmatprep.mubr.bf16.mxu1 %v4972_v1 }
 0x14c   :  { %3296 = vmatprep.mubr.bf16.mxu0 %v5015_v55 }
 0x14d   :  { %4103 = vmatpush1.bf16.msra.mxu1 %v5934_v31  ;;  %v4980_v31 = vld [vmem:[%s6621_s0 + $0x424] ss:$52 sps:$4 sm:$0xff]  }
 0x14e   :  { %4088 = vmatprep.subr.bf16.mxu1 %v5943_v33  ;;  %v4982_v33 = vld [vmem:[%s6621_s0 + $0x420] ss:$52 sps:$4 sm:$0xff]  }
 0x151   :  { %4104 = vmatpush1.bf16.msra.mxu1 %v5952_v38  ;;  %v4983_v38 = vld [vmem:[%s6621_s0 + $0x168] ss:$52 sps:$4 sm:$0xff]  }
 0x152   :  { %2723 = vmatmul.mubr.bf16.gmra.mrb[32].mxu1 %v4974_v7 }
 0x153   :  { %3297 = vmatmul.mubr.bf16.gmra.mrb[4].mxu0 %v4975_v13  ;;  %2732 = vmatprep.mubr.bf16.mxu1 %v4976_v16 }
 0x154   :  { %3306 = vmatprep.mubr.bf16.mxu0 %v5015_v55 }
 0x15a   :  { %2733 = vmatmul.mubr.bf16.gmra.mrb[36].mxu1 %v4978_v19 }
 0x15b   :  { %3307 = vmatmul.mubr.bf16.gmra.mrb[8].mxu0 %v4979_v27  ;;  %2742 = vmatprep.mubr.bf16.mxu1 %v4980_v31 }
 0x15c   :  { %3316 = vmatprep.mubr.bf16.mxu0 %v5015_v55 }
 0x162   :  { %2743 = vmatmul.mubr.bf16.gmra.mrb[40].mxu1 %v4982_v33 }
 0x163   :  { %3317 = vmatmul.mubr.bf16.gmra.mrb[12].mxu0 %v4983_v38  ;;  %2752 = vmatprep.mubr.bf16.mxu1 %v4984_v58 }
 0x164   :  { %3326 = vmatprep.mubr.bf16.mxu0 %v5015_v55 }
 0x16a   :  { %2753 = vmatmul.mubr.bf16.gmra.mrb[44].mxu1 %v4986_v63 }
 0x16b   :  { %3327 = vmatmul.mubr.bf16.gmra.mrb[16].mxu0 %v4987_v3  ;;  %2762 = vmatprep.mubr.bf16.mxu1 %v3807_v4 }
 0x16c   :  { %3336 = vmatprep.mubr.bf16.mxu0 %v5015_v55 }
 0x172   :  { %2763 = vmatmul.mubr.bf16.gmra.mrb[48].mxu1 %v3806_v5 }
 0x173   :  { %3337 = vmatmul.mubr.bf16.gmra.mrb[20].mxu0 %v4990_v9  ;;  %3195 = vmatprep.mubr.bf16.mxu1 %v4993_v10  ;;  %v400_v10 = vlaneseq }
 0x174   :  { %3346 = vmatprep.mubr.bf16.mxu0 %v5015_v55 }
 0x17a   :  { %3196 = vmatmul.mubr.bf16.vlgmr.msra.gmra.mrb[52].mxu1 %v4991_v11 }
 0x17b   :  { %3347 = vmatmul.mubr.bf16.gmra.mrb[24].mxu0 %v4994_v15  ;;  %3205 = vmatprep.mubr.bf16.mxu1 %v4995_v17 }
 0x17c   :  { %3356 = vmatprep.mubr.bf16.mxu0 %v5015_v55 }
 0x182   :  { %3206 = vmatmul.mubr.bf16.gmra.mrb[56].mxu1 %v4997_v20  ;;  %v401_v20 = vshrl.u32 %v400_v10, 7 }
 0x183   :  { %3357 = vmatmul.mubr.bf16.gmra.mrb[52].mxu0 %v4998_v21  ;;  %3215 = vmatprep.mubr.bf16.mxu1 %v4999_v23 }
 0x184   :  { %3366 = vmatprep.mubr.bf16.mxu0 %v5015_v55  ;;  %v402_v23 = vsub.s32 0, %v401_v20 }
 0x18a   :  { %3216 = vmatmul.mubr.bf16.gmra.mrb[60].mxu1 %v5001_v25  ;;  %v398_v25 = vld [vmem:[%s6622_s2] sm:$0x3] }
 0x18b   :  { %3367 = vmatmul.mubr.bf16.gmra.mrb[56].mxu0 %v5002_v28  ;;  %3225 = vmatprep.mubr.bf16.mxu1 %v5003_v29  ;;  %v406_v28 = vsub.s32 1, %v401_v20 }
 0x18c   :  { %3376 = vmatprep.mubr.bf16.mxu0 %v5015_v55 }
 0x192   :  { %3226 = vmatmul.mubr.bf16.gmra.mrb[64].mxu1 %v5005_v32 }
 0x193   :  { %3377 = vmatmul.mubr.bf16.gmra.mrb[60].mxu0 %v5006_v36  ;;  %3235 = vmatprep.mubr.bf16.mxu1 %v5007_v40  ;;  %v6379_v40 = vrot.slane %v398_v25, %v402_v23 }
 0x194   :  { %3386 = vmatprep.mubr.bf16.mxu0 %v5015_v55 }
 0x19a   :  { %3236 = vmatmul.mubr.bf16.gmra.mrb[68].mxu1 %v5009_v41  ;;  %v6383_v41 = vrot.slane %v398_v25, %v406_v28 }
 0x19b   :  { %3387 = vmatmul.mubr.bf16.gmra.mrb[64].mxu0 %v5010_v0  ;;  %3245 = vmatprep.mubr.bf16.mxu1 %v3813_v43 }
 0x19c   :  { %3396 = vmatprep.mubr.bf16.mxu0 %v5015_v55 }
 0x1a2   :  { %3246 = vmatmul.mubr.bf16.gmra.mrb[72].mxu1 %v3812_v2 }
 0x1a3   :  { %3397 = vmatmul.mubr.bf16.gmra.mrb[68].mxu0 %v5013_v6 }
 0x1a4   :  { %3406 = vmatprep.mubr.bf16.mxu0 %v5015_v55 }
 0x1ab   :  { %3407 = vmatmul.mubr.bf16.gmra.mrb[72].mxu0 %v5014_v44 }
 0x1b6   :  { %v6290_v45 = vpop.f32.mrb[28].mxu0 }
 0x1b7   :  { %v6292_v8 = vpop.f32.mrb[29].mxu0 }
 0x1b8   :  { %v6294_v12 = vpop.f32.mrb[30].mxu0 }
 0x1b9   :  { %v6296_v46 = vpop.f32.mrb[31].mxu0 }
 0x1be   :  { %v6298_v48 = vpop.f32.mrb[32].mxu0 }
 0x1bf   :  { %v6300_v14 = vpop.f32.mrb[33].mxu0 }
 0x1c0   :  { %v6302_v18 = vpop.f32.mrb[34].mxu0 }
 0x1c1   :  { %v6304_v50 = vpop.f32.mrb[35].mxu0 }
 0x1c6   :  { %v6306_v52 = vpop.f32.mrb[36].mxu0 }
 0x1c7   :  { %v6308_v22 = vpop.f32.mrb[37].mxu0 }
 0x1c8   :  { %v6310_v24 = vpop.f32.mrb[38].mxu0 }
 0x1c9   :  { %v6312_v35 = vpop.f32.mrb[39].mxu0 }
 0x1ce   :  { %v6314_v53 = vpop.f32.mrb[40].mxu0 }
 0x1cf   :  { %v6316_v26 = vpop.f32.mrb[41].mxu0 }
 0x1d0   :  { %v6318_v30 = vpop.f32.mrb[42].mxu0 }
 0x1d1   :  { %v6320_v54 = vpop.f32.mrb[43].mxu0 }
 0x1d6   :  { %v6322_v56 = vpop.f32.mrb[44].mxu0 }
 0x1d7   :  { %v6324_v34 = vpop.f32.mrb[45].mxu0 }
 0x1d8   :  { %v6326_v37 = vpop.f32.mrb[46].mxu0 }
 0x1d9   :  { %v6328_v57 = vpop.f32.mrb[47].mxu0 }
 0x1de   :  { %v6330_v39 = vpop.f32.mrb[48].mxu0 }
 0x1df   :  { %v6332_v42 = vpop.f32.mrb[49].mxu0 }
 0x1e0   :  { %6624 = vst [vmem:[#allocation2_spill] sm:$0xff] %v6332_v42  ;;  %v3090_v47 = vpop.f32.mrb[50].mxu0 }
 0x1e1   :  { %v3091_v49 = vpop.f32.mrb[51].mxu0 }
 0x1e5   :  { %v2644_v51 = vpop.f32.mrb[0].mxu1 }
 0x1e6   :  { %v2646_v55 = vpop.f32.mrb[1].mxu1  ;;  %v4105_v0 = vadd.f32 %v2644_v51, %v6379_v40 }
 0x1e7   :  { %v2648_v59 = vpop.f32.mrb[2].mxu1  ;;  %v4107_v43 = vadd.f32 %v2646_v55, %v6383_v41 }
 0x1e8   :  { %v2650_v62 = vpop.f32.mrb[3].mxu1  ;;  %v4109_v44 = vadd.f32 %v2648_v59, %v6379_v40 }
 0x1e9   :  { %v4111_v23 = vadd.f32 %v2650_v62, %v6383_v41 }
 0x1ed   :  { %v2654_v1 = vpop.f32.mrb[4].mxu1 }
 0x1ee   :  { %v2656_v7 = vpop.f32.mrb[5].mxu1 }
 0x1ef   :  { %v6334_v13 = vpop.f32.mrb[6].mxu1 }
 0x1f0   :  { %v6336_v16 = vpop.f32.mrb[7].mxu1 }
 0x1f5   :  { %v6338_v19 = vpop.f32.mrb[8].mxu1 }
 0x1f6   :  { %v6340_v27 = vpop.f32.mrb[9].mxu1 }
 0x1f7   :  { %v6342_v31 = vpop.f32.mrb[10].mxu1 }
 0x1f8   :  { %v6344_v33 = vpop.f32.mrb[11].mxu1 }
 0x1fd   :  { %v6346_v38 = vpop.f32.mrb[12].mxu1 }
 0x1fe   :  { %v6348_v58 = vpop.f32.mrb[13].mxu1 }
 0x1ff   :  { %v6350_v61 = vpop.f32.mrb[14].mxu1 }
 0x200   :  { %v6352_v63 = vpop.f32.mrb[15].mxu1 }
 0x205   :  { %v6354_v3 = vpop.f32.mrb[16].mxu1 }
 0x206   :  { %v6356_v4 = vpop.f32.mrb[17].mxu1 }
 0x207   :  { %v6358_v5 = vpop.f32.mrb[18].mxu1 }
 0x208   :  { %v6360_v9 = vpop.f32.mrb[19].mxu1 }
 0x20d   :  { %v6362_v11 = vpop.f32.mrb[20].mxu1 }
 0x20e   :  { %v6364_v15 = vpop.f32.mrb[21].mxu1 }
 0x20f   :  { %v6366_v17 = vpop.f32.mrb[22].mxu1 }
 0x210   :  { %v6368_v21 = vpop.f32.mrb[23].mxu1 }
 0x215   :  { %v6373_v29 = vpop.f32.mrb[24].mxu1 }
 0x216   :  { %6625 = vst [vmem:[#allocation3_spill] sm:$0xff] %v6373_v29  ;;  %v6375_v32 = vpop.f32.mrb[25].mxu1 }
 0x217   :  { %6626 = vst [vmem:[#allocation4_spill] sm:$0xff] %v6375_v32  ;;  %v6377_v36 = vpop.f32.mrb[26].mxu1 }
 0x218   :  { %6627 = vst [vmem:[#allocation5_spill] sm:$0xff] %v6377_v36  ;;  %v6381_v60 = vpop.f32.mrb[27].mxu1 }
 0x219   :  { %6628 = vst [vmem:[#allocation6_spill] sm:$0xff] %v6381_v60 }
 0x21d   :  { %v2714_v2 = vpop.f32.mrb[28].mxu1 }
 0x21e   :  { %v3288_v6 = vpop.f32.mrb[0].mxu0  ;;  %v4161_v47 = vadd.f32 %v2714_v2, %v6379_v40  ;;  %v2716_v10 = vpop.f32.mrb[29].mxu1 }
 0x21f   :  { %v4106_v49 = vadd.f32 %v4105_v0, %v3288_v6  ;;  %v3290_v20 = vpop.f32.mrb[1].mxu0  ;;  %v4165_v36 = vadd.f32 %v2716_v10, %v6383_v41  ;;  %v2718_v25 = vpop.f32.mrb[30].mxu1 }
 0x220   :  { %v4108_v60 = vadd.f32 %v4107_v43, %v3290_v20  ;;  %v3292_v28 = vpop.f32.mrb[2].mxu0  ;;  %v4169_v51 = vadd.f32 %v2718_v25, %v6379_v40  ;;  %v2720_v29 = vpop.f32.mrb[31].mxu1  ;;  %v6393_v59 = vadd.f32 %v4161_v47, %v6290_v45  ;;  %v4113_v25 = vadd.f32 %v2654_v1, %v6379_v40 }
 0x221   :  { %v3415_v32 = vmax.f32 %v4106_v49, 0.0  ;;  %v4110_v55 = vadd.f32 %v4109_v44, %v3292_v28  ;;  %v3294_v42 = vpop.f32.mrb[3].mxu0  ;;  %v4173_v0 = vadd.f32 %v2720_v29, %v6383_v41  ;;  %v6397_v62 = vadd.f32 %v4165_v36, %v6292_v8 }
 0x222   :  { %v3416_v2 = vmax.f32 %v4108_v60, 0.0  ;;  %v4112_v6 = vadd.f32 %v4111_v23, %v3294_v42  ;;  %v6400_v43 = vadd.f32 %v4169_v51, %v6294_v12  ;;  %v4115_v45 = vadd.f32 %v2656_v7, %v6383_v41 }
 0x223   :  { %v3417_v10 = vmax.f32 %v4110_v55, 0.0  ;;  %v6403_v44 = vadd.f32 %v4173_v0, %v6296_v46  ;;  %v4117_v12 = vadd.f32 %v6334_v13, %v6379_v40  ;;  %v4119_v1 = vadd.f32 %v6336_v16, %v6383_v41 }
 0x224   :  { %v4048_v49 = vpack.c.bf16 %v3416_v2, %v3415_v32  ;;  %v3418_v20 = vmax.f32 %v4112_v6, 0.0 }
 0x225   :  { %v2724_v8 = vpop.f32.mrb[32].mxu1 }
 0x226   :  { %3617 = vst [vmem:[%s6623_s3] sm:$0xff] %v4048_v49  ;;  %v4049_v42 = vpack.c.bf16 %v3418_v20, %v3417_v10  ;;  %v3298_v29 = vpop.f32.mrb[4].mxu0  ;;  %v4177_v32 = vadd.f32 %v2724_v8, %v6379_v40  ;;  %v2726_v60 = vpop.f32.mrb[33].mxu1 }
 0x227   :  { %v4114_v36 = vadd.f32 %v4113_v25, %v3298_v29  ;;  %v3300_v46 = vpop.f32.mrb[5].mxu0  ;;  %v4181_v7 = vadd.f32 %v2726_v60, %v6383_v41  ;;  %v2728_v23 = vpop.f32.mrb[34].mxu1 }
 0x228   :  { %3618 = vst [vmem:[%s6623_s3 + $0x8] sm:$0xff] %v4049_v42  ;;  %v4116_v47 = vadd.f32 %v4115_v45, %v3300_v46  ;;  %v3302_v28 = vpop.f32.mrb[6].mxu0  ;;  %v4185_v13 = vadd.f32 %v2728_v23, %v6379_v40  ;;  %v2730_v2 = vpop.f32.mrb[35].mxu1  ;;  %v6421_v6 = vadd.f32 %v4177_v32, %v6298_v48  ;;  %v4121_v48 = vadd.f32 %v6338_v19, %v6379_v40 }
 0x229   :  { %v3419_v51 = vmax.f32 %v4114_v36, 0.0  ;;  %v4118_v55 = vadd.f32 %v4117_v12, %v3302_v28  ;;  %v3304_v0 = vpop.f32.mrb[7].mxu0  ;;  %v4189_v16 = vadd.f32 %v2730_v2, %v6383_v41  ;;  %v6425_v20 = vadd.f32 %v4181_v7, %v6300_v14 }
 0x22a   :  { %v3420_v10 = vmax.f32 %v4116_v47, 0.0  ;;  %v4120_v49 = vadd.f32 %v4119_v1, %v3304_v0  ;;  %v6428_v45 = vadd.f32 %v4185_v13, %v6302_v18  ;;  %v4123_v12 = vadd.f32 %v6340_v27, %v6383_v41 }
 0x22b   :  { %v3421_v25 = vmax.f32 %v4118_v55, 0.0  ;;  %v6431_v29 = vadd.f32 %v4189_v16, %v6304_v50  ;;  %v4125_v18 = vadd.f32 %v6342_v31, %v6379_v40  ;;  %v4127_v19 = vadd.f32 %v6344_v33, %v6383_v41 }
 0x22c   :  { %v4050_v42 = vpack.c.bf16 %v3420_v10, %v3419_v51  ;;  %v3422_v8 = vmax.f32 %v4120_v49, 0.0 }
 0x22d   :  { %v2734_v32 = vpop.f32.mrb[36].mxu1 }
 0x22e   :  { %3619 = vst [vmem:[%s6623_s3 + $0x10] sm:$0xff] %v4050_v42  ;;  %v4051_v14 = vpack.c.bf16 %v3422_v8, %v3421_v25  ;;  %v3308_v36 = vpop.f32.mrb[8].mxu0  ;;  %v4193_v60 = vadd.f32 %v2734_v32, %v6379_v40  ;;  %v2736_v46 = vpop.f32.mrb[37].mxu1 }
 0x22f   :  { %v4122_v50 = vadd.f32 %v4121_v48, %v3308_v36  ;;  %v3310_v1 = vpop.f32.mrb[9].mxu0  ;;  %v4197_v27 = vadd.f32 %v2736_v46, %v6383_v41  ;;  %v2738_v47 = vpop.f32.mrb[38].mxu1 }
 0x230   :  { %3620 = vst [vmem:[%s6623_s3 + $0x18] sm:$0xff] %v4051_v14  ;;  %v4124_v7 = vadd.f32 %v4123_v12, %v3310_v1  ;;  %v3312_v23 = vpop.f32.mrb[10].mxu0  ;;  %v4201_v31 = vadd.f32 %v2738_v47, %v6379_v40  ;;  %v2740_v13 = vpop.f32.mrb[39].mxu1  ;;  %v6451_v2 = vadd.f32 %v4193_v60, %v6306_v52  ;;  %v4129_v52 = vadd.f32 %v6346_v38, %v6379_v40 }
 0x231   :  { %v3423_v28 = vmax.f32 %v4122_v50, 0.0  ;;  %v4126_v51 = vadd.f32 %v4125_v18, %v3312_v23  ;;  %v3314_v55 = vpop.f32.mrb[11].mxu0  ;;  %v4205_v33 = vadd.f32 %v2740_v13, %v6383_v41  ;;  %v6455_v16 = vadd.f32 %v4197_v27, %v6308_v22 }
 0x232   :  { %v3424_v0 = vmax.f32 %v4124_v7, 0.0  ;;  %v4128_v10 = vadd.f32 %v4127_v19, %v3314_v55  ;;  %v6458_v25 = vadd.f32 %v4201_v31, %v6310_v24  ;;  %v4131_v12 = vadd.f32 %v6348_v58, %v6383_v41 }
 0x233   :  { %v3425_v49 = vmax.f32 %v4126_v51, 0.0  ;;  %v6461_v48 = vadd.f32 %v4205_v33, %v6312_v35  ;;  %v4133_v24 = vadd.f32 %v6350_v61, %v6379_v40  ;;  %v4135_v38 = vadd.f32 %v6352_v63, %v6383_v41 }
 0x234   :  { %v4052_v42 = vpack.c.bf16 %v3424_v0, %v3423_v28  ;;  %v3426_v8 = vmax.f32 %v4128_v10, 0.0 }
 0x235   :  { %v2744_v14 = vpop.f32.mrb[40].mxu1 }
 0x236   :  { %3621 = vst [vmem:[%s6623_s3 + $0x20] sm:$0xff] %v4052_v42  ;;  %v4053_v22 = vpack.c.bf16 %v3426_v8, %v3425_v49  ;;  %v3318_v32 = vpop.f32.mrb[12].mxu0  ;;  %v4209_v36 = vadd.f32 %v2744_v14, %v6379_v40  ;;  %v2746_v18 = vpop.f32.mrb[41].mxu1  ;;  %v4139_v49 = vadd.f32 %v6356_v4, %v6383_v41 }
 0x237   :  { %v4130_v35 = vadd.f32 %v4129_v52, %v3318_v32  ;;  %v3320_v60 = vpop.f32.mrb[13].mxu0  ;;  %v4213_v58 = vadd.f32 %v2746_v18, %v6383_v41  ;;  %v2748_v46 = vpop.f32.mrb[42].mxu1 }
 0x238   :  { %3622 = vst [vmem:[%s6623_s3 + $0x28] sm:$0xff] %v4053_v22  ;;  %v4132_v50 = vadd.f32 %v4131_v12, %v3320_v60  ;;  %v3322_v1 = vpop.f32.mrb[14].mxu0  ;;  %v4217_v61 = vadd.f32 %v2748_v46, %v6379_v40  ;;  %v2750_v7 = vpop.f32.mrb[43].mxu1  ;;  %v6481_v23 = vadd.f32 %v4209_v36, %v6314_v53  ;;  %v4137_v53 = vadd.f32 %v6354_v3, %v6379_v40 }
 0x239   :  { %v3427_v19 = vmax.f32 %v4130_v35, 0.0  ;;  %v4134_v27 = vadd.f32 %v4133_v24, %v3322_v1  ;;  %v3324_v47 = vpop.f32.mrb[15].mxu0  ;;  %v4221_v63 = vadd.f32 %v2750_v7, %v6383_v41  ;;  %v6485_v51 = vadd.f32 %v4213_v58, %v6316_v26 }
 0x23a   :  { %v3428_v28 = vmax.f32 %v4132_v50, 0.0  ;;  %v4136_v31 = vadd.f32 %v4135_v38, %v3324_v47  ;;  %v6488_v55 = vadd.f32 %v4217_v61, %v6318_v30  ;;  %v4141_v30 = vadd.f32 %v6358_v5, %v6379_v40 }
 0x23b   :  { %v3429_v13 = vmax.f32 %v4134_v27, 0.0  ;;  %v6491_v10 = vadd.f32 %v4221_v63, %v6320_v54  ;;  %v4143_v3 = vadd.f32 %v6360_v9, %v6383_v41  ;;  %v4147_v47 = vadd.f32 %v6364_v15, %v6383_v41 }
 0x23c   :  { %v4054_v0 = vpack.c.bf16 %v3428_v28, %v3427_v19  ;;  %v3430_v33 = vmax.f32 %v4136_v31, 0.0 }
 0x23d   :  { %v2754_v42 = vpop.f32.mrb[44].mxu1 }
 0x23e   :  { %3623 = vst [vmem:[%s6623_s3 + $0x30] sm:$0xff] %v4054_v0  ;;  %v4055_v26 = vpack.c.bf16 %v3430_v33, %v3429_v13  ;;  %v3328_v8 = vpop.f32.mrb[16].mxu0  ;;  %v4225_v52 = vadd.f32 %v2754_v42, %v6379_v40  ;;  %v2756_v12 = vpop.f32.mrb[45].mxu1 }
 0x23f   :  { %v4138_v54 = vadd.f32 %v4137_v53, %v3328_v8  ;;  %v3330_v22 = vpop.f32.mrb[17].mxu0  ;;  %v4229_v4 = vadd.f32 %v2756_v12, %v6383_v41  ;;  %v2758_v32 = vpop.f32.mrb[46].mxu1  ;;  %v6629_v12 = vld [vmem:[#allocation2_spill] sm:$0xff] }
 0x240   :  { %3624 = vst [vmem:[%s6623_s3 + $0x38] sm:$0xff] %v4055_v26  ;;  %v4140_v14 = vadd.f32 %v4139_v49, %v3330_v22  ;;  %v3332_v24 = vpop.f32.mrb[18].mxu0  ;;  %v4233_v5 = vadd.f32 %v2758_v32, %v6379_v40  ;;  %v2760_v18 = vpop.f32.mrb[47].mxu1  ;;  %v6511_v38 = vadd.f32 %v4225_v52, %v6322_v56  ;;  %v4145_v56 = vadd.f32 %v6362_v11, %v6379_v40 }
 0x241   :  { %v3431_v36 = vmax.f32 %v4138_v54, 0.0  ;;  %v4142_v35 = vadd.f32 %v4141_v30, %v3332_v24  ;;  %v3334_v60 = vpop.f32.mrb[19].mxu0  ;;  %v4237_v9 = vadd.f32 %v2760_v18, %v6383_v41  ;;  %v6515_v46 = vadd.f32 %v4229_v4, %v6324_v34  ;;  %v6631_v24 = vld [vmem:[#allocation4_spill] sm:$0xff]  ;;  %v6632_v18 = vld [vmem:[#allocation5_spill] sm:$0xff] }
 0x242   :  { %v3432_v58 = vmax.f32 %v4140_v14, 0.0  ;;  %v4144_v50 = vadd.f32 %v4143_v3, %v3334_v60  ;;  %v6518_v19 = vadd.f32 %v4233_v5, %v6326_v37  ;;  %v4149_v37 = vadd.f32 %v6366_v17, %v6379_v40  ;;  %v6630_v14 = vld [vmem:[#allocation3_spill] sm:$0xff] }
 0x243   :  { %v3433_v1 = vmax.f32 %v4142_v35, 0.0  ;;  %v6521_v7 = vadd.f32 %v4237_v9, %v6328_v57  ;;  %v4151_v11 = vadd.f32 %v6368_v21, %v6383_v41  ;;  %v4153_v32 = vadd.f32 %v6630_v14, %v6379_v40 }
 0x244   :  { %v4056_v61 = vpack.c.bf16 %v3432_v58, %v3431_v36  ;;  %v3434_v27 = vmax.f32 %v4144_v50, 0.0  ;;  %v4155_v36 = vadd.f32 %v6631_v24, %v6383_v41  ;;  %v4157_v60 = vadd.f32 %v6632_v18, %v6379_v40 }
 0x245   :  { %v2764_v28 = vpop.f32.mrb[48].mxu1 }
 0x246   :  { %3625 = vst [vmem:[%s6623_s3 + $0x40] sm:$0xff] %v4056_v61  ;;  %v4057_v34 = vpack.c.bf16 %v3434_v27, %v3433_v1  ;;  %v3338_v63 = vpop.f32.mrb[20].mxu0  ;;  %v4241_v31 = vadd.f32 %v2764_v28, %v6379_v40  ;;  %v2766_v13 = vpop.f32.mrb[49].mxu1  ;;  %v6633_v61 = vld [vmem:[#allocation6_spill] sm:$0xff] }
 0x247   :  { %v4146_v57 = vadd.f32 %v4145_v56, %v3338_v63  ;;  %v3340_v0 = vpop.f32.mrb[21].mxu0  ;;  %v4245_v15 = vadd.f32 %v2766_v13, %v6383_v41  ;;  %v2768_v53 = vpop.f32.mrb[50].mxu1  ;;  %v4159_v27 = vadd.f32 %v6633_v61, %v6383_v41 }
 0x248   :  { %3626 = vst [vmem:[%s6623_s3 + $0x48] sm:$0xff] %v4057_v34  ;;  %v4148_v33 = vadd.f32 %v4147_v47, %v3340_v0  ;;  %v3342_v49 = vpop.f32.mrb[22].mxu0  ;;  %v2769_v17 = vpop.f32.mrb[51].mxu1  ;;  %v6540_v30 = vadd.f32 %v4241_v31, %v6330_v39 }
 0x249   :  { %v3435_v26 = vmax.f32 %v4146_v57, 0.0  ;;  %v4150_v42 = vadd.f32 %v4149_v37, %v3342_v49  ;;  %v3344_v8 = vpop.f32.mrb[23].mxu0  ;;  %v6543_v21 = vadd.f32 %v4245_v15, %v6629_v12 }
 0x24a   :  { %v3436_v52 = vmax.f32 %v4148_v33, 0.0  ;;  %v4152_v54 = vadd.f32 %v4151_v11, %v3344_v8 }
 0x24b   :  { %v3437_v22 = vmax.f32 %v4150_v42, 0.0 }
 0x24c   :  { %v4058_v3 = vpack.c.bf16 %v3436_v52, %v3435_v26  ;;  %v3438_v4 = vmax.f32 %v4152_v54, 0.0 }
 0x24d   :  { %v3197_v5 = vpop.f32.mrb[52].mxu1 }
 0x24e   :  { %3627 = vst [vmem:[%s6623_s3 + $0x50] sm:$0xff] %v4058_v3  ;;  %v4059_v39 = vpack.c.bf16 %v3438_v4, %v3437_v22  ;;  %v3348_v35 = vpop.f32.mrb[24].mxu0  ;;  %v4163_v58 = vadd.f32 %v6393_v59, %v3197_v5  ;;  %v3199_v50 = vpop.f32.mrb[53].mxu1 }
 0x24f   :  { %v4154_v9 = vadd.f32 %v4153_v32, %v3348_v35  ;;  %v3350_v1 = vpop.f32.mrb[25].mxu0  ;;  %v4167_v56 = vadd.f32 %v6397_v62, %v3199_v50  ;;  %v3201_v34 = vpop.f32.mrb[54].mxu1 }
 0x250   :  { %3628 = vst [vmem:[%s6623_s3 + $0x58] sm:$0xff] %v4059_v39  ;;  %v4156_v47 = vadd.f32 %v4155_v36, %v3350_v1  ;;  %v3352_v28 = vpop.f32.mrb[26].mxu0  ;;  %v4171_v40 = vadd.f32 %v6400_v43, %v3201_v34  ;;  %v3203_v59 = vpop.f32.mrb[55].mxu1 }
 0x251   :  { %v3439_v63 = vmax.f32 %v4154_v9, 0.0  ;;  %v4158_v37 = vadd.f32 %v4157_v60, %v3352_v28  ;;  %v3354_v31 = vpop.f32.mrb[27].mxu0  ;;  %v4175_v13 = vadd.f32 %v6403_v44, %v3203_v59 }
 0x252   :  { %v3440_v57 = vmax.f32 %v4156_v47, 0.0  ;;  %v4160_v0 = vadd.f32 %v4159_v27, %v3354_v31 }
 0x253   :  { %v3441_v41 = vmax.f32 %v4158_v37, 0.0 }
 0x254   :  { %v4060_v11 = vpack.c.bf16 %v3440_v57, %v3439_v63  ;;  %v3442_v15 = vmax.f32 %v4160_v0, 0.0 }
 0x255   :  { %v3207_v33 = vpop.f32.mrb[56].mxu1 }
 0x256   :  { %3629 = vst [vmem:[%s6623_s3 + $0x60] sm:$0xff] %v4060_v11  ;;  %v4061_v62 = vpack.c.bf16 %v3442_v15, %v3441_v41  ;;  %v3358_v53 = vpop.f32.mrb[52].mxu0  ;;  %v4179_v49 = vadd.f32 %v6421_v6, %v3207_v33  ;;  %v3209_v26 = vpop.f32.mrb[57].mxu1 }
 0x257   :  { %v4164_v43 = vadd.f32 %v4163_v58, %v3358_v53  ;;  %v3360_v42 = vpop.f32.mrb[53].mxu0  ;;  %v4183_v44 = vadd.f32 %v6425_v20, %v3209_v26  ;;  %v3211_v8 = vpop.f32.mrb[58].mxu1 }
 0x258   :  { %3630 = vst [vmem:[%s6623_s3 + $0x68] sm:$0xff] %v4061_v62  ;;  %v4168_v17 = vadd.f32 %v4167_v56, %v3360_v42  ;;  %v3362_v52 = vpop.f32.mrb[54].mxu0  ;;  %v4187_v12 = vadd.f32 %v6428_v45, %v3211_v8  ;;  %v3213_v3 = vpop.f32.mrb[59].mxu1 }
 0x259   :  { %v3443_v54 = vmax.f32 %v4164_v43, 0.0  ;;  %v4172_v22 = vadd.f32 %v4171_v40, %v3362_v52  ;;  %v3364_v4 = vpop.f32.mrb[55].mxu0  ;;  %v4191_v6 = vadd.f32 %v6431_v29, %v3213_v3 }
 0x25a   :  { %v3444_v14 = vmax.f32 %v4168_v17, 0.0  ;;  %v4176_v32 = vadd.f32 %v4175_v13, %v3364_v4 }
 0x25b   :  { %v3445_v24 = vmax.f32 %v4172_v22, 0.0 }
 0x25c   :  { %v4062_v36 = vpack.c.bf16 %v3444_v14, %v3443_v54  ;;  %v3446_v39 = vmax.f32 %v4176_v32, 0.0 }
 0x25d   :  { %v3217_v5 = vpop.f32.mrb[60].mxu1 }
 0x25e   :  { %3631 = vst [vmem:[%s6623_s3 + $0x70] sm:$0xff] %v4062_v36  ;;  %v4063_v20 = vpack.c.bf16 %v3446_v39, %v3445_v24  ;;  %v3368_v35 = vpop.f32.mrb[56].mxu0  ;;  %v4195_v18 = vadd.f32 %v6451_v2, %v3217_v5  ;;  %v3219_v60 = vpop.f32.mrb[61].mxu1 }
 0x25f   :  { %v4180_v45 = vadd.f32 %v4179_v49, %v3368_v35  ;;  %v3370_v58 = vpop.f32.mrb[57].mxu0  ;;  %v4199_v29 = vadd.f32 %v6455_v16, %v3219_v60  ;;  %v3221_v50 = vpop.f32.mrb[62].mxu1 }
 0x260   :  { %3632 = vst [vmem:[%s6623_s3 + $0x78] sm:$0xff] %v4063_v20  ;;  %v4184_v9 = vadd.f32 %v4183_v44, %v3370_v58  ;;  %v3372_v1 = vpop.f32.mrb[58].mxu0  ;;  %v4203_v27 = vadd.f32 %v6458_v25, %v3221_v50  ;;  %v3223_v47 = vpop.f32.mrb[63].mxu1 }
 0x261   :  { %v3447_v61 = vmax.f32 %v4180_v45, 0.0  ;;  %v4188_v56 = vadd.f32 %v4187_v12, %v3372_v1  ;;  %v3374_v34 = vpop.f32.mrb[59].mxu0  ;;  %v4207_v2 = vadd.f32 %v6461_v48, %v3223_v47 }
 0x262   :  { %v3448_v28 = vmax.f32 %v4184_v9, 0.0  ;;  %v4192_v63 = vadd.f32 %v4191_v6, %v3374_v34 }
 0x263   :  { %v3449_v40 = vmax.f32 %v4188_v56, 0.0 }
 0x264   :  { %v4064_v37 = vpack.c.bf16 %v3448_v28, %v3447_v61  ;;  %v3450_v59 = vmax.f32 %v4192_v63, 0.0 }
 0x265   :  { %v3227_v31 = vpop.f32.mrb[64].mxu1 }
 0x266   :  { %3633 = vst [vmem:[%s6623_s3 + $0x80] sm:$0xff] %v4064_v37  ;;  %v4065_v16 = vpack.c.bf16 %v3450_v59, %v3449_v40  ;;  %v3378_v57 = vpop.f32.mrb[60].mxu0  ;;  %v4211_v13 = vadd.f32 %v6481_v23, %v3227_v31  ;;  %v3229_v0 = vpop.f32.mrb[65].mxu1 }
 0x267   :  { %v4196_v25 = vadd.f32 %v4195_v18, %v3378_v57  ;;  %v3380_v41 = vpop.f32.mrb[61].mxu0  ;;  %v4215_v48 = vadd.f32 %v6485_v51, %v3229_v0  ;;  %v3231_v15 = vpop.f32.mrb[66].mxu1 }
 0x268   :  { %3634 = vst [vmem:[%s6623_s3 + $0x88] sm:$0xff] %v4065_v16  ;;  %v4200_v11 = vadd.f32 %v4199_v29, %v3380_v41  ;;  %v3382_v62 = vpop.f32.mrb[62].mxu0  ;;  %v4219_v53 = vadd.f32 %v6488_v55, %v3231_v15  ;;  %v3233_v43 = vpop.f32.mrb[67].mxu1 }
 0x269   :  { %v3451_v33 = vmax.f32 %v4196_v25, 0.0  ;;  %v4204_v49 = vadd.f32 %v4203_v27, %v3382_v62  ;;  %v3384_v26 = vpop.f32.mrb[63].mxu0  ;;  %v4223_v23 = vadd.f32 %v6491_v10, %v3233_v43 }
 0x26a   :  { %v3452_v42 = vmax.f32 %v4200_v11, 0.0  ;;  %v4208_v44 = vadd.f32 %v4207_v2, %v3384_v26 }
 0x26b   :  { %v3453_v17 = vmax.f32 %v4204_v49, 0.0 }
 0x26c   :  { %v4066_v8 = vpack.c.bf16 %v3452_v42, %v3451_v33  ;;  %v3454_v52 = vmax.f32 %v4208_v44, 0.0 }
 0x26d   :  { %v3237_v54 = vpop.f32.mrb[68].mxu1 }
 0x26e   :  { %3635 = vst [vmem:[%s6623_s3 + $0x90] sm:$0xff] %v4066_v8  ;;  %v4067_v51 = vpack.c.bf16 %v3454_v52, %v3453_v17  ;;  %v3388_v12 = vpop.f32.mrb[64].mxu0  ;;  %v4227_v22 = vadd.f32 %v6511_v38, %v3237_v54  ;;  %v3239_v3 = vpop.f32.mrb[69].mxu1 }
 0x26f   :  { %v4212_v55 = vadd.f32 %v4211_v13, %v3388_v12  ;;  %v3390_v4 = vpop.f32.mrb[65].mxu0  ;;  %v4231_v10 = vadd.f32 %v6515_v46, %v3239_v3  ;;  %v3241_v6 = vpop.f32.mrb[70].mxu1 }
 0x270   :  { %3636 = vst [vmem:[%s6623_s3 + $0x98] sm:$0xff] %v4067_v51  ;;  %v4216_v14 = vadd.f32 %v4215_v48, %v3390_v4  ;;  %v3392_v32 = vpop.f32.mrb[66].mxu0  ;;  %v4235_v36 = vadd.f32 %v6518_v19, %v3241_v6  ;;  %v3243_v20 = vpop.f32.mrb[71].mxu1 }
 0x271   :  { %v3455_v24 = vmax.f32 %v4212_v55, 0.0  ;;  %v4220_v39 = vadd.f32 %v4219_v53, %v3392_v32  ;;  %v3394_v5 = vpop.f32.mrb[67].mxu0  ;;  %v4239_v38 = vadd.f32 %v6521_v7, %v3243_v20 }
 0x272   :  { %v3456_v35 = vmax.f32 %v4216_v14, 0.0  ;;  %v4224_v18 = vadd.f32 %v4223_v23, %v3394_v5 }
 0x273   :  { %v3457_v45 = vmax.f32 %v4220_v39, 0.0 }
 0x274   :  { %v4068_v60 = vpack.c.bf16 %v3456_v35, %v3455_v24  ;;  %v3458_v58 = vmax.f32 %v4224_v18, 0.0 }
 0x275   :  { %v3247_v29 = vpop.f32.mrb[72].mxu1 }
 0x276   :  { %3637 = vst [vmem:[%s6623_s3 + $0xa0] sm:$0xff] %v4068_v60  ;;  %v4069_v46 = vpack.c.bf16 %v3458_v58, %v3457_v45  ;;  %v3398_v9 = vpop.f32.mrb[68].mxu0  ;;  %v4243_v50 = vadd.f32 %v6540_v30, %v3247_v29  ;;  %v3249_v1 = vpop.f32.mrb[73].mxu1 }
 0x277   :  { %v4228_v19 = vadd.f32 %v4227_v22, %v3398_v9  ;;  %v3400_v61 = vpop.f32.mrb[69].mxu0  ;;  %v4247_v7 = vadd.f32 %v6543_v21, %v3249_v1  ;;  %v3251_v47 = vpop.f32.mrb[74].mxu1 }
 0x278   :  { %3638 = vst [vmem:[%s6623_s3 + $0xa8] sm:$0xff] %v4069_v46  ;;  %v4232_v27 = vadd.f32 %v4231_v10, %v3400_v61  ;;  %v3402_v56 = vpop.f32.mrb[70].mxu0  ;;  %v3252_v63 = vpop.f32.mrb[75].mxu1 }
 0x279   :  { %v3459_v34 = vmax.f32 %v4228_v19, 0.0  ;;  %v4236_v28 = vadd.f32 %v4235_v36, %v3402_v56  ;;  %v3404_v2 = vpop.f32.mrb[71].mxu0 }
 0x27a   :  { %v3460_v40 = vmax.f32 %v4232_v27, 0.0  ;;  %v4240_v37 = vadd.f32 %v4239_v38, %v3404_v2 }
 0x27b   :  { %v3461_v59 = vmax.f32 %v4236_v28, 0.0 }
 0x27c   :  { %v4070_v30 = vpack.c.bf16 %v3460_v40, %v3459_v34  ;;  %v3462_v16 = vmax.f32 %v4240_v37, 0.0 }
 0x27e   :  { %3639 = vst [vmem:[%s6623_s3 + $0xb0] sm:$0xff] %v4070_v30  ;;  %v4071_v31 = vpack.c.bf16 %v3462_v16, %v3461_v59  ;;  %v3408_v57 = vpop.f32.mrb[72].mxu0 }
 0x27f   :  { %v4244_v13 = vadd.f32 %v4243_v50, %v3408_v57  ;;  %v3410_v21 = vpop.f32.mrb[73].mxu0 }
 0x280   :  { %3640 = vst [vmem:[%s6623_s3 + $0xb8] sm:$0xff] %v4071_v31  ;;  %v4248_v25 = vadd.f32 %v4247_v7, %v3410_v21  ;;  %v3412_v0 = vpop.f32.mrb[74].mxu0 }
 0x281   :  { %v3463_v41 = vmax.f32 %v4244_v13, 0.0  ;;  %v3413_v48 = vpop.f32.mrb[75].mxu0 }
 0x282   :  { %v3464_v11 = vmax.f32 %v4248_v25, 0.0 }
 0x284   :  { %v4072_v15 = vpack.c.bf16 %v3464_v11, %v3463_v41 }
 0x286   :  { %3641 = vst [vmem:[%s6623_s3 + $0xc0] sm:$0xff] %v4072_v15 }

// kernel: _lambda_.8
= control target key start
LH: loop header
LB: loop body
LE: loop exit
PB: predicated region body
PF: predicated region fallthrough
CT: control target
= control target key end

     0   :  { %s6011_s1 = inlined_call_operand.vmem [shape: bf16[1792,384], index: 1, kind: input, shape index: {}]   ;;  %s6012_s0 = inlined_call_operand.vmem [shape: bf16[40,1792], index: 0, kind: input, shape index: {}]   ;;  %s6013_s2 = inlined_call_operand.vmem [shape: f32[1,384], index: 2, kind: input, shape index: {}]   ;;  %s6014_s3 = inlined_call_operand.vmem [shape: bf16[40,384], index: 3, kind: output, shape index: {}]  }
   0x1   :  { %v4129_v0 = vld [vmem:[%s6011_s1 + $0x4] ss:$12 sps:$4 sm:$0xff]   ;;  %v4133_v2 = vld [vmem:[%s6011_s1] ss:$12 sps:$4 sm:$0xff]   ;;  %v4135_v4 = vld [vmem:[%s6011_s1 + $0x1c] ss:$12 sps:$4 sm:$0xff]  }
   0x2   :  { %v4131_v1 = vld [vmem:[%s6011_s1 + $0x304] ss:$12 sps:$4 sm:$0xff]   ;;  %2496 = vmatprep.subr.bf16.mxu1 %v4129_v0  ;;  %v4134_v3 = vld [vmem:[%s6011_s1 + $0x300] ss:$12 sps:$4 sm:$0xff]   ;;  %v4137_v5 = vld [vmem:[%s6011_s1 + $0x31c] ss:$12 sps:$4 sm:$0xff]  }
   0x3   :  { %2618 = vmatprep.subr.bf16.mxu0 %v4131_v1  ;;  %2497 = vmatpush1.bf16.msra.mxu1 %v4133_v2  ;;  %v4139_v6 = vld [vmem:[%s6011_s1 + $0x18] ss:$12 sps:$4 sm:$0xff]   ;;  %v4141_v8 = vld [vmem:[%s6011_s1 + $0x34] ss:$12 sps:$4 sm:$0xff]   ;;  %v4145_v10 = vld [vmem:[%s6011_s1 + $0x30] ss:$12 sps:$4 sm:$0xff]  }
   0x4   :  { %2619 = vmatpush1.bf16.msra.mxu0 %v4134_v3  ;;  %2498 = vmatprep.subr.bf16.mxu1 %v4135_v4  ;;  %v4140_v7 = vld [vmem:[%s6011_s1 + $0x318] ss:$12 sps:$4 sm:$0xff]   ;;  %v4143_v9 = vld [vmem:[%s6011_s1 + $0x334] ss:$12 sps:$4 sm:$0xff]   ;;  %v4146_v11 = vld [vmem:[%s6011_s1 + $0x330] ss:$12 sps:$4 sm:$0xff]  }
   0x5   :  { %2620 = vmatprep.subr.bf16.mxu0 %v4137_v5  ;;  %v4147_v12 = vld [vmem:[%s6011_s1 + $0x4c] ss:$12 sps:$4 sm:$0xff]   ;;  %v4151_v14 = vld [vmem:[%s6011_s1 + $0x48] ss:$12 sps:$4 sm:$0xff]   ;;  %v4153_v16 = vld [vmem:[%s6011_s1 + $0x64] ss:$12 sps:$4 sm:$0xff]  }
   0x6   :  { %v4149_v13 = vld [vmem:[%s6011_s1 + $0x34c] ss:$12 sps:$4 sm:$0xff]   ;;  %v4152_v15 = vld [vmem:[%s6011_s1 + $0x348] ss:$12 sps:$4 sm:$0xff]   ;;  %v4155_v17 = vld [vmem:[%s6011_s1 + $0x364] ss:$12 sps:$4 sm:$0xff]  }
   0x7   :  { %2499 = vmatpush1.bf16.msra.mxu1 %v4139_v6  ;;  %v4157_v18 = vld [vmem:[%s6011_s1 + $0x60] ss:$12 sps:$4 sm:$0xff]   ;;  %v4159_v20 = vld [vmem:[%s6011_s1 + $0x7c] ss:$12 sps:$4 sm:$0xff]   ;;  %v4163_v22 = vld [vmem:[%s6011_s1 + $0x78] ss:$12 sps:$4 sm:$0xff]  }
   0x8   :  { %2621 = vmatpush1.bf16.msra.mxu0 %v4140_v7  ;;  %2500 = vmatprep.subr.bf16.mxu1 %v4141_v8  ;;  %v4158_v19 = vld [vmem:[%s6011_s1 + $0x360] ss:$12 sps:$4 sm:$0xff]   ;;  %v4161_v21 = vld [vmem:[%s6011_s1 + $0x37c] ss:$12 sps:$4 sm:$0xff]   ;;  %v4164_v23 = vld [vmem:[%s6011_s1 + $0x378] ss:$12 sps:$4 sm:$0xff]  }
   0x9   :  { %2622 = vmatprep.subr.bf16.mxu0 %v4143_v9  ;;  %v4165_v24 = vld [vmem:[%s6011_s1 + $0x94] ss:$12 sps:$4 sm:$0xff]   ;;  %v4169_v26 = vld [vmem:[%s6011_s1 + $0x90] ss:$12 sps:$4 sm:$0xff]   ;;  %v4171_v28 = vld [vmem:[%s6011_s1 + $0xac] ss:$12 sps:$4 sm:$0xff]  }
   0xa   :  { %v4167_v25 = vld [vmem:[%s6011_s1 + $0x394] ss:$12 sps:$4 sm:$0xff]   ;;  %v4170_v27 = vld [vmem:[%s6011_s1 + $0x390] ss:$12 sps:$4 sm:$0xff]   ;;  %v4173_v29 = vld [vmem:[%s6011_s1 + $0x3ac] ss:$12 sps:$4 sm:$0xff]  }
   0xb   :  { %2501 = vmatpush1.bf16.msra.mxu1 %v4145_v10  ;;  %v4175_v30 = vld [vmem:[%s6011_s1 + $0xa8] ss:$12 sps:$4 sm:$0xff]   ;;  %v4177_v32 = vld [vmem:[%s6011_s1 + $0xc4] ss:$12 sps:$4 sm:$0xff]   ;;  %v4181_v34 = vld [vmem:[%s6011_s1 + $0xc0] ss:$12 sps:$4 sm:$0xff]  }
   0xc   :  { %2623 = vmatpush1.bf16.msra.mxu0 %v4146_v11  ;;  %2502 = vmatprep.subr.bf16.mxu1 %v4147_v12  ;;  %v4176_v31 = vld [vmem:[%s6011_s1 + $0x3a8] ss:$12 sps:$4 sm:$0xff]   ;;  %v4179_v33 = vld [vmem:[%s6011_s1 + $0x3c4] ss:$12 sps:$4 sm:$0xff]   ;;  %v4182_v35 = vld [vmem:[%s6011_s1 + $0x3c0] ss:$12 sps:$4 sm:$0xff]  }
   0xd   :  { %2624 = vmatprep.subr.bf16.mxu0 %v4149_v13  ;;  %v4183_v36 = vld [vmem:[%s6011_s1 + $0xdc] ss:$12 sps:$4 sm:$0xff]   ;;  %v4187_v38 = vld [vmem:[%s6011_s1 + $0xd8] ss:$12 sps:$4 sm:$0xff]   ;;  %v4189_v40 = vld [vmem:[%s6011_s1 + $0xf4] ss:$12 sps:$4 sm:$0xff]  }
   0xe   :  { %v4185_v37 = vld [vmem:[%s6011_s1 + $0x3dc] ss:$12 sps:$4 sm:$0xff]   ;;  %v4188_v39 = vld [vmem:[%s6011_s1 + $0x3d8] ss:$12 sps:$4 sm:$0xff]   ;;  %v4191_v41 = vld [vmem:[%s6011_s1 + $0x3f4] ss:$12 sps:$4 sm:$0xff]  }
   0xf   :  { %2503 = vmatpush1.bf16.msra.mxu1 %v4151_v14  ;;  %v4193_v42 = vld [vmem:[%s6011_s1 + $0xf0] ss:$12 sps:$4 sm:$0xff]   ;;  %v4195_v44 = vld [vmem:[%s6011_s1 + $0x10c] ss:$12 sps:$4 sm:$0xff]   ;;  %v4199_v46 = vld [vmem:[%s6011_s1 + $0x108] ss:$12 sps:$4 sm:$0xff]  }
  0x10   :  { %2625 = vmatpush1.bf16.msra.mxu0 %v4152_v15  ;;  %2504 = vmatprep.subr.bf16.mxu1 %v4153_v16  ;;  %v4194_v43 = vld [vmem:[%s6011_s1 + $0x3f0] ss:$12 sps:$4 sm:$0xff]   ;;  %v4197_v45 = vld [vmem:[%s6011_s1 + $0x40c] ss:$12 sps:$4 sm:$0xff]   ;;  %v4200_v47 = vld [vmem:[%s6011_s1 + $0x408] ss:$12 sps:$4 sm:$0xff]  }
  0x11   :  { %2626 = vmatprep.subr.bf16.mxu0 %v4155_v17  ;;  %v4809_v48 = vld [vmem:[%s6012_s0 + $0x4] ss:$56 sps:$4 sm:$0xff]   ;;  %v4233_v51 = vld [vmem:[%s6012_s0 + $0x14] ss:$56 sps:$4 sm:$0xff]   ;;  %v4872_v4 = vld [vmem:[%s6012_s0] ss:$56 sps:$4 sm:$0xff]  }
  0x12   :  { %v4201_v49 = vld [vmem:[%s6011_s1 + $0x124] ss:$12 sps:$4 sm:$0xff]   ;;  %2528 = vmatprep.mubr.bf16.mxu1 %v4809_v48  ;;  %v4205_v52 = vld [vmem:[%s6011_s1 + $0x120] ss:$12 sps:$4 sm:$0xff]   ;;  %v4207_v54 = vld [vmem:[%s6011_s1 + $0x13c] ss:$12 sps:$4 sm:$0xff]   ;;  %2650 = vmatprep.mubr.bf16.mxu0 %v4233_v51 }
  0x13   :  { %2505 = vmatpush1.bf16.msra.mxu1 %v4157_v18  ;;  %v4203_v50 = vld [vmem:[%s6011_s1 + $0x424] ss:$12 sps:$4 sm:$0xff]   ;;  %v4206_v53 = vld [vmem:[%s6011_s1 + $0x420] ss:$12 sps:$4 sm:$0xff]   ;;  %v4209_v55 = vld [vmem:[%s6011_s1 + $0x43c] ss:$12 sps:$4 sm:$0xff]  }
  0x14   :  { %2627 = vmatpush1.bf16.msra.mxu0 %v4158_v19  ;;  %2506 = vmatprep.subr.bf16.mxu1 %v4159_v20  ;;  %v4211_v56 = vld [vmem:[%s6011_s1 + $0x138] ss:$12 sps:$4 sm:$0xff]   ;;  %v4213_v58 = vld [vmem:[%s6011_s1 + $0x154] ss:$12 sps:$4 sm:$0xff]   ;;  %v4217_v60 = vld [vmem:[%s6011_s1 + $0x150] ss:$12 sps:$4 sm:$0xff]  }
  0x15   :  { %2628 = vmatprep.subr.bf16.mxu0 %v4161_v21  ;;  %v4212_v57 = vld [vmem:[%s6011_s1 + $0x438] ss:$12 sps:$4 sm:$0xff]   ;;  %v4215_v59 = vld [vmem:[%s6011_s1 + $0x454] ss:$12 sps:$4 sm:$0xff]   ;;  %v4218_v61 = vld [vmem:[%s6011_s1 + $0x450] ss:$12 sps:$4 sm:$0xff]  }
  0x16   :  { %v4219_v62 = vld [vmem:[%s6011_s1 + $0x16c] ss:$12 sps:$4 sm:$0xff]   ;;  %v4223_v0 = vld [vmem:[%s6011_s1 + $0x168] ss:$12 sps:$4 sm:$0xff]   ;;  %v4230_v2 = vld [vmem:[%s6011_s1 + $0x184] ss:$12 sps:$4 sm:$0xff]  }
  0x17   :  { %2507 = vmatpush1.bf16.msra.mxu1 %v4163_v22  ;;  %v4221_v63 = vld [vmem:[%s6011_s1 + $0x46c] ss:$12 sps:$4 sm:$0xff]   ;;  %v4224_v1 = vld [vmem:[%s6011_s1 + $0x468] ss:$12 sps:$4 sm:$0xff]   ;;  %v4236_v3 = vld [vmem:[%s6011_s1 + $0x484] ss:$12 sps:$4 sm:$0xff]  }
  0x18   :  { %2629 = vmatpush1.bf16.msra.mxu0 %v4164_v23  ;;  %2508 = vmatprep.subr.bf16.mxu1 %v4165_v24  ;;  %v4228_v5 = vld [vmem:[%s6011_s1 + $0x180] ss:$12 sps:$4 sm:$0xff]   ;;  %v4231_v6 = vld [vmem:[%s6012_s0 + $0x10] ss:$56 sps:$4 sm:$0xff]   ;;  %v4237_v10 = vld [vmem:[%s6011_s1 + $0x198] ss:$12 sps:$4 sm:$0xff]  }
  0x19   :  { %2630 = vmatprep.subr.bf16.mxu0 %v4167_v25  ;;  %v4234_v7 = vld [vmem:[%s6011_s1 + $0x480] ss:$12 sps:$4 sm:$0xff]   ;;  %v4239_v8 = vld [vmem:[%s6011_s1 + $0x19c] ss:$12 sps:$4 sm:$0xff]   ;;  %v4240_v11 = vld [vmem:[%s6011_s1 + $0x498] ss:$12 sps:$4 sm:$0xff]  }
  0x1a   :  { %v4242_v9 = vld [vmem:[%s6011_s1 + $0x49c] ss:$12 sps:$4 sm:$0xff]   ;;  %v4245_v12 = vld [vmem:[%s6011_s1 + $0x1b4] ss:$12 sps:$4 sm:$0xff]   ;;  %v4251_v16 = vld [vmem:[%s6011_s1 + $0x1cc] ss:$12 sps:$4 sm:$0xff]  }
  0x1b   :  { %2509 = vmatpush1.bf16.msra.mxu1 %v4169_v26  ;;  %v4248_v13 = vld [vmem:[%s6011_s1 + $0x4b4] ss:$12 sps:$4 sm:$0xff]   ;;  %v4243_v14 = vld [vmem:[%s6011_s1 + $0x1b0] ss:$12 sps:$4 sm:$0xff]   ;;  %v4254_v17 = vld [vmem:[%s6011_s1 + $0x4cc] ss:$12 sps:$4 sm:$0xff]  }
  0x1c   :  { %2631 = vmatpush1.bf16.msra.mxu0 %v4170_v27  ;;  %2510 = vmatprep.subr.bf16.mxu1 %v4171_v28  ;;  %v4246_v15 = vld [vmem:[%s6011_s1 + $0x4b0] ss:$12 sps:$4 sm:$0xff]   ;;  %v4249_v18 = vld [vmem:[%s6011_s1 + $0x1c8] ss:$12 sps:$4 sm:$0xff]   ;;  %v4255_v22 = vld [vmem:[%s6011_s1 + $0x1e0] ss:$12 sps:$4 sm:$0xff]  }
  0x1d   :  { %2632 = vmatprep.subr.bf16.mxu0 %v4173_v29  ;;  %v4252_v19 = vld [vmem:[%s6011_s1 + $0x4c8] ss:$12 sps:$4 sm:$0xff]   ;;  %v4257_v20 = vld [vmem:[%s6011_s1 + $0x1e4] ss:$12 sps:$4 sm:$0xff]   ;;  %v4258_v23 = vld [vmem:[%s6011_s1 + $0x4e0] ss:$12 sps:$4 sm:$0xff]  }
  0x1e   :  { %v4260_v21 = vld [vmem:[%s6011_s1 + $0x4e4] ss:$12 sps:$4 sm:$0xff]   ;;  %v4935_v24 = vld [vmem:[%s6012_s0 + $0x74] ss:$56 sps:$4 sm:$0xff]   ;;  %v4263_v25 = vld [vmem:[%s6011_s1 + $0x1fc] ss:$12 sps:$4 sm:$0xff]  }
  0x1f   :  { %2511 = vmatpush1.bf16.msra.mxu1 %v4175_v30  ;;  %v4943_v26 = vld [vmem:[%s6012_s0 + $0x70] ss:$56 sps:$4 sm:$0xff]   ;;  %v4309_v27 = vld [vmem:[%s6012_s0 + $0x84] ss:$56 sps:$4 sm:$0xff]   ;;  %v4314_v29 = vld [vmem:[%s6012_s0 + $0x80] ss:$56 sps:$4 sm:$0xff]  }
  0x20   :  { %2633 = vmatpush1.bf16.msra.mxu0 %v4176_v31  ;;  %2512 = vmatprep.subr.bf16.mxu1 %v4177_v32  ;;  %v4266_v28 = vld [vmem:[%s6011_s1 + $0x4fc] ss:$12 sps:$4 sm:$0xff]   ;;  %v4261_v30 = vld [vmem:[%s6011_s1 + $0x1f8] ss:$12 sps:$4 sm:$0xff]   ;;  %v4269_v32 = vld [vmem:[%s6011_s1 + $0x214] ss:$12 sps:$4 sm:$0xff]  }
  0x21   :  { %2634 = vmatprep.subr.bf16.mxu0 %v4179_v33  ;;  %v4264_v31 = vld [vmem:[%s6011_s1 + $0x4f8] ss:$12 sps:$4 sm:$0xff]   ;;  %v4272_v33 = vld [vmem:[%s6011_s1 + $0x514] ss:$12 sps:$4 sm:$0xff]  }
  0x22   :  { %v4279_v51 = vld [vmem:[%s6011_s1 + $0x240] ss:$12 sps:$4 sm:$0xff]  }
  0x23   :  { %2513 = vmatpush1.bf16.msra.mxu1 %v4181_v34  ;;  %v43_v34 = vld [vmem:[%s6012_s0 + $0xe0] sm:$0xff] }
  0x24   :  { %2635 = vmatpush1.bf16.msra.mxu0 %v4182_v35  ;;  %2514 = vmatprep.subr.bf16.mxu1 %v4183_v36  ;;  %v4971_v35 = vcombine.high %v43_v34, %v43_v34  ;;  %v4973_v36 = vcombine.low %v43_v34, %v43_v34  ;;  %v4356_v34 = vld [vmem:[%s6011_s1 + $0x630] ss:$12 sps:$4 sm:$0xff]  }
  0x25   :  { %2636 = vmatprep.subr.bf16.mxu0 %v4185_v37  ;;  %v45_v37 = vld [vmem:[%s6012_s0 + $0xf0] sm:$0xff] }
  0x27   :  { %2515 = vmatpush1.bf16.msra.mxu1 %v4187_v38  ;;  %v4267_v38 = vld [vmem:[%s6011_s1 + $0x210] ss:$12 sps:$4 sm:$0xff]  }
  0x28   :  { %2637 = vmatpush1.bf16.msra.mxu0 %v4188_v39  ;;  %2516 = vmatprep.subr.bf16.mxu1 %v4189_v40  ;;  %v4270_v39 = vld [vmem:[%s6011_s1 + $0x510] ss:$12 sps:$4 sm:$0xff]   ;;  %v4984_v40 = vcombine.high %v45_v37, %v45_v37 }
  0x29   :  { %2638 = vmatprep.subr.bf16.mxu0 %v4191_v41  ;;  %v4275_v41 = vld [vmem:[%s6011_s1 + $0x22c] ss:$12 sps:$4 sm:$0xff]  }
  0x2b   :  { %2517 = vmatpush1.bf16.msra.mxu1 %v4193_v42  ;;  %v4278_v42 = vld [vmem:[%s6011_s1 + $0x52c] ss:$12 sps:$4 sm:$0xff]  }
  0x2c   :  { %2639 = vmatpush1.bf16.msra.mxu0 %v4194_v43  ;;  %2518 = vmatprep.subr.bf16.mxu1 %v4195_v44  ;;  %v4273_v43 = vld [vmem:[%s6011_s1 + $0x228] ss:$12 sps:$4 sm:$0xff]   ;;  %v4997_v44 = vcombine.low %v45_v37, %v45_v37  ;;  %v4360_v37 = vld [vmem:[%s6011_s1 + $0x38] ss:$12 sps:$4 sm:$0xff]  }
  0x2d   :  { %2640 = vmatprep.subr.bf16.mxu0 %v4197_v45  ;;  %v4276_v45 = vld [vmem:[%s6011_s1 + $0x528] ss:$12 sps:$4 sm:$0xff]  }
  0x2f   :  { %2519 = vmatpush1.bf16.msra.mxu1 %v4199_v46  ;;  %v4281_v46 = vld [vmem:[%s6011_s1 + $0x244] ss:$12 sps:$4 sm:$0xff]  }
  0x30   :  { %2641 = vmatpush1.bf16.msra.mxu0 %v4200_v47  ;;  %2520 = vmatprep.subr.bf16.mxu1 %v4201_v49  ;;  %v5009_v47 = vld [vmem:[%s6012_s0 + $0xc] ss:$56 sps:$4 sm:$0xff]  }
  0x31   :  { %2642 = vmatprep.subr.bf16.mxu0 %v4203_v50  ;;  %v4284_v49 = vld [vmem:[%s6011_s1 + $0x544] ss:$12 sps:$4 sm:$0xff]   ;;  %v4342_v50 = vld [vmem:[%s6012_s0 + $0x1c] ss:$56 sps:$4 sm:$0xff]  }
  0x33   :  { %2521 = vmatpush1.bf16.msra.mxu1 %v4205_v52  ;;  %v4282_v52 = vld [vmem:[%s6011_s1 + $0x540] ss:$12 sps:$4 sm:$0xff]  }
  0x34   :  { %2643 = vmatpush1.bf16.msra.mxu0 %v4206_v53  ;;  %2522 = vmatprep.subr.bf16.mxu1 %v4207_v54  ;;  %v4287_v53 = vld [vmem:[%s6011_s1 + $0x25c] ss:$12 sps:$4 sm:$0xff]  }
  0x35   :  { %2644 = vmatprep.subr.bf16.mxu0 %v4209_v55  ;;  %v4290_v54 = vld [vmem:[%s6011_s1 + $0x55c] ss:$12 sps:$4 sm:$0xff]   ;;  %v4285_v55 = vld [vmem:[%s6011_s1 + $0x258] ss:$12 sps:$4 sm:$0xff]  }
  0x37   :  { %2523 = vmatpush1.bf16.msra.mxu1 %v4211_v56  ;;  %v4288_v56 = vld [vmem:[%s6011_s1 + $0x558] ss:$12 sps:$4 sm:$0xff]  }
  0x38   :  { %2645 = vmatpush1.bf16.msra.mxu0 %v4212_v57  ;;  %2524 = vmatprep.subr.bf16.mxu1 %v4213_v58  ;;  %v4293_v57 = vld [vmem:[%s6011_s1 + $0x274] ss:$12 sps:$4 sm:$0xff]  }
  0x39   :  { %2646 = vmatprep.subr.bf16.mxu0 %v4215_v59  ;;  %v4296_v58 = vld [vmem:[%s6011_s1 + $0x574] ss:$12 sps:$4 sm:$0xff]   ;;  %v4291_v59 = vld [vmem:[%s6011_s1 + $0x270] ss:$12 sps:$4 sm:$0xff]  }
  0x3b   :  { %2525 = vmatpush1.bf16.msra.mxu1 %v4217_v60  ;;  %v4294_v60 = vld [vmem:[%s6011_s1 + $0x570] ss:$12 sps:$4 sm:$0xff]  }
  0x3c   :  { %2647 = vmatpush1.bf16.msra.mxu0 %v4218_v61  ;;  %2526 = vmatprep.subr.bf16.mxu1 %v4219_v62  ;;  %v4299_v61 = vld [vmem:[%s6011_s1 + $0x28c] ss:$12 sps:$4 sm:$0xff]  }
  0x3d   :  { %2648 = vmatprep.subr.bf16.mxu0 %v4221_v63  ;;  %v4302_v62 = vld [vmem:[%s6011_s1 + $0x58c] ss:$12 sps:$4 sm:$0xff]   ;;  %v4297_v63 = vld [vmem:[%s6011_s1 + $0x288] ss:$12 sps:$4 sm:$0xff]  }
  0x3f   :  { %2527 = vmatpush1.bf16.msra.mxu1 %v4223_v0  ;;  %v4300_v0 = vld [vmem:[%s6011_s1 + $0x588] ss:$12 sps:$4 sm:$0xff]  }
  0x40   :  { %2649 = vmatpush1.bf16.msra.mxu0 %v4224_v1  ;;  %2557 = vmatprep.subr.bf16.mxu1 %v4230_v2  ;;  %v4308_v1 = vld [vmem:[%s6011_s1 + $0x2a4] ss:$12 sps:$4 sm:$0xff]  }
  0x41   :  { %2679 = vmatprep.subr.bf16.mxu0 %v4236_v3  ;;  %v4313_v2 = vld [vmem:[%s6011_s1 + $0x5a4] ss:$12 sps:$4 sm:$0xff]   ;;  %v4306_v3 = vld [vmem:[%s6011_s1 + $0x2a0] ss:$12 sps:$4 sm:$0xff]  }
  0x42   :  { %2529 = vmatmul.mubr.bf16.vlgmr.msra.gmra.mrb[0].mxu1 %v4872_v4 }
  0x43   :  { %2651 = vmatmul.mubr.bf16.vlgmr.msra.gmra.mrb[0].mxu0 %v4231_v6  ;;  %2558 = vmatpush1.bf16.msra.mxu1 %v4228_v5  ;;  %v4311_v5 = vld [vmem:[%s6011_s1 + $0x5a0] ss:$12 sps:$4 sm:$0xff]   ;;  %v4317_v6 = vld [vmem:[%s6011_s1 + $0x2bc] ss:$12 sps:$4 sm:$0xff]  }
  0x44   :  { %2680 = vmatpush1.bf16.msra.mxu0 %v4234_v7  ;;  %2559 = vmatprep.subr.bf16.mxu1 %v4239_v8  ;;  %v4320_v7 = vld [vmem:[%s6011_s1 + $0x5bc] ss:$12 sps:$4 sm:$0xff]   ;;  %v4315_v8 = vld [vmem:[%s6011_s1 + $0x2b8] ss:$12 sps:$4 sm:$0xff]  }
  0x45   :  { %2681 = vmatprep.subr.bf16.mxu0 %v4242_v9  ;;  %2538 = vmatprep.mubr.bf16.mxu1 %v4935_v24  ;;  %v4318_v9 = vld [vmem:[%s6011_s1 + $0x5b8] ss:$12 sps:$4 sm:$0xff]  }
  0x46   :  { %2660 = vmatprep.mubr.bf16.mxu0 %v4309_v27  ;;  %v4351_v27 = vld [vmem:[%s6011_s1 + $0xe0] ss:$12 sps:$4 sm:$0xff]  }
  0x47   :  { %2560 = vmatpush1.bf16.msra.mxu1 %v4237_v10  ;;  %v4325_v10 = vld [vmem:[%s6011_s1 + $0x2d4] ss:$12 sps:$4 sm:$0xff]  }
  0x48   :  { %2682 = vmatpush1.bf16.msra.mxu0 %v4240_v11  ;;  %2561 = vmatprep.subr.bf16.mxu1 %v4245_v12  ;;  %v4329_v11 = vld [vmem:[%s6011_s1 + $0x5d4] ss:$12 sps:$4 sm:$0xff]   ;;  %v4323_v12 = vld [vmem:[%s6011_s1 + $0x2d0] ss:$12 sps:$4 sm:$0xff]  }
  0x49   :  { %2683 = vmatprep.subr.bf16.mxu0 %v4248_v13  ;;  %v4327_v13 = vld [vmem:[%s6011_s1 + $0x5d0] ss:$12 sps:$4 sm:$0xff]  }
  0x4a   :  { %2539 = vmatmul.mubr.bf16.gmra.mrb[4].mxu1 %v4943_v26 }
  0x4b   :  { %2562 = vmatpush1.bf16.msra.mxu1 %v4243_v14  ;;  %2661 = vmatmul.mubr.bf16.gmra.mrb[4].mxu0 %v4314_v29  ;;  %v4333_v14 = vld [vmem:[%s6011_s1 + $0x2ec] ss:$12 sps:$4 sm:$0xff]  }
  0x4c   :  { %2684 = vmatpush1.bf16.msra.mxu0 %v4246_v15  ;;  %2563 = vmatprep.subr.bf16.mxu1 %v4251_v16  ;;  %v4336_v15 = vld [vmem:[%s6011_s1 + $0x5ec] ss:$12 sps:$4 sm:$0xff]   ;;  %v4331_v16 = vld [vmem:[%s6011_s1 + $0x2e8] ss:$12 sps:$4 sm:$0xff]  }
  0x4d   :  { %2685 = vmatprep.subr.bf16.mxu0 %v4254_v17  ;;  %2548 = vmatprep.mubr.bf16.mxu1 %v4971_v35  ;;  %v4334_v17 = vld [vmem:[%s6011_s1 + $0x5e8] ss:$12 sps:$4 sm:$0xff]   ;;  %v4348_v29 = vld [vmem:[%s6011_s1 + $0x618] ss:$12 sps:$4 sm:$0xff]  }
  0x4e   :  { %2670 = vmatprep.mubr.bf16.mxu0 %v4984_v40 }
  0x4f   :  { %2564 = vmatpush1.bf16.msra.mxu1 %v4249_v18  ;;  %v4345_v18 = vld [vmem:[%s6011_s1 + $0x604] ss:$12 sps:$4 sm:$0xff]  }
  0x50   :  { %2686 = vmatpush1.bf16.msra.mxu0 %v4252_v19  ;;  %2565 = vmatprep.subr.bf16.mxu1 %v4257_v20  ;;  %v5115_v19 = vld [vmem:[%s6012_s0 + $0x8] ss:$56 sps:$4 sm:$0xff]  }
  0x51   :  { %2687 = vmatprep.subr.bf16.mxu0 %v4260_v21  ;;  %v4346_v20 = vld [vmem:[%s6011_s1 + $0xc8] ss:$12 sps:$4 sm:$0xff]   ;;  %v4340_v21 = vld [vmem:[%s6012_s0 + $0x18] ss:$56 sps:$4 sm:$0xff]  }
  0x52   :  { %2549 = vmatmul.mubr.bf16.gmra.mrb[8].mxu1 %v4973_v36 }
  0x53   :  { %2566 = vmatpush1.bf16.msra.mxu1 %v4255_v22  ;;  %2671 = vmatmul.mubr.bf16.gmra.mrb[8].mxu0 %v4997_v44  ;;  %v4343_v22 = vld [vmem:[%s6011_s1 + $0x600] ss:$12 sps:$4 sm:$0xff]  }
  0x54   :  { %2688 = vmatpush1.bf16.msra.mxu0 %v4258_v23  ;;  %2567 = vmatprep.subr.bf16.mxu1 %v4263_v25  ;;  %v4347_v23 = vld [vmem:[%s6011_s1 + $0x8] ss:$12 sps:$4 sm:$0xff]  }
  0x55   :  { %2689 = vmatprep.subr.bf16.mxu0 %v4266_v28  ;;  %2589 = vmatprep.mubr.bf16.mxu1 %v5009_v47  ;;  %v4350_v25 = vld [vmem:[%s6011_s1 + $0x61c] ss:$12 sps:$4 sm:$0xff]  }
  0x56   :  { %2711 = vmatprep.mubr.bf16.mxu0 %v4342_v50  ;;  %v5138_v28 = vld [vmem:[%s6012_s0 + $0x7c] ss:$56 sps:$4 sm:$0xff]   ;;  %v4370_v50 = vld [vmem:[%s6011_s1 + $0x664] ss:$12 sps:$4 sm:$0xff]  }
  0x57   :  { %2568 = vmatpush1.bf16.msra.mxu1 %v4261_v30  ;;  %v4352_v30 = vld [vmem:[%s6011_s1 + $0x20] ss:$12 sps:$4 sm:$0xff]  }
  0x58   :  { %2690 = vmatpush1.bf16.msra.mxu0 %v4264_v31  ;;  %2569 = vmatprep.subr.bf16.mxu1 %v4269_v32  ;;  %v5150_v31 = vld [vmem:[%s6012_s0 + $0x78] ss:$56 sps:$4 sm:$0xff]   ;;  %v4358_v32 = vld [vmem:[%s6011_s1 + $0x634] ss:$12 sps:$4 sm:$0xff]  }
  0x59   :  { %2691 = vmatprep.subr.bf16.mxu0 %v4272_v33  ;;  %v4359_v33 = vld [vmem:[%s6011_s1 + $0xf8] ss:$12 sps:$4 sm:$0xff]  }
  0x5b   :  { %2570 = vmatpush1.bf16.msra.mxu1 %v4267_v38  ;;  %v44_v38 = vld [vmem:[%s6012_s0 + $0xe8] sm:$0xff] }
  0x5c   :  { %2692 = vmatpush1.bf16.msra.mxu0 %v4270_v39  ;;  %2571 = vmatprep.subr.bf16.mxu1 %v4275_v41  ;;  %v4408_v39 = vld [vmem:[%s6012_s0 + $0x8c] ss:$56 sps:$4 sm:$0xff]  }
  0x5d   :  { %2693 = vmatprep.subr.bf16.mxu0 %v4278_v42  ;;  %v4363_v41 = vld [vmem:[%s6011_s1 + $0x64c] ss:$12 sps:$4 sm:$0xff]   ;;  %v4364_v42 = vld [vmem:[%s6011_s1 + $0x110] ss:$12 sps:$4 sm:$0xff]  }
  0x5f   :  { %2572 = vmatpush1.bf16.msra.mxu1 %v4273_v43  ;;  %v4361_v43 = vld [vmem:[%s6011_s1 + $0x648] ss:$12 sps:$4 sm:$0xff]  }
  0x60   :  { %2694 = vmatpush1.bf16.msra.mxu0 %v4276_v45  ;;  %2573 = vmatprep.subr.bf16.mxu1 %v4281_v46  ;;  %v5180_v45 = vcombine.high %v44_v38, %v44_v38  ;;  %v4414_v46 = vld [vmem:[%s6012_s0 + $0x88] ss:$56 sps:$4 sm:$0xff]  }
  0x61   :  { %2695 = vmatprep.subr.bf16.mxu0 %v4284_v49  ;;  %v4365_v49 = vld [vmem:[%s6011_s1 + $0x50] ss:$12 sps:$4 sm:$0xff]  }
  0x63   :  { %2574 = vmatpush1.bf16.msra.mxu1 %v4279_v51  ;;  %v4371_v51 = vld [vmem:[%s6011_s1 + $0x128] ss:$12 sps:$4 sm:$0xff]  }
  0x64   :  { %2696 = vmatpush1.bf16.msra.mxu0 %v4282_v52  ;;  %2575 = vmatprep.subr.bf16.mxu1 %v4287_v53  ;;  %v4368_v52 = vld [vmem:[%s6011_s1 + $0x660] ss:$12 sps:$4 sm:$0xff]   ;;  %v5199_v53 = vcombine.low %v44_v38, %v44_v38  ;;  %v4431_v38 = vld [vmem:[%s6011_s1 + $0x2f0] ss:$12 sps:$4 sm:$0xff]  }
  0x65   :  { %2697 = vmatprep.subr.bf16.mxu0 %v4290_v54  ;;  %v4372_v54 = vld [vmem:[%s6011_s1 + $0x68] ss:$12 sps:$4 sm:$0xff]  }
  0x67   :  { %2576 = vmatpush1.bf16.msra.mxu1 %v4285_v55  ;;  %v46_v55 = vld [vmem:[%s6012_s0 + $0xf8] sm:$0xff] }
  0x68   :  { %2698 = vmatpush1.bf16.msra.mxu0 %v4288_v56  ;;  %2577 = vmatprep.subr.bf16.mxu1 %v4293_v57  ;;  %v4375_v56 = vld [vmem:[%s6011_s1 + $0x67c] ss:$12 sps:$4 sm:$0xff]   ;;  %v5210_v57 = vcombine.high %v46_v55, %v46_v55 }
  0x69   :  { %2699 = vmatprep.subr.bf16.mxu0 %v4296_v58  ;;  %v4376_v58 = vld [vmem:[%s6011_s1 + $0x140] ss:$12 sps:$4 sm:$0xff]  }
  0x6b   :  { %2578 = vmatpush1.bf16.msra.mxu1 %v4291_v59  ;;  %v5216_v59 = vcombine.low %v46_v55, %v46_v55  ;;  %v4445_v55 = vld [vmem:[%s6011_s1 + $0x320] ss:$12 sps:$4 sm:$0xff]  }
  0x6c   :  { %2700 = vmatpush1.bf16.msra.mxu0 %v4294_v60  ;;  %2579 = vmatprep.subr.bf16.mxu1 %v4299_v61  ;;  %v4373_v60 = vld [vmem:[%s6011_s1 + $0x678] ss:$12 sps:$4 sm:$0xff]   ;;  %v4377_v61 = vld [vmem:[%s6011_s1 + $0x80] ss:$12 sps:$4 sm:$0xff]  }
  0x6d   :  { %2701 = vmatprep.subr.bf16.mxu0 %v4302_v62  ;;  %v4380_v62 = vld [vmem:[%s6011_s1 + $0x694] ss:$12 sps:$4 sm:$0xff]  }
  0x6f   :  { %2580 = vmatpush1.bf16.msra.mxu1 %v4297_v63  ;;  %v4381_v63 = vld [vmem:[%s6011_s1 + $0x158] ss:$12 sps:$4 sm:$0xff]  }
  0x70   :  { %2702 = vmatpush1.bf16.msra.mxu0 %v4300_v0  ;;  %2581 = vmatprep.subr.bf16.mxu1 %v4308_v1  ;;  %v4378_v0 = vld [vmem:[%s6011_s1 + $0x690] ss:$12 sps:$4 sm:$0xff]   ;;  %v4382_v1 = vld [vmem:[%s6011_s1 + $0x98] ss:$12 sps:$4 sm:$0xff]  }
  0x71   :  { %2703 = vmatprep.subr.bf16.mxu0 %v4313_v2  ;;  %v4435_v2 = vld [vmem:[%s6012_s0 + $0x24] ss:$56 sps:$4 sm:$0xff]  }
  0x73   :  { %2582 = vmatpush1.bf16.msra.mxu1 %v4306_v3  ;;  %v4385_v3 = vld [vmem:[%s6011_s1 + $0x6ac] ss:$12 sps:$4 sm:$0xff]  }
  0x74   :  { %2704 = vmatpush1.bf16.msra.mxu0 %v4311_v5  ;;  %2583 = vmatprep.subr.bf16.mxu1 %v4317_v6  ;;  %v4383_v5 = vld [vmem:[%s6011_s1 + $0x6a8] ss:$12 sps:$4 sm:$0xff]   ;;  %v4387_v6 = vld [vmem:[%s6011_s1 + $0xb0] ss:$12 sps:$4 sm:$0xff]  }
  0x75   :  { %2705 = vmatprep.subr.bf16.mxu0 %v4320_v7  ;;  %v4390_v7 = vld [vmem:[%s6011_s1 + $0x6c4] ss:$12 sps:$4 sm:$0xff]  }
  0x77   :  { %2584 = vmatpush1.bf16.msra.mxu1 %v4315_v8  ;;  %v4391_v8 = vld [vmem:[%s6011_s1 + $0x248] ss:$12 sps:$4 sm:$0xff]  }
  0x78   :  { %2706 = vmatpush1.bf16.msra.mxu0 %v4318_v9  ;;  %2585 = vmatprep.subr.bf16.mxu1 %v4325_v10  ;;  %v4388_v9 = vld [vmem:[%s6011_s1 + $0x6c0] ss:$12 sps:$4 sm:$0xff]   ;;  %v4392_v10 = vld [vmem:[%s6011_s1 + $0x188] ss:$12 sps:$4 sm:$0xff]  }
  0x79   :  { %2707 = vmatprep.subr.bf16.mxu0 %v4329_v11  ;;  %v4395_v11 = vld [vmem:[%s6011_s1 + $0x6dc] ss:$12 sps:$4 sm:$0xff]  }
  0x7b   :  { %2586 = vmatpush1.bf16.msra.mxu1 %v4323_v12  ;;  %v4396_v12 = vld [vmem:[%s6011_s1 + $0x260] ss:$12 sps:$4 sm:$0xff]  }
  0x7c   :  { %2708 = vmatpush1.bf16.msra.mxu0 %v4327_v13  ;;  %2587 = vmatprep.subr.bf16.mxu1 %v4333_v14  ;;  %v4393_v13 = vld [vmem:[%s6011_s1 + $0x6d8] ss:$12 sps:$4 sm:$0xff]   ;;  %v4397_v14 = vld [vmem:[%s6011_s1 + $0x1a0] ss:$12 sps:$4 sm:$0xff]  }
  0x7d   :  { %2709 = vmatprep.subr.bf16.mxu0 %v4336_v15  ;;  %v4400_v15 = vld [vmem:[%s6011_s1 + $0x6f4] ss:$12 sps:$4 sm:$0xff]  }
  0x7f   :  { %2588 = vmatpush1.bf16.msra.mxu1 %v4331_v16  ;;  %v4401_v16 = vld [vmem:[%s6011_s1 + $0x278] ss:$12 sps:$4 sm:$0xff]  }
  0x80   :  { %2710 = vmatpush1.bf16.msra.mxu0 %v4334_v17  ;;  %3795 = vmatprep.subr.bf16.mxu1 %v4346_v20  ;;  %v4402_v17 = vld [vmem:[%s6011_s1 + $0x1b8] ss:$12 sps:$4 sm:$0xff]   ;;  %v4403_v20 = vld [vmem:[%s6011_s1 + $0x708] ss:$12 sps:$4 sm:$0xff]  }
  0x81   :  { %2740 = vmatprep.subr.bf16.mxu0 %v4345_v18  ;;  %v4405_v18 = vld [vmem:[%s6011_s1 + $0x70c] ss:$12 sps:$4 sm:$0xff]  }
  0x82   :  { %2590 = vmatmul.mubr.bf16.vlgmr.msra.gmra.mrb[0].mxu1 %v5115_v19 }
  0x83   :  { %2712 = vmatmul.mubr.bf16.vlgmr.msra.gmra.mrb[0].mxu0 %v4340_v21  ;;  %3796 = vmatpush3.bf16.msra.mxu1 %v4347_v23  ;;  %v4407_v21 = vld [vmem:[%s6011_s1 + $0x1d0] ss:$12 sps:$4 sm:$0xff]   ;;  %v4413_v23 = vld [vmem:[%s6011_s1 + $0x2a8] ss:$12 sps:$4 sm:$0xff]  }
  0x84   :  { %2741 = vmatpush1.bf16.msra.mxu0 %v4343_v22  ;;  %3797 = vmatprep.subr.bf16.mxu1 %v4351_v27  ;;  %v4412_v22 = vld [vmem:[%s6011_s1 + $0x724] ss:$12 sps:$4 sm:$0xff]   ;;  %v4418_v27 = vld [vmem:[%s6011_s1 + $0x73c] ss:$12 sps:$4 sm:$0xff]  }
  0x85   :  { %2742 = vmatprep.subr.bf16.mxu0 %v4350_v25  ;;  %2599 = vmatprep.mubr.bf16.mxu1 %v5138_v28  ;;  %v4410_v25 = vld [vmem:[%s6011_s1 + $0x720] ss:$12 sps:$4 sm:$0xff]  }
  0x86   :  { %2721 = vmatprep.mubr.bf16.mxu0 %v4408_v39  ;;  %v4432_v39 = vld [vmem:[%s6011_s1 + $0x230] ss:$12 sps:$4 sm:$0xff]  }
  0x87   :  { %3798 = vmatpush3.bf16.msra.mxu1 %v4352_v30  ;;  %v4420_v30 = vld [vmem:[%s6011_s1 + $0x200] ss:$12 sps:$4 sm:$0xff]  }
  0x88   :  { %2743 = vmatpush1.bf16.msra.mxu0 %v4348_v29  ;;  %3799 = vmatprep.subr.bf16.mxu1 %v4359_v33  ;;  %v4416_v29 = vld [vmem:[%s6011_s1 + $0x738] ss:$12 sps:$4 sm:$0xff]  }
  0x89   :  { %2744 = vmatprep.subr.bf16.mxu0 %v4358_v32  ;;  %v4424_v32 = vld [vmem:[%s6011_s1 + $0x754] ss:$12 sps:$4 sm:$0xff]   ;;  %v4425_v33 = vld [vmem:[%s6011_s1 + $0x2d8] ss:$12 sps:$4 sm:$0xff]  }
  0x8a   :  { %2600 = vmatmul.mubr.bf16.gmra.mrb[4].mxu1 %v5150_v31 }
  0x8b   :  { %3800 = vmatpush3.bf16.msra.mxu1 %v4360_v37  ;;  %2609 = vmatprep.mubr.bf16.mxu1 %v5180_v45  ;;  %v4430_v37 = vld [vmem:[%s6011_s1 + $0x76c] ss:$12 sps:$4 sm:$0xff]  }
  0x8c   :  { %2745 = vmatpush1.bf16.msra.mxu0 %v4356_v34  ;;  %3801 = vmatprep.subr.bf16.mxu1 %v4364_v42  ;;  %v4422_v34 = vld [vmem:[%s6011_s1 + $0x750] ss:$12 sps:$4 sm:$0xff]  }
  0x8d   :  { %2746 = vmatprep.subr.bf16.mxu0 %v4363_v41  ;;  %2722 = vmatmul.mubr.bf16.gmra.mrb[4].mxu0 %v4414_v46  ;;  %v5359_v41 = vld [vmem:[%s6012_s0 + $0x20] ss:$56 sps:$4 sm:$0xff]   ;;  %v4438_v42 = vld [vmem:[%s6011_s1 + $0x784] ss:$12 sps:$4 sm:$0xff]  }
  0x8e   :  { %2731 = vmatprep.mubr.bf16.mxu0 %v5210_v57  ;;  %v4436_v46 = vld [vmem:[%s6011_s1 + $0x780] ss:$12 sps:$4 sm:$0xff]  }
  0x8f   :  { %3802 = vmatpush3.bf16.msra.mxu1 %v4365_v49  ;;  %v4440_v49 = vld [vmem:[%s6011_s1 + $0x308] ss:$12 sps:$4 sm:$0xff]  }
  0x90   :  { %2747 = vmatpush1.bf16.msra.mxu0 %v4361_v43  ;;  %3803 = vmatprep.subr.bf16.mxu1 %v4371_v51  ;;  %v4439_v43 = vld [vmem:[%s6011_s1 + $0x3c8] ss:$12 sps:$4 sm:$0xff]   ;;  %v4444_v51 = vld [vmem:[%s6011_s1 + $0x3e0] ss:$12 sps:$4 sm:$0xff]  }
  0x91   :  { %2748 = vmatprep.subr.bf16.mxu0 %v4370_v50  ;;  %v4443_v50 = vld [vmem:[%s6011_s1 + $0x79c] ss:$12 sps:$4 sm:$0xff]  }
  0x92   :  { %2610 = vmatmul.mubr.bf16.gmra.mrb[8].mxu1 %v5199_v53 }
  0x93   :  { %3804 = vmatpush3.bf16.msra.mxu1 %v4372_v54  ;;  %2955 = vmatprep.mubr.bf16.mxu1 %v4809_v48  ;;  %v4386_v48 = vld [vmem:[%s6011_s1 + $0x170] ss:$12 sps:$4 sm:$0xff]   ;;  %v4441_v54 = vld [vmem:[%s6011_s1 + $0x798] ss:$12 sps:$4 sm:$0xff]  }
  0x94   :  { %2749 = vmatpush1.bf16.msra.mxu0 %v4368_v52  ;;  %3805 = vmatprep.subr.bf16.mxu1 %v4376_v58  ;;  %v5382_v52 = vld [vmem:[%s6012_s0 + $0x94] ss:$56 sps:$4 sm:$0xff]   ;;  %v4446_v58 = vld [vmem:[%s6011_s1 + $0x7b0] ss:$12 sps:$4 sm:$0xff]  }
  0x95   :  { %2750 = vmatprep.subr.bf16.mxu0 %v4375_v56  ;;  %2732 = vmatmul.mubr.bf16.gmra.mrb[8].mxu0 %v5216_v59  ;;  %v4448_v56 = vld [vmem:[%s6011_s1 + $0x7b4] ss:$12 sps:$4 sm:$0xff]  }
  0x96   :  { %2772 = vmatprep.mubr.bf16.mxu0 %v4435_v2  ;;  %v4455_v2 = vld [vmem:[%s6011_s1 + $0x350] ss:$12 sps:$4 sm:$0xff]  }
  0x97   :  { %3806 = vmatpush3.bf16.msra.mxu1 %v4377_v61  ;;  %v5409_v61 = vld [vmem:[%s6012_s0 + $0x90] ss:$56 sps:$4 sm:$0xff]  }
  0x98   :  { %2751 = vmatpush1.bf16.msra.mxu0 %v4373_v60  ;;  %3807 = vmatprep.subr.bf16.mxu1 %v4381_v63  ;;  %v4450_v60 = vld [vmem:[%s6011_s1 + $0x338] ss:$12 sps:$4 sm:$0xff]   ;;  %v4454_v63 = vld [vmem:[%s6011_s1 + $0x410] ss:$12 sps:$4 sm:$0xff]  }
  0x99   :  { %2752 = vmatprep.subr.bf16.mxu0 %v4380_v62  ;;  %v4453_v62 = vld [vmem:[%s6011_s1 + $0x7cc] ss:$12 sps:$4 sm:$0xff]  }
  0x9b   :  { %3808 = vmatpush3.bf16.msra.mxu1 %v4382_v1  ;;  %v4451_v1 = vld [vmem:[%s6011_s1 + $0x7c8] ss:$12 sps:$4 sm:$0xff]  }
  0x9c   :  { %2753 = vmatpush1.bf16.msra.mxu0 %v4378_v0  ;;  %3809 = vmatprep.subr.bf16.mxu1 %v4386_v48  ;;  %v4456_v48 = vld [vmem:[%s6011_s1 + $0x7e0] ss:$12 sps:$4 sm:$0xff]  }
  0x9d   :  { %2754 = vmatprep.subr.bf16.mxu0 %v4385_v3  ;;  %v4458_v3 = vld [vmem:[%s6011_s1 + $0x7e4] ss:$12 sps:$4 sm:$0xff]  }
  0x9f   :  { %3810 = vmatpush3.bf16.msra.mxu1 %v4387_v6  ;;  %v4460_v6 = vld [vmem:[%s6011_s1 + $0x368] ss:$12 sps:$4 sm:$0xff]  }
  0xa0   :  { %2755 = vmatpush1.bf16.msra.mxu0 %v4383_v5  ;;  %3829 = vmatprep.subr.bf16.mxu1 %v4391_v8  ;;  %v5455_v8 = vld [vmem:[%s6012_s0 + $0x2c] ss:$56 sps:$4 sm:$0xff]  }
  0xa1   :  { %2756 = vmatprep.subr.bf16.mxu0 %v4390_v7  ;;  %v4464_v7 = vld [vmem:[%s6011_s1 + $0x440] ss:$12 sps:$4 sm:$0xff]  }
  0xa2   :  { %2956 = vmatmul.mubr.bf16.vlgmr.msra.gmra.mrb[12].mxu1 %v4872_v4  ;;  %v4398_v4 = vld [vmem:[%s6011_s1 + $0x6f0] ss:$12 sps:$4 sm:$0xff]  }
  0xa3   :  { %3830 = vmatpush3.bf16.msra.mxu1 %v4392_v10  ;;  %2963 = vmatprep.mubr.bf16.mxu1 %v4935_v24  ;;  %v4406_v24 = vld [vmem:[%s6011_s1 + $0x290] ss:$12 sps:$4 sm:$0xff]   ;;  %v4465_v10 = vld [vmem:[%s6011_s1 + $0x380] ss:$12 sps:$4 sm:$0xff]  }
  0xa4   :  { %2757 = vmatpush1.bf16.msra.mxu0 %v4388_v9  ;;  %3831 = vmatprep.subr.bf16.mxu1 %v4396_v12  ;;  %v4461_v9 = vld [vmem:[%s6011_s1 + $0x7f8] ss:$12 sps:$4 sm:$0xff]   ;;  %v4466_v12 = vld [vmem:[%s6011_s1 + $0x810] ss:$12 sps:$4 sm:$0xff]  }
  0xa5   :  { %2758 = vmatprep.subr.bf16.mxu0 %v4395_v11  ;;  %v4468_v11 = vld [vmem:[%s6011_s1 + $0x814] ss:$12 sps:$4 sm:$0xff]  }
  0xa7   :  { %3832 = vmatpush3.bf16.msra.mxu1 %v4397_v14  ;;  %v4470_v14 = vld [vmem:[%s6011_s1 + $0x398] ss:$12 sps:$4 sm:$0xff]  }
  0xa8   :  { %2759 = vmatpush1.bf16.msra.mxu0 %v4393_v13  ;;  %3833 = vmatprep.subr.bf16.mxu1 %v4401_v16  ;;  %v4633_v13 = vld [vmem:[%s6012_s0 + $0x14] ss:$56 sps:$4 sm:$0xff]   ;;  %v4474_v16 = vld [vmem:[%s6011_s1 + $0x470] ss:$12 sps:$4 sm:$0xff]  }
  0xa9   :  { %2760 = vmatprep.subr.bf16.mxu0 %v4400_v15  ;;  %v4473_v15 = vld [vmem:[%s6011_s1 + $0x82c] ss:$12 sps:$4 sm:$0xff]  }
  0xaa   :  { %2964 = vmatmul.mubr.bf16.gmra.mrb[16].mxu1 %v4943_v26  ;;  %v4415_v26 = vld [vmem:[%s6011_s1 + $0x1e8] ss:$12 sps:$4 sm:$0xff]  }
  0xab   :  { %3834 = vmatpush3.bf16.msra.mxu1 %v4402_v17  ;;  %2971 = vmatprep.mubr.bf16.mxu1 %v4971_v35  ;;  %v4419_v35 = vld [vmem:[%s6011_s1 + $0x2c0] ss:$12 sps:$4 sm:$0xff]   ;;  %v4475_v17 = vld [vmem:[%s6011_s1 + $0x3b0] ss:$12 sps:$4 sm:$0xff]  }
  0xac   :  { %2761 = vmatpush1.bf16.msra.mxu0 %v4398_v4  ;;  %3835 = vmatprep.subr.bf16.mxu1 %v4406_v24  ;;  %v4471_v4 = vld [vmem:[%s6011_s1 + $0x828] ss:$12 sps:$4 sm:$0xff]  }
  0xad   :  { %2762 = vmatprep.subr.bf16.mxu0 %v4405_v18  ;;  %v4478_v18 = vld [vmem:[%s6011_s1 + $0x844] ss:$12 sps:$4 sm:$0xff]   ;;  %v4479_v24 = vld [vmem:[%s6011_s1 + $0x548] ss:$12 sps:$4 sm:$0xff]  }
  0xaf   :  { %3836 = vmatpush3.bf16.msra.mxu1 %v4407_v21  ;;  %v4480_v21 = vld [vmem:[%s6011_s1 + $0x488] ss:$12 sps:$4 sm:$0xff]  }
  0xb0   :  { %2763 = vmatpush1.bf16.msra.mxu0 %v4403_v20  ;;  %3837 = vmatprep.subr.bf16.mxu1 %v4413_v23  ;;  %v4476_v20 = vld [vmem:[%s6011_s1 + $0x840] ss:$12 sps:$4 sm:$0xff]  }
  0xb1   :  { %2764 = vmatprep.subr.bf16.mxu0 %v4412_v22  ;;  %v4483_v22 = vld [vmem:[%s6011_s1 + $0x85c] ss:$12 sps:$4 sm:$0xff]   ;;  %v4484_v23 = vld [vmem:[%s6011_s1 + $0x560] ss:$12 sps:$4 sm:$0xff]  }
  0xb2   :  { %2972 = vmatmul.mubr.bf16.gmra.mrb[20].mxu1 %v4973_v36  ;;  %v4427_v36 = vld [vmem:[%s6011_s1 + $0x218] ss:$12 sps:$4 sm:$0xff]  }
  0xb3   :  { %3838 = vmatpush3.bf16.msra.mxu1 %v4415_v26  ;;  %3011 = vmatprep.mubr.bf16.mxu1 %v5009_v47  ;;  %v4428_v47 = vld [vmem:[%s6011_s1 + $0x768] ss:$12 sps:$4 sm:$0xff]   ;;  %v4481_v26 = vld [vmem:[%s6011_s1 + $0x858] ss:$12 sps:$4 sm:$0xff]  }
  0xb4   :  { %2765 = vmatpush1.bf16.msra.mxu0 %v4410_v25  ;;  %3839 = vmatprep.subr.bf16.mxu1 %v4419_v35  ;;  %v4634_v25 = vld [vmem:[%s6012_s0 + $0x10] ss:$56 sps:$4 sm:$0xff]   ;;  %v4488_v35 = vld [vmem:[%s6011_s1 + $0x874] ss:$12 sps:$4 sm:$0xff]  }
  0xb5   :  { %2766 = vmatprep.subr.bf16.mxu0 %v4418_v27  ;;  %v4485_v27 = vld [vmem:[%s6011_s1 + $0x4a0] ss:$12 sps:$4 sm:$0xff]  }
  0xb7   :  { %3840 = vmatpush3.bf16.msra.mxu1 %v4420_v30  ;;  %v4635_v30 = vld [vmem:[%s6012_s0 + $0x84] ss:$56 sps:$4 sm:$0xff]  }
  0xb8   :  { %2767 = vmatpush1.bf16.msra.mxu0 %v4416_v29  ;;  %3841 = vmatprep.subr.bf16.mxu1 %v4425_v33  ;;  %v4489_v29 = vld [vmem:[%s6011_s1 + $0x578] ss:$12 sps:$4 sm:$0xff]  }
  0xb9   :  { %2768 = vmatprep.subr.bf16.mxu0 %v4424_v32  ;;  %v4486_v32 = vld [vmem:[%s6011_s1 + $0x870] ss:$12 sps:$4 sm:$0xff]   ;;  %v4490_v33 = vld [vmem:[%s6011_s1 + $0x4b8] ss:$12 sps:$4 sm:$0xff]  }
  0xbb   :  { %3842 = vmatpush3.bf16.msra.mxu1 %v4427_v36  ;;  %v4494_v36 = vld [vmem:[%s6011_s1 + $0x590] ss:$12 sps:$4 sm:$0xff]  }
  0xbc   :  { %2769 = vmatpush1.bf16.msra.mxu0 %v4422_v34  ;;  %3843 = vmatprep.subr.bf16.mxu1 %v4431_v38  ;;  %v4493_v34 = vld [vmem:[%s6011_s1 + $0x88c] ss:$12 sps:$4 sm:$0xff]  }
  0xbd   :  { %2770 = vmatprep.subr.bf16.mxu0 %v4430_v37  ;;  %v4491_v37 = vld [vmem:[%s6011_s1 + $0x888] ss:$12 sps:$4 sm:$0xff]   ;;  %v4636_v38 = vld [vmem:[%s6012_s0 + $0x80] ss:$56 sps:$4 sm:$0xff]  }
  0xbf   :  { %3844 = vmatpush3.bf16.msra.mxu1 %v4432_v39  ;;  %v4500_v39 = vld [vmem:[%s6011_s1 + $0x8a4] ss:$12 sps:$4 sm:$0xff]  }
  0xc0   :  { %2771 = vmatpush1.bf16.msra.mxu0 %v4428_v47  ;;  %3863 = vmatprep.subr.bf16.mxu1 %v4439_v43  ;;  %v4495_v47 = vld [vmem:[%s6011_s1 + $0x4d0] ss:$12 sps:$4 sm:$0xff]   ;;  %v4498_v43 = vld [vmem:[%s6011_s1 + $0x8a0] ss:$12 sps:$4 sm:$0xff]  }
  0xc1   :  { %2801 = vmatprep.subr.bf16.mxu0 %v4438_v42  ;;  %v4501_v42 = vld [vmem:[%s6011_s1 + $0x5a8] ss:$12 sps:$4 sm:$0xff]  }
  0xc2   :  { %3012 = vmatmul.mubr.bf16.vlgmr.msra.gmra.mrb[24].mxu1 %v5115_v19  ;;  %v4449_v19 = vld [vmem:[%s6011_s1 + $0x3f8] ss:$12 sps:$4 sm:$0xff]  }
  0xc3   :  { %2773 = vmatmul.mubr.bf16.vlgmr.msra.gmra.mrb[0].mxu0 %v5359_v41  ;;  %3864 = vmatpush3.bf16.msra.mxu1 %v4440_v49  ;;  %v4506_v49 = vld [vmem:[%s6011_s1 + $0x8bc] ss:$12 sps:$4 sm:$0xff]  }
  0xc4   :  { %2802 = vmatpush1.bf16.msra.mxu0 %v4436_v46  ;;  %3865 = vmatprep.subr.bf16.mxu1 %v4444_v51  ;;  %v4503_v46 = vld [vmem:[%s6011_s1 + $0x4e8] ss:$12 sps:$4 sm:$0xff]   ;;  %v4508_v51 = vld [vmem:[%s6011_s1 + $0x500] ss:$12 sps:$4 sm:$0xff]  }
  0xc5   :  { %2803 = vmatprep.subr.bf16.mxu0 %v4443_v50  ;;  %3019 = vmatprep.mubr.bf16.mxu1 %v5138_v28  ;;  %v47_v28 = vld [vmem:[%s6012_s0 + $0x100] sm:$0xff] }
  0xc6   :  { %2782 = vmatprep.mubr.bf16.mxu0 %v5382_v52  ;;  %v5420_v0 = vcombine.high %v47_v28, %v47_v28  ;;  %v5441_v5 = vcombine.low %v47_v28, %v47_v28  ;;  %v4504_v50 = vld [vmem:[%s6011_s1 + $0x8b8] ss:$12 sps:$4 sm:$0xff]   ;;  %v4516_v28 = vld [vmem:[%s6011_s1 + $0x8e8] ss:$12 sps:$4 sm:$0xff]  }
  0xc7   :  { %3866 = vmatpush3.bf16.msra.mxu1 %v4445_v55  ;;  %v4513_v55 = vld [vmem:[%s6011_s1 + $0x5d8] ss:$12 sps:$4 sm:$0xff]  }
  0xc8   :  { %2804 = vmatpush1.bf16.msra.mxu0 %v4441_v54  ;;  %3867 = vmatprep.subr.bf16.mxu1 %v4449_v19  ;;  %v4512_v54 = vld [vmem:[%s6011_s1 + $0x8d4] ss:$12 sps:$4 sm:$0xff]   ;;  %v4515_v19 = vld [vmem:[%s6011_s1 + $0x518] ss:$12 sps:$4 sm:$0xff]  }
  0xc9   :  { %2805 = vmatprep.subr.bf16.mxu0 %v4448_v56  ;;  %v4510_v56 = vld [vmem:[%s6011_s1 + $0x8d0] ss:$12 sps:$4 sm:$0xff]  }
  0xca   :  { %3020 = vmatmul.mubr.bf16.gmra.mrb[28].mxu1 %v5150_v31  ;;  %v4459_v31 = vld [vmem:[%s6011_s1 + $0x428] ss:$12 sps:$4 sm:$0xff]  }
  0xcb   :  { %2783 = vmatmul.mubr.bf16.gmra.mrb[4].mxu0 %v5409_v61  ;;  %3868 = vmatpush3.bf16.msra.mxu1 %v4450_v60  ;;  %v4519_v60 = vld [vmem:[%s6011_s1 + $0x5f0] ss:$12 sps:$4 sm:$0xff]  }
  0xcc   :  { %2806 = vmatpush1.bf16.msra.mxu0 %v4446_v58  ;;  %3869 = vmatprep.subr.bf16.mxu1 %v4454_v63  ;;  %v4518_v58 = vld [vmem:[%s6011_s1 + $0x8ec] ss:$12 sps:$4 sm:$0xff]   ;;  %v4526_v63 = vld [vmem:[%s6011_s1 + $0x904] ss:$12 sps:$4 sm:$0xff]  }
  0xcd   :  { %2807 = vmatprep.subr.bf16.mxu0 %v4453_v62  ;;  %3027 = vmatprep.mubr.bf16.mxu1 %v5180_v45  ;;  %v4463_v45 = vld [vmem:[%s6011_s1 + $0x7fc] ss:$12 sps:$4 sm:$0xff]  }
  0xce   :  { %2792 = vmatprep.mubr.bf16.mxu0 %v5420_v0  ;;  %v4520_v62 = vld [vmem:[%s6011_s1 + $0x530] ss:$12 sps:$4 sm:$0xff]  }
  0xcf   :  { %3870 = vmatpush3.bf16.msra.mxu1 %v4455_v2  ;;  %v5612_v2 = vld [vmem:[%s6012_s0 + $0x28] ss:$56 sps:$4 sm:$0xff]  }
  0xd0   :  { %2808 = vmatpush1.bf16.msra.mxu0 %v4451_v1  ;;  %3871 = vmatprep.subr.bf16.mxu1 %v4459_v31  ;;  %v4527_v1 = vld [vmem:[%s6011_s1 + $0x6c8] ss:$12 sps:$4 sm:$0xff]  }
  0xd1   :  { %2809 = vmatprep.subr.bf16.mxu0 %v4458_v3  ;;  %v4524_v3 = vld [vmem:[%s6011_s1 + $0x900] ss:$12 sps:$4 sm:$0xff]   ;;  %v4528_v31 = vld [vmem:[%s6011_s1 + $0x608] ss:$12 sps:$4 sm:$0xff]  }
  0xd2   :  { %3028 = vmatmul.mubr.bf16.gmra.mrb[32].mxu1 %v5199_v53  ;;  %v4469_v53 = vld [vmem:[%s6011_s1 + $0x458] ss:$12 sps:$4 sm:$0xff]  }
  0xd3   :  { %2793 = vmatmul.mubr.bf16.gmra.mrb[8].mxu0 %v5441_v5  ;;  %3872 = vmatpush3.bf16.msra.mxu1 %v4460_v6  ;;  %v4532_v6 = vld [vmem:[%s6011_s1 + $0x6e0] ss:$12 sps:$4 sm:$0xff]  }
  0xd4   :  { %2810 = vmatpush1.bf16.msra.mxu0 %v4456_v48  ;;  %3873 = vmatprep.subr.bf16.mxu1 %v4464_v7  ;;  %v4531_v48 = vld [vmem:[%s6011_s1 + $0x91c] ss:$12 sps:$4 sm:$0xff]  }
  0xd5   :  { %2811 = vmatprep.subr.bf16.mxu0 %v4463_v45  ;;  %3067 = vmatprep.mubr.bf16.mxu1 %v4633_v13  ;;  %v4529_v45 = vld [vmem:[%s6011_s1 + $0x918] ss:$12 sps:$4 sm:$0xff]   ;;  %v5632_v7 = vld [vmem:[%s6012_s0 + $0x9c] ss:$56 sps:$4 sm:$0xff]  }
  0xd6   :  { %2833 = vmatprep.mubr.bf16.mxu0 %v5455_v8  ;;  %v4534_v13 = vld [vmem:[%s6011_s1 + $0x930] ss:$12 sps:$4 sm:$0xff]  }
  0xd7   :  { %3874 = vmatpush3.bf16.msra.mxu1 %v4465_v10  ;;  %v4533_v10 = vld [vmem:[%s6011_s1 + $0x620] ss:$12 sps:$4 sm:$0xff]  }
  0xd8   :  { %2812 = vmatpush1.bf16.msra.mxu0 %v4461_v9  ;;  %3875 = vmatprep.subr.bf16.mxu1 %v4469_v53  ;;  %v4638_v9 = vld [vmem:[%s6012_s0 + $0x18] ss:$56 sps:$4 sm:$0xff]  }
  0xd9   :  { %2813 = vmatprep.subr.bf16.mxu0 %v4468_v11  ;;  %v4536_v11 = vld [vmem:[%s6011_s1 + $0x934] ss:$12 sps:$4 sm:$0xff]   ;;  %v4537_v53 = vld [vmem:[%s6011_s1 + $0x6f8] ss:$12 sps:$4 sm:$0xff]  }
  0xdb   :  { %3876 = vmatpush3.bf16.msra.mxu1 %v4470_v14  ;;  %v5657_v14 = vld [vmem:[%s6012_s0 + $0x98] ss:$56 sps:$4 sm:$0xff]  }
  0xdc   :  { %2814 = vmatpush1.bf16.msra.mxu0 %v4466_v12  ;;  %3877 = vmatprep.subr.bf16.mxu1 %v4474_v16  ;;  %v4639_v12 = vld [vmem:[%s6012_s0 + $0x8c] ss:$56 sps:$4 sm:$0xff]  }
  0xdd   :  { %2815 = vmatprep.subr.bf16.mxu0 %v4473_v15  ;;  %v48_v15 = vld [vmem:[%s6012_s0 + $0x108] sm:$0xff]  ;;  %v4538_v16 = vld [vmem:[%s6011_s1 + $0x638] ss:$12 sps:$4 sm:$0xff]  }
  0xdf   :  { %3878 = vmatpush3.bf16.msra.mxu1 %v4475_v17  ;;  %v4542_v17 = vld [vmem:[%s6011_s1 + $0x710] ss:$12 sps:$4 sm:$0xff]  }
  0xe0   :  { %2816 = vmatpush1.bf16.msra.mxu0 %v4471_v4  ;;  %3897 = vmatprep.subr.bf16.mxu1 %v4479_v24  ;;  %v4541_v4 = vld [vmem:[%s6011_s1 + $0x94c] ss:$12 sps:$4 sm:$0xff]   ;;  %v4640_v24 = vld [vmem:[%s6012_s0 + $0x88] ss:$56 sps:$4 sm:$0xff]  }
  0xe1   :  { %2817 = vmatprep.subr.bf16.mxu0 %v4478_v18  ;;  %v5671_v18 = vcombine.high %v48_v15, %v48_v15 }
  0xe2   :  { %3068 = vmatmul.mubr.bf16.vlgmr.msra.gmra.mrb[36].mxu1 %v4634_v25  ;;  %v4544_v25 = vld [vmem:[%s6011_s1 + $0x960] ss:$12 sps:$4 sm:$0xff]  }
  0xe3   :  { %3898 = vmatpush3.bf16.msra.mxu1 %v4480_v21  ;;  %3075 = vmatprep.mubr.bf16.mxu1 %v4635_v30  ;;  %v4543_v21 = vld [vmem:[%s6011_s1 + $0x650] ss:$12 sps:$4 sm:$0xff]   ;;  %v4549_v30 = vld [vmem:[%s6011_s1 + $0x978] ss:$12 sps:$4 sm:$0xff]  }
  0xe4   :  { %2818 = vmatpush1.bf16.msra.mxu0 %v4476_v20  ;;  %3899 = vmatprep.subr.bf16.mxu1 %v4484_v23  ;;  %v4539_v20 = vld [vmem:[%s6011_s1 + $0x948] ss:$12 sps:$4 sm:$0xff]  }
  0xe5   :  { %2819 = vmatprep.subr.bf16.mxu0 %v4483_v22  ;;  %v4546_v22 = vld [vmem:[%s6011_s1 + $0x964] ss:$12 sps:$4 sm:$0xff]   ;;  %v4547_v23 = vld [vmem:[%s6011_s1 + $0x728] ss:$12 sps:$4 sm:$0xff]  }
  0xe7   :  { %3900 = vmatpush3.bf16.msra.mxu1 %v4485_v27  ;;  %v5697_v27 = vcombine.low %v48_v15, %v48_v15  ;;  %v4613_v15 = vld [vmem:[%s6011_s1 + $0x908] ss:$12 sps:$4 sm:$0xff]  }
  0xe8   :  { %2820 = vmatpush1.bf16.msra.mxu0 %v4481_v26  ;;  %3901 = vmatprep.subr.bf16.mxu1 %v4489_v29  ;;  %v4548_v26 = vld [vmem:[%s6011_s1 + $0x668] ss:$12 sps:$4 sm:$0xff]  }
  0xe9   :  { %2821 = vmatprep.subr.bf16.mxu0 %v4488_v35  ;;  %v4551_v35 = vld [vmem:[%s6011_s1 + $0x97c] ss:$12 sps:$4 sm:$0xff]   ;;  %v5708_v29 = vld [vmem:[%s6012_s0 + $0x34] ss:$56 sps:$4 sm:$0xff]  }
  0xea   :  { %3076 = vmatmul.mubr.bf16.gmra.mrb[40].mxu1 %v4636_v38  ;;  %v4561_v38 = vld [vmem:[%s6011_s1 + $0x9ac] ss:$12 sps:$4 sm:$0xff]  }
  0xeb   :  { %3902 = vmatpush3.bf16.msra.mxu1 %v4490_v33  ;;  %3083 = vmatprep.mubr.bf16.mxu1 %v4984_v40  ;;  %v4507_v40 = vld [vmem:[%s6011_s1 + $0x5c0] ss:$12 sps:$4 sm:$0xff]  }
  0xec   :  { %2822 = vmatpush1.bf16.msra.mxu0 %v4486_v32  ;;  %3903 = vmatprep.subr.bf16.mxu1 %v4494_v36  ;;  %v4553_v32 = vld [vmem:[%s6011_s1 + $0x680] ss:$12 sps:$4 sm:$0xff]   ;;  %v4641_v36 = vld [vmem:[%s6012_s0 + $0x24] ss:$56 sps:$4 sm:$0xff]  }
  0xed   :  { %2823 = vmatprep.subr.bf16.mxu0 %v4493_v34  ;;  %v4556_v33 = vld [vmem:[%s6011_s1 + $0x994] ss:$12 sps:$4 sm:$0xff]   ;;  %v4554_v34 = vld [vmem:[%s6011_s1 + $0x990] ss:$12 sps:$4 sm:$0xff]  }
  0xef   :  { %3904 = vmatpush3.bf16.msra.mxu1 %v4495_v47  ;;  %v4562_v47 = vld [vmem:[%s6011_s1 + $0x770] ss:$12 sps:$4 sm:$0xff]  }
  0xf0   :  { %2824 = vmatpush1.bf16.msra.mxu0 %v4491_v37  ;;  %3905 = vmatprep.subr.bf16.mxu1 %v4501_v42  ;;  %v4558_v37 = vld [vmem:[%s6011_s1 + $0x698] ss:$12 sps:$4 sm:$0xff]   ;;  %v4563_v42 = vld [vmem:[%s6011_s1 + $0x6b0] ss:$12 sps:$4 sm:$0xff]  }
  0xf1   :  { %2825 = vmatprep.subr.bf16.mxu0 %v4500_v39  ;;  %v4559_v39 = vld [vmem:[%s6011_s1 + $0x9a8] ss:$12 sps:$4 sm:$0xff]  }
  0xf2   :  { %3084 = vmatmul.mubr.bf16.gmra.mrb[44].mxu1 %v4997_v44  ;;  %v4637_v44 = vld [vmem:[%s6012_s0 + $0x1c] ss:$56 sps:$4 sm:$0xff]  }
  0xf3   :  { %3906 = vmatpush3.bf16.msra.mxu1 %v4503_v46  ;;  %3123 = vmatprep.mubr.bf16.mxu1 %v4637_v44  ;;  %v4567_v46 = vld [vmem:[%s6011_s1 + $0x848] ss:$12 sps:$4 sm:$0xff]  }
  0xf4   :  { %2826 = vmatpush1.bf16.msra.mxu0 %v4498_v43  ;;  %3907 = vmatprep.subr.bf16.mxu1 %v4507_v40  ;;  %v4566_v43 = vld [vmem:[%s6011_s1 + $0x9c4] ss:$12 sps:$4 sm:$0xff]   ;;  %v4568_v40 = vld [vmem:[%s6011_s1 + $0x788] ss:$12 sps:$4 sm:$0xff]  }
  0xf5   :  { %2827 = vmatprep.subr.bf16.mxu0 %v4506_v49  ;;  %v4564_v49 = vld [vmem:[%s6011_s1 + $0x9c0] ss:$12 sps:$4 sm:$0xff]  }
  0xf6   :  { %v4576_v44 = vld [vmem:[%s6011_s1 + $0x9f4] ss:$12 sps:$4 sm:$0xff]  }
  0xf7   :  { %3908 = vmatpush3.bf16.msra.mxu1 %v4508_v51  ;;  %v4572_v51 = vld [vmem:[%s6011_s1 + $0x860] ss:$12 sps:$4 sm:$0xff]  }
  0xf8   :  { %2828 = vmatpush1.bf16.msra.mxu0 %v4504_v50  ;;  %3909 = vmatprep.subr.bf16.mxu1 %v4513_v55  ;;  %v4571_v50 = vld [vmem:[%s6011_s1 + $0x9dc] ss:$12 sps:$4 sm:$0xff]   ;;  %v4573_v55 = vld [vmem:[%s6011_s1 + $0x7a0] ss:$12 sps:$4 sm:$0xff]  }
  0xf9   :  { %2829 = vmatprep.subr.bf16.mxu0 %v4512_v54  ;;  %v4569_v54 = vld [vmem:[%s6011_s1 + $0x9d8] ss:$12 sps:$4 sm:$0xff]  }
  0xfb   :  { %3910 = vmatpush3.bf16.msra.mxu1 %v4515_v19  ;;  %v4578_v19 = vld [vmem:[%s6011_s1 + $0x7b8] ss:$12 sps:$4 sm:$0xff]  }
  0xfc   :  { %2830 = vmatpush1.bf16.msra.mxu0 %v4510_v56  ;;  %3911 = vmatprep.subr.bf16.mxu1 %v4519_v60  ;;  %v4574_v56 = vld [vmem:[%s6011_s1 + $0x9f0] ss:$12 sps:$4 sm:$0xff]   ;;  %v4579_v60 = vld [vmem:[%s6011_s1 + $0xa08] ss:$12 sps:$4 sm:$0xff]  }
  0xfd   :  { %2831 = vmatprep.subr.bf16.mxu0 %v4518_v58  ;;  %v4581_v58 = vld [vmem:[%s6011_s1 + $0xa0c] ss:$12 sps:$4 sm:$0xff]  }
  0xff   :  { %3912 = vmatpush3.bf16.msra.mxu1 %v4520_v62  ;;  %v4589_v62 = vld [vmem:[%s6011_s1 + $0xa24] ss:$12 sps:$4 sm:$0xff]  }
 0x100   :  { %2832 = vmatpush1.bf16.msra.mxu0 %v4516_v28  ;;  %3931 = vmatprep.subr.bf16.mxu1 %v4527_v1  ;;  %v4583_v28 = vld [vmem:[%s6011_s1 + $0x7d0] ss:$12 sps:$4 sm:$0xff]   ;;  %v4591_v1 = vld [vmem:[%s6011_s1 + $0x7e8] ss:$12 sps:$4 sm:$0xff]  }
 0x101   :  { %2862 = vmatprep.subr.bf16.mxu0 %v4526_v63  ;;  %v4587_v63 = vld [vmem:[%s6011_s1 + $0xa20] ss:$12 sps:$4 sm:$0xff]  }
 0x102   :  { %3124 = vmatmul.mubr.bf16.vlgmr.msra.gmra.mrb[48].mxu1 %v4638_v9  ;;  %v4603_v9 = vld [vmem:[%s6011_s1 + $0x818] ss:$12 sps:$4 sm:$0xff]  }
 0x103   :  { %2834 = vmatmul.mubr.bf16.vlgmr.msra.gmra.mrb[0].mxu0 %v5612_v2  ;;  %3932 = vmatpush3.bf16.msra.mxu1 %v4528_v31  ;;  %v4592_v31 = vld [vmem:[%s6011_s1 + $0xa38] ss:$12 sps:$4 sm:$0xff]  }
 0x104   :  { %2863 = vmatpush1.bf16.msra.mxu0 %v4524_v3  ;;  %3933 = vmatprep.subr.bf16.mxu1 %v4532_v6  ;;  %v4594_v3 = vld [vmem:[%s6011_s1 + $0xa3c] ss:$12 sps:$4 sm:$0xff]   ;;  %v4601_v6 = vld [vmem:[%s6011_s1 + $0xa54] ss:$12 sps:$4 sm:$0xff]  }
 0x105   :  { %2864 = vmatprep.subr.bf16.mxu0 %v4531_v48  ;;  %3131 = vmatprep.mubr.bf16.mxu1 %v4639_v12  ;;  %v4596_v48 = vld [vmem:[%s6011_s1 + $0x800] ss:$12 sps:$4 sm:$0xff]   ;;  %v4612_v12 = vld [vmem:[%s6011_s1 + $0x9c8] ss:$12 sps:$4 sm:$0xff]  }
 0x106   :  { %2843 = vmatprep.mubr.bf16.mxu0 %v5632_v7 }
 0x107   :  { %3934 = vmatpush3.bf16.msra.mxu1 %v4533_v10  ;;  %v4606_v10 = vld [vmem:[%s6011_s1 + $0xa6c] ss:$12 sps:$4 sm:$0xff]  }
 0x108   :  { %2865 = vmatpush1.bf16.msra.mxu0 %v4529_v45  ;;  %3935 = vmatprep.subr.bf16.mxu1 %v4537_v53  ;;  %v4599_v45 = vld [vmem:[%s6011_s1 + $0xa50] ss:$12 sps:$4 sm:$0xff]  }
 0x109   :  { %2866 = vmatprep.subr.bf16.mxu0 %v4536_v11  ;;  %v4604_v11 = vld [vmem:[%s6011_s1 + $0xa68] ss:$12 sps:$4 sm:$0xff]   ;;  %v4608_v53 = vld [vmem:[%s6011_s1 + $0x830] ss:$12 sps:$4 sm:$0xff]  }
 0x10a   :  { %3132 = vmatmul.mubr.bf16.gmra.mrb[52].mxu1 %v4640_v24  ;;  %v4619_v24 = vld [vmem:[%s6011_s1 + $0x9f8] ss:$12 sps:$4 sm:$0xff]  }
 0x10b   :  { %2844 = vmatmul.mubr.bf16.gmra.mrb[4].mxu0 %v5657_v14  ;;  %3936 = vmatpush3.bf16.msra.mxu1 %v4538_v16  ;;  %v4614_v16 = vld [vmem:[%s6011_s1 + $0x9e0] ss:$12 sps:$4 sm:$0xff]  }
 0x10c   :  { %2867 = vmatpush1.bf16.msra.mxu0 %v4534_v13  ;;  %3937 = vmatprep.subr.bf16.mxu1 %v4542_v17  ;;  %v5854_v13 = vld [vmem:[%s6012_s0 + $0x30] ss:$56 sps:$4 sm:$0xff]   ;;  %v4615_v17 = vld [vmem:[%s6011_s1 + $0x920] ss:$12 sps:$4 sm:$0xff]  }
 0x10d   :  { %2868 = vmatprep.subr.bf16.mxu0 %v4541_v4  ;;  %3139 = vmatprep.mubr.bf16.mxu1 %v5210_v57  ;;  %v4552_v57 = vld [vmem:[%s6011_s1 + $0x740] ss:$12 sps:$4 sm:$0xff]   ;;  %v5865_v4 = vld [vmem:[%s6012_s0 + $0xa4] ss:$56 sps:$4 sm:$0xff]  }
 0x10e   :  { %2853 = vmatprep.mubr.bf16.mxu0 %v5671_v18 }
 0x10f   :  { %3938 = vmatpush3.bf16.msra.mxu1 %v4543_v21  ;;  %v4620_v21 = vld [vmem:[%s6011_s1 + $0x938] ss:$12 sps:$4 sm:$0xff]  }
 0x110   :  { %2869 = vmatpush1.bf16.msra.mxu0 %v4539_v20  ;;  %3939 = vmatprep.subr.bf16.mxu1 %v4547_v23  ;;  %v49_v20 = vld [vmem:[%s6012_s0 + $0x110] sm:$0xff] }
 0x111   :  { %2870 = vmatprep.subr.bf16.mxu0 %v4546_v22  ;;  %v3438_v22 = vcombine.high %v49_v20, %v49_v20  ;;  %v4622_v23 = vld [vmem:[%s6011_s1 + $0x950] ss:$12 sps:$4 sm:$0xff]  }
 0x112   :  { %3140 = vmatmul.mubr.bf16.gmra.mrb[56].mxu1 %v5216_v59  ;;  %v4557_v59 = vld [vmem:[%s6011_s1 + $0x758] ss:$12 sps:$4 sm:$0xff]  }
 0x113   :  { %2854 = vmatmul.mubr.bf16.gmra.mrb[8].mxu0 %v5697_v27  ;;  %3940 = vmatpush3.bf16.msra.mxu1 %v4548_v26  ;;  %v3437_v26 = vcombine.low %v49_v20, %v49_v20 }
 0x114   :  { %2871 = vmatpush1.bf16.msra.mxu0 %v4544_v25  ;;  %3941 = vmatprep.subr.bf16.mxu1 %v4552_v57  ;;  %v4625_v25 = vld [vmem:[%s6011_s1 + $0xa28] ss:$12 sps:$4 sm:$0xff]   ;;  %v4629_v57 = vld [vmem:[%s6011_s1 + $0xa58] ss:$12 sps:$4 sm:$0xff]  }
 0x115   :  { %2872 = vmatprep.subr.bf16.mxu0 %v4551_v35  ;;  %3179 = vmatprep.mubr.bf16.mxu1 %v4641_v36  ;;  %v4627_v35 = vld [vmem:[%s6011_s1 + $0xa40] ss:$12 sps:$4 sm:$0xff]  }
 0x116   :  { %2894 = vmatprep.mubr.bf16.mxu0 %v5708_v29 }
 0x117   :  { %3942 = vmatpush3.bf16.msra.mxu1 %v4553_v32 }
 0x118   :  { %2873 = vmatpush1.bf16.msra.mxu0 %v4549_v30  ;;  %3943 = vmatprep.subr.bf16.mxu1 %v4557_v59 }
 0x119   :  { %2874 = vmatprep.subr.bf16.mxu0 %v4556_v33  ;;  %v4630_v33 = vld [vmem:[%s6011_s1 + $0x998] ss:$12 sps:$4 sm:$0xff]  }
 0x11b   :  { %3944 = vmatpush3.bf16.msra.mxu1 %v4558_v37 }
 0x11c   :  { %2875 = vmatpush1.bf16.msra.mxu0 %v4554_v34  ;;  %3945 = vmatprep.subr.bf16.mxu1 %v4562_v47  ;;  %v4631_v34 = vld [vmem:[%s6011_s1 + $0xa70] ss:$12 sps:$4 sm:$0xff]  }
 0x11d   :  { %2876 = vmatprep.subr.bf16.mxu0 %v4561_v38 }
 0x11f   :  { %3946 = vmatpush3.bf16.msra.mxu1 %v4563_v42 }
 0x120   :  { %2877 = vmatpush1.bf16.msra.mxu0 %v4559_v39  ;;  %3965 = vmatprep.subr.bf16.mxu1 %v4567_v46 }
 0x121   :  { %2878 = vmatprep.subr.bf16.mxu0 %v4566_v43 }
 0x122   :  { %3180 = vmatmul.mubr.bf16.vlgmr.msra.gmra.mrb[60].mxu1 %v5359_v41  ;;  %v4577_v41 = vld [vmem:[%s6011_s1 + $0x878] ss:$12 sps:$4 sm:$0xff]  }
 0x123   :  { %3966 = vmatpush3.bf16.msra.mxu1 %v4568_v40  ;;  %3187 = vmatprep.mubr.bf16.mxu1 %v5382_v52  ;;  %v4582_v52 = vld [vmem:[%s6011_s1 + $0x890] ss:$12 sps:$4 sm:$0xff]  }
 0x124   :  { %2879 = vmatpush1.bf16.msra.mxu0 %v4564_v49  ;;  %3967 = vmatprep.subr.bf16.mxu1 %v4572_v51 }
 0x125   :  { %2880 = vmatprep.subr.bf16.mxu0 %v4571_v50 }
 0x127   :  { %3968 = vmatpush3.bf16.msra.mxu1 %v4573_v55 }
 0x128   :  { %2881 = vmatpush1.bf16.msra.mxu0 %v4569_v54  ;;  %3969 = vmatprep.subr.bf16.mxu1 %v4577_v41 }
 0x129   :  { %2882 = vmatprep.subr.bf16.mxu0 %v4576_v44 }
 0x12a   :  { %3188 = vmatmul.mubr.bf16.gmra.mrb[64].mxu1 %v5409_v61  ;;  %v4590_v61 = vld [vmem:[%s6011_s1 + $0x8a8] ss:$12 sps:$4 sm:$0xff]  }
 0x12b   :  { %3970 = vmatpush3.bf16.msra.mxu1 %v4578_v19  ;;  %3195 = vmatprep.mubr.bf16.mxu1 %v5420_v0  ;;  %v4595_v0 = vld [vmem:[%s6011_s1 + $0x8c0] ss:$12 sps:$4 sm:$0xff]  }
 0x12c   :  { %2883 = vmatpush1.bf16.msra.mxu0 %v4574_v56  ;;  %3971 = vmatprep.subr.bf16.mxu1 %v4582_v52 }
 0x12d   :  { %2884 = vmatprep.subr.bf16.mxu0 %v4581_v58 }
 0x12f   :  { %3972 = vmatpush3.bf16.msra.mxu1 %v4583_v28 }
 0x130   :  { %2885 = vmatpush1.bf16.msra.mxu0 %v4579_v60  ;;  %3973 = vmatprep.subr.bf16.mxu1 %v4590_v61 }
 0x131   :  { %2886 = vmatprep.subr.bf16.mxu0 %v4589_v62 }
 0x132   :  { %3196 = vmatmul.mubr.bf16.gmra.mrb[68].mxu1 %v5441_v5  ;;  %v4602_v5 = vld [vmem:[%s6011_s1 + $0x8d8] ss:$12 sps:$4 sm:$0xff]  }
 0x133   :  { %3974 = vmatpush3.bf16.msra.mxu1 %v4591_v1  ;;  %3235 = vmatprep.mubr.bf16.mxu1 %v5455_v8  ;;  %v4607_v8 = vld [vmem:[%s6011_s1 + $0x8f0] ss:$12 sps:$4 sm:$0xff]   ;;  %v500_v1 = vlaneseq }
 0x134   :  { %2887 = vmatpush1.bf16.msra.mxu0 %v4587_v63  ;;  %3975 = vmatprep.subr.bf16.mxu1 %v4595_v0 }
 0x135   :  { %2888 = vmatprep.subr.bf16.mxu0 %v4594_v3  ;;  %v5946_v3 = vshrl.u32 %v500_v1, 7 }
 0x137   :  { %3976 = vmatpush3.bf16.msra.mxu1 %v4596_v48  ;;  %v510_v0 = vsub.s32 2, %v5946_v3 }
 0x138   :  { %2889 = vmatpush1.bf16.msra.mxu0 %v4592_v31  ;;  %3977 = vmatprep.subr.bf16.mxu1 %v4602_v5  ;;  %v5952_v31 = vld [vmem:[%s6013_s2] sm:$0x7] }
 0x139   :  { %2890 = vmatprep.subr.bf16.mxu0 %v4601_v6  ;;  %v511_v48 = vrot.slane %v5952_v31, %v510_v0 }
 0x13b   :  { %3978 = vmatpush3.bf16.msra.mxu1 %v4603_v9 }
 0x13c   :  { %2891 = vmatpush1.bf16.msra.mxu0 %v4599_v45  ;;  %3979 = vmatprep.subr.bf16.mxu1 %v4607_v8 }
 0x13d   :  { %2892 = vmatprep.subr.bf16.mxu0 %v4606_v10 }
 0x13f   :  { %3980 = vmatpush3.bf16.msra.mxu1 %v4608_v53 }
 0x140   :  { %2893 = vmatpush1.bf16.msra.mxu0 %v4604_v11  ;;  %4033 = vmatprep.subr.bf16.mxu1 %v4612_v12 }
 0x141   :  { %3999 = vmatprep.subr.bf16.mxu0 %v4612_v12 }
 0x142   :  { %3236 = vmatmul.mubr.bf16.vlgmr.msra.gmra.mrb[72].mxu1 %v5612_v2  ;;  %v5880_v2 = vld [vmem:[%s6012_s0 + $0xa0] ss:$56 sps:$4 sm:$0xff]  }
 0x143   :  { %2895 = vmatmul.mubr.bf16.vlgmr.msra.gmra.mrb[0].mxu0 %v5854_v13  ;;  %4041 = vmatpush3.bf16.msra.mxu1 %v4613_v15 }
 0x144   :  { %4000 = vmatpush3.bf16.msra.mxu0 %v4613_v15  ;;  %4034 = vmatprep.subr.bf16.mxu1 %v4614_v16 }
 0x145   :  { %4001 = vmatprep.subr.bf16.mxu0 %v4614_v16  ;;  %2904 = vmatprep.mubr.bf16.mxu0 %v5865_v4 }
 0x146   :  { %3243 = vmatprep.mubr.bf16.mxu1 %v5632_v7  ;;  %v4621_v7 = vld [vmem:[%s6011_s1 + $0xa10] ss:$12 sps:$4 sm:$0xff]  }
 0x147   :  { %4042 = vmatpush3.bf16.msra.mxu1 %v4615_v17 }
 0x148   :  { %4002 = vmatpush3.bf16.msra.mxu0 %v4615_v17  ;;  %4035 = vmatprep.subr.bf16.mxu1 %v4619_v24 }
 0x149   :  { %4003 = vmatprep.subr.bf16.mxu0 %v4619_v24 }
 0x14a   :  { %3244 = vmatmul.mubr.bf16.gmra.mrb[76].mxu1 %v5657_v14  ;;  %v4626_v14 = vld [vmem:[%s6011_s1 + $0x968] ss:$12 sps:$4 sm:$0xff]  }
 0x14b   :  { %2905 = vmatmul.mubr.bf16.gmra.mrb[4].mxu0 %v5880_v2  ;;  %4043 = vmatpush3.bf16.msra.mxu1 %v4620_v21 }
 0x14c   :  { %4004 = vmatpush3.bf16.msra.mxu0 %v4620_v21  ;;  %4036 = vmatprep.subr.bf16.mxu1 %v4621_v7 }
 0x14d   :  { %4005 = vmatprep.subr.bf16.mxu0 %v4621_v7  ;;  %2914 = vmatprep.mubr.bf16.mxu0 %v3438_v22 }
 0x14e   :  { %3251 = vmatprep.mubr.bf16.mxu1 %v5671_v18  ;;  %v4628_v18 = vld [vmem:[%s6011_s1 + $0x980] ss:$12 sps:$4 sm:$0xff]  }
 0x14f   :  { %4044 = vmatpush3.bf16.msra.mxu1 %v4622_v23 }
 0x150   :  { %4006 = vmatpush3.bf16.msra.mxu0 %v4622_v23  ;;  %4037 = vmatprep.subr.bf16.mxu1 %v4625_v25 }
 0x151   :  { %4007 = vmatprep.subr.bf16.mxu0 %v4625_v25 }
 0x152   :  { %3252 = vmatmul.mubr.bf16.gmra.mrb[80].mxu1 %v5697_v27 }
 0x153   :  { %2915 = vmatmul.mubr.bf16.gmra.mrb[8].mxu0 %v3437_v26  ;;  %4045 = vmatpush3.bf16.msra.mxu1 %v4626_v14 }
 0x154   :  { %4008 = vmatpush3.bf16.msra.mxu0 %v4626_v14  ;;  %4038 = vmatprep.subr.bf16.mxu1 %v4627_v35 }
 0x155   :  { %4009 = vmatprep.subr.bf16.mxu0 %v4627_v35  ;;  %v5913_v30 = vpop.f32.mrb[0].mxu1  ;;  %3291 = vmatprep.mubr.bf16.mxu0 %v5708_v29  ;;  %v4632_v29 = vld [vmem:[%s6011_s1 + $0x9b0] ss:$12 sps:$4 sm:$0xff]  }
 0x156   :  { %3307 = vmatprep.mubr.bf16.mxu1 %v3438_v22  ;;  %v5916_v32 = vpop.f32.mrb[1].mxu1 }
 0x157   :  { %v5918_v27 = vpop.f32.mrb[2].mxu1  ;;  %4046 = vmatpush3.bf16.msra.mxu1 %v4628_v18 }
 0x158   :  { %4010 = vmatpush3.bf16.msra.mxu0 %v4628_v18  ;;  %v5923_v59 = vpop.f32.mrb[3].mxu1  ;;  %4039 = vmatprep.subr.bf16.mxu1 %v4629_v57 }
 0x159   :  { %4011 = vmatprep.subr.bf16.mxu0 %v4629_v57 }
 0x15b   :  { %4047 = vmatpush3.bf16.msra.mxu1 %v4630_v33 }
 0x15c   :  { %4012 = vmatpush3.bf16.msra.mxu0 %v4630_v33  ;;  %4040 = vmatprep.subr.bf16.mxu1 %v4631_v34 }
 0x15d   :  { %4013 = vmatprep.subr.bf16.mxu0 %v4631_v34  ;;  %v5931_v36 = vpop.f32.mrb[4].mxu1 }
 0x15e   :  { %v5933_v37 = vpop.f32.mrb[5].mxu1 }
 0x15f   :  { %v5935_v38 = vpop.f32.mrb[6].mxu1  ;;  %4048 = vmatpush3.bf16.msra.mxu1 %v4632_v29 }
 0x160   :  { %4014 = vmatpush3.bf16.msra.mxu0 %v4632_v29  ;;  %v5937_v47 = vpop.f32.mrb[7].mxu1 }
 0x162   :  { %3308 = vmatmul.mubr.bf16.vlgmr.msra.gmra.mrb[84].mxu1 %v3437_v26 }
 0x163   :  { %3292 = vmatmul.mubr.bf16.vlgmr.msra.gmra.mrb[12].mxu0 %v5854_v13 }
 0x164   :  { %3299 = vmatprep.mubr.bf16.mxu0 %v5865_v4 }
 0x165   :  { %v5941_v39 = vpop.f32.mrb[8].mxu1 }
 0x166   :  { %v5943_v42 = vpop.f32.mrb[9].mxu1 }
 0x167   :  { %v2615_v43 = vpop.f32.mrb[10].mxu1 }
 0x168   :  { %v2616_v46 = vpop.f32.mrb[11].mxu1 }
 0x16b   :  { %3300 = vmatmul.mubr.bf16.gmra.mrb[16].mxu0 %v5880_v2 }
 0x175   :  { %v3811_v49 = vpop.f32.mrb[12].mxu1 }
 0x176   :  { %v3812_v40 = vpop.f32.mrb[13].mxu1 }
 0x177   :  { %v3813_v50 = vadd.f32 %v3812_v40, %v3811_v49  ;;  %v3814_v51 = vpop.f32.mrb[14].mxu1 }
 0x178   :  { %v3815_v54 = vpop.f32.mrb[15].mxu1 }
 0x179   :  { %v3816_v55 = vadd.f32 %v3815_v54, %v3814_v51  ;;  %v2958_v45 = vadd.f32 %v3813_v50, %v511_v48 }
 0x17b   :  { %v2961_v11 = vadd.f32 %v3816_v55, %v511_v48 }
 0x17d   :  { %v3817_v44 = vpop.f32.mrb[16].mxu1 }
 0x17e   :  { %v3818_v41 = vpop.f32.mrb[17].mxu1 }
 0x17f   :  { %v3819_v56 = vadd.f32 %v3818_v41, %v3817_v44  ;;  %v3820_v19 = vpop.f32.mrb[18].mxu1 }
 0x180   :  { %v3821_v58 = vpop.f32.mrb[19].mxu1 }
 0x181   :  { %v3822_v52 = vadd.f32 %v3821_v58, %v3820_v19  ;;  %v2966_v4 = vadd.f32 %v3819_v56, %v511_v48 }
 0x183   :  { %v2969_v20 = vadd.f32 %v3822_v52, %v511_v48 }
 0x185   :  { %v3823_v60 = vpop.f32.mrb[20].mxu1 }
 0x186   :  { %v3824_v28 = vpop.f32.mrb[21].mxu1 }
 0x187   :  { %v3825_v62 = vadd.f32 %v3824_v28, %v3823_v60  ;;  %v3826_v61 = vpop.f32.mrb[22].mxu1 }
 0x188   :  { %v3827_v63 = vpop.f32.mrb[23].mxu1 }
 0x189   :  { %v2974_v26 = vadd.f32 %v3825_v62, %v511_v48 }
 0x195   :  { %v3845_v6 = vpop.f32.mrb[24].mxu1 }
 0x196   :  { %v3846_v5 = vpop.f32.mrb[25].mxu1 }
 0x197   :  { %v3847_v9 = vadd.f32 %v3846_v5, %v3845_v6  ;;  %v3848_v10 = vpop.f32.mrb[26].mxu1 }
 0x198   :  { %v3849_v8 = vpop.f32.mrb[27].mxu1 }
 0x199   :  { %v3014_v53 = vadd.f32 %v3847_v9, %v2958_v45  ;;  %v3850_v12 = vadd.f32 %v3849_v8, %v3848_v10 }
 0x19b   :  { %v3017_v13 = vadd.f32 %v3850_v12, %v2961_v11 }
 0x19d   :  { %v3851_v15 = vpop.f32.mrb[28].mxu1 }
 0x19e   :  { %v3852_v16 = vpop.f32.mrb[29].mxu1 }
 0x19f   :  { %v3853_v17 = vadd.f32 %v3852_v16, %v3851_v15  ;;  %v3854_v24 = vpop.f32.mrb[30].mxu1 }
 0x1a0   :  { %v3855_v2 = vpop.f32.mrb[31].mxu1 }
 0x1a1   :  { %v3022_v21 = vadd.f32 %v3853_v17, %v2966_v4  ;;  %v3856_v7 = vadd.f32 %v3855_v2, %v3854_v24 }
 0x1a3   :  { %v3025_v22 = vadd.f32 %v3856_v7, %v2969_v20 }
 0x1a5   :  { %v3857_v23 = vpop.f32.mrb[32].mxu1 }
 0x1a6   :  { %v3858_v25 = vpop.f32.mrb[33].mxu1 }
 0x1a7   :  { %v3859_v14 = vadd.f32 %v3858_v25, %v3857_v23  ;;  %v3860_v35 = vpop.f32.mrb[34].mxu1 }
 0x1a8   :  { %v3861_v18 = vpop.f32.mrb[35].mxu1 }
 0x1a9   :  { %v3030_v57 = vadd.f32 %v3859_v14, %v2974_v26 }
 0x1b5   :  { %v3879_v33 = vpop.f32.mrb[36].mxu1 }
 0x1b6   :  { %v3880_v34 = vpop.f32.mrb[37].mxu1 }
 0x1b7   :  { %v3881_v29 = vadd.f32 %v3880_v34, %v3879_v33  ;;  %v3882_v43 = vpop.f32.mrb[38].mxu1 }
 0x1b8   :  { %v3883_v46 = vpop.f32.mrb[39].mxu1 }
 0x1b9   :  { %v3070_v49 = vadd.f32 %v3881_v29, %v3014_v53  ;;  %v3884_v40 = vadd.f32 %v3883_v46, %v3882_v43 }
 0x1bb   :  { %v3073_v50 = vadd.f32 %v3884_v40, %v3017_v13 }
 0x1bd   :  { %v3885_v51 = vpop.f32.mrb[40].mxu1 }
 0x1be   :  { %v3886_v54 = vpop.f32.mrb[41].mxu1 }
 0x1bf   :  { %v3887_v55 = vadd.f32 %v3886_v54, %v3885_v51  ;;  %v3888_v44 = vpop.f32.mrb[42].mxu1 }
 0x1c0   :  { %v3889_v41 = vpop.f32.mrb[43].mxu1 }
 0x1c1   :  { %v3078_v56 = vadd.f32 %v3887_v55, %v3022_v21  ;;  %v3890_v19 = vadd.f32 %v3889_v41, %v3888_v44 }
 0x1c3   :  { %v3081_v58 = vadd.f32 %v3890_v19, %v3025_v22  ;;  %v502_v19 = vsub.s32 0, %v5946_v3 }
 0x1c5   :  { %v3891_v52 = vpop.f32.mrb[44].mxu1 }
 0x1c6   :  { %v3892_v60 = vpop.f32.mrb[45].mxu1 }
 0x1c7   :  { %v3893_v28 = vadd.f32 %v3892_v60, %v3891_v52  ;;  %v3894_v62 = vpop.f32.mrb[46].mxu1  ;;  %v503_v52 = vrot.slane %v5952_v31, %v502_v19 }
 0x1c8   :  { %v3895_v61 = vpop.f32.mrb[47].mxu1 }
 0x1c9   :  { %v3086_v63 = vadd.f32 %v3893_v28, %v3030_v57  ;;  %v4049_v28 = vadd.f32 %v5913_v30, %v503_v52 }
 0x1d5   :  { %v3913_v1 = vpop.f32.mrb[48].mxu1 }
 0x1d6   :  { %v3914_v0 = vpop.f32.mrb[49].mxu1 }
 0x1d7   :  { %v3915_v48 = vadd.f32 %v3914_v0, %v3913_v1  ;;  %v3916_v6 = vpop.f32.mrb[50].mxu1  ;;  %v4053_v1 = vadd.f32 %v5918_v27, %v503_v52 }
 0x1d8   :  { %v3917_v5 = vpop.f32.mrb[51].mxu1 }
 0x1d9   :  { %v3126_v45 = vadd.f32 %v3915_v48, %v3070_v49  ;;  %v3918_v9 = vadd.f32 %v3917_v5, %v3916_v6 }
 0x1db   :  { %v3129_v10 = vadd.f32 %v3918_v9, %v3073_v50 }
 0x1dd   :  { %v3919_v8 = vpop.f32.mrb[52].mxu1 }
 0x1de   :  { %v3920_v11 = vpop.f32.mrb[53].mxu1 }
 0x1df   :  { %v3921_v53 = vadd.f32 %v3920_v11, %v3919_v8  ;;  %v3922_v12 = vpop.f32.mrb[54].mxu1 }
 0x1e0   :  { %v3923_v13 = vpop.f32.mrb[55].mxu1 }
 0x1e1   :  { %v3134_v15 = vadd.f32 %v3921_v53, %v3078_v56  ;;  %v3924_v16 = vadd.f32 %v3923_v13, %v3922_v12 }
 0x1e3   :  { %v3137_v4 = vadd.f32 %v3924_v16, %v3081_v58  ;;  %v506_v58 = vsub.s32 1, %v5946_v3 }
 0x1e5   :  { %v3925_v17 = vpop.f32.mrb[56].mxu1  ;;  %v507_v60 = vrot.slane %v5952_v31, %v506_v58 }
 0x1e6   :  { %v3926_v24 = vpop.f32.mrb[57].mxu1 }
 0x1e7   :  { %v3927_v2 = vadd.f32 %v3926_v24, %v3925_v17  ;;  %v3928_v20 = vpop.f32.mrb[58].mxu1  ;;  %v4051_v62 = vadd.f32 %v5916_v32, %v507_v60  ;;  %v4055_v5 = vadd.f32 %v5923_v59, %v507_v60  ;;  %v4057_v59 = vadd.f32 %v5931_v36, %v503_v52 }
 0x1e8   :  { %v3929_v21 = vpop.f32.mrb[59].mxu1  ;;  %v4059_v17 = vadd.f32 %v5933_v37, %v507_v60 }
 0x1e9   :  { %v3142_v7 = vadd.f32 %v3927_v2, %v3086_v63  ;;  %v4061_v21 = vadd.f32 %v5935_v38, %v503_v52 }
 0x1f5   :  { %v3947_v22 = vpop.f32.mrb[60].mxu1 }
 0x1f6   :  { %v3948_v23 = vpop.f32.mrb[61].mxu1 }
 0x1f7   :  { %v3949_v25 = vadd.f32 %v3948_v23, %v3947_v22  ;;  %v3950_v26 = vpop.f32.mrb[62].mxu1 }
 0x1f8   :  { %v3951_v14 = vpop.f32.mrb[63].mxu1 }
 0x1f9   :  { %v3182_v35 = vadd.f32 %v3949_v25, %v3126_v45  ;;  %v3952_v18 = vadd.f32 %v3951_v14, %v3950_v26  ;;  %v4063_v25 = vadd.f32 %v5937_v47, %v507_v60 }
 0x1fb   :  { %v3185_v57 = vadd.f32 %v3952_v18, %v3129_v10 }
 0x1fd   :  { %v3953_v33 = vpop.f32.mrb[64].mxu1 }
 0x1fe   :  { %v3954_v34 = vpop.f32.mrb[65].mxu1 }
 0x1ff   :  { %v3955_v29 = vadd.f32 %v3954_v34, %v3953_v33  ;;  %v3956_v43 = vpop.f32.mrb[66].mxu1 }
 0x200   :  { %v3957_v46 = vpop.f32.mrb[67].mxu1 }
 0x201   :  { %v3190_v49 = vadd.f32 %v3955_v29, %v3134_v15  ;;  %v3958_v40 = vadd.f32 %v3957_v46, %v3956_v43 }
 0x203   :  { %v5955_v50 = vadd.f32 %v3958_v40, %v3137_v4 }
 0x205   :  { %v3959_v51 = vpop.f32.mrb[68].mxu1 }
 0x206   :  { %v3960_v54 = vpop.f32.mrb[69].mxu1 }
 0x207   :  { %v3961_v55 = vadd.f32 %v3960_v54, %v3959_v51  ;;  %v3962_v44 = vpop.f32.mrb[70].mxu1  ;;  %v4065_v54 = vadd.f32 %v5941_v39, %v503_v52 }
 0x208   :  { %v3963_v41 = vpop.f32.mrb[71].mxu1 }
 0x209   :  { %v5957_v56 = vadd.f32 %v3961_v55, %v3142_v7  ;;  %v4067_v55 = vadd.f32 %v5943_v42, %v507_v60 }
 0x215   :  { %v3981_v63 = vpop.f32.mrb[72].mxu1 }
 0x216   :  { %v2896_v61 = vpop.f32.mrb[0].mxu0  ;;  %v3982_v6 = vpop.f32.mrb[73].mxu1 }
 0x217   :  { %v4050_v0 = vadd.f32 %v4049_v28, %v2896_v61  ;;  %v2898_v48 = vpop.f32.mrb[1].mxu0  ;;  %v3983_v9 = vadd.f32 %v3982_v6, %v3981_v63  ;;  %v3984_v10 = vpop.f32.mrb[74].mxu1 }
 0x218   :  { %v4052_v45 = vadd.f32 %v4051_v62, %v2898_v48  ;;  %v2900_v3 = vpop.f32.mrb[2].mxu0  ;;  %v3985_v53 = vpop.f32.mrb[75].mxu1 }
 0x219   :  { %v3315_v8 = vmax.f32 %v4050_v0, 0.0  ;;  %v4054_v11 = vadd.f32 %v4053_v1, %v2900_v3  ;;  %v2902_v31 = vpop.f32.mrb[3].mxu0  ;;  %v5967_v12 = vadd.f32 %v3983_v9, %v3182_v35  ;;  %v3986_v13 = vadd.f32 %v3985_v53, %v3984_v10 }
 0x21a   :  { %v3316_v30 = vmax.f32 %v4052_v45, 0.0  ;;  %v4056_v32 = vadd.f32 %v4055_v5, %v2902_v31 }
 0x21b   :  { %v3318_v15 = vmax.f32 %v4054_v11, 0.0  ;;  %v5969_v4 = vadd.f32 %v3986_v13, %v3185_v57 }
 0x21c   :  { %v3785_v27 = vpack.c.bf16 %v3316_v30, %v3315_v8  ;;  %v3319_v16 = vmax.f32 %v4056_v32, 0.0 }
 0x21d   :  { %v3987_v20 = vpop.f32.mrb[76].mxu1 }
 0x21e   :  { %3383 = vst [vmem:[%s6014_s3] sm:$0xff] %v3785_v27  ;;  %v3787_v24 = vpack.c.bf16 %v3319_v16, %v3318_v15  ;;  %v2906_v2 = vpop.f32.mrb[4].mxu0  ;;  %v3988_v23 = vpop.f32.mrb[77].mxu1 }
 0x21f   :  { %v4058_v7 = vadd.f32 %v4057_v59, %v2906_v2  ;;  %v2908_v22 = vpop.f32.mrb[5].mxu0  ;;  %v3989_v37 = vadd.f32 %v3988_v23, %v3987_v20  ;;  %v3990_v14 = vpop.f32.mrb[78].mxu1 }
 0x220   :  { %3385 = vst [vmem:[%s6014_s3 + $0xc] sm:$0xff] %v3787_v24  ;;  %v4060_v36 = vadd.f32 %v4059_v17, %v2908_v22  ;;  %v2910_v26 = vpop.f32.mrb[6].mxu0  ;;  %v3991_v33 = vpop.f32.mrb[79].mxu1 }
 0x221   :  { %v3321_v35 = vmax.f32 %v4058_v7, 0.0  ;;  %v4062_v18 = vadd.f32 %v4061_v21, %v2910_v26  ;;  %v2912_v57 = vpop.f32.mrb[7].mxu0  ;;  %v3246_v29 = vadd.f32 %v3989_v37, %v3190_v49  ;;  %v3992_v43 = vadd.f32 %v3991_v33, %v3990_v14 }
 0x222   :  { %v3322_v34 = vmax.f32 %v4060_v36, 0.0  ;;  %v4064_v38 = vadd.f32 %v4063_v25, %v2912_v57 }
 0x223   :  { %v3324_v46 = vmax.f32 %v4062_v18, 0.0  ;;  %v3249_v47 = vadd.f32 %v3992_v43, %v5955_v50 }
 0x224   :  { %v3789_v40 = vpack.c.bf16 %v3322_v34, %v3321_v35  ;;  %v3325_v51 = vmax.f32 %v4064_v38, 0.0 }
 0x225   :  { %v3993_v19 = vpop.f32.mrb[80].mxu1 }
 0x226   :  { %3387 = vst [vmem:[%s6014_s3 + $0x18] sm:$0xff] %v3789_v40  ;;  %v3791_v44 = vpack.c.bf16 %v3325_v51, %v3324_v46  ;;  %v2916_v41 = vpop.f32.mrb[8].mxu0  ;;  %v3994_v28 = vpop.f32.mrb[81].mxu1 }
 0x227   :  { %v4066_v58 = vadd.f32 %v4065_v54, %v2916_v41  ;;  %v2918_v49 = vpop.f32.mrb[9].mxu0  ;;  %v3995_v50 = vadd.f32 %v3994_v28, %v3993_v19  ;;  %v3996_v39 = vpop.f32.mrb[82].mxu1 }
 0x228   :  { %3389 = vst [vmem:[%s6014_s3 + $0x24] sm:$0xff] %v3791_v44  ;;  %v4068_v62 = vadd.f32 %v4067_v55, %v2918_v49  ;;  %v2920_v61 = vpop.f32.mrb[10].mxu0  ;;  %v3997_v60 = vpop.f32.mrb[83].mxu1 }
 0x229   :  { %v3327_v52 = vmax.f32 %v4066_v58, 0.0  ;;  %v2921_v42 = vpop.f32.mrb[11].mxu0  ;;  %v3254_v1 = vadd.f32 %v3995_v50, %v5957_v56 }
 0x22a   :  { %v3328_v63 = vmax.f32 %v4068_v62, 0.0 }
 0x22c   :  { %v3793_v0 = vpack.c.bf16 %v3328_v63, %v3327_v52 }
 0x22e   :  { %3391 = vst [vmem:[%s6014_s3 + $0x30] sm:$0xff] %v3793_v0 }
 0x235   :  { %v4027_v6 = vpop.f32.mrb[84].mxu1 }
 0x236   :  { %v4015_v48 = vpop.f32.mrb[12].mxu0  ;;  %v4028_v45 = vpop.f32.mrb[85].mxu1 }
 0x237   :  { %v4016_v5 = vpop.f32.mrb[13].mxu0  ;;  %v4029_v3 = vadd.f32 %v4028_v45, %v4027_v6  ;;  %v4030_v8 = vpop.f32.mrb[86].mxu1 }
 0x238   :  { %v4017_v9 = vadd.f32 %v4016_v5, %v4015_v48  ;;  %v4018_v10 = vpop.f32.mrb[14].mxu0  ;;  %v4031_v31 = vpop.f32.mrb[87].mxu1 }
 0x239   :  { %v4019_v11 = vpop.f32.mrb[15].mxu0  ;;  %v3310_v30 = vadd.f32 %v4029_v3, %v3254_v1 }
 0x23a   :  { %v3294_v53 = vadd.f32 %v4017_v9, %v5967_v12  ;;  %v4020_v32 = vadd.f32 %v4019_v11, %v4018_v10 }
 0x23b   :  { %v3329_v13 = vmax.f32 %v3310_v30, 0.0 }
 0x23c   :  { %v3317_v56 = vmax.f32 %v3294_v53, 0.0  ;;  %v3297_v15 = vadd.f32 %v4020_v32, %v5969_v4 }
 0x23d   :  { %v3794_v16 = vpack.c.bf16 %v3329_v13, %v3329_v13 }
 0x23e   :  { %v3786_v27 = vpack.c.bf16 %v3317_v56, %v3317_v56  ;;  %v3320_v59 = vmax.f32 %v3297_v15, 0.0  ;;  %v4021_v17 = vpop.f32.mrb[16].mxu0 }
 0x23f   :  { %v4022_v24 = vpop.f32.mrb[17].mxu0  ;;  %3392 = vst [vmem:[%s6014_s3 + $0x38] sm:$0xf] %v3794_v16 }
 0x240   :  { %3384 = vst [vmem:[%s6014_s3 + $0x8] sm:$0xf] %v3786_v27  ;;  %v3788_v12 = vpack.c.bf16 %v3320_v59, %v3320_v59  ;;  %v4023_v2 = vadd.f32 %v4022_v24, %v4021_v17  ;;  %v4024_v20 = vpop.f32.mrb[18].mxu0 }
 0x241   :  { %v4025_v21 = vpop.f32.mrb[19].mxu0 }
 0x242   :  { %3386 = vst [vmem:[%s6014_s3 + $0x14] sm:$0xf] %v3788_v12  ;;  %v3302_v4 = vadd.f32 %v4023_v2, %v3246_v29  ;;  %v4026_v7 = vadd.f32 %v4025_v21, %v4024_v20 }
 0x244   :  { %v3323_v22 = vmax.f32 %v3302_v4, 0.0  ;;  %v3305_v23 = vadd.f32 %v4026_v7, %v3249_v47 }
 0x246   :  { %v3790_v25 = vpack.c.bf16 %v3323_v22, %v3323_v22  ;;  %v3326_v36 = vmax.f32 %v3305_v23, 0.0 }
 0x248   :  { %3388 = vst [vmem:[%s6014_s3 + $0x20] sm:$0xf] %v3790_v25  ;;  %v3792_v37 = vpack.c.bf16 %v3326_v36, %v3326_v36 }
 0x24a   :  { %3390 = vst [vmem:[%s6014_s3 + $0x2c] sm:$0xf] %v3792_v37 }

// kernel: _lambda_.9
= control target key start
LH: loop header
LB: loop body
LE: loop exit
PB: predicated region body
PF: predicated region fallthrough
CT: control target
= control target key end

     0   :  { %s6943_s1 = inlined_call_operand.vmem [shape: bf16[3456,256], index: 1, kind: input, shape index: {}]   ;;  %s6944_s0 = inlined_call_operand.vmem [shape: bf16[40,3456], index: 0, kind: input, shape index: {}]   ;;  %s6945_s2 = inlined_call_operand.vmem [shape: f32[1,256], index: 2, kind: input, shape index: {}]   ;;  %s6946_s3 = inlined_call_operand.vmem [shape: bf16[40,256], index: 3, kind: output, shape index: {}]  }
   0x1   :  { %v4649_v0 = vld [vmem:[%s6943_s1 + $0x4] ss:$8 sps:$4 sm:$0xff]   ;;  %v4653_v2 = vld [vmem:[%s6943_s1] ss:$8 sps:$4 sm:$0xff]   ;;  %v4655_v4 = vld [vmem:[%s6943_s1 + $0x14] ss:$8 sps:$4 sm:$0xff]  }
   0x2   :  { %v4651_v1 = vld [vmem:[%s6943_s1 + $0x704] ss:$8 sps:$4 sm:$0xff]   ;;  %3056 = vmatprep.subr.bf16.mxu1 %v4649_v0  ;;  %v4654_v3 = vld [vmem:[%s6943_s1 + $0x700] ss:$8 sps:$4 sm:$0xff]   ;;  %v4657_v5 = vld [vmem:[%s6943_s1 + $0x714] ss:$8 sps:$4 sm:$0xff]  }
   0x3   :  { %3483 = vmatprep.subr.bf16.mxu0 %v4651_v1  ;;  %3057 = vmatpush1.bf16.msra.mxu1 %v4653_v2  ;;  %v4659_v6 = vld [vmem:[%s6943_s1 + $0x10] ss:$8 sps:$4 sm:$0xff]   ;;  %v4661_v8 = vld [vmem:[%s6943_s1 + $0x24] ss:$8 sps:$4 sm:$0xff]   ;;  %v4665_v10 = vld [vmem:[%s6943_s1 + $0x20] ss:$8 sps:$4 sm:$0xff]  }
   0x4   :  { %3484 = vmatpush1.bf16.msra.mxu0 %v4654_v3  ;;  %3058 = vmatprep.subr.bf16.mxu1 %v4655_v4  ;;  %v4660_v7 = vld [vmem:[%s6943_s1 + $0x710] ss:$8 sps:$4 sm:$0xff]   ;;  %v4663_v9 = vld [vmem:[%s6943_s1 + $0x724] ss:$8 sps:$4 sm:$0xff]   ;;  %v4666_v11 = vld [vmem:[%s6943_s1 + $0x720] ss:$8 sps:$4 sm:$0xff]  }
   0x5   :  { %3485 = vmatprep.subr.bf16.mxu0 %v4657_v5  ;;  %v4667_v12 = vld [vmem:[%s6943_s1 + $0x34] ss:$8 sps:$4 sm:$0xff]   ;;  %v4671_v14 = vld [vmem:[%s6943_s1 + $0x30] ss:$8 sps:$4 sm:$0xff]   ;;  %v4673_v16 = vld [vmem:[%s6943_s1 + $0x44] ss:$8 sps:$4 sm:$0xff]  }
   0x6   :  { %v4669_v13 = vld [vmem:[%s6943_s1 + $0x734] ss:$8 sps:$4 sm:$0xff]   ;;  %v4672_v15 = vld [vmem:[%s6943_s1 + $0x730] ss:$8 sps:$4 sm:$0xff]   ;;  %v4675_v17 = vld [vmem:[%s6943_s1 + $0x744] ss:$8 sps:$4 sm:$0xff]  }
   0x7   :  { %3059 = vmatpush1.bf16.msra.mxu1 %v4659_v6  ;;  %v4677_v18 = vld [vmem:[%s6943_s1 + $0x40] ss:$8 sps:$4 sm:$0xff]   ;;  %v4679_v20 = vld [vmem:[%s6943_s1 + $0x54] ss:$8 sps:$4 sm:$0xff]   ;;  %v4683_v22 = vld [vmem:[%s6943_s1 + $0x50] ss:$8 sps:$4 sm:$0xff]  }
   0x8   :  { %3486 = vmatpush1.bf16.msra.mxu0 %v4660_v7  ;;  %3060 = vmatprep.subr.bf16.mxu1 %v4661_v8  ;;  %v4678_v19 = vld [vmem:[%s6943_s1 + $0x740] ss:$8 sps:$4 sm:$0xff]   ;;  %v4681_v21 = vld [vmem:[%s6943_s1 + $0x754] ss:$8 sps:$4 sm:$0xff]   ;;  %v4684_v23 = vld [vmem:[%s6943_s1 + $0x750] ss:$8 sps:$4 sm:$0xff]  }
   0x9   :  { %3487 = vmatprep.subr.bf16.mxu0 %v4663_v9  ;;  %v4685_v24 = vld [vmem:[%s6943_s1 + $0x64] ss:$8 sps:$4 sm:$0xff]   ;;  %v4689_v26 = vld [vmem:[%s6943_s1 + $0x60] ss:$8 sps:$4 sm:$0xff]   ;;  %v4691_v28 = vld [vmem:[%s6943_s1 + $0x74] ss:$8 sps:$4 sm:$0xff]  }
   0xa   :  { %v4687_v25 = vld [vmem:[%s6943_s1 + $0x764] ss:$8 sps:$4 sm:$0xff]   ;;  %v4690_v27 = vld [vmem:[%s6943_s1 + $0x760] ss:$8 sps:$4 sm:$0xff]   ;;  %v4693_v29 = vld [vmem:[%s6943_s1 + $0x774] ss:$8 sps:$4 sm:$0xff]  }
   0xb   :  { %3061 = vmatpush1.bf16.msra.mxu1 %v4665_v10  ;;  %v4695_v30 = vld [vmem:[%s6943_s1 + $0x70] ss:$8 sps:$4 sm:$0xff]   ;;  %v4697_v32 = vld [vmem:[%s6943_s1 + $0x84] ss:$8 sps:$4 sm:$0xff]   ;;  %v4701_v34 = vld [vmem:[%s6943_s1 + $0x80] ss:$8 sps:$4 sm:$0xff]  }
   0xc   :  { %3488 = vmatpush1.bf16.msra.mxu0 %v4666_v11  ;;  %3062 = vmatprep.subr.bf16.mxu1 %v4667_v12  ;;  %v4696_v31 = vld [vmem:[%s6943_s1 + $0x770] ss:$8 sps:$4 sm:$0xff]   ;;  %v4699_v33 = vld [vmem:[%s6943_s1 + $0x784] ss:$8 sps:$4 sm:$0xff]   ;;  %v4702_v35 = vld [vmem:[%s6943_s1 + $0x780] ss:$8 sps:$4 sm:$0xff]  }
   0xd   :  { %3489 = vmatprep.subr.bf16.mxu0 %v4669_v13  ;;  %v4703_v36 = vld [vmem:[%s6943_s1 + $0x94] ss:$8 sps:$4 sm:$0xff]   ;;  %v4707_v38 = vld [vmem:[%s6943_s1 + $0x90] ss:$8 sps:$4 sm:$0xff]   ;;  %v4709_v40 = vld [vmem:[%s6943_s1 + $0xa4] ss:$8 sps:$4 sm:$0xff]  }
   0xe   :  { %v4705_v37 = vld [vmem:[%s6943_s1 + $0x794] ss:$8 sps:$4 sm:$0xff]   ;;  %v4708_v39 = vld [vmem:[%s6943_s1 + $0x790] ss:$8 sps:$4 sm:$0xff]   ;;  %v4711_v41 = vld [vmem:[%s6943_s1 + $0x7a4] ss:$8 sps:$4 sm:$0xff]  }
   0xf   :  { %3063 = vmatpush1.bf16.msra.mxu1 %v4671_v14  ;;  %v4713_v42 = vld [vmem:[%s6943_s1 + $0xa0] ss:$8 sps:$4 sm:$0xff]   ;;  %v4715_v44 = vld [vmem:[%s6943_s1 + $0xb4] ss:$8 sps:$4 sm:$0xff]   ;;  %v4719_v46 = vld [vmem:[%s6943_s1 + $0xb0] ss:$8 sps:$4 sm:$0xff]  }
  0x10   :  { %3490 = vmatpush1.bf16.msra.mxu0 %v4672_v15  ;;  %3064 = vmatprep.subr.bf16.mxu1 %v4673_v16  ;;  %v4714_v43 = vld [vmem:[%s6943_s1 + $0x7a0] ss:$8 sps:$4 sm:$0xff]   ;;  %v4717_v45 = vld [vmem:[%s6943_s1 + $0x7b4] ss:$8 sps:$4 sm:$0xff]   ;;  %v4720_v47 = vld [vmem:[%s6943_s1 + $0x7b0] ss:$8 sps:$4 sm:$0xff]  }
  0x11   :  { %3491 = vmatprep.subr.bf16.mxu0 %v4675_v17  ;;  %v4747_v48 = vld [vmem:[%s6944_s0 + $0x4] ss:$108 sps:$4 sm:$0xff]   ;;  %v4753_v51 = vld [vmem:[%s6944_s0 + $0x3c] ss:$108 sps:$4 sm:$0xff]   ;;  %v4745_v4 = vld [vmem:[%s6944_s0] ss:$108 sps:$4 sm:$0xff]  }
  0x12   :  { %v4721_v49 = vld [vmem:[%s6943_s1 + $0xc4] ss:$8 sps:$4 sm:$0xff]   ;;  %3088 = vmatprep.mubr.bf16.mxu1 %v4747_v48  ;;  %v4725_v52 = vld [vmem:[%s6943_s1 + $0xc0] ss:$8 sps:$4 sm:$0xff]   ;;  %v4727_v54 = vld [vmem:[%s6943_s1 + $0xd4] ss:$8 sps:$4 sm:$0xff]   ;;  %3515 = vmatprep.mubr.bf16.mxu0 %v4753_v51 }
  0x13   :  { %3065 = vmatpush1.bf16.msra.mxu1 %v4677_v18  ;;  %v4723_v50 = vld [vmem:[%s6943_s1 + $0x7c4] ss:$8 sps:$4 sm:$0xff]   ;;  %v4726_v53 = vld [vmem:[%s6943_s1 + $0x7c0] ss:$8 sps:$4 sm:$0xff]   ;;  %v4729_v55 = vld [vmem:[%s6943_s1 + $0x7d4] ss:$8 sps:$4 sm:$0xff]  }
  0x14   :  { %3492 = vmatpush1.bf16.msra.mxu0 %v4678_v19  ;;  %3066 = vmatprep.subr.bf16.mxu1 %v4679_v20  ;;  %v4731_v56 = vld [vmem:[%s6943_s1 + $0xd0] ss:$8 sps:$4 sm:$0xff]   ;;  %v4733_v58 = vld [vmem:[%s6943_s1 + $0xe4] ss:$8 sps:$4 sm:$0xff]   ;;  %v4737_v60 = vld [vmem:[%s6943_s1 + $0xe0] ss:$8 sps:$4 sm:$0xff]  }
  0x15   :  { %3493 = vmatprep.subr.bf16.mxu0 %v4681_v21  ;;  %v4732_v57 = vld [vmem:[%s6943_s1 + $0x7d0] ss:$8 sps:$4 sm:$0xff]   ;;  %v4735_v59 = vld [vmem:[%s6943_s1 + $0x7e4] ss:$8 sps:$4 sm:$0xff]   ;;  %v4738_v61 = vld [vmem:[%s6943_s1 + $0x7e0] ss:$8 sps:$4 sm:$0xff]  }
  0x16   :  { %v4739_v62 = vld [vmem:[%s6943_s1 + $0xf4] ss:$8 sps:$4 sm:$0xff]   ;;  %v4743_v0 = vld [vmem:[%s6943_s1 + $0xf0] ss:$8 sps:$4 sm:$0xff]   ;;  %v4750_v2 = vld [vmem:[%s6943_s1 + $0x104] ss:$8 sps:$4 sm:$0xff]  }
  0x17   :  { %3067 = vmatpush1.bf16.msra.mxu1 %v4683_v22  ;;  %v4741_v63 = vld [vmem:[%s6943_s1 + $0x7f4] ss:$8 sps:$4 sm:$0xff]   ;;  %v4744_v1 = vld [vmem:[%s6943_s1 + $0x7f0] ss:$8 sps:$4 sm:$0xff]   ;;  %v4756_v3 = vld [vmem:[%s6943_s1 + $0x804] ss:$8 sps:$4 sm:$0xff]  }
  0x18   :  { %3494 = vmatpush1.bf16.msra.mxu0 %v4684_v23  ;;  %3068 = vmatprep.subr.bf16.mxu1 %v4685_v24  ;;  %v4748_v5 = vld [vmem:[%s6943_s1 + $0x100] ss:$8 sps:$4 sm:$0xff]   ;;  %v4751_v6 = vld [vmem:[%s6944_s0 + $0x38] ss:$108 sps:$4 sm:$0xff]   ;;  %v4759_v8 = vld [vmem:[%s6943_s1 + $0x114] ss:$8 sps:$4 sm:$0xff]  }
  0x19   :  { %3495 = vmatprep.subr.bf16.mxu0 %v4687_v25  ;;  %v4754_v7 = vld [vmem:[%s6943_s1 + $0x800] ss:$8 sps:$4 sm:$0xff]   ;;  %v4762_v9 = vld [vmem:[%s6943_s1 + $0x814] ss:$8 sps:$4 sm:$0xff]   ;;  %v4757_v10 = vld [vmem:[%s6943_s1 + $0x110] ss:$8 sps:$4 sm:$0xff]  }
  0x1a   :  { %v4760_v11 = vld [vmem:[%s6943_s1 + $0x810] ss:$8 sps:$4 sm:$0xff]   ;;  %v4765_v12 = vld [vmem:[%s6943_s1 + $0x124] ss:$8 sps:$4 sm:$0xff]   ;;  %v4763_v14 = vld [vmem:[%s6943_s1 + $0x120] ss:$8 sps:$4 sm:$0xff]  }
  0x1b   :  { %3069 = vmatpush1.bf16.msra.mxu1 %v4689_v26  ;;  %v4768_v13 = vld [vmem:[%s6943_s1 + $0x824] ss:$8 sps:$4 sm:$0xff]   ;;  %v4766_v15 = vld [vmem:[%s6943_s1 + $0x820] ss:$8 sps:$4 sm:$0xff]   ;;  %v4771_v16 = vld [vmem:[%s6943_s1 + $0x134] ss:$8 sps:$4 sm:$0xff]  }
  0x1c   :  { %3496 = vmatpush1.bf16.msra.mxu0 %v4690_v27  ;;  %3070 = vmatprep.subr.bf16.mxu1 %v4691_v28  ;;  %v4774_v17 = vld [vmem:[%s6943_s1 + $0x834] ss:$8 sps:$4 sm:$0xff]   ;;  %v4769_v18 = vld [vmem:[%s6943_s1 + $0x130] ss:$8 sps:$4 sm:$0xff]   ;;  %v4777_v20 = vld [vmem:[%s6943_s1 + $0x144] ss:$8 sps:$4 sm:$0xff]  }
  0x1d   :  { %3497 = vmatprep.subr.bf16.mxu0 %v4693_v29  ;;  %v4772_v19 = vld [vmem:[%s6943_s1 + $0x830] ss:$8 sps:$4 sm:$0xff]   ;;  %v4780_v21 = vld [vmem:[%s6943_s1 + $0x844] ss:$8 sps:$4 sm:$0xff]   ;;  %v4823_v22 = vld [vmem:[%s6944_s0 + $0xdc] ss:$108 sps:$4 sm:$0xff]  }
  0x1e   :  { %v4775_v23 = vld [vmem:[%s6943_s1 + $0x140] ss:$8 sps:$4 sm:$0xff]   ;;  %v4783_v26 = vld [vmem:[%s6943_s1 + $0x154] ss:$8 sps:$4 sm:$0xff]   ;;  %v4833_v28 = vld [vmem:[%s6944_s0 + $0xd8] ss:$108 sps:$4 sm:$0xff]  }
  0x1f   :  { %3071 = vmatpush1.bf16.msra.mxu1 %v4695_v30  ;;  %v4778_v24 = vld [vmem:[%s6943_s1 + $0x840] ss:$8 sps:$4 sm:$0xff]   ;;  %v4786_v27 = vld [vmem:[%s6943_s1 + $0x854] ss:$8 sps:$4 sm:$0xff]   ;;  %v4781_v30 = vld [vmem:[%s6943_s1 + $0x150] ss:$8 sps:$4 sm:$0xff]  }
  0x20   :  { %3498 = vmatpush1.bf16.msra.mxu0 %v4696_v31  ;;  %3072 = vmatprep.subr.bf16.mxu1 %v4697_v32  ;;  %v4828_v25 = vld [vmem:[%s6944_s0 + $0x114] ss:$108 sps:$4 sm:$0xff]   ;;  %v4834_v29 = vld [vmem:[%s6944_s0 + $0x110] ss:$108 sps:$4 sm:$0xff]   ;;  %v4789_v32 = vld [vmem:[%s6943_s1 + $0x164] ss:$8 sps:$4 sm:$0xff]  }
  0x21   :  { %3499 = vmatprep.subr.bf16.mxu0 %v4699_v33  ;;  %v4784_v31 = vld [vmem:[%s6943_s1 + $0x850] ss:$8 sps:$4 sm:$0xff]   ;;  %v4792_v33 = vld [vmem:[%s6943_s1 + $0x864] ss:$8 sps:$4 sm:$0xff]   ;;  %v4802_v51 = vld [vmem:[%s6943_s1 + $0x880] ss:$8 sps:$4 sm:$0xff]  }
  0x22   :  { %v4804_v48 = vld [vmem:[%s6943_s1 + $0x884] ss:$8 sps:$4 sm:$0xff]  }
  0x23   :  { %3073 = vmatpush1.bf16.msra.mxu1 %v4701_v34  ;;  %v71_v34 = vld [vmem:[%s6944_s0 + $0x1b0] sm:$0xff] }
  0x24   :  { %3500 = vmatpush1.bf16.msra.mxu0 %v4702_v35  ;;  %3074 = vmatprep.subr.bf16.mxu1 %v4703_v36  ;;  %v4016_v35 = vcombine.high %v71_v34, %v71_v34  ;;  %v78_v36 = vld [vmem:[%s6944_s0 + $0x1e8] sm:$0xff] }
  0x25   :  { %3501 = vmatprep.subr.bf16.mxu0 %v4705_v37  ;;  %v4787_v37 = vld [vmem:[%s6943_s1 + $0x160] ss:$8 sps:$4 sm:$0xff]  }
  0x27   :  { %3075 = vmatpush1.bf16.msra.mxu1 %v4707_v38  ;;  %v4790_v38 = vld [vmem:[%s6943_s1 + $0x860] ss:$8 sps:$4 sm:$0xff]  }
  0x28   :  { %3502 = vmatpush1.bf16.msra.mxu0 %v4708_v39  ;;  %3076 = vmatprep.subr.bf16.mxu1 %v4709_v40  ;;  %v4030_v39 = vcombine.high %v78_v36, %v78_v36  ;;  %v4795_v40 = vld [vmem:[%s6943_s1 + $0x174] ss:$8 sps:$4 sm:$0xff]  }
  0x29   :  { %3503 = vmatprep.subr.bf16.mxu0 %v4711_v41  ;;  %v4798_v41 = vld [vmem:[%s6943_s1 + $0x874] ss:$8 sps:$4 sm:$0xff]  }
  0x2b   :  { %3077 = vmatpush1.bf16.msra.mxu1 %v4713_v42  ;;  %v4015_v42 = vcombine.low %v71_v34, %v71_v34  ;;  %v72_v34 = vld [vmem:[%s6944_s0 + $0x1b8] sm:$0xff] }
  0x2c   :  { %3504 = vmatpush1.bf16.msra.mxu0 %v4714_v43  ;;  %3078 = vmatprep.subr.bf16.mxu1 %v4715_v44  ;;  %v4029_v43 = vcombine.low %v78_v36, %v78_v36  ;;  %v4793_v44 = vld [vmem:[%s6943_s1 + $0x170] ss:$8 sps:$4 sm:$0xff]   ;;  %v4883_v36 = vld [vmem:[%s6943_s1 + $0x234] ss:$8 sps:$4 sm:$0xff]  }
  0x2d   :  { %3505 = vmatprep.subr.bf16.mxu0 %v4717_v45  ;;  %v4796_v45 = vld [vmem:[%s6943_s1 + $0x870] ss:$8 sps:$4 sm:$0xff]  }
  0x2f   :  { %3079 = vmatpush1.bf16.msra.mxu1 %v4719_v46  ;;  %v4859_v46 = vld [vmem:[%s6944_s0 + $0xc] ss:$108 sps:$4 sm:$0xff]  }
  0x30   :  { %3506 = vmatpush1.bf16.msra.mxu0 %v4720_v47  ;;  %3080 = vmatprep.subr.bf16.mxu1 %v4721_v49  ;;  %v4801_v47 = vld [vmem:[%s6943_s1 + $0x184] ss:$8 sps:$4 sm:$0xff]  }
  0x31   :  { %3507 = vmatprep.subr.bf16.mxu0 %v4723_v50  ;;  %v4865_v49 = vld [vmem:[%s6944_s0 + $0x44] ss:$108 sps:$4 sm:$0xff]   ;;  %v4799_v50 = vld [vmem:[%s6943_s1 + $0x180] ss:$8 sps:$4 sm:$0xff]  }
  0x33   :  { %3081 = vmatpush1.bf16.msra.mxu1 %v4725_v52  ;;  %v4807_v52 = vld [vmem:[%s6943_s1 + $0x194] ss:$8 sps:$4 sm:$0xff]  }
  0x34   :  { %3508 = vmatpush1.bf16.msra.mxu0 %v4726_v53  ;;  %3082 = vmatprep.subr.bf16.mxu1 %v4727_v54  ;;  %v4810_v53 = vld [vmem:[%s6943_s1 + $0x894] ss:$8 sps:$4 sm:$0xff]   ;;  %v4805_v54 = vld [vmem:[%s6943_s1 + $0x190] ss:$8 sps:$4 sm:$0xff]  }
  0x35   :  { %3509 = vmatprep.subr.bf16.mxu0 %v4729_v55  ;;  %v4808_v55 = vld [vmem:[%s6943_s1 + $0x890] ss:$8 sps:$4 sm:$0xff]  }
  0x37   :  { %3083 = vmatpush1.bf16.msra.mxu1 %v4731_v56  ;;  %v4813_v56 = vld [vmem:[%s6943_s1 + $0x1a4] ss:$8 sps:$4 sm:$0xff]  }
  0x38   :  { %3510 = vmatpush1.bf16.msra.mxu0 %v4732_v57  ;;  %3084 = vmatprep.subr.bf16.mxu1 %v4733_v58  ;;  %v4816_v57 = vld [vmem:[%s6943_s1 + $0x8a4] ss:$8 sps:$4 sm:$0xff]   ;;  %v4811_v58 = vld [vmem:[%s6943_s1 + $0x1a0] ss:$8 sps:$4 sm:$0xff]  }
  0x39   :  { %3511 = vmatprep.subr.bf16.mxu0 %v4735_v59  ;;  %v4814_v59 = vld [vmem:[%s6943_s1 + $0x8a0] ss:$8 sps:$4 sm:$0xff]  }
  0x3b   :  { %3085 = vmatpush1.bf16.msra.mxu1 %v4737_v60  ;;  %v4819_v60 = vld [vmem:[%s6943_s1 + $0x1b4] ss:$8 sps:$4 sm:$0xff]  }
  0x3c   :  { %3512 = vmatpush1.bf16.msra.mxu0 %v4738_v61  ;;  %3086 = vmatprep.subr.bf16.mxu1 %v4739_v62  ;;  %v4822_v61 = vld [vmem:[%s6943_s1 + $0x8b4] ss:$8 sps:$4 sm:$0xff]   ;;  %v4817_v62 = vld [vmem:[%s6943_s1 + $0x1b0] ss:$8 sps:$4 sm:$0xff]  }
  0x3d   :  { %3513 = vmatprep.subr.bf16.mxu0 %v4741_v63  ;;  %v4820_v63 = vld [vmem:[%s6943_s1 + $0x8b0] ss:$8 sps:$4 sm:$0xff]  }
  0x3f   :  { %3087 = vmatpush1.bf16.msra.mxu1 %v4743_v0  ;;  %v4827_v0 = vld [vmem:[%s6943_s1 + $0x1c4] ss:$8 sps:$4 sm:$0xff]  }
  0x40   :  { %3514 = vmatpush1.bf16.msra.mxu0 %v4744_v1  ;;  %3117 = vmatprep.subr.bf16.mxu1 %v4750_v2  ;;  %v4832_v1 = vld [vmem:[%s6943_s1 + $0x8c4] ss:$8 sps:$4 sm:$0xff]   ;;  %v4825_v2 = vld [vmem:[%s6943_s1 + $0x1c0] ss:$8 sps:$4 sm:$0xff]  }
  0x41   :  { %3544 = vmatprep.subr.bf16.mxu0 %v4756_v3  ;;  %v4830_v3 = vld [vmem:[%s6943_s1 + $0x8c0] ss:$8 sps:$4 sm:$0xff]  }
  0x42   :  { %3089 = vmatmul.mubr.bf16.vlgmr.msra.gmra.mrb[0].mxu1 %v4745_v4  ;;  %v4837_v4 = vld [vmem:[%s6943_s1 + $0x1d4] ss:$8 sps:$4 sm:$0xff]  }
  0x43   :  { %3516 = vmatmul.mubr.bf16.vlgmr.msra.gmra.mrb[0].mxu0 %v4751_v6  ;;  %3118 = vmatpush1.bf16.msra.mxu1 %v4748_v5  ;;  %v4840_v5 = vld [vmem:[%s6943_s1 + $0x8d4] ss:$8 sps:$4 sm:$0xff]   ;;  %v4835_v6 = vld [vmem:[%s6943_s1 + $0x1d0] ss:$8 sps:$4 sm:$0xff]  }
  0x44   :  { %3545 = vmatpush1.bf16.msra.mxu0 %v4754_v7  ;;  %3119 = vmatprep.subr.bf16.mxu1 %v4759_v8  ;;  %v4838_v7 = vld [vmem:[%s6943_s1 + $0x8d0] ss:$8 sps:$4 sm:$0xff]   ;;  %v4844_v8 = vld [vmem:[%s6943_s1 + $0x1e4] ss:$8 sps:$4 sm:$0xff]  }
  0x45   :  { %3546 = vmatprep.subr.bf16.mxu0 %v4762_v9  ;;  %3098 = vmatprep.mubr.bf16.mxu1 %v4823_v22  ;;  %v4848_v9 = vld [vmem:[%s6943_s1 + $0x8e4] ss:$8 sps:$4 sm:$0xff]   ;;  %v4871_v22 = vld [vmem:[%s6943_s1 + $0x214] ss:$8 sps:$4 sm:$0xff]  }
  0x46   :  { %3525 = vmatprep.mubr.bf16.mxu0 %v4828_v25  ;;  %v4940_v25 = vld [vmem:[%s6944_s0 + $0x11c] ss:$108 sps:$4 sm:$0xff]  }
  0x47   :  { %3120 = vmatpush1.bf16.msra.mxu1 %v4757_v10  ;;  %v4842_v10 = vld [vmem:[%s6943_s1 + $0x1e0] ss:$8 sps:$4 sm:$0xff]  }
  0x48   :  { %3547 = vmatpush1.bf16.msra.mxu0 %v4760_v11  ;;  %3121 = vmatprep.subr.bf16.mxu1 %v4765_v12  ;;  %v4846_v11 = vld [vmem:[%s6943_s1 + $0x8e0] ss:$8 sps:$4 sm:$0xff]   ;;  %v4853_v12 = vld [vmem:[%s6943_s1 + $0x1f4] ss:$8 sps:$4 sm:$0xff]  }
  0x49   :  { %3548 = vmatprep.subr.bf16.mxu0 %v4768_v13  ;;  %v4856_v13 = vld [vmem:[%s6943_s1 + $0x8f4] ss:$8 sps:$4 sm:$0xff]  }
  0x4a   :  { %3099 = vmatmul.mubr.bf16.gmra.mrb[4].mxu1 %v4833_v28  ;;  %v4877_v28 = vld [vmem:[%s6943_s1 + $0x224] ss:$8 sps:$4 sm:$0xff]  }
  0x4b   :  { %3122 = vmatpush1.bf16.msra.mxu1 %v4763_v14  ;;  %3526 = vmatmul.mubr.bf16.gmra.mrb[4].mxu0 %v4834_v29  ;;  %v4851_v14 = vld [vmem:[%s6943_s1 + $0x1f0] ss:$8 sps:$4 sm:$0xff]   ;;  %v4880_v29 = vld [vmem:[%s6943_s1 + $0x924] ss:$8 sps:$4 sm:$0xff]  }
  0x4c   :  { %3549 = vmatpush1.bf16.msra.mxu0 %v4766_v15  ;;  %3123 = vmatprep.subr.bf16.mxu1 %v4771_v16  ;;  %v4854_v15 = vld [vmem:[%s6943_s1 + $0x8f0] ss:$8 sps:$4 sm:$0xff]   ;;  %v4857_v16 = vld [vmem:[%s6944_s0 + $0x8] ss:$108 sps:$4 sm:$0xff]  }
  0x4d   :  { %3550 = vmatprep.subr.bf16.mxu0 %v4774_v17  ;;  %3108 = vmatprep.mubr.bf16.mxu1 %v4016_v35  ;;  %v4862_v17 = vld [vmem:[%s6943_s1 + $0x204] ss:$8 sps:$4 sm:$0xff]   ;;  %v79_v35 = vld [vmem:[%s6944_s0 + $0x1f0] sm:$0xff] }
  0x4e   :  { %3535 = vmatprep.mubr.bf16.mxu0 %v4030_v39  ;;  %v4032_v39 = vcombine.high %v79_v35, %v79_v35 }
  0x4f   :  { %3124 = vmatpush1.bf16.msra.mxu1 %v4769_v18  ;;  %v4868_v18 = vld [vmem:[%s6943_s1 + $0x904] ss:$8 sps:$4 sm:$0xff]  }
  0x50   :  { %3551 = vmatpush1.bf16.msra.mxu0 %v4772_v19  ;;  %3125 = vmatprep.subr.bf16.mxu1 %v4777_v20  ;;  %v4860_v19 = vld [vmem:[%s6943_s1 + $0x200] ss:$8 sps:$4 sm:$0xff]  }
  0x51   :  { %3552 = vmatprep.subr.bf16.mxu0 %v4780_v21  ;;  %v4863_v20 = vld [vmem:[%s6944_s0 + $0x40] ss:$108 sps:$4 sm:$0xff]  }
  0x52   :  { %3109 = vmatmul.mubr.bf16.gmra.mrb[8].mxu1 %v4015_v42  ;;  %v4866_v21 = vld [vmem:[%s6943_s1 + $0x900] ss:$8 sps:$4 sm:$0xff]   ;;  %v4889_v42 = vld [vmem:[%s6943_s1 + $0x244] ss:$8 sps:$4 sm:$0xff]  }
  0x53   :  { %3126 = vmatpush1.bf16.msra.mxu1 %v4775_v23  ;;  %3536 = vmatmul.mubr.bf16.gmra.mrb[8].mxu0 %v4029_v43  ;;  %v4874_v23 = vld [vmem:[%s6943_s1 + $0x914] ss:$8 sps:$4 sm:$0xff]   ;;  %v4892_v43 = vld [vmem:[%s6943_s1 + $0x944] ss:$8 sps:$4 sm:$0xff]  }
  0x54   :  { %3553 = vmatpush1.bf16.msra.mxu0 %v4778_v24  ;;  %3127 = vmatprep.subr.bf16.mxu1 %v4783_v26  ;;  %v4935_v24 = vld [vmem:[%s6944_s0 + $0xe4] ss:$108 sps:$4 sm:$0xff]  }
  0x55   :  { %3554 = vmatprep.subr.bf16.mxu0 %v4786_v27  ;;  %3149 = vmatprep.mubr.bf16.mxu1 %v4859_v46  ;;  %v4869_v26 = vld [vmem:[%s6943_s1 + $0x210] ss:$8 sps:$4 sm:$0xff]   ;;  %v4017_v46 = vcombine.low %v72_v34, %v72_v34 }
  0x56   :  { %3576 = vmatprep.mubr.bf16.mxu0 %v4865_v49  ;;  %v4872_v27 = vld [vmem:[%s6943_s1 + $0x910] ss:$8 sps:$4 sm:$0xff]   ;;  %v4898_v49 = vld [vmem:[%s6943_s1 + $0x954] ss:$8 sps:$4 sm:$0xff]  }
  0x57   :  { %3128 = vmatpush1.bf16.msra.mxu1 %v4781_v30  ;;  %v4875_v30 = vld [vmem:[%s6943_s1 + $0x220] ss:$8 sps:$4 sm:$0xff]  }
  0x58   :  { %3555 = vmatpush1.bf16.msra.mxu0 %v4784_v31  ;;  %3129 = vmatprep.subr.bf16.mxu1 %v4789_v32  ;;  %v4878_v31 = vld [vmem:[%s6943_s1 + $0x920] ss:$8 sps:$4 sm:$0xff]  }
  0x59   :  { %3556 = vmatprep.subr.bf16.mxu0 %v4792_v33  ;;  %v4945_v32 = vld [vmem:[%s6944_s0 + $0xe0] ss:$108 sps:$4 sm:$0xff]   ;;  %v4946_v33 = vld [vmem:[%s6944_s0 + $0x118] ss:$108 sps:$4 sm:$0xff]  }
  0x5b   :  { %3130 = vmatpush1.bf16.msra.mxu1 %v4787_v37  ;;  %v4886_v37 = vld [vmem:[%s6943_s1 + $0x934] ss:$8 sps:$4 sm:$0xff]  }
  0x5c   :  { %3557 = vmatpush1.bf16.msra.mxu0 %v4790_v38  ;;  %3131 = vmatprep.subr.bf16.mxu1 %v4795_v40  ;;  %v4018_v38 = vcombine.high %v72_v34, %v72_v34  ;;  %v4881_v40 = vld [vmem:[%s6943_s1 + $0x230] ss:$8 sps:$4 sm:$0xff]   ;;  %v4975_v34 = vld [vmem:[%s6944_s0 + $0x48] ss:$108 sps:$4 sm:$0xff]  }
  0x5d   :  { %3558 = vmatprep.subr.bf16.mxu0 %v4798_v41  ;;  %v4884_v41 = vld [vmem:[%s6943_s1 + $0x930] ss:$8 sps:$4 sm:$0xff]  }
  0x5f   :  { %3132 = vmatpush1.bf16.msra.mxu1 %v4793_v44  ;;  %v4887_v44 = vld [vmem:[%s6943_s1 + $0x240] ss:$8 sps:$4 sm:$0xff]  }
  0x60   :  { %3559 = vmatpush1.bf16.msra.mxu0 %v4796_v45  ;;  %3133 = vmatprep.subr.bf16.mxu1 %v4801_v47  ;;  %v4890_v45 = vld [vmem:[%s6943_s1 + $0x940] ss:$8 sps:$4 sm:$0xff]   ;;  %v4031_v47 = vcombine.low %v79_v35, %v79_v35 }
  0x61   :  { %3560 = vmatprep.subr.bf16.mxu0 %v4804_v48  ;;  %v4895_v48 = vld [vmem:[%s6943_s1 + $0x254] ss:$8 sps:$4 sm:$0xff]   ;;  %v4978_v35 = vld [vmem:[%s6943_s1 + $0xa00] ss:$8 sps:$4 sm:$0xff]  }
  0x63   :  { %3134 = vmatpush1.bf16.msra.mxu1 %v4799_v50  ;;  %v4971_v50 = vld [vmem:[%s6944_s0 + $0x14] ss:$108 sps:$4 sm:$0xff]  }
  0x64   :  { %3561 = vmatpush1.bf16.msra.mxu0 %v4802_v51  ;;  %3135 = vmatprep.subr.bf16.mxu1 %v4807_v52  ;;  %v4977_v51 = vld [vmem:[%s6944_s0 + $0x4c] ss:$108 sps:$4 sm:$0xff]  }
  0x65   :  { %3562 = vmatprep.subr.bf16.mxu0 %v4810_v53  ;;  %v4893_v52 = vld [vmem:[%s6943_s1 + $0x250] ss:$8 sps:$4 sm:$0xff]  }
  0x66   :  { %v4896_v53 = vld [vmem:[%s6943_s1 + $0x950] ss:$8 sps:$4 sm:$0xff]  }
  0x67   :  { %3136 = vmatpush1.bf16.msra.mxu1 %v4805_v54  ;;  %v4901_v54 = vld [vmem:[%s6943_s1 + $0x264] ss:$8 sps:$4 sm:$0xff]  }
  0x68   :  { %3563 = vmatpush1.bf16.msra.mxu0 %v4808_v55  ;;  %3137 = vmatprep.subr.bf16.mxu1 %v4813_v56  ;;  %v4904_v55 = vld [vmem:[%s6943_s1 + $0x964] ss:$8 sps:$4 sm:$0xff]   ;;  %v4899_v56 = vld [vmem:[%s6943_s1 + $0x260] ss:$8 sps:$4 sm:$0xff]  }
  0x69   :  { %3564 = vmatprep.subr.bf16.mxu0 %v4816_v57  ;;  %v4902_v57 = vld [vmem:[%s6943_s1 + $0x960] ss:$8 sps:$4 sm:$0xff]  }
  0x6b   :  { %3138 = vmatpush1.bf16.msra.mxu1 %v4811_v58  ;;  %v4907_v58 = vld [vmem:[%s6943_s1 + $0x274] ss:$8 sps:$4 sm:$0xff]  }
  0x6c   :  { %3565 = vmatpush1.bf16.msra.mxu0 %v4814_v59  ;;  %3139 = vmatprep.subr.bf16.mxu1 %v4819_v60  ;;  %v4910_v59 = vld [vmem:[%s6943_s1 + $0x974] ss:$8 sps:$4 sm:$0xff]   ;;  %v4905_v60 = vld [vmem:[%s6943_s1 + $0x270] ss:$8 sps:$4 sm:$0xff]  }
  0x6d   :  { %3566 = vmatprep.subr.bf16.mxu0 %v4822_v61  ;;  %v4908_v61 = vld [vmem:[%s6943_s1 + $0x970] ss:$8 sps:$4 sm:$0xff]  }
  0x6f   :  { %3140 = vmatpush1.bf16.msra.mxu1 %v4817_v62  ;;  %v4913_v62 = vld [vmem:[%s6943_s1 + $0x284] ss:$8 sps:$4 sm:$0xff]  }
  0x70   :  { %3567 = vmatpush1.bf16.msra.mxu0 %v4820_v63  ;;  %3141 = vmatprep.subr.bf16.mxu1 %v4827_v0  ;;  %v4916_v63 = vld [vmem:[%s6943_s1 + $0x984] ss:$8 sps:$4 sm:$0xff]   ;;  %v4911_v0 = vld [vmem:[%s6943_s1 + $0x280] ss:$8 sps:$4 sm:$0xff]  }
  0x71   :  { %3568 = vmatprep.subr.bf16.mxu0 %v4832_v1  ;;  %v4914_v1 = vld [vmem:[%s6943_s1 + $0x980] ss:$8 sps:$4 sm:$0xff]  }
  0x73   :  { %3142 = vmatpush1.bf16.msra.mxu1 %v4825_v2  ;;  %v4919_v2 = vld [vmem:[%s6943_s1 + $0x294] ss:$8 sps:$4 sm:$0xff]  }
  0x74   :  { %3569 = vmatpush1.bf16.msra.mxu0 %v4830_v3  ;;  %3143 = vmatprep.subr.bf16.mxu1 %v4837_v4  ;;  %v4922_v3 = vld [vmem:[%s6943_s1 + $0x994] ss:$8 sps:$4 sm:$0xff]   ;;  %v4917_v4 = vld [vmem:[%s6943_s1 + $0x290] ss:$8 sps:$4 sm:$0xff]  }
  0x75   :  { %3570 = vmatprep.subr.bf16.mxu0 %v4840_v5  ;;  %v4920_v5 = vld [vmem:[%s6943_s1 + $0x990] ss:$8 sps:$4 sm:$0xff]  }
  0x77   :  { %3144 = vmatpush1.bf16.msra.mxu1 %v4835_v6  ;;  %v4925_v6 = vld [vmem:[%s6943_s1 + $0x2a4] ss:$8 sps:$4 sm:$0xff]  }
  0x78   :  { %3571 = vmatpush1.bf16.msra.mxu0 %v4838_v7  ;;  %3145 = vmatprep.subr.bf16.mxu1 %v4844_v8  ;;  %v4928_v7 = vld [vmem:[%s6943_s1 + $0x9a4] ss:$8 sps:$4 sm:$0xff]   ;;  %v4923_v8 = vld [vmem:[%s6943_s1 + $0x2a0] ss:$8 sps:$4 sm:$0xff]  }
  0x79   :  { %3572 = vmatprep.subr.bf16.mxu0 %v4848_v9  ;;  %v4926_v9 = vld [vmem:[%s6943_s1 + $0x9a0] ss:$8 sps:$4 sm:$0xff]  }
  0x7b   :  { %3146 = vmatpush1.bf16.msra.mxu1 %v4842_v10  ;;  %v4931_v10 = vld [vmem:[%s6943_s1 + $0x2b4] ss:$8 sps:$4 sm:$0xff]  }
  0x7c   :  { %3573 = vmatpush1.bf16.msra.mxu0 %v4846_v11  ;;  %3147 = vmatprep.subr.bf16.mxu1 %v4853_v12  ;;  %v4934_v11 = vld [vmem:[%s6943_s1 + $0x9b4] ss:$8 sps:$4 sm:$0xff]   ;;  %v4929_v12 = vld [vmem:[%s6943_s1 + $0x2b0] ss:$8 sps:$4 sm:$0xff]  }
  0x7d   :  { %3574 = vmatprep.subr.bf16.mxu0 %v4856_v13  ;;  %v4932_v13 = vld [vmem:[%s6943_s1 + $0x9b0] ss:$8 sps:$4 sm:$0xff]  }
  0x7f   :  { %3148 = vmatpush1.bf16.msra.mxu1 %v4851_v14  ;;  %v4939_v14 = vld [vmem:[%s6943_s1 + $0x2c4] ss:$8 sps:$4 sm:$0xff]  }
  0x80   :  { %3575 = vmatpush1.bf16.msra.mxu0 %v4854_v15  ;;  %3178 = vmatprep.subr.bf16.mxu1 %v4862_v17  ;;  %v4944_v15 = vld [vmem:[%s6943_s1 + $0x9c4] ss:$8 sps:$4 sm:$0xff]   ;;  %v4942_v17 = vld [vmem:[%s6943_s1 + $0x9c0] ss:$8 sps:$4 sm:$0xff]  }
  0x81   :  { %3605 = vmatprep.subr.bf16.mxu0 %v4868_v18  ;;  %v4949_v18 = vld [vmem:[%s6943_s1 + $0x2d4] ss:$8 sps:$4 sm:$0xff]  }
  0x82   :  { %3150 = vmatmul.mubr.bf16.vlgmr.msra.gmra.mrb[0].mxu1 %v4857_v16  ;;  %v4937_v16 = vld [vmem:[%s6943_s1 + $0x2c0] ss:$8 sps:$4 sm:$0xff]  }
  0x83   :  { %3577 = vmatmul.mubr.bf16.vlgmr.msra.gmra.mrb[0].mxu0 %v4863_v20  ;;  %3179 = vmatpush1.bf16.msra.mxu1 %v4860_v19  ;;  %v4952_v19 = vld [vmem:[%s6943_s1 + $0x9d4] ss:$8 sps:$4 sm:$0xff]   ;;  %v4947_v20 = vld [vmem:[%s6943_s1 + $0x2d0] ss:$8 sps:$4 sm:$0xff]  }
  0x84   :  { %3606 = vmatpush1.bf16.msra.mxu0 %v4866_v21  ;;  %3180 = vmatprep.subr.bf16.mxu1 %v4871_v22  ;;  %v4950_v21 = vld [vmem:[%s6943_s1 + $0x9d0] ss:$8 sps:$4 sm:$0xff]   ;;  %v4956_v22 = vld [vmem:[%s6943_s1 + $0x2e4] ss:$8 sps:$4 sm:$0xff]  }
  0x85   :  { %3607 = vmatprep.subr.bf16.mxu0 %v4874_v23  ;;  %3159 = vmatprep.mubr.bf16.mxu1 %v4935_v24  ;;  %v4960_v23 = vld [vmem:[%s6943_s1 + $0x9e4] ss:$8 sps:$4 sm:$0xff]   ;;  %v4954_v24 = vld [vmem:[%s6943_s1 + $0x2e0] ss:$8 sps:$4 sm:$0xff]  }
  0x86   :  { %3586 = vmatprep.mubr.bf16.mxu0 %v4940_v25  ;;  %v4958_v25 = vld [vmem:[%s6943_s1 + $0x9e0] ss:$8 sps:$4 sm:$0xff]  }
  0x87   :  { %3181 = vmatpush1.bf16.msra.mxu1 %v4869_v26  ;;  %v4965_v26 = vld [vmem:[%s6943_s1 + $0x2f4] ss:$8 sps:$4 sm:$0xff]  }
  0x88   :  { %3608 = vmatpush1.bf16.msra.mxu0 %v4872_v27  ;;  %3182 = vmatprep.subr.bf16.mxu1 %v4877_v28  ;;  %v4968_v27 = vld [vmem:[%s6943_s1 + $0x9f4] ss:$8 sps:$4 sm:$0xff]   ;;  %v4963_v28 = vld [vmem:[%s6943_s1 + $0x2f0] ss:$8 sps:$4 sm:$0xff]  }
  0x89   :  { %3609 = vmatprep.subr.bf16.mxu0 %v4880_v29  ;;  %v4966_v29 = vld [vmem:[%s6943_s1 + $0x9f0] ss:$8 sps:$4 sm:$0xff]  }
  0x8a   :  { %3160 = vmatmul.mubr.bf16.gmra.mrb[4].mxu1 %v4945_v32  ;;  %v4980_v32 = vld [vmem:[%s6943_s1 + $0xa04] ss:$8 sps:$4 sm:$0xff]  }
  0x8b   :  { %3587 = vmatmul.mubr.bf16.gmra.mrb[4].mxu0 %v4946_v33  ;;  %3183 = vmatpush1.bf16.msra.mxu1 %v4875_v30  ;;  %v4969_v30 = vld [vmem:[%s6944_s0 + $0x10] ss:$108 sps:$4 sm:$0xff]   ;;  %v4972_v33 = vld [vmem:[%s6943_s1 + $0x300] ss:$8 sps:$4 sm:$0xff]  }
  0x8c   :  { %3610 = vmatpush1.bf16.msra.mxu0 %v4878_v31  ;;  %3184 = vmatprep.subr.bf16.mxu1 %v4883_v36  ;;  %v4974_v31 = vld [vmem:[%s6943_s1 + $0x304] ss:$8 sps:$4 sm:$0xff]   ;;  %v4983_v36 = vld [vmem:[%s6943_s1 + $0x314] ss:$8 sps:$4 sm:$0xff]  }
  0x8d   :  { %3611 = vmatprep.subr.bf16.mxu0 %v4886_v37  ;;  %3169 = vmatprep.mubr.bf16.mxu1 %v4018_v38  ;;  %v4986_v37 = vld [vmem:[%s6943_s1 + $0xa14] ss:$8 sps:$4 sm:$0xff]   ;;  %v5047_v38 = vld [vmem:[%s6944_s0 + $0xec] ss:$108 sps:$4 sm:$0xff]  }
  0x8e   :  { %3596 = vmatprep.mubr.bf16.mxu0 %v4032_v39  ;;  %v4981_v39 = vld [vmem:[%s6943_s1 + $0x310] ss:$8 sps:$4 sm:$0xff]  }
  0x8f   :  { %3185 = vmatpush1.bf16.msra.mxu1 %v4881_v40  ;;  %v5052_v40 = vld [vmem:[%s6944_s0 + $0x124] ss:$108 sps:$4 sm:$0xff]  }
  0x90   :  { %3612 = vmatpush1.bf16.msra.mxu0 %v4884_v41  ;;  %3186 = vmatprep.subr.bf16.mxu1 %v4889_v42  ;;  %v4984_v41 = vld [vmem:[%s6943_s1 + $0xa10] ss:$8 sps:$4 sm:$0xff]   ;;  %v4989_v42 = vld [vmem:[%s6943_s1 + $0x324] ss:$8 sps:$4 sm:$0xff]  }
  0x91   :  { %3613 = vmatprep.subr.bf16.mxu0 %v4892_v43  ;;  %v4992_v43 = vld [vmem:[%s6943_s1 + $0xa24] ss:$8 sps:$4 sm:$0xff]  }
  0x92   :  { %3170 = vmatmul.mubr.bf16.gmra.mrb[8].mxu1 %v4017_v46  ;;  %v73_v46 = vld [vmem:[%s6944_s0 + $0x1c0] sm:$0xff] }
  0x93   :  { %3597 = vmatmul.mubr.bf16.gmra.mrb[8].mxu0 %v4031_v47  ;;  %3187 = vmatpush1.bf16.msra.mxu1 %v4887_v44  ;;  %v5057_v44 = vld [vmem:[%s6944_s0 + $0xe8] ss:$108 sps:$4 sm:$0xff]   ;;  %v80_v47 = vld [vmem:[%s6944_s0 + $0x1f8] sm:$0xff] }
  0x94   :  { %3614 = vmatpush1.bf16.msra.mxu0 %v4890_v45  ;;  %3188 = vmatprep.subr.bf16.mxu1 %v4895_v48  ;;  %v5058_v45 = vld [vmem:[%s6944_s0 + $0x120] ss:$108 sps:$4 sm:$0xff]  }
  0x95   :  { %3615 = vmatprep.subr.bf16.mxu0 %v4898_v49  ;;  %3210 = vmatprep.mubr.bf16.mxu1 %v4971_v50  ;;  %v4987_v48 = vld [vmem:[%s6943_s1 + $0x320] ss:$8 sps:$4 sm:$0xff]   ;;  %v4995_v50 = vld [vmem:[%s6943_s1 + $0x334] ss:$8 sps:$4 sm:$0xff]  }
  0x96   :  { %3637 = vmatprep.mubr.bf16.mxu0 %v4977_v51  ;;  %v4990_v49 = vld [vmem:[%s6943_s1 + $0xa20] ss:$8 sps:$4 sm:$0xff]   ;;  %v4998_v51 = vld [vmem:[%s6943_s1 + $0xa34] ss:$8 sps:$4 sm:$0xff]  }
  0x97   :  { %3189 = vmatpush1.bf16.msra.mxu1 %v4893_v52  ;;  %v4020_v52 = vcombine.high %v73_v46, %v73_v46 }
  0x98   :  { %3616 = vmatpush1.bf16.msra.mxu0 %v4896_v53  ;;  %3190 = vmatprep.subr.bf16.mxu1 %v4901_v54  ;;  %v4034_v53 = vcombine.high %v80_v47, %v80_v47  ;;  %v4993_v54 = vld [vmem:[%s6943_s1 + $0x330] ss:$8 sps:$4 sm:$0xff]  }
  0x99   :  { %3617 = vmatprep.subr.bf16.mxu0 %v4904_v55  ;;  %v4996_v55 = vld [vmem:[%s6943_s1 + $0xa30] ss:$8 sps:$4 sm:$0xff]  }
  0x9b   :  { %3191 = vmatpush1.bf16.msra.mxu1 %v4899_v56  ;;  %v5001_v56 = vld [vmem:[%s6943_s1 + $0x344] ss:$8 sps:$4 sm:$0xff]  }
  0x9c   :  { %3618 = vmatpush1.bf16.msra.mxu0 %v4902_v57  ;;  %3192 = vmatprep.subr.bf16.mxu1 %v4907_v58  ;;  %v5004_v57 = vld [vmem:[%s6943_s1 + $0xa44] ss:$8 sps:$4 sm:$0xff]   ;;  %v4999_v58 = vld [vmem:[%s6943_s1 + $0x340] ss:$8 sps:$4 sm:$0xff]  }
  0x9d   :  { %3619 = vmatprep.subr.bf16.mxu0 %v4910_v59  ;;  %v4019_v59 = vcombine.low %v73_v46, %v73_v46  ;;  %v5081_v46 = vld [vmem:[%s6944_s0 + $0x18] ss:$108 sps:$4 sm:$0xff]  }
  0x9f   :  { %3193 = vmatpush1.bf16.msra.mxu1 %v4905_v60  ;;  %v4033_v60 = vcombine.low %v80_v47, %v80_v47  ;;  %v5084_v47 = vld [vmem:[%s6943_s1 + $0x400] ss:$8 sps:$4 sm:$0xff]  }
  0xa0   :  { %3620 = vmatpush1.bf16.msra.mxu0 %v4908_v61  ;;  %3194 = vmatprep.subr.bf16.mxu1 %v4913_v62  ;;  %v5002_v61 = vld [vmem:[%s6943_s1 + $0xa40] ss:$8 sps:$4 sm:$0xff]   ;;  %v5007_v62 = vld [vmem:[%s6943_s1 + $0x354] ss:$8 sps:$4 sm:$0xff]  }
  0xa1   :  { %3621 = vmatprep.subr.bf16.mxu0 %v4916_v63  ;;  %v5010_v63 = vld [vmem:[%s6943_s1 + $0xa54] ss:$8 sps:$4 sm:$0xff]  }
  0xa3   :  { %3195 = vmatpush1.bf16.msra.mxu1 %v4911_v0  ;;  %v5083_v0 = vld [vmem:[%s6944_s0 + $0x1c] ss:$108 sps:$4 sm:$0xff]  }
  0xa4   :  { %3622 = vmatpush1.bf16.msra.mxu0 %v4914_v1  ;;  %3196 = vmatprep.subr.bf16.mxu1 %v4919_v2  ;;  %v5089_v1 = vld [vmem:[%s6944_s0 + $0x54] ss:$108 sps:$4 sm:$0xff]   ;;  %v5005_v2 = vld [vmem:[%s6943_s1 + $0x350] ss:$8 sps:$4 sm:$0xff]  }
  0xa5   :  { %3623 = vmatprep.subr.bf16.mxu0 %v4922_v3  ;;  %v5008_v3 = vld [vmem:[%s6943_s1 + $0xa50] ss:$8 sps:$4 sm:$0xff]  }
  0xa7   :  { %3197 = vmatpush1.bf16.msra.mxu1 %v4917_v4  ;;  %v5013_v4 = vld [vmem:[%s6943_s1 + $0x364] ss:$8 sps:$4 sm:$0xff]  }
  0xa8   :  { %3624 = vmatpush1.bf16.msra.mxu0 %v4920_v5  ;;  %3198 = vmatprep.subr.bf16.mxu1 %v4925_v6  ;;  %v5016_v5 = vld [vmem:[%s6943_s1 + $0xa64] ss:$8 sps:$4 sm:$0xff]   ;;  %v5011_v6 = vld [vmem:[%s6943_s1 + $0x360] ss:$8 sps:$4 sm:$0xff]  }
  0xa9   :  { %3625 = vmatprep.subr.bf16.mxu0 %v4928_v7  ;;  %v5014_v7 = vld [vmem:[%s6943_s1 + $0xa60] ss:$8 sps:$4 sm:$0xff]  }
  0xab   :  { %3199 = vmatpush1.bf16.msra.mxu1 %v4923_v8  ;;  %v5019_v8 = vld [vmem:[%s6943_s1 + $0x374] ss:$8 sps:$4 sm:$0xff]  }
  0xac   :  { %3626 = vmatpush1.bf16.msra.mxu0 %v4926_v9  ;;  %3200 = vmatprep.subr.bf16.mxu1 %v4931_v10  ;;  %v5022_v9 = vld [vmem:[%s6943_s1 + $0xa74] ss:$8 sps:$4 sm:$0xff]   ;;  %v5017_v10 = vld [vmem:[%s6943_s1 + $0x370] ss:$8 sps:$4 sm:$0xff]  }
  0xad   :  { %3627 = vmatprep.subr.bf16.mxu0 %v4934_v11  ;;  %v5020_v11 = vld [vmem:[%s6943_s1 + $0xa70] ss:$8 sps:$4 sm:$0xff]  }
  0xaf   :  { %3201 = vmatpush1.bf16.msra.mxu1 %v4929_v12  ;;  %v5025_v12 = vld [vmem:[%s6943_s1 + $0x384] ss:$8 sps:$4 sm:$0xff]  }
  0xb0   :  { %3628 = vmatpush1.bf16.msra.mxu0 %v4932_v13  ;;  %3202 = vmatprep.subr.bf16.mxu1 %v4939_v14  ;;  %v5028_v13 = vld [vmem:[%s6943_s1 + $0xa84] ss:$8 sps:$4 sm:$0xff]   ;;  %v5023_v14 = vld [vmem:[%s6943_s1 + $0x380] ss:$8 sps:$4 sm:$0xff]  }
  0xb1   :  { %3629 = vmatprep.subr.bf16.mxu0 %v4944_v15  ;;  %v5026_v15 = vld [vmem:[%s6943_s1 + $0xa80] ss:$8 sps:$4 sm:$0xff]  }
  0xb3   :  { %3203 = vmatpush1.bf16.msra.mxu1 %v4937_v16  ;;  %v5031_v16 = vld [vmem:[%s6943_s1 + $0x394] ss:$8 sps:$4 sm:$0xff]  }
  0xb4   :  { %3630 = vmatpush1.bf16.msra.mxu0 %v4942_v17  ;;  %3204 = vmatprep.subr.bf16.mxu1 %v4949_v18  ;;  %v5034_v17 = vld [vmem:[%s6943_s1 + $0xa94] ss:$8 sps:$4 sm:$0xff]   ;;  %v5029_v18 = vld [vmem:[%s6943_s1 + $0x390] ss:$8 sps:$4 sm:$0xff]  }
  0xb5   :  { %3631 = vmatprep.subr.bf16.mxu0 %v4952_v19  ;;  %v5032_v19 = vld [vmem:[%s6943_s1 + $0xa90] ss:$8 sps:$4 sm:$0xff]  }
  0xb7   :  { %3205 = vmatpush1.bf16.msra.mxu1 %v4947_v20  ;;  %v5037_v20 = vld [vmem:[%s6943_s1 + $0x3a4] ss:$8 sps:$4 sm:$0xff]  }
  0xb8   :  { %3632 = vmatpush1.bf16.msra.mxu0 %v4950_v21  ;;  %3206 = vmatprep.subr.bf16.mxu1 %v4956_v22  ;;  %v5040_v21 = vld [vmem:[%s6943_s1 + $0xaa4] ss:$8 sps:$4 sm:$0xff]   ;;  %v5035_v22 = vld [vmem:[%s6943_s1 + $0x3a0] ss:$8 sps:$4 sm:$0xff]  }
  0xb9   :  { %3633 = vmatprep.subr.bf16.mxu0 %v4960_v23  ;;  %v5038_v23 = vld [vmem:[%s6943_s1 + $0xaa0] ss:$8 sps:$4 sm:$0xff]  }
  0xbb   :  { %3207 = vmatpush1.bf16.msra.mxu1 %v4954_v24  ;;  %v5043_v24 = vld [vmem:[%s6943_s1 + $0x3b4] ss:$8 sps:$4 sm:$0xff]  }
  0xbc   :  { %3634 = vmatpush1.bf16.msra.mxu0 %v4958_v25  ;;  %3208 = vmatprep.subr.bf16.mxu1 %v4965_v26  ;;  %v5046_v25 = vld [vmem:[%s6943_s1 + $0xab4] ss:$8 sps:$4 sm:$0xff]   ;;  %v5041_v26 = vld [vmem:[%s6943_s1 + $0x3b0] ss:$8 sps:$4 sm:$0xff]  }
  0xbd   :  { %3635 = vmatprep.subr.bf16.mxu0 %v4968_v27  ;;  %v5044_v27 = vld [vmem:[%s6943_s1 + $0xab0] ss:$8 sps:$4 sm:$0xff]  }
  0xbf   :  { %3209 = vmatpush1.bf16.msra.mxu1 %v4963_v28  ;;  %v5051_v28 = vld [vmem:[%s6943_s1 + $0x3c4] ss:$8 sps:$4 sm:$0xff]  }
  0xc0   :  { %3636 = vmatpush1.bf16.msra.mxu0 %v4966_v29  ;;  %3239 = vmatprep.subr.bf16.mxu1 %v4974_v31  ;;  %v5056_v29 = vld [vmem:[%s6943_s1 + $0xac4] ss:$8 sps:$4 sm:$0xff]   ;;  %v5054_v31 = vld [vmem:[%s6943_s1 + $0xac0] ss:$8 sps:$4 sm:$0xff]  }
  0xc1   :  { %3666 = vmatprep.subr.bf16.mxu0 %v4980_v32  ;;  %v5061_v32 = vld [vmem:[%s6943_s1 + $0x3d4] ss:$8 sps:$4 sm:$0xff]  }
  0xc2   :  { %3211 = vmatmul.mubr.bf16.vlgmr.msra.gmra.mrb[0].mxu1 %v4969_v30  ;;  %v5049_v30 = vld [vmem:[%s6943_s1 + $0x3c0] ss:$8 sps:$4 sm:$0xff]  }
  0xc3   :  { %3638 = vmatmul.mubr.bf16.vlgmr.msra.gmra.mrb[0].mxu0 %v4975_v34  ;;  %3240 = vmatpush1.bf16.msra.mxu1 %v4972_v33  ;;  %v5064_v33 = vld [vmem:[%s6943_s1 + $0xad4] ss:$8 sps:$4 sm:$0xff]   ;;  %v5059_v34 = vld [vmem:[%s6943_s1 + $0x3d0] ss:$8 sps:$4 sm:$0xff]  }
  0xc4   :  { %3667 = vmatpush1.bf16.msra.mxu0 %v4978_v35  ;;  %3241 = vmatprep.subr.bf16.mxu1 %v4983_v36  ;;  %v5062_v35 = vld [vmem:[%s6943_s1 + $0xad0] ss:$8 sps:$4 sm:$0xff]   ;;  %v5068_v36 = vld [vmem:[%s6943_s1 + $0x3e4] ss:$8 sps:$4 sm:$0xff]  }
  0xc5   :  { %3668 = vmatprep.subr.bf16.mxu0 %v4986_v37  ;;  %3220 = vmatprep.mubr.bf16.mxu1 %v5047_v38  ;;  %v5072_v37 = vld [vmem:[%s6943_s1 + $0xae4] ss:$8 sps:$4 sm:$0xff]   ;;  %v5066_v38 = vld [vmem:[%s6943_s1 + $0x3e0] ss:$8 sps:$4 sm:$0xff]  }
  0xc6   :  { %3647 = vmatprep.mubr.bf16.mxu0 %v5052_v40  ;;  %v5077_v40 = vld [vmem:[%s6943_s1 + $0x3f4] ss:$8 sps:$4 sm:$0xff]  }
  0xc7   :  { %3242 = vmatpush1.bf16.msra.mxu1 %v4981_v39  ;;  %v5070_v39 = vld [vmem:[%s6943_s1 + $0xae0] ss:$8 sps:$4 sm:$0xff]  }
  0xc8   :  { %3669 = vmatpush1.bf16.msra.mxu0 %v4984_v41  ;;  %3243 = vmatprep.subr.bf16.mxu1 %v4989_v42  ;;  %v5080_v41 = vld [vmem:[%s6943_s1 + $0xaf4] ss:$8 sps:$4 sm:$0xff]   ;;  %v5075_v42 = vld [vmem:[%s6943_s1 + $0x3f0] ss:$8 sps:$4 sm:$0xff]  }
  0xc9   :  { %3670 = vmatprep.subr.bf16.mxu0 %v4992_v43  ;;  %v5078_v43 = vld [vmem:[%s6943_s1 + $0xaf0] ss:$8 sps:$4 sm:$0xff]  }
  0xca   :  { %3221 = vmatmul.mubr.bf16.gmra.mrb[4].mxu1 %v5057_v44  ;;  %v5086_v44 = vld [vmem:[%s6943_s1 + $0x404] ss:$8 sps:$4 sm:$0xff]  }
  0xcb   :  { %3648 = vmatmul.mubr.bf16.gmra.mrb[4].mxu0 %v5058_v45  ;;  %3244 = vmatpush1.bf16.msra.mxu1 %v4987_v48  ;;  %v5092_v45 = vld [vmem:[%s6943_s1 + $0xb04] ss:$8 sps:$4 sm:$0xff]   ;;  %v5087_v48 = vld [vmem:[%s6944_s0 + $0x50] ss:$108 sps:$4 sm:$0xff]  }
  0xcc   :  { %3671 = vmatpush1.bf16.msra.mxu0 %v4990_v49  ;;  %3245 = vmatprep.subr.bf16.mxu1 %v4995_v50  ;;  %v5090_v49 = vld [vmem:[%s6943_s1 + $0xb00] ss:$8 sps:$4 sm:$0xff]   ;;  %v5095_v50 = vld [vmem:[%s6943_s1 + $0x414] ss:$8 sps:$4 sm:$0xff]  }
  0xcd   :  { %3672 = vmatprep.subr.bf16.mxu0 %v4998_v51  ;;  %3230 = vmatprep.mubr.bf16.mxu1 %v4020_v52  ;;  %v5098_v51 = vld [vmem:[%s6943_s1 + $0xb14] ss:$8 sps:$4 sm:$0xff]  }
  0xce   :  { %3657 = vmatprep.mubr.bf16.mxu0 %v4034_v53  ;;  %v5159_v52 = vld [vmem:[%s6944_s0 + $0xf4] ss:$108 sps:$4 sm:$0xff]   ;;  %v5164_v53 = vld [vmem:[%s6944_s0 + $0x12c] ss:$108 sps:$4 sm:$0xff]  }
  0xcf   :  { %3246 = vmatpush1.bf16.msra.mxu1 %v4993_v54  ;;  %v5093_v54 = vld [vmem:[%s6943_s1 + $0x410] ss:$8 sps:$4 sm:$0xff]  }
  0xd0   :  { %3673 = vmatpush1.bf16.msra.mxu0 %v4996_v55  ;;  %3247 = vmatprep.subr.bf16.mxu1 %v5001_v56  ;;  %v5096_v55 = vld [vmem:[%s6943_s1 + $0xb10] ss:$8 sps:$4 sm:$0xff]   ;;  %v5101_v56 = vld [vmem:[%s6943_s1 + $0x424] ss:$8 sps:$4 sm:$0xff]  }
  0xd1   :  { %3674 = vmatprep.subr.bf16.mxu0 %v5004_v57  ;;  %v5104_v57 = vld [vmem:[%s6943_s1 + $0xb24] ss:$8 sps:$4 sm:$0xff]  }
  0xd2   :  { %3231 = vmatmul.mubr.bf16.gmra.mrb[8].mxu1 %v4019_v59  ;;  %v5102_v59 = vld [vmem:[%s6943_s1 + $0xb20] ss:$8 sps:$4 sm:$0xff]  }
  0xd3   :  { %3658 = vmatmul.mubr.bf16.gmra.mrb[8].mxu0 %v4033_v60  ;;  %3248 = vmatpush1.bf16.msra.mxu1 %v4999_v58  ;;  %v5099_v58 = vld [vmem:[%s6943_s1 + $0x420] ss:$8 sps:$4 sm:$0xff]   ;;  %v5169_v60 = vld [vmem:[%s6944_s0 + $0xf0] ss:$108 sps:$4 sm:$0xff]  }
  0xd4   :  { %3675 = vmatpush1.bf16.msra.mxu0 %v5002_v61  ;;  %3249 = vmatprep.subr.bf16.mxu1 %v5007_v62  ;;  %v5170_v61 = vld [vmem:[%s6944_s0 + $0x128] ss:$108 sps:$4 sm:$0xff]  }
  0xd5   :  { %3676 = vmatprep.subr.bf16.mxu0 %v5010_v63  ;;  %3271 = vmatprep.mubr.bf16.mxu1 %v5083_v0  ;;  %v74_v62 = vld [vmem:[%s6944_s0 + $0x1c8] sm:$0xff]  ;;  %v81_v63 = vld [vmem:[%s6944_s0 + $0x200] sm:$0xff]  ;;  %v5107_v0 = vld [vmem:[%s6943_s1 + $0x434] ss:$8 sps:$4 sm:$0xff]  }
  0xd6   :  { %3698 = vmatprep.mubr.bf16.mxu0 %v5089_v1  ;;  %v5110_v1 = vld [vmem:[%s6943_s1 + $0xb34] ss:$8 sps:$4 sm:$0xff]  }
  0xd7   :  { %3250 = vmatpush1.bf16.msra.mxu1 %v5005_v2  ;;  %v4022_v2 = vcombine.high %v74_v62, %v74_v62 }
  0xd8   :  { %3677 = vmatpush1.bf16.msra.mxu0 %v5008_v3  ;;  %3251 = vmatprep.subr.bf16.mxu1 %v5013_v4  ;;  %v4036_v3 = vcombine.high %v81_v63, %v81_v63  ;;  %v5105_v4 = vld [vmem:[%s6943_s1 + $0x430] ss:$8 sps:$4 sm:$0xff]  }
  0xd9   :  { %3678 = vmatprep.subr.bf16.mxu0 %v5016_v5  ;;  %v5108_v5 = vld [vmem:[%s6943_s1 + $0xb30] ss:$8 sps:$4 sm:$0xff]  }
  0xdb   :  { %3252 = vmatpush1.bf16.msra.mxu1 %v5011_v6  ;;  %v5113_v6 = vld [vmem:[%s6943_s1 + $0x444] ss:$8 sps:$4 sm:$0xff]  }
  0xdc   :  { %3679 = vmatpush1.bf16.msra.mxu0 %v5014_v7  ;;  %3253 = vmatprep.subr.bf16.mxu1 %v5019_v8  ;;  %v5116_v7 = vld [vmem:[%s6943_s1 + $0xb44] ss:$8 sps:$4 sm:$0xff]   ;;  %v5111_v8 = vld [vmem:[%s6943_s1 + $0x440] ss:$8 sps:$4 sm:$0xff]  }
  0xdd   :  { %3680 = vmatprep.subr.bf16.mxu0 %v5022_v9  ;;  %v5114_v9 = vld [vmem:[%s6943_s1 + $0xb40] ss:$8 sps:$4 sm:$0xff]  }
  0xdf   :  { %3254 = vmatpush1.bf16.msra.mxu1 %v5017_v10  ;;  %v5119_v10 = vld [vmem:[%s6943_s1 + $0x454] ss:$8 sps:$4 sm:$0xff]  }
  0xe0   :  { %3681 = vmatpush1.bf16.msra.mxu0 %v5020_v11  ;;  %3255 = vmatprep.subr.bf16.mxu1 %v5025_v12  ;;  %v4021_v11 = vcombine.low %v74_v62, %v74_v62  ;;  %v4035_v12 = vcombine.low %v81_v63, %v81_v63  ;;  %v5199_v62 = vld [vmem:[%s6944_s0 + $0x58] ss:$108 sps:$4 sm:$0xff]   ;;  %v5202_v63 = vld [vmem:[%s6943_s1 + $0xc00] ss:$8 sps:$4 sm:$0xff]  }
  0xe1   :  { %3682 = vmatprep.subr.bf16.mxu0 %v5028_v13  ;;  %v5122_v13 = vld [vmem:[%s6943_s1 + $0xb54] ss:$8 sps:$4 sm:$0xff]  }
  0xe3   :  { %3256 = vmatpush1.bf16.msra.mxu1 %v5023_v14  ;;  %v5195_v14 = vld [vmem:[%s6944_s0 + $0x24] ss:$108 sps:$4 sm:$0xff]  }
  0xe4   :  { %3683 = vmatpush1.bf16.msra.mxu0 %v5026_v15  ;;  %3257 = vmatprep.subr.bf16.mxu1 %v5031_v16  ;;  %v5201_v15 = vld [vmem:[%s6944_s0 + $0x5c] ss:$108 sps:$4 sm:$0xff]   ;;  %v5117_v16 = vld [vmem:[%s6943_s1 + $0x450] ss:$8 sps:$4 sm:$0xff]  }
  0xe5   :  { %3684 = vmatprep.subr.bf16.mxu0 %v5034_v17  ;;  %v5120_v17 = vld [vmem:[%s6943_s1 + $0xb50] ss:$8 sps:$4 sm:$0xff]  }
  0xe7   :  { %3258 = vmatpush1.bf16.msra.mxu1 %v5029_v18  ;;  %v5125_v18 = vld [vmem:[%s6943_s1 + $0x464] ss:$8 sps:$4 sm:$0xff]  }
  0xe8   :  { %3685 = vmatpush1.bf16.msra.mxu0 %v5032_v19  ;;  %3259 = vmatprep.subr.bf16.mxu1 %v5037_v20  ;;  %v5128_v19 = vld [vmem:[%s6943_s1 + $0xb64] ss:$8 sps:$4 sm:$0xff]   ;;  %v5123_v20 = vld [vmem:[%s6943_s1 + $0x460] ss:$8 sps:$4 sm:$0xff]  }
  0xe9   :  { %3686 = vmatprep.subr.bf16.mxu0 %v5040_v21  ;;  %v5126_v21 = vld [vmem:[%s6943_s1 + $0xb60] ss:$8 sps:$4 sm:$0xff]  }
  0xeb   :  { %3260 = vmatpush1.bf16.msra.mxu1 %v5035_v22  ;;  %v5131_v22 = vld [vmem:[%s6943_s1 + $0x474] ss:$8 sps:$4 sm:$0xff]  }
  0xec   :  { %3687 = vmatpush1.bf16.msra.mxu0 %v5038_v23  ;;  %3261 = vmatprep.subr.bf16.mxu1 %v5043_v24  ;;  %v5134_v23 = vld [vmem:[%s6943_s1 + $0xb74] ss:$8 sps:$4 sm:$0xff]   ;;  %v5129_v24 = vld [vmem:[%s6943_s1 + $0x470] ss:$8 sps:$4 sm:$0xff]  }
  0xed   :  { %3688 = vmatprep.subr.bf16.mxu0 %v5046_v25  ;;  %v5132_v25 = vld [vmem:[%s6943_s1 + $0xb70] ss:$8 sps:$4 sm:$0xff]  }
  0xef   :  { %3262 = vmatpush1.bf16.msra.mxu1 %v5041_v26  ;;  %v5137_v26 = vld [vmem:[%s6943_s1 + $0x484] ss:$8 sps:$4 sm:$0xff]  }
  0xf0   :  { %3689 = vmatpush1.bf16.msra.mxu0 %v5044_v27  ;;  %3263 = vmatprep.subr.bf16.mxu1 %v5051_v28  ;;  %v5140_v27 = vld [vmem:[%s6943_s1 + $0xb84] ss:$8 sps:$4 sm:$0xff]   ;;  %v5135_v28 = vld [vmem:[%s6943_s1 + $0x480] ss:$8 sps:$4 sm:$0xff]  }
  0xf1   :  { %3690 = vmatprep.subr.bf16.mxu0 %v5056_v29  ;;  %v5138_v29 = vld [vmem:[%s6943_s1 + $0xb80] ss:$8 sps:$4 sm:$0xff]  }
  0xf3   :  { %3264 = vmatpush1.bf16.msra.mxu1 %v5049_v30  ;;  %v5143_v30 = vld [vmem:[%s6943_s1 + $0x494] ss:$8 sps:$4 sm:$0xff]  }
  0xf4   :  { %3691 = vmatpush1.bf16.msra.mxu0 %v5054_v31  ;;  %3265 = vmatprep.subr.bf16.mxu1 %v5061_v32  ;;  %v5146_v31 = vld [vmem:[%s6943_s1 + $0xb94] ss:$8 sps:$4 sm:$0xff]   ;;  %v5141_v32 = vld [vmem:[%s6943_s1 + $0x490] ss:$8 sps:$4 sm:$0xff]  }
  0xf5   :  { %3692 = vmatprep.subr.bf16.mxu0 %v5064_v33  ;;  %v5144_v33 = vld [vmem:[%s6943_s1 + $0xb90] ss:$8 sps:$4 sm:$0xff]  }
  0xf7   :  { %3266 = vmatpush1.bf16.msra.mxu1 %v5059_v34  ;;  %v5149_v34 = vld [vmem:[%s6943_s1 + $0x4a4] ss:$8 sps:$4 sm:$0xff]  }
  0xf8   :  { %3693 = vmatpush1.bf16.msra.mxu0 %v5062_v35  ;;  %3267 = vmatprep.subr.bf16.mxu1 %v5068_v36  ;;  %v5152_v35 = vld [vmem:[%s6943_s1 + $0xba4] ss:$8 sps:$4 sm:$0xff]   ;;  %v5147_v36 = vld [vmem:[%s6943_s1 + $0x4a0] ss:$8 sps:$4 sm:$0xff]  }
  0xf9   :  { %3694 = vmatprep.subr.bf16.mxu0 %v5072_v37  ;;  %v5150_v37 = vld [vmem:[%s6943_s1 + $0xba0] ss:$8 sps:$4 sm:$0xff]  }
  0xfb   :  { %3268 = vmatpush1.bf16.msra.mxu1 %v5066_v38  ;;  %v5155_v38 = vld [vmem:[%s6943_s1 + $0x4b4] ss:$8 sps:$4 sm:$0xff]  }
  0xfc   :  { %3695 = vmatpush1.bf16.msra.mxu0 %v5070_v39  ;;  %3269 = vmatprep.subr.bf16.mxu1 %v5077_v40  ;;  %v5158_v39 = vld [vmem:[%s6943_s1 + $0xbb4] ss:$8 sps:$4 sm:$0xff]   ;;  %v5153_v40 = vld [vmem:[%s6943_s1 + $0x4b0] ss:$8 sps:$4 sm:$0xff]  }
  0xfd   :  { %3696 = vmatprep.subr.bf16.mxu0 %v5080_v41  ;;  %v5156_v41 = vld [vmem:[%s6943_s1 + $0xbb0] ss:$8 sps:$4 sm:$0xff]  }
  0xff   :  { %3270 = vmatpush1.bf16.msra.mxu1 %v5075_v42  ;;  %v5163_v42 = vld [vmem:[%s6943_s1 + $0x4c4] ss:$8 sps:$4 sm:$0xff]  }
 0x100   :  { %3697 = vmatpush1.bf16.msra.mxu0 %v5078_v43  ;;  %3300 = vmatprep.subr.bf16.mxu1 %v5086_v44  ;;  %v5168_v43 = vld [vmem:[%s6943_s1 + $0xbc4] ss:$8 sps:$4 sm:$0xff]   ;;  %v5161_v44 = vld [vmem:[%s6943_s1 + $0x4c0] ss:$8 sps:$4 sm:$0xff]  }
 0x101   :  { %3727 = vmatprep.subr.bf16.mxu0 %v5092_v45  ;;  %v5166_v45 = vld [vmem:[%s6943_s1 + $0xbc0] ss:$8 sps:$4 sm:$0xff]  }
 0x102   :  { %3272 = vmatmul.mubr.bf16.vlgmr.msra.gmra.mrb[0].mxu1 %v5081_v46  ;;  %v5173_v46 = vld [vmem:[%s6943_s1 + $0x4d4] ss:$8 sps:$4 sm:$0xff]  }
 0x103   :  { %3699 = vmatmul.mubr.bf16.vlgmr.msra.gmra.mrb[0].mxu0 %v5087_v48  ;;  %3301 = vmatpush1.bf16.msra.mxu1 %v5084_v47  ;;  %v5176_v47 = vld [vmem:[%s6943_s1 + $0xbd4] ss:$8 sps:$4 sm:$0xff]   ;;  %v5171_v48 = vld [vmem:[%s6943_s1 + $0x4d0] ss:$8 sps:$4 sm:$0xff]  }
 0x104   :  { %3728 = vmatpush1.bf16.msra.mxu0 %v5090_v49  ;;  %3302 = vmatprep.subr.bf16.mxu1 %v5095_v50  ;;  %v5174_v49 = vld [vmem:[%s6943_s1 + $0xbd0] ss:$8 sps:$4 sm:$0xff]   ;;  %v5180_v50 = vld [vmem:[%s6943_s1 + $0x4e4] ss:$8 sps:$4 sm:$0xff]  }
 0x105   :  { %3729 = vmatprep.subr.bf16.mxu0 %v5098_v51  ;;  %3281 = vmatprep.mubr.bf16.mxu1 %v5159_v52  ;;  %v5184_v51 = vld [vmem:[%s6943_s1 + $0xbe4] ss:$8 sps:$4 sm:$0xff]   ;;  %v5178_v52 = vld [vmem:[%s6943_s1 + $0x4e0] ss:$8 sps:$4 sm:$0xff]  }
 0x106   :  { %3708 = vmatprep.mubr.bf16.mxu0 %v5164_v53  ;;  %v5182_v53 = vld [vmem:[%s6943_s1 + $0xbe0] ss:$8 sps:$4 sm:$0xff]  }
 0x107   :  { %3303 = vmatpush1.bf16.msra.mxu1 %v5093_v54  ;;  %v5189_v54 = vld [vmem:[%s6943_s1 + $0x4f4] ss:$8 sps:$4 sm:$0xff]  }
 0x108   :  { %3730 = vmatpush1.bf16.msra.mxu0 %v5096_v55  ;;  %3304 = vmatprep.subr.bf16.mxu1 %v5101_v56  ;;  %v5192_v55 = vld [vmem:[%s6943_s1 + $0xbf4] ss:$8 sps:$4 sm:$0xff]   ;;  %v5187_v56 = vld [vmem:[%s6943_s1 + $0x4f0] ss:$8 sps:$4 sm:$0xff]  }
 0x109   :  { %3731 = vmatprep.subr.bf16.mxu0 %v5104_v57  ;;  %v5190_v57 = vld [vmem:[%s6943_s1 + $0xbf0] ss:$8 sps:$4 sm:$0xff]  }
 0x10a   :  { %3282 = vmatmul.mubr.bf16.gmra.mrb[4].mxu1 %v5169_v60  ;;  %v5204_v60 = vld [vmem:[%s6943_s1 + $0xc04] ss:$8 sps:$4 sm:$0xff]  }
 0x10b   :  { %3709 = vmatmul.mubr.bf16.gmra.mrb[4].mxu0 %v5170_v61  ;;  %3305 = vmatpush1.bf16.msra.mxu1 %v5099_v58  ;;  %v5198_v58 = vld [vmem:[%s6943_s1 + $0x504] ss:$8 sps:$4 sm:$0xff]   ;;  %v5196_v61 = vld [vmem:[%s6943_s1 + $0x500] ss:$8 sps:$4 sm:$0xff]  }
 0x10c   :  { %3732 = vmatpush1.bf16.msra.mxu0 %v5102_v59  ;;  %3306 = vmatprep.subr.bf16.mxu1 %v5107_v0  ;;  %v5193_v59 = vld [vmem:[%s6944_s0 + $0x20] ss:$108 sps:$4 sm:$0xff]   ;;  %v5207_v0 = vld [vmem:[%s6943_s1 + $0x514] ss:$8 sps:$4 sm:$0xff]  }
 0x10d   :  { %3733 = vmatprep.subr.bf16.mxu0 %v5110_v1  ;;  %3291 = vmatprep.mubr.bf16.mxu1 %v4022_v2  ;;  %v5210_v1 = vld [vmem:[%s6943_s1 + $0xc14] ss:$8 sps:$4 sm:$0xff]  }
 0x10e   :  { %3718 = vmatprep.mubr.bf16.mxu0 %v4036_v3  ;;  %v5271_v2 = vld [vmem:[%s6944_s0 + $0xfc] ss:$108 sps:$4 sm:$0xff]   ;;  %v5276_v3 = vld [vmem:[%s6944_s0 + $0x134] ss:$108 sps:$4 sm:$0xff]  }
 0x10f   :  { %3307 = vmatpush1.bf16.msra.mxu1 %v5105_v4  ;;  %v5205_v4 = vld [vmem:[%s6943_s1 + $0x510] ss:$8 sps:$4 sm:$0xff]  }
 0x110   :  { %3734 = vmatpush1.bf16.msra.mxu0 %v5108_v5  ;;  %3308 = vmatprep.subr.bf16.mxu1 %v5113_v6  ;;  %v5208_v5 = vld [vmem:[%s6943_s1 + $0xc10] ss:$8 sps:$4 sm:$0xff]   ;;  %v5213_v6 = vld [vmem:[%s6943_s1 + $0x524] ss:$8 sps:$4 sm:$0xff]  }
 0x111   :  { %3735 = vmatprep.subr.bf16.mxu0 %v5116_v7  ;;  %v5216_v7 = vld [vmem:[%s6943_s1 + $0xc24] ss:$8 sps:$4 sm:$0xff]  }
 0x112   :  { %3292 = vmatmul.mubr.bf16.gmra.mrb[8].mxu1 %v4021_v11  ;;  %v75_v11 = vld [vmem:[%s6944_s0 + $0x1d0] sm:$0xff] }
 0x113   :  { %3719 = vmatmul.mubr.bf16.gmra.mrb[8].mxu0 %v4035_v12  ;;  %3309 = vmatpush1.bf16.msra.mxu1 %v5111_v8  ;;  %v5211_v8 = vld [vmem:[%s6943_s1 + $0x520] ss:$8 sps:$4 sm:$0xff]  }
 0x114   :  { %3736 = vmatpush1.bf16.msra.mxu0 %v5114_v9  ;;  %3310 = vmatprep.subr.bf16.mxu1 %v5119_v10  ;;  %v5281_v9 = vld [vmem:[%s6944_s0 + $0xf8] ss:$108 sps:$4 sm:$0xff]   ;;  %v5282_v10 = vld [vmem:[%s6944_s0 + $0x130] ss:$108 sps:$4 sm:$0xff]   ;;  %v82_v12 = vld [vmem:[%s6944_s0 + $0x208] sm:$0xff] }
 0x115   :  { %3737 = vmatprep.subr.bf16.mxu0 %v5122_v13  ;;  %3332 = vmatprep.mubr.bf16.mxu1 %v5195_v14  ;;  %v5214_v13 = vld [vmem:[%s6943_s1 + $0xc20] ss:$8 sps:$4 sm:$0xff]   ;;  %v5219_v14 = vld [vmem:[%s6943_s1 + $0x534] ss:$8 sps:$4 sm:$0xff]  }
 0x116   :  { %3759 = vmatprep.mubr.bf16.mxu0 %v5201_v15  ;;  %v5222_v15 = vld [vmem:[%s6943_s1 + $0xc34] ss:$8 sps:$4 sm:$0xff]  }
 0x117   :  { %3311 = vmatpush1.bf16.msra.mxu1 %v5117_v16  ;;  %v4024_v16 = vcombine.high %v75_v11, %v75_v11 }
 0x118   :  { %3738 = vmatpush1.bf16.msra.mxu0 %v5120_v17  ;;  %3312 = vmatprep.subr.bf16.mxu1 %v5125_v18  ;;  %v4038_v17 = vcombine.high %v82_v12, %v82_v12  ;;  %v5217_v18 = vld [vmem:[%s6943_s1 + $0x530] ss:$8 sps:$4 sm:$0xff]  }
 0x119   :  { %3739 = vmatprep.subr.bf16.mxu0 %v5128_v19  ;;  %v5220_v19 = vld [vmem:[%s6943_s1 + $0xc30] ss:$8 sps:$4 sm:$0xff]  }
 0x11b   :  { %3313 = vmatpush1.bf16.msra.mxu1 %v5123_v20  ;;  %v5225_v20 = vld [vmem:[%s6943_s1 + $0x544] ss:$8 sps:$4 sm:$0xff]  }
 0x11c   :  { %3740 = vmatpush1.bf16.msra.mxu0 %v5126_v21  ;;  %3314 = vmatprep.subr.bf16.mxu1 %v5131_v22  ;;  %v5228_v21 = vld [vmem:[%s6943_s1 + $0xc44] ss:$8 sps:$4 sm:$0xff]   ;;  %v4023_v22 = vcombine.low %v75_v11, %v75_v11 }
 0x11d   :  { %3741 = vmatprep.subr.bf16.mxu0 %v5134_v23  ;;  %v4037_v23 = vcombine.low %v82_v12, %v82_v12  ;;  %v5311_v11 = vld [vmem:[%s6944_s0 + $0x60] ss:$108 sps:$4 sm:$0xff]  }
 0x11e   :  { %v5308_v12 = vld [vmem:[%s6943_s1 + $0x600] ss:$8 sps:$4 sm:$0xff]  }
 0x11f   :  { %3315 = vmatpush1.bf16.msra.mxu1 %v5129_v24  ;;  %v5223_v24 = vld [vmem:[%s6943_s1 + $0x540] ss:$8 sps:$4 sm:$0xff]  }
 0x120   :  { %3742 = vmatpush1.bf16.msra.mxu0 %v5132_v25  ;;  %3316 = vmatprep.subr.bf16.mxu1 %v5137_v26  ;;  %v5226_v25 = vld [vmem:[%s6943_s1 + $0xc40] ss:$8 sps:$4 sm:$0xff]   ;;  %v5231_v26 = vld [vmem:[%s6943_s1 + $0x554] ss:$8 sps:$4 sm:$0xff]  }
 0x121   :  { %3743 = vmatprep.subr.bf16.mxu0 %v5140_v27  ;;  %v5234_v27 = vld [vmem:[%s6943_s1 + $0xc54] ss:$8 sps:$4 sm:$0xff]  }
 0x123   :  { %3317 = vmatpush1.bf16.msra.mxu1 %v5135_v28  ;;  %v5307_v28 = vld [vmem:[%s6944_s0 + $0x2c] ss:$108 sps:$4 sm:$0xff]  }
 0x124   :  { %3744 = vmatpush1.bf16.msra.mxu0 %v5138_v29  ;;  %3318 = vmatprep.subr.bf16.mxu1 %v5143_v30  ;;  %v5313_v29 = vld [vmem:[%s6944_s0 + $0x64] ss:$108 sps:$4 sm:$0xff]  }
 0x125   :  { %3745 = vmatprep.subr.bf16.mxu0 %v5146_v31  ;;  %v5229_v30 = vld [vmem:[%s6943_s1 + $0x550] ss:$8 sps:$4 sm:$0xff]  }
 0x126   :  { %v5232_v31 = vld [vmem:[%s6943_s1 + $0xc50] ss:$8 sps:$4 sm:$0xff]  }
 0x127   :  { %3319 = vmatpush1.bf16.msra.mxu1 %v5141_v32  ;;  %v5237_v32 = vld [vmem:[%s6943_s1 + $0x564] ss:$8 sps:$4 sm:$0xff]  }
 0x128   :  { %3746 = vmatpush1.bf16.msra.mxu0 %v5144_v33  ;;  %3320 = vmatprep.subr.bf16.mxu1 %v5149_v34  ;;  %v5240_v33 = vld [vmem:[%s6943_s1 + $0xc64] ss:$8 sps:$4 sm:$0xff]   ;;  %v5235_v34 = vld [vmem:[%s6943_s1 + $0x560] ss:$8 sps:$4 sm:$0xff]  }
 0x129   :  { %3747 = vmatprep.subr.bf16.mxu0 %v5152_v35  ;;  %v5238_v35 = vld [vmem:[%s6943_s1 + $0xc60] ss:$8 sps:$4 sm:$0xff]  }
 0x12b   :  { %3321 = vmatpush1.bf16.msra.mxu1 %v5147_v36  ;;  %v5243_v36 = vld [vmem:[%s6943_s1 + $0x574] ss:$8 sps:$4 sm:$0xff]  }
 0x12c   :  { %3748 = vmatpush1.bf16.msra.mxu0 %v5150_v37  ;;  %3322 = vmatprep.subr.bf16.mxu1 %v5155_v38  ;;  %v5246_v37 = vld [vmem:[%s6943_s1 + $0xc74] ss:$8 sps:$4 sm:$0xff]   ;;  %v5241_v38 = vld [vmem:[%s6943_s1 + $0x570] ss:$8 sps:$4 sm:$0xff]  }
 0x12d   :  { %3749 = vmatprep.subr.bf16.mxu0 %v5158_v39  ;;  %v5244_v39 = vld [vmem:[%s6943_s1 + $0xc70] ss:$8 sps:$4 sm:$0xff]  }
 0x12f   :  { %3323 = vmatpush1.bf16.msra.mxu1 %v5153_v40  ;;  %v5249_v40 = vld [vmem:[%s6943_s1 + $0x584] ss:$8 sps:$4 sm:$0xff]  }
 0x130   :  { %3750 = vmatpush1.bf16.msra.mxu0 %v5156_v41  ;;  %3324 = vmatprep.subr.bf16.mxu1 %v5163_v42  ;;  %v5252_v41 = vld [vmem:[%s6943_s1 + $0xc84] ss:$8 sps:$4 sm:$0xff]   ;;  %v5247_v42 = vld [vmem:[%s6943_s1 + $0x580] ss:$8 sps:$4 sm:$0xff]  }
 0x131   :  { %3751 = vmatprep.subr.bf16.mxu0 %v5168_v43  ;;  %v5250_v43 = vld [vmem:[%s6943_s1 + $0xc80] ss:$8 sps:$4 sm:$0xff]  }
 0x133   :  { %3325 = vmatpush1.bf16.msra.mxu1 %v5161_v44  ;;  %v5255_v44 = vld [vmem:[%s6943_s1 + $0x594] ss:$8 sps:$4 sm:$0xff]  }
 0x134   :  { %3752 = vmatpush1.bf16.msra.mxu0 %v5166_v45  ;;  %3326 = vmatprep.subr.bf16.mxu1 %v5173_v46  ;;  %v5258_v45 = vld [vmem:[%s6943_s1 + $0xc94] ss:$8 sps:$4 sm:$0xff]   ;;  %v5253_v46 = vld [vmem:[%s6943_s1 + $0x590] ss:$8 sps:$4 sm:$0xff]  }
 0x135   :  { %3753 = vmatprep.subr.bf16.mxu0 %v5176_v47  ;;  %v5256_v47 = vld [vmem:[%s6943_s1 + $0xc90] ss:$8 sps:$4 sm:$0xff]  }
 0x137   :  { %3327 = vmatpush1.bf16.msra.mxu1 %v5171_v48  ;;  %v5261_v48 = vld [vmem:[%s6943_s1 + $0x5a4] ss:$8 sps:$4 sm:$0xff]  }
 0x138   :  { %3754 = vmatpush1.bf16.msra.mxu0 %v5174_v49  ;;  %3328 = vmatprep.subr.bf16.mxu1 %v5180_v50  ;;  %v5264_v49 = vld [vmem:[%s6943_s1 + $0xca4] ss:$8 sps:$4 sm:$0xff]   ;;  %v5259_v50 = vld [vmem:[%s6943_s1 + $0x5a0] ss:$8 sps:$4 sm:$0xff]  }
 0x139   :  { %3755 = vmatprep.subr.bf16.mxu0 %v5184_v51  ;;  %v5262_v51 = vld [vmem:[%s6943_s1 + $0xca0] ss:$8 sps:$4 sm:$0xff]  }
 0x13b   :  { %3329 = vmatpush1.bf16.msra.mxu1 %v5178_v52  ;;  %v5267_v52 = vld [vmem:[%s6943_s1 + $0x5b4] ss:$8 sps:$4 sm:$0xff]  }
 0x13c   :  { %3756 = vmatpush1.bf16.msra.mxu0 %v5182_v53  ;;  %3330 = vmatprep.subr.bf16.mxu1 %v5189_v54  ;;  %v5270_v53 = vld [vmem:[%s6943_s1 + $0xcb4] ss:$8 sps:$4 sm:$0xff]   ;;  %v5265_v54 = vld [vmem:[%s6943_s1 + $0x5b0] ss:$8 sps:$4 sm:$0xff]  }
 0x13d   :  { %3757 = vmatprep.subr.bf16.mxu0 %v5192_v55  ;;  %v5268_v55 = vld [vmem:[%s6943_s1 + $0xcb0] ss:$8 sps:$4 sm:$0xff]  }
 0x13f   :  { %3331 = vmatpush1.bf16.msra.mxu1 %v5187_v56  ;;  %v5275_v56 = vld [vmem:[%s6943_s1 + $0x5c4] ss:$8 sps:$4 sm:$0xff]  }
 0x140   :  { %3758 = vmatpush1.bf16.msra.mxu0 %v5190_v57  ;;  %3361 = vmatprep.subr.bf16.mxu1 %v5198_v58  ;;  %v5280_v57 = vld [vmem:[%s6943_s1 + $0xcc4] ss:$8 sps:$4 sm:$0xff]   ;;  %v5273_v58 = vld [vmem:[%s6943_s1 + $0x5c0] ss:$8 sps:$4 sm:$0xff]  }
 0x141   :  { %3788 = vmatprep.subr.bf16.mxu0 %v5204_v60  ;;  %v5285_v60 = vld [vmem:[%s6943_s1 + $0x5d4] ss:$8 sps:$4 sm:$0xff]  }
 0x142   :  { %3333 = vmatmul.mubr.bf16.vlgmr.msra.gmra.mrb[0].mxu1 %v5193_v59  ;;  %v5278_v59 = vld [vmem:[%s6943_s1 + $0xcc0] ss:$8 sps:$4 sm:$0xff]  }
 0x143   :  { %3760 = vmatmul.mubr.bf16.vlgmr.msra.gmra.mrb[0].mxu0 %v5199_v62  ;;  %3362 = vmatpush1.bf16.msra.mxu1 %v5196_v61  ;;  %v5288_v61 = vld [vmem:[%s6943_s1 + $0xcd4] ss:$8 sps:$4 sm:$0xff]   ;;  %v5283_v62 = vld [vmem:[%s6943_s1 + $0x5d0] ss:$8 sps:$4 sm:$0xff]  }
 0x144   :  { %3789 = vmatpush1.bf16.msra.mxu0 %v5202_v63  ;;  %3363 = vmatprep.subr.bf16.mxu1 %v5207_v0  ;;  %v5286_v63 = vld [vmem:[%s6943_s1 + $0xcd0] ss:$8 sps:$4 sm:$0xff]   ;;  %v5292_v0 = vld [vmem:[%s6943_s1 + $0x5e4] ss:$8 sps:$4 sm:$0xff]  }
 0x145   :  { %3790 = vmatprep.subr.bf16.mxu0 %v5210_v1  ;;  %3342 = vmatprep.mubr.bf16.mxu1 %v5271_v2  ;;  %v5296_v1 = vld [vmem:[%s6943_s1 + $0xce4] ss:$8 sps:$4 sm:$0xff]   ;;  %v5290_v2 = vld [vmem:[%s6943_s1 + $0x5e0] ss:$8 sps:$4 sm:$0xff]  }
 0x146   :  { %3769 = vmatprep.mubr.bf16.mxu0 %v5276_v3  ;;  %v5294_v3 = vld [vmem:[%s6943_s1 + $0xce0] ss:$8 sps:$4 sm:$0xff]  }
 0x147   :  { %3364 = vmatpush1.bf16.msra.mxu1 %v5205_v4  ;;  %v5301_v4 = vld [vmem:[%s6943_s1 + $0x5f4] ss:$8 sps:$4 sm:$0xff]  }
 0x148   :  { %3791 = vmatpush1.bf16.msra.mxu0 %v5208_v5  ;;  %3365 = vmatprep.subr.bf16.mxu1 %v5213_v6  ;;  %v5304_v5 = vld [vmem:[%s6943_s1 + $0xcf4] ss:$8 sps:$4 sm:$0xff]   ;;  %v5299_v6 = vld [vmem:[%s6943_s1 + $0x5f0] ss:$8 sps:$4 sm:$0xff]  }
 0x149   :  { %3792 = vmatprep.subr.bf16.mxu0 %v5216_v7  ;;  %v5302_v7 = vld [vmem:[%s6943_s1 + $0xcf0] ss:$8 sps:$4 sm:$0xff]  }
 0x14a   :  { %3343 = vmatmul.mubr.bf16.gmra.mrb[4].mxu1 %v5281_v9  ;;  %v5316_v9 = vld [vmem:[%s6943_s1 + $0xd04] ss:$8 sps:$4 sm:$0xff]  }
 0x14b   :  { %3770 = vmatmul.mubr.bf16.gmra.mrb[4].mxu0 %v5282_v10  ;;  %3366 = vmatpush1.bf16.msra.mxu1 %v5211_v8  ;;  %v5310_v8 = vld [vmem:[%s6943_s1 + $0x604] ss:$8 sps:$4 sm:$0xff]   ;;  %v5305_v10 = vld [vmem:[%s6944_s0 + $0x28] ss:$108 sps:$4 sm:$0xff]  }
 0x14c   :  { %3793 = vmatpush1.bf16.msra.mxu0 %v5214_v13  ;;  %3367 = vmatprep.subr.bf16.mxu1 %v5219_v14  ;;  %v5314_v13 = vld [vmem:[%s6943_s1 + $0xd00] ss:$8 sps:$4 sm:$0xff]   ;;  %v5319_v14 = vld [vmem:[%s6943_s1 + $0x614] ss:$8 sps:$4 sm:$0xff]  }
 0x14d   :  { %3794 = vmatprep.subr.bf16.mxu0 %v5222_v15  ;;  %3352 = vmatprep.mubr.bf16.mxu1 %v4024_v16  ;;  %v5322_v15 = vld [vmem:[%s6943_s1 + $0xd14] ss:$8 sps:$4 sm:$0xff]  }
 0x14e   :  { %3779 = vmatprep.mubr.bf16.mxu0 %v4038_v17  ;;  %v5335_v16 = vld [vmem:[%s6944_s0 + $0x13c] ss:$108 sps:$4 sm:$0xff]   ;;  %v5378_v17 = vld [vmem:[%s6944_s0 + $0x104] ss:$108 sps:$4 sm:$0xff]  }
 0x14f   :  { %3368 = vmatpush1.bf16.msra.mxu1 %v5217_v18  ;;  %v5317_v18 = vld [vmem:[%s6943_s1 + $0x610] ss:$8 sps:$4 sm:$0xff]  }
 0x150   :  { %3795 = vmatpush1.bf16.msra.mxu0 %v5220_v19  ;;  %3369 = vmatprep.subr.bf16.mxu1 %v5225_v20  ;;  %v5320_v19 = vld [vmem:[%s6943_s1 + $0xd10] ss:$8 sps:$4 sm:$0xff]   ;;  %v5325_v20 = vld [vmem:[%s6943_s1 + $0x624] ss:$8 sps:$4 sm:$0xff]  }
 0x151   :  { %3796 = vmatprep.subr.bf16.mxu0 %v5228_v21  ;;  %v5328_v21 = vld [vmem:[%s6943_s1 + $0xd24] ss:$8 sps:$4 sm:$0xff]  }
 0x152   :  { %3353 = vmatmul.mubr.bf16.gmra.mrb[8].mxu1 %v4023_v22  ;;  %v5340_v22 = vld [vmem:[%s6944_s0 + $0x138] ss:$108 sps:$4 sm:$0xff]  }
 0x153   :  { %3780 = vmatmul.mubr.bf16.gmra.mrb[8].mxu0 %v4037_v23  ;;  %3370 = vmatpush1.bf16.msra.mxu1 %v5223_v24  ;;  %v83_v23 = vld [vmem:[%s6944_s0 + $0x210] sm:$0xff]  ;;  %v5380_v24 = vld [vmem:[%s6944_s0 + $0x100] ss:$108 sps:$4 sm:$0xff]  }
 0x154   :  { %3797 = vmatpush1.bf16.msra.mxu0 %v5226_v25  ;;  %3371 = vmatprep.subr.bf16.mxu1 %v5231_v26  ;;  %v76_v25 = vld [vmem:[%s6944_s0 + $0x1d8] sm:$0xff]  ;;  %v5323_v26 = vld [vmem:[%s6943_s1 + $0x620] ss:$8 sps:$4 sm:$0xff]  }
 0x155   :  { %3798 = vmatprep.subr.bf16.mxu0 %v5234_v27  ;;  %3393 = vmatprep.mubr.bf16.mxu1 %v5307_v28  ;;  %v5326_v27 = vld [vmem:[%s6943_s1 + $0xd20] ss:$8 sps:$4 sm:$0xff]   ;;  %v5331_v28 = vld [vmem:[%s6943_s1 + $0x634] ss:$8 sps:$4 sm:$0xff]  }
 0x156   :  { %3820 = vmatprep.mubr.bf16.mxu0 %v5313_v29  ;;  %v5334_v29 = vld [vmem:[%s6943_s1 + $0xd34] ss:$8 sps:$4 sm:$0xff]  }
 0x157   :  { %3372 = vmatpush1.bf16.msra.mxu1 %v5229_v30  ;;  %v4040_v30 = vcombine.high %v83_v23, %v83_v23 }
 0x158   :  { %3799 = vmatpush1.bf16.msra.mxu0 %v5232_v31  ;;  %3373 = vmatprep.subr.bf16.mxu1 %v5237_v32  ;;  %v4026_v31 = vcombine.high %v76_v25, %v76_v25  ;;  %v5329_v32 = vld [vmem:[%s6943_s1 + $0x630] ss:$8 sps:$4 sm:$0xff]  }
 0x159   :  { %3800 = vmatprep.subr.bf16.mxu0 %v5240_v33  ;;  %v5332_v33 = vld [vmem:[%s6943_s1 + $0xd30] ss:$8 sps:$4 sm:$0xff]  }
 0x15b   :  { %3374 = vmatpush1.bf16.msra.mxu1 %v5235_v34  ;;  %v5339_v34 = vld [vmem:[%s6943_s1 + $0x644] ss:$8 sps:$4 sm:$0xff]  }
 0x15c   :  { %3801 = vmatpush1.bf16.msra.mxu0 %v5238_v35  ;;  %3375 = vmatprep.subr.bf16.mxu1 %v5243_v36  ;;  %v5343_v35 = vld [vmem:[%s6943_s1 + $0xd44] ss:$8 sps:$4 sm:$0xff]   ;;  %v4039_v36 = vcombine.low %v83_v23, %v83_v23 }
 0x15d   :  { %3802 = vmatprep.subr.bf16.mxu0 %v5246_v37  ;;  %v4025_v37 = vcombine.low %v76_v25, %v76_v25  ;;  %v519_v25 = vlaneseq }
 0x15f   :  { %3376 = vmatpush1.bf16.msra.mxu1 %v5241_v38  ;;  %v5337_v38 = vld [vmem:[%s6943_s1 + $0x640] ss:$8 sps:$4 sm:$0xff]  }
 0x160   :  { %3803 = vmatpush1.bf16.msra.mxu0 %v5244_v39  ;;  %3377 = vmatprep.subr.bf16.mxu1 %v5249_v40  ;;  %v5341_v39 = vld [vmem:[%s6943_s1 + $0xd40] ss:$8 sps:$4 sm:$0xff]   ;;  %v5346_v40 = vld [vmem:[%s6943_s1 + $0x654] ss:$8 sps:$4 sm:$0xff]  }
 0x161   :  { %3804 = vmatprep.subr.bf16.mxu0 %v5252_v41  ;;  %v5349_v41 = vld [vmem:[%s6943_s1 + $0xd54] ss:$8 sps:$4 sm:$0xff]  }
 0x163   :  { %3378 = vmatpush1.bf16.msra.mxu1 %v5247_v42  ;;  %v5398_v42 = vld [vmem:[%s6944_s0 + $0x34] ss:$108 sps:$4 sm:$0xff]  }
 0x164   :  { %3805 = vmatpush1.bf16.msra.mxu0 %v5250_v43  ;;  %3379 = vmatprep.subr.bf16.mxu1 %v5255_v44  ;;  %v5344_v43 = vld [vmem:[%s6943_s1 + $0x650] ss:$8 sps:$4 sm:$0xff]  }
 0x165   :  { %3806 = vmatprep.subr.bf16.mxu0 %v5258_v45  ;;  %v5347_v44 = vld [vmem:[%s6943_s1 + $0xd50] ss:$8 sps:$4 sm:$0xff]   ;;  %v5353_v45 = vld [vmem:[%s6943_s1 + $0x664] ss:$8 sps:$4 sm:$0xff]  }
 0x167   :  { %3380 = vmatpush1.bf16.msra.mxu1 %v5253_v46  ;;  %v5357_v46 = vld [vmem:[%s6943_s1 + $0xd64] ss:$8 sps:$4 sm:$0xff]  }
 0x168   :  { %3807 = vmatpush1.bf16.msra.mxu0 %v5256_v47  ;;  %3381 = vmatprep.subr.bf16.mxu1 %v5261_v48  ;;  %v5404_v47 = vmov 0   ;;  %v5351_v48 = vld [vmem:[%s6943_s1 + $0x660] ss:$8 sps:$4 sm:$0xff]  }
 0x169   :  { %3808 = vmatprep.subr.bf16.mxu0 %v5264_v49  ;;  %v5355_v49 = vld [vmem:[%s6943_s1 + $0xd60] ss:$8 sps:$4 sm:$0xff]  }
 0x16b   :  { %3382 = vmatpush1.bf16.msra.mxu1 %v5259_v50  ;;  %v5360_v50 = vld [vmem:[%s6943_s1 + $0x674] ss:$8 sps:$4 sm:$0xff]  }
 0x16c   :  { %3809 = vmatpush1.bf16.msra.mxu0 %v5262_v51  ;;  %3383 = vmatprep.subr.bf16.mxu1 %v5267_v52  ;;  %v5363_v51 = vld [vmem:[%s6943_s1 + $0xd74] ss:$8 sps:$4 sm:$0xff]   ;;  %v5358_v52 = vld [vmem:[%s6943_s1 + $0x670] ss:$8 sps:$4 sm:$0xff]  }
 0x16d   :  { %3810 = vmatprep.subr.bf16.mxu0 %v5270_v53  ;;  %v5361_v53 = vld [vmem:[%s6943_s1 + $0xd70] ss:$8 sps:$4 sm:$0xff]  }
 0x16f   :  { %3384 = vmatpush1.bf16.msra.mxu1 %v5265_v54  ;;  %v5366_v54 = vld [vmem:[%s6943_s1 + $0x684] ss:$8 sps:$4 sm:$0xff]  }
 0x170   :  { %3811 = vmatpush1.bf16.msra.mxu0 %v5268_v55  ;;  %3385 = vmatprep.subr.bf16.mxu1 %v5275_v56  ;;  %v5367_v55 = vld [vmem:[%s6944_s0 + $0x68] ss:$108 sps:$4 sm:$0xff]  }
 0x171   :  { %3812 = vmatprep.subr.bf16.mxu0 %v5280_v57  ;;  %v5364_v56 = vld [vmem:[%s6943_s1 + $0x680] ss:$8 sps:$4 sm:$0xff]   ;;  %v5370_v57 = vld [vmem:[%s6943_s1 + $0x694] ss:$8 sps:$4 sm:$0xff]  }
 0x173   :  { %3386 = vmatpush1.bf16.msra.mxu1 %v5273_v58  ;;  %v5368_v58 = vld [vmem:[%s6943_s1 + $0x690] ss:$8 sps:$4 sm:$0xff]  }
 0x174   :  { %3813 = vmatpush1.bf16.msra.mxu0 %v5278_v59  ;;  %3387 = vmatprep.subr.bf16.mxu1 %v5285_v60  ;;  %v5373_v59 = vld [vmem:[%s6943_s1 + $0x6a4] ss:$8 sps:$4 sm:$0xff]  }
 0x175   :  { %3814 = vmatprep.subr.bf16.mxu0 %v5288_v61  ;;  %v5374_v60 = vld [vmem:[%s6944_s0 + $0x140] ss:$108 sps:$4 sm:$0xff]  }
 0x176   :  { %v5371_v61 = vld [vmem:[%s6943_s1 + $0x6a0] ss:$8 sps:$4 sm:$0xff]  }
 0x177   :  { %3388 = vmatpush1.bf16.msra.mxu1 %v5283_v62  ;;  %v5377_v62 = vld [vmem:[%s6943_s1 + $0x6b4] ss:$8 sps:$4 sm:$0xff]  }
 0x178   :  { %3815 = vmatpush1.bf16.msra.mxu0 %v5286_v63  ;;  %3389 = vmatprep.subr.bf16.mxu1 %v5292_v0  ;;  %v5375_v63 = vld [vmem:[%s6943_s1 + $0x6b0] ss:$8 sps:$4 sm:$0xff]   ;;  %v5383_v0 = vld [vmem:[%s6943_s1 + $0x6c4] ss:$8 sps:$4 sm:$0xff]  }
 0x179   :  { %3816 = vmatprep.subr.bf16.mxu0 %v5296_v1  ;;  %v5384_v1 = vld [vmem:[%s6944_s0 + $0x218] ss:$0 sps:$4 sm:$0xff]  }
 0x17b   :  { %3390 = vmatpush1.bf16.msra.mxu1 %v5290_v2  ;;  %v5381_v2 = vld [vmem:[%s6943_s1 + $0x6c0] ss:$8 sps:$4 sm:$0xff]  }
 0x17c   :  { %3817 = vmatpush1.bf16.msra.mxu0 %v5294_v3  ;;  %3391 = vmatprep.subr.bf16.mxu1 %v5301_v4  ;;  %v5387_v3 = vld [vmem:[%s6943_s1 + $0x6d4] ss:$8 sps:$4 sm:$0xff]   ;;  %v5385_v4 = vld [vmem:[%s6943_s1 + $0x6d0] ss:$8 sps:$4 sm:$0xff]  }
 0x17d   :  { %3818 = vmatprep.subr.bf16.mxu0 %v5304_v5  ;;  %v5392_v5 = vld [vmem:[%s6943_s1 + $0x6e4] ss:$8 sps:$4 sm:$0xff]  }
 0x17f   :  { %3392 = vmatpush1.bf16.msra.mxu1 %v5299_v6  ;;  %v5390_v6 = vld [vmem:[%s6943_s1 + $0x6e0] ss:$8 sps:$4 sm:$0xff]  }
 0x180   :  { %3819 = vmatpush1.bf16.msra.mxu0 %v5302_v7  ;;  %3422 = vmatprep.subr.bf16.mxu1 %v5310_v8  ;;  %v5395_v7 = vld [vmem:[%s6943_s1 + $0x6f4] ss:$8 sps:$4 sm:$0xff]   ;;  %v5393_v8 = vld [vmem:[%s6943_s1 + $0x6f0] ss:$8 sps:$4 sm:$0xff]  }
 0x181   :  { %3849 = vmatprep.subr.bf16.mxu0 %v5316_v9  ;;  %v5396_v9 = vld [vmem:[%s6944_s0 + $0x30] ss:$108 sps:$4 sm:$0xff]  }
 0x182   :  { %3394 = vmatmul.mubr.bf16.vlgmr.msra.gmra.mrb[0].mxu1 %v5305_v10  ;;  %v5399_v10 = vld [vmem:[%s6944_s0 + $0x10c] ss:$108 sps:$4 sm:$0xff]  }
 0x183   :  { %3821 = vmatmul.mubr.bf16.vlgmr.msra.gmra.mrb[0].mxu0 %v5311_v11  ;;  %3423 = vmatpush1.bf16.msra.mxu1 %v5308_v12  ;;  %v77_v11 = vld [vmem:[%s6944_s0 + $0x1e0] sm:$0xff]  ;;  %v5401_v12 = vld [vmem:[%s6944_s0 + $0x108] ss:$108 sps:$4 sm:$0xff]  }
 0x184   :  { %3850 = vmatpush1.bf16.msra.mxu0 %v5314_v13  ;;  %3424 = vmatprep.subr.bf16.mxu1 %v5319_v14  ;;  %v4028_v13 = vcombine.high %v77_v11, %v77_v11  ;;  %v4027_v14 = vcombine.low %v77_v11, %v77_v11 }
 0x185   :  { %3851 = vmatprep.subr.bf16.mxu0 %v5322_v15  ;;  %3830 = vmatprep.mubr.bf16.mxu0 %v5335_v16 }
 0x186   :  { %3403 = vmatprep.mubr.bf16.mxu1 %v5378_v17 }
 0x187   :  { %3425 = vmatpush1.bf16.msra.mxu1 %v5317_v18 }
 0x188   :  { %3852 = vmatpush1.bf16.msra.mxu0 %v5320_v19  ;;  %3426 = vmatprep.subr.bf16.mxu1 %v5325_v20 }
 0x189   :  { %3853 = vmatprep.subr.bf16.mxu0 %v5328_v21 }
 0x18a   :  { %3404 = vmatmul.mubr.bf16.gmra.mrb[4].mxu1 %v5380_v24 }
 0x18b   :  { %3831 = vmatmul.mubr.bf16.gmra.mrb[4].mxu0 %v5340_v22  ;;  %3427 = vmatpush1.bf16.msra.mxu1 %v5323_v26 }
 0x18c   :  { %3854 = vmatpush1.bf16.msra.mxu0 %v5326_v27  ;;  %3428 = vmatprep.subr.bf16.mxu1 %v5331_v28  ;;  %v520_v28 = vshrl.u32 %v519_v25, 7 }
 0x18d   :  { %3855 = vmatprep.subr.bf16.mxu0 %v5334_v29  ;;  %3840 = vmatprep.mubr.bf16.mxu0 %v4040_v30  ;;  %v517_v30 = vld [vmem:[%s6945_s2] sm:$0x3] }
 0x18e   :  { %3413 = vmatprep.mubr.bf16.mxu1 %v4026_v31  ;;  %v521_v29 = vsub.s32 0, %v520_v28  ;;  %v525_v31 = vsub.s32 1, %v520_v28 }
 0x18f   :  { %3429 = vmatpush1.bf16.msra.mxu1 %v5329_v32 }
 0x190   :  { %3856 = vmatpush1.bf16.msra.mxu0 %v5332_v33  ;;  %3430 = vmatprep.subr.bf16.mxu1 %v5339_v34  ;;  %v522_v32 = vrot.slane %v517_v30, %v521_v29  ;;  %v526_v33 = vrot.slane %v517_v30, %v525_v31 }
 0x191   :  { %3857 = vmatprep.subr.bf16.mxu0 %v5343_v35 }
 0x192   :  { %3414 = vmatmul.mubr.bf16.gmra.mrb[8].mxu1 %v4025_v37 }
 0x193   :  { %3841 = vmatmul.mubr.bf16.gmra.mrb[8].mxu0 %v4039_v36  ;;  %3431 = vmatpush1.bf16.msra.mxu1 %v5337_v38 }
 0x194   :  { %3858 = vmatpush1.bf16.msra.mxu0 %v5341_v39  ;;  %3432 = vmatprep.subr.bf16.mxu1 %v5346_v40 }
 0x195   :  { %3859 = vmatprep.subr.bf16.mxu0 %v5349_v41  ;;  %3881 = vmatprep.mubr.bf16.mxu0 %v5404_v47 }
 0x196   :  { %3454 = vmatprep.mubr.bf16.mxu1 %v5398_v42 }
 0x197   :  { %3433 = vmatpush1.bf16.msra.mxu1 %v5344_v43 }
 0x198   :  { %3860 = vmatpush1.bf16.msra.mxu0 %v5347_v44  ;;  %3434 = vmatprep.subr.bf16.mxu1 %v5353_v45 }
 0x199   :  { %3861 = vmatprep.subr.bf16.mxu0 %v5357_v46 }
 0x19b   :  { %3435 = vmatpush1.bf16.msra.mxu1 %v5351_v48 }
 0x19c   :  { %3862 = vmatpush1.bf16.msra.mxu0 %v5355_v49  ;;  %3436 = vmatprep.subr.bf16.mxu1 %v5360_v50 }
 0x19d   :  { %3863 = vmatprep.subr.bf16.mxu0 %v5363_v51 }
 0x19f   :  { %3437 = vmatpush1.bf16.msra.mxu1 %v5358_v52 }
 0x1a0   :  { %3864 = vmatpush1.bf16.msra.mxu0 %v5361_v53  ;;  %3438 = vmatprep.subr.bf16.mxu1 %v5366_v54 }
 0x1a3   :  { %3882 = vmatmul.mubr.bf16.vlgmr.msra.gmra.mrb[0].mxu0 %v5367_v55  ;;  %3439 = vmatpush1.bf16.msra.mxu1 %v5364_v56 }
 0x1a4   :  { %3891 = vmatprep.mubr.bf16.mxu0 %v5404_v47  ;;  %3440 = vmatprep.subr.bf16.mxu1 %v5370_v57 }
 0x1a7   :  { %3441 = vmatpush1.bf16.msra.mxu1 %v5368_v58 }
 0x1a8   :  { %3442 = vmatprep.subr.bf16.mxu1 %v5373_v59 }
 0x1ab   :  { %3892 = vmatmul.mubr.bf16.gmra.mrb[4].mxu0 %v5374_v60  ;;  %3443 = vmatpush1.bf16.msra.mxu1 %v5371_v61 }
 0x1ac   :  { %3901 = vmatprep.mubr.bf16.mxu0 %v5404_v47  ;;  %3444 = vmatprep.subr.bf16.mxu1 %v5377_v62 }
 0x1af   :  { %3445 = vmatpush1.bf16.msra.mxu1 %v5375_v63 }
 0x1b0   :  { %3446 = vmatprep.subr.bf16.mxu1 %v5383_v0 }
 0x1b3   :  { %3902 = vmatmul.mubr.bf16.gmra.mrb[8].mxu0 %v5384_v1  ;;  %3447 = vmatpush1.bf16.msra.mxu1 %v5381_v2 }
 0x1b4   :  { %3448 = vmatprep.subr.bf16.mxu1 %v5387_v3 }
 0x1b7   :  { %3449 = vmatpush1.bf16.msra.mxu1 %v5385_v4 }
 0x1b8   :  { %3450 = vmatprep.subr.bf16.mxu1 %v5392_v5 }
 0x1bb   :  { %3451 = vmatpush1.bf16.msra.mxu1 %v5390_v6 }
 0x1bc   :  { %3452 = vmatprep.subr.bf16.mxu1 %v5395_v7 }
 0x1bf   :  { %3453 = vmatpush1.bf16.msra.mxu1 %v5393_v8 }
 0x1c2   :  { %3455 = vmatmul.mubr.bf16.vlgmr.msra.gmra.mrb[0].mxu1 %v5396_v9 }
 0x1c3   :  { %3464 = vmatprep.mubr.bf16.mxu1 %v5399_v10 }
 0x1ca   :  { %3465 = vmatmul.mubr.bf16.gmra.mrb[4].mxu1 %v5401_v12 }
 0x1cb   :  { %3474 = vmatprep.mubr.bf16.mxu1 %v4028_v13 }
 0x1d2   :  { %3475 = vmatmul.mubr.bf16.gmra.mrb[8].mxu1 %v4027_v14 }
 0x276   :  { %v3883_v15 = vpop.f32.mrb[0].mxu0 }
 0x277   :  { %v3885_v16 = vpop.f32.mrb[1].mxu0 }
 0x278   :  { %v3887_v17 = vpop.f32.mrb[2].mxu0 }
 0x279   :  { %v3889_v18 = vpop.f32.mrb[3].mxu0 }
 0x27e   :  { %v3893_v19 = vpop.f32.mrb[4].mxu0 }
 0x27f   :  { %v3895_v20 = vpop.f32.mrb[5].mxu0 }
 0x280   :  { %v3897_v21 = vpop.f32.mrb[6].mxu0 }
 0x281   :  { %v3899_v22 = vpop.f32.mrb[7].mxu0 }
 0x286   :  { %v3903_v23 = vpop.f32.mrb[8].mxu0 }
 0x287   :  { %v3905_v24 = vpop.f32.mrb[9].mxu0 }
 0x288   :  { %v3907_v26 = vpop.f32.mrb[10].mxu0 }
 0x289   :  { %v3908_v27 = vpop.f32.mrb[11].mxu0 }
 0x295   :  { %v3456_v34 = vpop.f32.mrb[0].mxu1 }
 0x296   :  { %v4484_v35 = vadd.f32 %v3456_v34, %v522_v32  ;;  %v3458_v36 = vpop.f32.mrb[1].mxu1 }
 0x297   :  { %v4486_v37 = vadd.f32 %v3458_v36, %v526_v33  ;;  %v3460_v38 = vpop.f32.mrb[2].mxu1 }
 0x298   :  { %v4485_v39 = vadd.f32 %v4484_v35, %v3883_v15  ;;  %v4488_v40 = vadd.f32 %v3460_v38, %v522_v32  ;;  %v3462_v41 = vpop.f32.mrb[3].mxu1 }
 0x299   :  { %v4487_v42 = vadd.f32 %v4486_v37, %v3885_v16  ;;  %v4490_v43 = vadd.f32 %v3462_v41, %v526_v33 }
 0x29a   :  { %v3910_v44 = vmax.f32 %v4485_v39, 0.0  ;;  %v4489_v45 = vadd.f32 %v4488_v40, %v3887_v17 }
 0x29b   :  { %v3911_v46 = vmax.f32 %v4487_v42, 0.0  ;;  %v4491_v47 = vadd.f32 %v4490_v43, %v3889_v18 }
 0x29c   :  { %v3912_v48 = vmax.f32 %v4489_v45, 0.0 }
 0x29d   :  { %v4479_v49 = vpack.c.bf16 %v3911_v46, %v3910_v44  ;;  %v3913_v50 = vmax.f32 %v4491_v47, 0.0  ;;  %v3466_v51 = vpop.f32.mrb[4].mxu1 }
 0x29e   :  { %v4492_v52 = vadd.f32 %v3466_v51, %v522_v32  ;;  %v3468_v53 = vpop.f32.mrb[5].mxu1 }
 0x29f   :  { %3952 = vst [vmem:[%s6946_s3] sm:$0xff] %v4479_v49  ;;  %v4480_v54 = vpack.c.bf16 %v3913_v50, %v3912_v48  ;;  %v4494_v55 = vadd.f32 %v3468_v53, %v526_v33  ;;  %v3470_v56 = vpop.f32.mrb[6].mxu1 }
 0x2a0   :  { %v4493_v57 = vadd.f32 %v4492_v52, %v3893_v19  ;;  %v4496_v58 = vadd.f32 %v3470_v56, %v522_v32  ;;  %v3472_v59 = vpop.f32.mrb[7].mxu1 }
 0x2a1   :  { %3953 = vst [vmem:[%s6946_s3 + $0x8] sm:$0xff] %v4480_v54  ;;  %v4495_v60 = vadd.f32 %v4494_v55, %v3895_v20  ;;  %v4498_v61 = vadd.f32 %v3472_v59, %v526_v33 }
 0x2a2   :  { %v3914_v62 = vmax.f32 %v4493_v57, 0.0  ;;  %v4497_v63 = vadd.f32 %v4496_v58, %v3897_v21 }
 0x2a3   :  { %v3915_v0 = vmax.f32 %v4495_v60, 0.0  ;;  %v4499_v1 = vadd.f32 %v4498_v61, %v3899_v22 }
 0x2a4   :  { %v3916_v2 = vmax.f32 %v4497_v63, 0.0 }
 0x2a5   :  { %v4481_v3 = vpack.c.bf16 %v3915_v0, %v3914_v62  ;;  %v3917_v4 = vmax.f32 %v4499_v1, 0.0  ;;  %v3476_v5 = vpop.f32.mrb[8].mxu1 }
 0x2a6   :  { %v4500_v6 = vadd.f32 %v3476_v5, %v522_v32  ;;  %v3478_v7 = vpop.f32.mrb[9].mxu1 }
 0x2a7   :  { %3954 = vst [vmem:[%s6946_s3 + $0x10] sm:$0xff] %v4481_v3  ;;  %v4482_v8 = vpack.c.bf16 %v3917_v4, %v3916_v2  ;;  %v4502_v9 = vadd.f32 %v3478_v7, %v526_v33  ;;  %v3480_v10 = vpop.f32.mrb[10].mxu1 }
 0x2a8   :  { %v4501_v11 = vadd.f32 %v4500_v6, %v3903_v23  ;;  %v3481_v12 = vpop.f32.mrb[11].mxu1 }
 0x2a9   :  { %3955 = vst [vmem:[%s6946_s3 + $0x18] sm:$0xff] %v4482_v8  ;;  %v4503_v13 = vadd.f32 %v4502_v9, %v3905_v24 }
 0x2aa   :  { %v3918_v14 = vmax.f32 %v4501_v11, 0.0 }
 0x2ab   :  { %v3919_v15 = vmax.f32 %v4503_v13, 0.0 }
 0x2ad   :  { %v4483_v16 = vpack.c.bf16 %v3919_v15, %v3918_v14 }
 0x2af   :  { %3956 = vst [vmem:[%s6946_s3 + $0x20] sm:$0xff] %v4483_v16 }

// kernel: _lambda_.10
= control target key start
LH: loop header
LB: loop body
LE: loop exit
PB: predicated region body
PF: predicated region fallthrough
CT: control target
= control target key end

     0   :  { %s4669_s1 = inlined_call_operand.vmem [shape: bf16[2304,256], index: 1, kind: input, shape index: {}]   ;;  %s4670_s0 = inlined_call_operand.vmem [shape: bf16[40,2304], index: 0, kind: input, shape index: {}]   ;;  %s4671_s2 = inlined_call_operand.vmem [shape: f32[1,256], index: 2, kind: input, shape index: {}]   ;;  %s4672_s3 = inlined_call_operand.vmem [shape: bf16[40,256], index: 3, kind: output, shape index: {}]  }
   0x1   :  { %v3128_v0 = vld [vmem:[%s4669_s1 + $0x4] ss:$8 sps:$4 sm:$0xff]   ;;  %v3132_v2 = vld [vmem:[%s4669_s1] ss:$8 sps:$4 sm:$0xff]   ;;  %v3134_v4 = vld [vmem:[%s4669_s1 + $0x14] ss:$8 sps:$4 sm:$0xff]  }
   0x2   :  { %v3130_v1 = vld [vmem:[%s4669_s1 + $0x404] ss:$8 sps:$4 sm:$0xff]   ;;  %2042 = vmatprep.subr.bf16.mxu1 %v3128_v0  ;;  %v3133_v3 = vld [vmem:[%s4669_s1 + $0x400] ss:$8 sps:$4 sm:$0xff]   ;;  %v3136_v5 = vld [vmem:[%s4669_s1 + $0x414] ss:$8 sps:$4 sm:$0xff]  }
   0x3   :  { %2286 = vmatprep.subr.bf16.mxu0 %v3130_v1  ;;  %2043 = vmatpush1.bf16.msra.mxu1 %v3132_v2  ;;  %v3138_v6 = vld [vmem:[%s4669_s1 + $0x10] ss:$8 sps:$4 sm:$0xff]   ;;  %v3140_v8 = vld [vmem:[%s4669_s1 + $0x24] ss:$8 sps:$4 sm:$0xff]   ;;  %v3144_v10 = vld [vmem:[%s4669_s1 + $0x20] ss:$8 sps:$4 sm:$0xff]  }
   0x4   :  { %2287 = vmatpush1.bf16.msra.mxu0 %v3133_v3  ;;  %2044 = vmatprep.subr.bf16.mxu1 %v3134_v4  ;;  %v3139_v7 = vld [vmem:[%s4669_s1 + $0x410] ss:$8 sps:$4 sm:$0xff]   ;;  %v3142_v9 = vld [vmem:[%s4669_s1 + $0x424] ss:$8 sps:$4 sm:$0xff]   ;;  %v3145_v11 = vld [vmem:[%s4669_s1 + $0x420] ss:$8 sps:$4 sm:$0xff]  }
   0x5   :  { %2288 = vmatprep.subr.bf16.mxu0 %v3136_v5  ;;  %v3146_v12 = vld [vmem:[%s4669_s1 + $0x34] ss:$8 sps:$4 sm:$0xff]   ;;  %v3150_v14 = vld [vmem:[%s4669_s1 + $0x30] ss:$8 sps:$4 sm:$0xff]   ;;  %v3152_v16 = vld [vmem:[%s4669_s1 + $0x44] ss:$8 sps:$4 sm:$0xff]  }
   0x6   :  { %v3148_v13 = vld [vmem:[%s4669_s1 + $0x434] ss:$8 sps:$4 sm:$0xff]   ;;  %v3151_v15 = vld [vmem:[%s4669_s1 + $0x430] ss:$8 sps:$4 sm:$0xff]   ;;  %v3154_v17 = vld [vmem:[%s4669_s1 + $0x444] ss:$8 sps:$4 sm:$0xff]  }
   0x7   :  { %2045 = vmatpush1.bf16.msra.mxu1 %v3138_v6  ;;  %v3156_v18 = vld [vmem:[%s4669_s1 + $0x40] ss:$8 sps:$4 sm:$0xff]   ;;  %v3158_v20 = vld [vmem:[%s4669_s1 + $0x54] ss:$8 sps:$4 sm:$0xff]   ;;  %v3162_v22 = vld [vmem:[%s4669_s1 + $0x50] ss:$8 sps:$4 sm:$0xff]  }
   0x8   :  { %2289 = vmatpush1.bf16.msra.mxu0 %v3139_v7  ;;  %2046 = vmatprep.subr.bf16.mxu1 %v3140_v8  ;;  %v3157_v19 = vld [vmem:[%s4669_s1 + $0x440] ss:$8 sps:$4 sm:$0xff]   ;;  %v3160_v21 = vld [vmem:[%s4669_s1 + $0x454] ss:$8 sps:$4 sm:$0xff]   ;;  %v3163_v23 = vld [vmem:[%s4669_s1 + $0x450] ss:$8 sps:$4 sm:$0xff]  }
   0x9   :  { %2290 = vmatprep.subr.bf16.mxu0 %v3142_v9  ;;  %v3164_v24 = vld [vmem:[%s4669_s1 + $0x64] ss:$8 sps:$4 sm:$0xff]   ;;  %v3168_v26 = vld [vmem:[%s4669_s1 + $0x60] ss:$8 sps:$4 sm:$0xff]   ;;  %v3170_v28 = vld [vmem:[%s4669_s1 + $0x74] ss:$8 sps:$4 sm:$0xff]  }
   0xa   :  { %v3166_v25 = vld [vmem:[%s4669_s1 + $0x464] ss:$8 sps:$4 sm:$0xff]   ;;  %v3169_v27 = vld [vmem:[%s4669_s1 + $0x460] ss:$8 sps:$4 sm:$0xff]   ;;  %v3172_v29 = vld [vmem:[%s4669_s1 + $0x474] ss:$8 sps:$4 sm:$0xff]  }
   0xb   :  { %2047 = vmatpush1.bf16.msra.mxu1 %v3144_v10  ;;  %v3174_v30 = vld [vmem:[%s4669_s1 + $0x70] ss:$8 sps:$4 sm:$0xff]   ;;  %v3176_v32 = vld [vmem:[%s4669_s1 + $0x84] ss:$8 sps:$4 sm:$0xff]   ;;  %v3180_v34 = vld [vmem:[%s4669_s1 + $0x80] ss:$8 sps:$4 sm:$0xff]  }
   0xc   :  { %2291 = vmatpush1.bf16.msra.mxu0 %v3145_v11  ;;  %2048 = vmatprep.subr.bf16.mxu1 %v3146_v12  ;;  %v3175_v31 = vld [vmem:[%s4669_s1 + $0x470] ss:$8 sps:$4 sm:$0xff]   ;;  %v3178_v33 = vld [vmem:[%s4669_s1 + $0x484] ss:$8 sps:$4 sm:$0xff]   ;;  %v3181_v35 = vld [vmem:[%s4669_s1 + $0x480] ss:$8 sps:$4 sm:$0xff]  }
   0xd   :  { %2292 = vmatprep.subr.bf16.mxu0 %v3148_v13  ;;  %v3182_v36 = vld [vmem:[%s4669_s1 + $0x94] ss:$8 sps:$4 sm:$0xff]   ;;  %v3186_v38 = vld [vmem:[%s4669_s1 + $0x90] ss:$8 sps:$4 sm:$0xff]   ;;  %v3188_v40 = vld [vmem:[%s4669_s1 + $0xa4] ss:$8 sps:$4 sm:$0xff]  }
   0xe   :  { %v3184_v37 = vld [vmem:[%s4669_s1 + $0x494] ss:$8 sps:$4 sm:$0xff]   ;;  %v3187_v39 = vld [vmem:[%s4669_s1 + $0x490] ss:$8 sps:$4 sm:$0xff]   ;;  %v3190_v41 = vld [vmem:[%s4669_s1 + $0x4a4] ss:$8 sps:$4 sm:$0xff]  }
   0xf   :  { %2049 = vmatpush1.bf16.msra.mxu1 %v3150_v14  ;;  %v3192_v42 = vld [vmem:[%s4669_s1 + $0xa0] ss:$8 sps:$4 sm:$0xff]   ;;  %v3194_v44 = vld [vmem:[%s4669_s1 + $0xb4] ss:$8 sps:$4 sm:$0xff]   ;;  %v3198_v46 = vld [vmem:[%s4669_s1 + $0xb0] ss:$8 sps:$4 sm:$0xff]  }
  0x10   :  { %2293 = vmatpush1.bf16.msra.mxu0 %v3151_v15  ;;  %2050 = vmatprep.subr.bf16.mxu1 %v3152_v16  ;;  %v3193_v43 = vld [vmem:[%s4669_s1 + $0x4a0] ss:$8 sps:$4 sm:$0xff]   ;;  %v3196_v45 = vld [vmem:[%s4669_s1 + $0x4b4] ss:$8 sps:$4 sm:$0xff]   ;;  %v3199_v47 = vld [vmem:[%s4669_s1 + $0x4b0] ss:$8 sps:$4 sm:$0xff]  }
  0x11   :  { %2294 = vmatprep.subr.bf16.mxu0 %v3154_v17  ;;  %v3226_v48 = vld [vmem:[%s4670_s0 + $0x4] ss:$72 sps:$4 sm:$0xff]   ;;  %v3204_v52 = vld [vmem:[%s4669_s1 + $0xc0] ss:$8 sps:$4 sm:$0xff]   ;;  %v3206_v54 = vld [vmem:[%s4669_s1 + $0xd4] ss:$8 sps:$4 sm:$0xff]  }
  0x12   :  { %v3200_v49 = vld [vmem:[%s4669_s1 + $0xc4] ss:$8 sps:$4 sm:$0xff]   ;;  %2074 = vmatprep.mubr.bf16.mxu1 %v3226_v48  ;;  %v3205_v53 = vld [vmem:[%s4669_s1 + $0x4c0] ss:$8 sps:$4 sm:$0xff]   ;;  %v3208_v55 = vld [vmem:[%s4669_s1 + $0x4d4] ss:$8 sps:$4 sm:$0xff]  }
  0x13   :  { %2051 = vmatpush1.bf16.msra.mxu1 %v3156_v18  ;;  %v3202_v50 = vld [vmem:[%s4669_s1 + $0x4c4] ss:$8 sps:$4 sm:$0xff]   ;;  %v3210_v56 = vld [vmem:[%s4669_s1 + $0xd0] ss:$8 sps:$4 sm:$0xff]   ;;  %v3216_v60 = vld [vmem:[%s4669_s1 + $0xe0] ss:$8 sps:$4 sm:$0xff]  }
  0x14   :  { %2295 = vmatpush1.bf16.msra.mxu0 %v3157_v19  ;;  %2052 = vmatprep.subr.bf16.mxu1 %v3158_v20  ;;  %v3232_v51 = vld [vmem:[%s4670_s0 + $0x24] ss:$72 sps:$4 sm:$0xff]   ;;  %v3211_v57 = vld [vmem:[%s4669_s1 + $0x4d0] ss:$8 sps:$4 sm:$0xff]   ;;  %v3217_v61 = vld [vmem:[%s4669_s1 + $0x4e0] ss:$8 sps:$4 sm:$0xff]  }
  0x15   :  { %2296 = vmatprep.subr.bf16.mxu0 %v3160_v21  ;;  %2318 = vmatprep.mubr.bf16.mxu0 %v3232_v51  ;;  %v3212_v58 = vld [vmem:[%s4669_s1 + $0xe4] ss:$8 sps:$4 sm:$0xff]   ;;  %v3218_v62 = vld [vmem:[%s4669_s1 + $0xf4] ss:$8 sps:$4 sm:$0xff]   ;;  %v3222_v0 = vld [vmem:[%s4669_s1 + $0xf0] ss:$8 sps:$4 sm:$0xff]  }
  0x16   :  { %v3214_v59 = vld [vmem:[%s4669_s1 + $0x4e4] ss:$8 sps:$4 sm:$0xff]   ;;  %v3220_v63 = vld [vmem:[%s4669_s1 + $0x4f4] ss:$8 sps:$4 sm:$0xff]   ;;  %v3223_v1 = vld [vmem:[%s4669_s1 + $0x4f0] ss:$8 sps:$4 sm:$0xff]  }
  0x17   :  { %2053 = vmatpush1.bf16.msra.mxu1 %v3162_v22  ;;  %v3229_v2 = vld [vmem:[%s4669_s1 + $0x104] ss:$8 sps:$4 sm:$0xff]   ;;  %v3224_v4 = vld [vmem:[%s4670_s0] ss:$72 sps:$4 sm:$0xff]   ;;  %v3238_v8 = vld [vmem:[%s4669_s1 + $0x114] ss:$8 sps:$4 sm:$0xff]  }
  0x18   :  { %2297 = vmatpush1.bf16.msra.mxu0 %v3163_v23  ;;  %2054 = vmatprep.subr.bf16.mxu1 %v3164_v24  ;;  %v3235_v3 = vld [vmem:[%s4669_s1 + $0x504] ss:$8 sps:$4 sm:$0xff]   ;;  %v3227_v5 = vld [vmem:[%s4669_s1 + $0x100] ss:$8 sps:$4 sm:$0xff]   ;;  %v3241_v9 = vld [vmem:[%s4669_s1 + $0x514] ss:$8 sps:$4 sm:$0xff]  }
  0x19   :  { %2298 = vmatprep.subr.bf16.mxu0 %v3166_v25  ;;  %v3230_v6 = vld [vmem:[%s4670_s0 + $0x20] ss:$72 sps:$4 sm:$0xff]   ;;  %v3236_v10 = vld [vmem:[%s4669_s1 + $0x110] ss:$8 sps:$4 sm:$0xff]   ;;  %v3244_v12 = vld [vmem:[%s4669_s1 + $0x124] ss:$8 sps:$4 sm:$0xff]  }
  0x1a   :  { %v3233_v7 = vld [vmem:[%s4669_s1 + $0x500] ss:$8 sps:$4 sm:$0xff]   ;;  %v3239_v11 = vld [vmem:[%s4669_s1 + $0x510] ss:$8 sps:$4 sm:$0xff]   ;;  %v3247_v13 = vld [vmem:[%s4669_s1 + $0x524] ss:$8 sps:$4 sm:$0xff]  }
  0x1b   :  { %2055 = vmatpush1.bf16.msra.mxu1 %v3168_v26  ;;  %v3242_v14 = vld [vmem:[%s4669_s1 + $0x120] ss:$8 sps:$4 sm:$0xff]   ;;  %v3250_v16 = vld [vmem:[%s4669_s1 + $0x134] ss:$8 sps:$4 sm:$0xff]   ;;  %v3248_v18 = vld [vmem:[%s4669_s1 + $0x130] ss:$8 sps:$4 sm:$0xff]  }
  0x1c   :  { %2299 = vmatpush1.bf16.msra.mxu0 %v3169_v27  ;;  %2056 = vmatprep.subr.bf16.mxu1 %v3170_v28  ;;  %v3245_v15 = vld [vmem:[%s4669_s1 + $0x520] ss:$8 sps:$4 sm:$0xff]   ;;  %v3253_v17 = vld [vmem:[%s4669_s1 + $0x534] ss:$8 sps:$4 sm:$0xff]   ;;  %v3251_v19 = vld [vmem:[%s4669_s1 + $0x530] ss:$8 sps:$4 sm:$0xff]  }
  0x1d   :  { %2300 = vmatprep.subr.bf16.mxu0 %v3172_v29  ;;  %v3256_v20 = vld [vmem:[%s4669_s1 + $0x144] ss:$8 sps:$4 sm:$0xff]   ;;  %v3302_v22 = vld [vmem:[%s4670_s0 + $0x94] ss:$72 sps:$4 sm:$0xff]   ;;  %v3254_v23 = vld [vmem:[%s4669_s1 + $0x140] ss:$8 sps:$4 sm:$0xff]  }
  0x1e   :  { %v3259_v21 = vld [vmem:[%s4669_s1 + $0x544] ss:$8 sps:$4 sm:$0xff]   ;;  %v3257_v24 = vld [vmem:[%s4669_s1 + $0x540] ss:$8 sps:$4 sm:$0xff]   ;;  %v3307_v25 = vld [vmem:[%s4670_s0 + $0xb4] ss:$72 sps:$4 sm:$0xff]  }
  0x1f   :  { %2057 = vmatpush1.bf16.msra.mxu1 %v3174_v30  ;;  %v3262_v26 = vld [vmem:[%s4669_s1 + $0x154] ss:$8 sps:$4 sm:$0xff]   ;;  %v3312_v28 = vld [vmem:[%s4670_s0 + $0x90] ss:$72 sps:$4 sm:$0xff]   ;;  %v3283_v48 = vld [vmem:[%s4669_s1 + $0x584] ss:$8 sps:$4 sm:$0xff]  }
  0x20   :  { %2301 = vmatpush1.bf16.msra.mxu0 %v3175_v31  ;;  %2058 = vmatprep.subr.bf16.mxu1 %v3176_v32  ;;  %v3265_v27 = vld [vmem:[%s4669_s1 + $0x554] ss:$8 sps:$4 sm:$0xff]   ;;  %v3313_v29 = vld [vmem:[%s4670_s0 + $0xb0] ss:$72 sps:$4 sm:$0xff]   ;;  %v3268_v32 = vld [vmem:[%s4669_s1 + $0x164] ss:$8 sps:$4 sm:$0xff]  }
  0x21   :  { %2302 = vmatprep.subr.bf16.mxu0 %v3178_v33  ;;  %v3260_v30 = vld [vmem:[%s4669_s1 + $0x150] ss:$8 sps:$4 sm:$0xff]   ;;  %v3271_v33 = vld [vmem:[%s4669_s1 + $0x564] ss:$8 sps:$4 sm:$0xff]   ;;  %v3281_v51 = vld [vmem:[%s4669_s1 + $0x580] ss:$8 sps:$4 sm:$0xff]  }
  0x22   :  { %v3263_v31 = vld [vmem:[%s4669_s1 + $0x550] ss:$8 sps:$4 sm:$0xff]  }
  0x23   :  { %2059 = vmatpush1.bf16.msra.mxu1 %v3180_v34  ;;  %v50_v34 = vld [vmem:[%s4670_s0 + $0x120] sm:$0xff] }
  0x24   :  { %2303 = vmatpush1.bf16.msra.mxu0 %v3181_v35  ;;  %2060 = vmatprep.subr.bf16.mxu1 %v3182_v36  ;;  %v2679_v35 = vcombine.high %v50_v34, %v50_v34  ;;  %v54_v36 = vld [vmem:[%s4670_s0 + $0x140] sm:$0xff] }
  0x25   :  { %2304 = vmatprep.subr.bf16.mxu0 %v3184_v37  ;;  %v3266_v37 = vld [vmem:[%s4669_s1 + $0x160] ss:$8 sps:$4 sm:$0xff]  }
  0x27   :  { %2061 = vmatpush1.bf16.msra.mxu1 %v3186_v38  ;;  %v3269_v38 = vld [vmem:[%s4669_s1 + $0x560] ss:$8 sps:$4 sm:$0xff]  }
  0x28   :  { %2305 = vmatpush1.bf16.msra.mxu0 %v3187_v39  ;;  %2062 = vmatprep.subr.bf16.mxu1 %v3188_v40  ;;  %v2687_v39 = vcombine.high %v54_v36, %v54_v36  ;;  %v3274_v40 = vld [vmem:[%s4669_s1 + $0x174] ss:$8 sps:$4 sm:$0xff]  }
  0x29   :  { %2306 = vmatprep.subr.bf16.mxu0 %v3190_v41  ;;  %v3277_v41 = vld [vmem:[%s4669_s1 + $0x574] ss:$8 sps:$4 sm:$0xff]  }
  0x2b   :  { %2063 = vmatpush1.bf16.msra.mxu1 %v3192_v42  ;;  %v2678_v42 = vcombine.low %v50_v34, %v50_v34  ;;  %v51_v34 = vld [vmem:[%s4670_s0 + $0x128] sm:$0xff] }
  0x2c   :  { %2307 = vmatpush1.bf16.msra.mxu0 %v3193_v43  ;;  %2064 = vmatprep.subr.bf16.mxu1 %v3194_v44  ;;  %v2686_v43 = vcombine.low %v54_v36, %v54_v36  ;;  %v3272_v44 = vld [vmem:[%s4669_s1 + $0x170] ss:$8 sps:$4 sm:$0xff]   ;;  %v3362_v36 = vld [vmem:[%s4669_s1 + $0x234] ss:$8 sps:$4 sm:$0xff]  }
  0x2d   :  { %2308 = vmatprep.subr.bf16.mxu0 %v3196_v45  ;;  %v3275_v45 = vld [vmem:[%s4669_s1 + $0x570] ss:$8 sps:$4 sm:$0xff]  }
  0x2f   :  { %2065 = vmatpush1.bf16.msra.mxu1 %v3198_v46  ;;  %v3338_v46 = vld [vmem:[%s4670_s0 + $0xc] ss:$72 sps:$4 sm:$0xff]  }
  0x30   :  { %2309 = vmatpush1.bf16.msra.mxu0 %v3199_v47  ;;  %2066 = vmatprep.subr.bf16.mxu1 %v3200_v49  ;;  %v3280_v47 = vld [vmem:[%s4669_s1 + $0x184] ss:$8 sps:$4 sm:$0xff]  }
  0x31   :  { %2310 = vmatprep.subr.bf16.mxu0 %v3202_v50  ;;  %v3344_v49 = vld [vmem:[%s4670_s0 + $0x2c] ss:$72 sps:$4 sm:$0xff]   ;;  %v3278_v50 = vld [vmem:[%s4669_s1 + $0x180] ss:$8 sps:$4 sm:$0xff]  }
  0x33   :  { %2067 = vmatpush1.bf16.msra.mxu1 %v3204_v52  ;;  %v3286_v52 = vld [vmem:[%s4669_s1 + $0x194] ss:$8 sps:$4 sm:$0xff]  }
  0x34   :  { %2311 = vmatpush1.bf16.msra.mxu0 %v3205_v53  ;;  %2068 = vmatprep.subr.bf16.mxu1 %v3206_v54  ;;  %v3289_v53 = vld [vmem:[%s4669_s1 + $0x594] ss:$8 sps:$4 sm:$0xff]   ;;  %v3284_v54 = vld [vmem:[%s4669_s1 + $0x190] ss:$8 sps:$4 sm:$0xff]  }
  0x35   :  { %2312 = vmatprep.subr.bf16.mxu0 %v3208_v55  ;;  %v3287_v55 = vld [vmem:[%s4669_s1 + $0x590] ss:$8 sps:$4 sm:$0xff]  }
  0x37   :  { %2069 = vmatpush1.bf16.msra.mxu1 %v3210_v56  ;;  %v3292_v56 = vld [vmem:[%s4669_s1 + $0x1a4] ss:$8 sps:$4 sm:$0xff]  }
  0x38   :  { %2313 = vmatpush1.bf16.msra.mxu0 %v3211_v57  ;;  %2070 = vmatprep.subr.bf16.mxu1 %v3212_v58  ;;  %v3295_v57 = vld [vmem:[%s4669_s1 + $0x5a4] ss:$8 sps:$4 sm:$0xff]   ;;  %v3290_v58 = vld [vmem:[%s4669_s1 + $0x1a0] ss:$8 sps:$4 sm:$0xff]  }
  0x39   :  { %2314 = vmatprep.subr.bf16.mxu0 %v3214_v59  ;;  %v3293_v59 = vld [vmem:[%s4669_s1 + $0x5a0] ss:$8 sps:$4 sm:$0xff]  }
  0x3b   :  { %2071 = vmatpush1.bf16.msra.mxu1 %v3216_v60  ;;  %v3298_v60 = vld [vmem:[%s4669_s1 + $0x1b4] ss:$8 sps:$4 sm:$0xff]  }
  0x3c   :  { %2315 = vmatpush1.bf16.msra.mxu0 %v3217_v61  ;;  %2072 = vmatprep.subr.bf16.mxu1 %v3218_v62  ;;  %v3301_v61 = vld [vmem:[%s4669_s1 + $0x5b4] ss:$8 sps:$4 sm:$0xff]   ;;  %v3296_v62 = vld [vmem:[%s4669_s1 + $0x1b0] ss:$8 sps:$4 sm:$0xff]  }
  0x3d   :  { %2316 = vmatprep.subr.bf16.mxu0 %v3220_v63  ;;  %v3299_v63 = vld [vmem:[%s4669_s1 + $0x5b0] ss:$8 sps:$4 sm:$0xff]  }
  0x3f   :  { %2073 = vmatpush1.bf16.msra.mxu1 %v3222_v0  ;;  %v3306_v0 = vld [vmem:[%s4669_s1 + $0x1c4] ss:$8 sps:$4 sm:$0xff]  }
  0x40   :  { %2317 = vmatpush1.bf16.msra.mxu0 %v3223_v1  ;;  %2103 = vmatprep.subr.bf16.mxu1 %v3229_v2  ;;  %v3311_v1 = vld [vmem:[%s4669_s1 + $0x5c4] ss:$8 sps:$4 sm:$0xff]   ;;  %v3304_v2 = vld [vmem:[%s4669_s1 + $0x1c0] ss:$8 sps:$4 sm:$0xff]  }
  0x41   :  { %2347 = vmatprep.subr.bf16.mxu0 %v3235_v3  ;;  %v3309_v3 = vld [vmem:[%s4669_s1 + $0x5c0] ss:$8 sps:$4 sm:$0xff]  }
  0x42   :  { %2075 = vmatmul.mubr.bf16.vlgmr.msra.gmra.mrb[0].mxu1 %v3224_v4  ;;  %v3316_v4 = vld [vmem:[%s4669_s1 + $0x1d4] ss:$8 sps:$4 sm:$0xff]  }
  0x43   :  { %2319 = vmatmul.mubr.bf16.vlgmr.msra.gmra.mrb[0].mxu0 %v3230_v6  ;;  %2104 = vmatpush1.bf16.msra.mxu1 %v3227_v5  ;;  %v3319_v5 = vld [vmem:[%s4669_s1 + $0x5d4] ss:$8 sps:$4 sm:$0xff]   ;;  %v3314_v6 = vld [vmem:[%s4669_s1 + $0x1d0] ss:$8 sps:$4 sm:$0xff]  }
  0x44   :  { %2348 = vmatpush1.bf16.msra.mxu0 %v3233_v7  ;;  %2105 = vmatprep.subr.bf16.mxu1 %v3238_v8  ;;  %v3317_v7 = vld [vmem:[%s4669_s1 + $0x5d0] ss:$8 sps:$4 sm:$0xff]   ;;  %v3323_v8 = vld [vmem:[%s4669_s1 + $0x1e4] ss:$8 sps:$4 sm:$0xff]  }
  0x45   :  { %2349 = vmatprep.subr.bf16.mxu0 %v3241_v9  ;;  %2084 = vmatprep.mubr.bf16.mxu1 %v3302_v22  ;;  %v3327_v9 = vld [vmem:[%s4669_s1 + $0x5e4] ss:$8 sps:$4 sm:$0xff]   ;;  %v3350_v22 = vld [vmem:[%s4669_s1 + $0x214] ss:$8 sps:$4 sm:$0xff]  }
  0x46   :  { %2328 = vmatprep.mubr.bf16.mxu0 %v3307_v25  ;;  %v3419_v25 = vld [vmem:[%s4670_s0 + $0xbc] ss:$72 sps:$4 sm:$0xff]  }
  0x47   :  { %2106 = vmatpush1.bf16.msra.mxu1 %v3236_v10  ;;  %v3321_v10 = vld [vmem:[%s4669_s1 + $0x1e0] ss:$8 sps:$4 sm:$0xff]  }
  0x48   :  { %2350 = vmatpush1.bf16.msra.mxu0 %v3239_v11  ;;  %2107 = vmatprep.subr.bf16.mxu1 %v3244_v12  ;;  %v3325_v11 = vld [vmem:[%s4669_s1 + $0x5e0] ss:$8 sps:$4 sm:$0xff]   ;;  %v3332_v12 = vld [vmem:[%s4669_s1 + $0x1f4] ss:$8 sps:$4 sm:$0xff]  }
  0x49   :  { %2351 = vmatprep.subr.bf16.mxu0 %v3247_v13  ;;  %v3335_v13 = vld [vmem:[%s4669_s1 + $0x5f4] ss:$8 sps:$4 sm:$0xff]  }
  0x4a   :  { %2085 = vmatmul.mubr.bf16.gmra.mrb[4].mxu1 %v3312_v28  ;;  %v3356_v28 = vld [vmem:[%s4669_s1 + $0x224] ss:$8 sps:$4 sm:$0xff]  }
  0x4b   :  { %2108 = vmatpush1.bf16.msra.mxu1 %v3242_v14  ;;  %2329 = vmatmul.mubr.bf16.gmra.mrb[4].mxu0 %v3313_v29  ;;  %v3330_v14 = vld [vmem:[%s4669_s1 + $0x1f0] ss:$8 sps:$4 sm:$0xff]   ;;  %v3359_v29 = vld [vmem:[%s4669_s1 + $0x624] ss:$8 sps:$4 sm:$0xff]  }
  0x4c   :  { %2352 = vmatpush1.bf16.msra.mxu0 %v3245_v15  ;;  %2109 = vmatprep.subr.bf16.mxu1 %v3250_v16  ;;  %v3333_v15 = vld [vmem:[%s4669_s1 + $0x5f0] ss:$8 sps:$4 sm:$0xff]  }
  0x4d   :  { %2353 = vmatprep.subr.bf16.mxu0 %v3253_v17  ;;  %2094 = vmatprep.mubr.bf16.mxu1 %v2679_v35  ;;  %v3336_v16 = vld [vmem:[%s4670_s0 + $0x8] ss:$72 sps:$4 sm:$0xff]   ;;  %v3341_v17 = vld [vmem:[%s4669_s1 + $0x204] ss:$8 sps:$4 sm:$0xff]  }
  0x4e   :  { %2338 = vmatprep.mubr.bf16.mxu0 %v2687_v39  ;;  %v55_v35 = vld [vmem:[%s4670_s0 + $0x148] sm:$0xff] }
  0x4f   :  { %2110 = vmatpush1.bf16.msra.mxu1 %v3248_v18  ;;  %v3347_v18 = vld [vmem:[%s4669_s1 + $0x604] ss:$8 sps:$4 sm:$0xff]   ;;  %v2689_v39 = vcombine.high %v55_v35, %v55_v35 }
  0x50   :  { %2354 = vmatpush1.bf16.msra.mxu0 %v3251_v19  ;;  %2111 = vmatprep.subr.bf16.mxu1 %v3256_v20  ;;  %v3339_v19 = vld [vmem:[%s4669_s1 + $0x200] ss:$8 sps:$4 sm:$0xff]  }
  0x51   :  { %2355 = vmatprep.subr.bf16.mxu0 %v3259_v21  ;;  %v3342_v20 = vld [vmem:[%s4670_s0 + $0x28] ss:$72 sps:$4 sm:$0xff]  }
  0x52   :  { %2095 = vmatmul.mubr.bf16.gmra.mrb[8].mxu1 %v2678_v42  ;;  %v3345_v21 = vld [vmem:[%s4669_s1 + $0x600] ss:$8 sps:$4 sm:$0xff]   ;;  %v3368_v42 = vld [vmem:[%s4669_s1 + $0x244] ss:$8 sps:$4 sm:$0xff]  }
  0x53   :  { %2112 = vmatpush1.bf16.msra.mxu1 %v3254_v23  ;;  %2339 = vmatmul.mubr.bf16.gmra.mrb[8].mxu0 %v2686_v43  ;;  %v3353_v23 = vld [vmem:[%s4669_s1 + $0x614] ss:$8 sps:$4 sm:$0xff]   ;;  %v3371_v43 = vld [vmem:[%s4669_s1 + $0x644] ss:$8 sps:$4 sm:$0xff]  }
  0x54   :  { %2356 = vmatpush1.bf16.msra.mxu0 %v3257_v24  ;;  %2113 = vmatprep.subr.bf16.mxu1 %v3262_v26  ;;  %v3414_v24 = vld [vmem:[%s4670_s0 + $0x9c] ss:$72 sps:$4 sm:$0xff]   ;;  %v3348_v26 = vld [vmem:[%s4669_s1 + $0x210] ss:$8 sps:$4 sm:$0xff]  }
  0x55   :  { %2357 = vmatprep.subr.bf16.mxu0 %v3265_v27  ;;  %2135 = vmatprep.mubr.bf16.mxu1 %v3338_v46  ;;  %v3351_v27 = vld [vmem:[%s4669_s1 + $0x610] ss:$8 sps:$4 sm:$0xff]   ;;  %v2680_v46 = vcombine.low %v51_v34, %v51_v34 }
  0x56   :  { %2379 = vmatprep.mubr.bf16.mxu0 %v3344_v49  ;;  %v3377_v49 = vld [vmem:[%s4669_s1 + $0x654] ss:$8 sps:$4 sm:$0xff]  }
  0x57   :  { %2114 = vmatpush1.bf16.msra.mxu1 %v3260_v30  ;;  %v3354_v30 = vld [vmem:[%s4669_s1 + $0x220] ss:$8 sps:$4 sm:$0xff]  }
  0x58   :  { %2358 = vmatpush1.bf16.msra.mxu0 %v3263_v31  ;;  %2115 = vmatprep.subr.bf16.mxu1 %v3268_v32  ;;  %v3357_v31 = vld [vmem:[%s4669_s1 + $0x620] ss:$8 sps:$4 sm:$0xff]  }
  0x59   :  { %2359 = vmatprep.subr.bf16.mxu0 %v3271_v33  ;;  %v3424_v32 = vld [vmem:[%s4670_s0 + $0x98] ss:$72 sps:$4 sm:$0xff]  }
  0x5a   :  { %v3425_v33 = vld [vmem:[%s4670_s0 + $0xb8] ss:$72 sps:$4 sm:$0xff]  }
  0x5b   :  { %2116 = vmatpush1.bf16.msra.mxu1 %v3266_v37  ;;  %v3365_v37 = vld [vmem:[%s4669_s1 + $0x634] ss:$8 sps:$4 sm:$0xff]  }
  0x5c   :  { %2360 = vmatpush1.bf16.msra.mxu0 %v3269_v38  ;;  %2117 = vmatprep.subr.bf16.mxu1 %v3274_v40  ;;  %v2681_v38 = vcombine.high %v51_v34, %v51_v34  ;;  %v3360_v40 = vld [vmem:[%s4669_s1 + $0x230] ss:$8 sps:$4 sm:$0xff]  }
  0x5d   :  { %2361 = vmatprep.subr.bf16.mxu0 %v3277_v41  ;;  %v3363_v41 = vld [vmem:[%s4669_s1 + $0x630] ss:$8 sps:$4 sm:$0xff]  }
  0x5e   :  { %v3454_v34 = vld [vmem:[%s4670_s0 + $0x30] ss:$72 sps:$4 sm:$0xff]  }
  0x5f   :  { %2118 = vmatpush1.bf16.msra.mxu1 %v3272_v44  ;;  %v3366_v44 = vld [vmem:[%s4669_s1 + $0x240] ss:$8 sps:$4 sm:$0xff]  }
  0x60   :  { %2362 = vmatpush1.bf16.msra.mxu0 %v3275_v45  ;;  %2119 = vmatprep.subr.bf16.mxu1 %v3280_v47  ;;  %v3369_v45 = vld [vmem:[%s4669_s1 + $0x640] ss:$8 sps:$4 sm:$0xff]   ;;  %v2688_v47 = vcombine.low %v55_v35, %v55_v35 }
  0x61   :  { %2363 = vmatprep.subr.bf16.mxu0 %v3283_v48  ;;  %v3374_v48 = vld [vmem:[%s4669_s1 + $0x254] ss:$8 sps:$4 sm:$0xff]   ;;  %v3457_v35 = vld [vmem:[%s4669_s1 + $0x700] ss:$8 sps:$4 sm:$0xff]  }
  0x63   :  { %2120 = vmatpush1.bf16.msra.mxu1 %v3278_v50  ;;  %v3450_v50 = vld [vmem:[%s4670_s0 + $0x14] ss:$72 sps:$4 sm:$0xff]  }
  0x64   :  { %2364 = vmatpush1.bf16.msra.mxu0 %v3281_v51  ;;  %2121 = vmatprep.subr.bf16.mxu1 %v3286_v52  ;;  %v3456_v51 = vld [vmem:[%s4670_s0 + $0x34] ss:$72 sps:$4 sm:$0xff]   ;;  %v3372_v52 = vld [vmem:[%s4669_s1 + $0x250] ss:$8 sps:$4 sm:$0xff]  }
  0x65   :  { %2365 = vmatprep.subr.bf16.mxu0 %v3289_v53  ;;  %v3375_v53 = vld [vmem:[%s4669_s1 + $0x650] ss:$8 sps:$4 sm:$0xff]  }
  0x67   :  { %2122 = vmatpush1.bf16.msra.mxu1 %v3284_v54  ;;  %v3380_v54 = vld [vmem:[%s4669_s1 + $0x264] ss:$8 sps:$4 sm:$0xff]  }
  0x68   :  { %2366 = vmatpush1.bf16.msra.mxu0 %v3287_v55  ;;  %2123 = vmatprep.subr.bf16.mxu1 %v3292_v56  ;;  %v3383_v55 = vld [vmem:[%s4669_s1 + $0x664] ss:$8 sps:$4 sm:$0xff]   ;;  %v3378_v56 = vld [vmem:[%s4669_s1 + $0x260] ss:$8 sps:$4 sm:$0xff]  }
  0x69   :  { %2367 = vmatprep.subr.bf16.mxu0 %v3295_v57  ;;  %v3381_v57 = vld [vmem:[%s4669_s1 + $0x660] ss:$8 sps:$4 sm:$0xff]  }
  0x6b   :  { %2124 = vmatpush1.bf16.msra.mxu1 %v3290_v58  ;;  %v3386_v58 = vld [vmem:[%s4669_s1 + $0x274] ss:$8 sps:$4 sm:$0xff]  }
  0x6c   :  { %2368 = vmatpush1.bf16.msra.mxu0 %v3293_v59  ;;  %2125 = vmatprep.subr.bf16.mxu1 %v3298_v60  ;;  %v3389_v59 = vld [vmem:[%s4669_s1 + $0x674] ss:$8 sps:$4 sm:$0xff]   ;;  %v3384_v60 = vld [vmem:[%s4669_s1 + $0x270] ss:$8 sps:$4 sm:$0xff]  }
  0x6d   :  { %2369 = vmatprep.subr.bf16.mxu0 %v3301_v61  ;;  %v3387_v61 = vld [vmem:[%s4669_s1 + $0x670] ss:$8 sps:$4 sm:$0xff]  }
  0x6f   :  { %2126 = vmatpush1.bf16.msra.mxu1 %v3296_v62  ;;  %v3392_v62 = vld [vmem:[%s4669_s1 + $0x284] ss:$8 sps:$4 sm:$0xff]  }
  0x70   :  { %2370 = vmatpush1.bf16.msra.mxu0 %v3299_v63  ;;  %2127 = vmatprep.subr.bf16.mxu1 %v3306_v0  ;;  %v3395_v63 = vld [vmem:[%s4669_s1 + $0x684] ss:$8 sps:$4 sm:$0xff]   ;;  %v3390_v0 = vld [vmem:[%s4669_s1 + $0x280] ss:$8 sps:$4 sm:$0xff]  }
  0x71   :  { %2371 = vmatprep.subr.bf16.mxu0 %v3311_v1  ;;  %v3393_v1 = vld [vmem:[%s4669_s1 + $0x680] ss:$8 sps:$4 sm:$0xff]  }
  0x73   :  { %2128 = vmatpush1.bf16.msra.mxu1 %v3304_v2  ;;  %v3398_v2 = vld [vmem:[%s4669_s1 + $0x294] ss:$8 sps:$4 sm:$0xff]  }
  0x74   :  { %2372 = vmatpush1.bf16.msra.mxu0 %v3309_v3  ;;  %2129 = vmatprep.subr.bf16.mxu1 %v3316_v4  ;;  %v3401_v3 = vld [vmem:[%s4669_s1 + $0x694] ss:$8 sps:$4 sm:$0xff]   ;;  %v3396_v4 = vld [vmem:[%s4669_s1 + $0x290] ss:$8 sps:$4 sm:$0xff]  }
  0x75   :  { %2373 = vmatprep.subr.bf16.mxu0 %v3319_v5  ;;  %v3399_v5 = vld [vmem:[%s4669_s1 + $0x690] ss:$8 sps:$4 sm:$0xff]  }
  0x77   :  { %2130 = vmatpush1.bf16.msra.mxu1 %v3314_v6  ;;  %v3404_v6 = vld [vmem:[%s4669_s1 + $0x2a4] ss:$8 sps:$4 sm:$0xff]  }
  0x78   :  { %2374 = vmatpush1.bf16.msra.mxu0 %v3317_v7  ;;  %2131 = vmatprep.subr.bf16.mxu1 %v3323_v8  ;;  %v3407_v7 = vld [vmem:[%s4669_s1 + $0x6a4] ss:$8 sps:$4 sm:$0xff]   ;;  %v3402_v8 = vld [vmem:[%s4669_s1 + $0x2a0] ss:$8 sps:$4 sm:$0xff]  }
  0x79   :  { %2375 = vmatprep.subr.bf16.mxu0 %v3327_v9  ;;  %v3405_v9 = vld [vmem:[%s4669_s1 + $0x6a0] ss:$8 sps:$4 sm:$0xff]  }
  0x7b   :  { %2132 = vmatpush1.bf16.msra.mxu1 %v3321_v10  ;;  %v3410_v10 = vld [vmem:[%s4669_s1 + $0x2b4] ss:$8 sps:$4 sm:$0xff]  }
  0x7c   :  { %2376 = vmatpush1.bf16.msra.mxu0 %v3325_v11  ;;  %2133 = vmatprep.subr.bf16.mxu1 %v3332_v12  ;;  %v3413_v11 = vld [vmem:[%s4669_s1 + $0x6b4] ss:$8 sps:$4 sm:$0xff]   ;;  %v3408_v12 = vld [vmem:[%s4669_s1 + $0x2b0] ss:$8 sps:$4 sm:$0xff]  }
  0x7d   :  { %2377 = vmatprep.subr.bf16.mxu0 %v3335_v13  ;;  %v3411_v13 = vld [vmem:[%s4669_s1 + $0x6b0] ss:$8 sps:$4 sm:$0xff]  }
  0x7f   :  { %2134 = vmatpush1.bf16.msra.mxu1 %v3330_v14  ;;  %v3418_v14 = vld [vmem:[%s4669_s1 + $0x2c4] ss:$8 sps:$4 sm:$0xff]  }
  0x80   :  { %2378 = vmatpush1.bf16.msra.mxu0 %v3333_v15  ;;  %2164 = vmatprep.subr.bf16.mxu1 %v3341_v17  ;;  %v3423_v15 = vld [vmem:[%s4669_s1 + $0x6c4] ss:$8 sps:$4 sm:$0xff]   ;;  %v3421_v17 = vld [vmem:[%s4669_s1 + $0x6c0] ss:$8 sps:$4 sm:$0xff]  }
  0x81   :  { %2408 = vmatprep.subr.bf16.mxu0 %v3347_v18  ;;  %v3428_v18 = vld [vmem:[%s4669_s1 + $0x2d4] ss:$8 sps:$4 sm:$0xff]  }
  0x82   :  { %2136 = vmatmul.mubr.bf16.vlgmr.msra.gmra.mrb[0].mxu1 %v3336_v16  ;;  %v3416_v16 = vld [vmem:[%s4669_s1 + $0x2c0] ss:$8 sps:$4 sm:$0xff]  }
  0x83   :  { %2380 = vmatmul.mubr.bf16.vlgmr.msra.gmra.mrb[0].mxu0 %v3342_v20  ;;  %2165 = vmatpush1.bf16.msra.mxu1 %v3339_v19  ;;  %v3431_v19 = vld [vmem:[%s4669_s1 + $0x6d4] ss:$8 sps:$4 sm:$0xff]   ;;  %v3426_v20 = vld [vmem:[%s4669_s1 + $0x2d0] ss:$8 sps:$4 sm:$0xff]  }
  0x84   :  { %2409 = vmatpush1.bf16.msra.mxu0 %v3345_v21  ;;  %2166 = vmatprep.subr.bf16.mxu1 %v3350_v22  ;;  %v3429_v21 = vld [vmem:[%s4669_s1 + $0x6d0] ss:$8 sps:$4 sm:$0xff]   ;;  %v3435_v22 = vld [vmem:[%s4669_s1 + $0x2e4] ss:$8 sps:$4 sm:$0xff]  }
  0x85   :  { %2410 = vmatprep.subr.bf16.mxu0 %v3353_v23  ;;  %2145 = vmatprep.mubr.bf16.mxu1 %v3414_v24  ;;  %v3439_v23 = vld [vmem:[%s4669_s1 + $0x6e4] ss:$8 sps:$4 sm:$0xff]   ;;  %v3433_v24 = vld [vmem:[%s4669_s1 + $0x2e0] ss:$8 sps:$4 sm:$0xff]  }
  0x86   :  { %2389 = vmatprep.mubr.bf16.mxu0 %v3419_v25  ;;  %v3437_v25 = vld [vmem:[%s4669_s1 + $0x6e0] ss:$8 sps:$4 sm:$0xff]  }
  0x87   :  { %2167 = vmatpush1.bf16.msra.mxu1 %v3348_v26  ;;  %v3444_v26 = vld [vmem:[%s4669_s1 + $0x2f4] ss:$8 sps:$4 sm:$0xff]  }
  0x88   :  { %2411 = vmatpush1.bf16.msra.mxu0 %v3351_v27  ;;  %2168 = vmatprep.subr.bf16.mxu1 %v3356_v28  ;;  %v3447_v27 = vld [vmem:[%s4669_s1 + $0x6f4] ss:$8 sps:$4 sm:$0xff]   ;;  %v3442_v28 = vld [vmem:[%s4669_s1 + $0x2f0] ss:$8 sps:$4 sm:$0xff]  }
  0x89   :  { %2412 = vmatprep.subr.bf16.mxu0 %v3359_v29  ;;  %v3445_v29 = vld [vmem:[%s4669_s1 + $0x6f0] ss:$8 sps:$4 sm:$0xff]  }
  0x8a   :  { %2146 = vmatmul.mubr.bf16.gmra.mrb[4].mxu1 %v3424_v32  ;;  %v3459_v32 = vld [vmem:[%s4669_s1 + $0x704] ss:$8 sps:$4 sm:$0xff]  }
  0x8b   :  { %2390 = vmatmul.mubr.bf16.gmra.mrb[4].mxu0 %v3425_v33  ;;  %2169 = vmatpush1.bf16.msra.mxu1 %v3354_v30  ;;  %v3448_v30 = vld [vmem:[%s4670_s0 + $0x10] ss:$72 sps:$4 sm:$0xff]   ;;  %v3451_v33 = vld [vmem:[%s4669_s1 + $0x300] ss:$8 sps:$4 sm:$0xff]  }
  0x8c   :  { %2413 = vmatpush1.bf16.msra.mxu0 %v3357_v31  ;;  %2170 = vmatprep.subr.bf16.mxu1 %v3362_v36  ;;  %v3453_v31 = vld [vmem:[%s4669_s1 + $0x304] ss:$8 sps:$4 sm:$0xff]   ;;  %v3462_v36 = vld [vmem:[%s4669_s1 + $0x314] ss:$8 sps:$4 sm:$0xff]  }
  0x8d   :  { %2414 = vmatprep.subr.bf16.mxu0 %v3365_v37  ;;  %2155 = vmatprep.mubr.bf16.mxu1 %v2681_v38  ;;  %v3465_v37 = vld [vmem:[%s4669_s1 + $0x714] ss:$8 sps:$4 sm:$0xff]   ;;  %v3526_v38 = vld [vmem:[%s4670_s0 + $0xa4] ss:$72 sps:$4 sm:$0xff]  }
  0x8e   :  { %2399 = vmatprep.mubr.bf16.mxu0 %v2689_v39  ;;  %v3528_v39 = vld [vmem:[%s4670_s0 + $0xc4] ss:$72 sps:$4 sm:$0xff]  }
  0x8f   :  { %2171 = vmatpush1.bf16.msra.mxu1 %v3360_v40  ;;  %v3460_v40 = vld [vmem:[%s4669_s1 + $0x310] ss:$8 sps:$4 sm:$0xff]  }
  0x90   :  { %2415 = vmatpush1.bf16.msra.mxu0 %v3363_v41  ;;  %2172 = vmatprep.subr.bf16.mxu1 %v3368_v42  ;;  %v3463_v41 = vld [vmem:[%s4669_s1 + $0x710] ss:$8 sps:$4 sm:$0xff]   ;;  %v3468_v42 = vld [vmem:[%s4669_s1 + $0x324] ss:$8 sps:$4 sm:$0xff]  }
  0x91   :  { %2416 = vmatprep.subr.bf16.mxu0 %v3371_v43  ;;  %v3471_v43 = vld [vmem:[%s4669_s1 + $0x724] ss:$8 sps:$4 sm:$0xff]  }
  0x92   :  { %2156 = vmatmul.mubr.bf16.gmra.mrb[8].mxu1 %v2680_v46  ;;  %v3530_v46 = vld [vmem:[%s4670_s0 + $0xa0] ss:$72 sps:$4 sm:$0xff]  }
  0x93   :  { %2400 = vmatmul.mubr.bf16.gmra.mrb[8].mxu0 %v2688_v47  ;;  %2173 = vmatpush1.bf16.msra.mxu1 %v3366_v44  ;;  %v3466_v44 = vld [vmem:[%s4669_s1 + $0x320] ss:$8 sps:$4 sm:$0xff]  }
  0x94   :  { %2417 = vmatpush1.bf16.msra.mxu0 %v3369_v45  ;;  %2174 = vmatprep.subr.bf16.mxu1 %v3374_v48  ;;  %v3469_v45 = vld [vmem:[%s4669_s1 + $0x720] ss:$8 sps:$4 sm:$0xff]   ;;  %v52_v48 = vld [vmem:[%s4670_s0 + $0x130] sm:$0xff] }
  0x95   :  { %2418 = vmatprep.subr.bf16.mxu0 %v3377_v49  ;;  %2196 = vmatprep.mubr.bf16.mxu1 %v3450_v50  ;;  %v3534_v47 = vld [vmem:[%s4670_s0 + $0xc0] ss:$72 sps:$4 sm:$0xff]   ;;  %v56_v49 = vld [vmem:[%s4670_s0 + $0x150] sm:$0xff] }
  0x96   :  { %2440 = vmatprep.mubr.bf16.mxu0 %v3456_v51  ;;  %v3474_v50 = vld [vmem:[%s4669_s1 + $0x334] ss:$8 sps:$4 sm:$0xff]  }
  0x97   :  { %2175 = vmatpush1.bf16.msra.mxu1 %v3372_v52  ;;  %v3477_v51 = vld [vmem:[%s4669_s1 + $0x734] ss:$8 sps:$4 sm:$0xff]   ;;  %v2683_v52 = vcombine.high %v52_v48, %v52_v48 }
  0x98   :  { %2419 = vmatpush1.bf16.msra.mxu0 %v3375_v53  ;;  %2176 = vmatprep.subr.bf16.mxu1 %v3380_v54  ;;  %v2691_v53 = vcombine.high %v56_v49, %v56_v49  ;;  %v3472_v54 = vld [vmem:[%s4669_s1 + $0x330] ss:$8 sps:$4 sm:$0xff]  }
  0x99   :  { %2420 = vmatprep.subr.bf16.mxu0 %v3383_v55  ;;  %v3475_v55 = vld [vmem:[%s4669_s1 + $0x730] ss:$8 sps:$4 sm:$0xff]  }
  0x9b   :  { %2177 = vmatpush1.bf16.msra.mxu1 %v3378_v56  ;;  %v3480_v56 = vld [vmem:[%s4669_s1 + $0x344] ss:$8 sps:$4 sm:$0xff]  }
  0x9c   :  { %2421 = vmatpush1.bf16.msra.mxu0 %v3381_v57  ;;  %2178 = vmatprep.subr.bf16.mxu1 %v3386_v58  ;;  %v3483_v57 = vld [vmem:[%s4669_s1 + $0x744] ss:$8 sps:$4 sm:$0xff]   ;;  %v3478_v58 = vld [vmem:[%s4669_s1 + $0x340] ss:$8 sps:$4 sm:$0xff]  }
  0x9d   :  { %2422 = vmatprep.subr.bf16.mxu0 %v3389_v59  ;;  %v3481_v59 = vld [vmem:[%s4669_s1 + $0x740] ss:$8 sps:$4 sm:$0xff]  }
  0x9f   :  { %2179 = vmatpush1.bf16.msra.mxu1 %v3384_v60  ;;  %v2682_v60 = vcombine.low %v52_v48, %v52_v48  ;;  %v3571_v48 = vld [vmem:[%s4669_s1 + $0x814] ss:$8 sps:$4 sm:$0xff]  }
  0xa0   :  { %2423 = vmatpush1.bf16.msra.mxu0 %v3387_v61  ;;  %2180 = vmatprep.subr.bf16.mxu1 %v3392_v62  ;;  %v2690_v61 = vcombine.low %v56_v49, %v56_v49  ;;  %v3486_v62 = vld [vmem:[%s4669_s1 + $0x354] ss:$8 sps:$4 sm:$0xff]  }
  0xa1   :  { %2424 = vmatprep.subr.bf16.mxu0 %v3395_v63  ;;  %v3489_v63 = vld [vmem:[%s4669_s1 + $0x754] ss:$8 sps:$4 sm:$0xff]  }
  0xa2   :  { %v3572_v49 = vld [vmem:[%s4670_s0 + $0xac] ss:$72 sps:$4 sm:$0xff]  }
  0xa3   :  { %2181 = vmatpush1.bf16.msra.mxu1 %v3390_v0  ;;  %v3562_v0 = vld [vmem:[%s4670_s0 + $0x1c] ss:$72 sps:$4 sm:$0xff]  }
  0xa4   :  { %2425 = vmatpush1.bf16.msra.mxu0 %v3393_v1  ;;  %2182 = vmatprep.subr.bf16.mxu1 %v3398_v2  ;;  %v3565_v1 = vld [vmem:[%s4670_s0 + $0x3c] ss:$72 sps:$4 sm:$0xff]   ;;  %v3484_v2 = vld [vmem:[%s4669_s1 + $0x350] ss:$8 sps:$4 sm:$0xff]  }
  0xa5   :  { %2426 = vmatprep.subr.bf16.mxu0 %v3401_v3  ;;  %v3487_v3 = vld [vmem:[%s4669_s1 + $0x750] ss:$8 sps:$4 sm:$0xff]  }
  0xa7   :  { %2183 = vmatpush1.bf16.msra.mxu1 %v3396_v4  ;;  %v3492_v4 = vld [vmem:[%s4669_s1 + $0x364] ss:$8 sps:$4 sm:$0xff]  }
  0xa8   :  { %2427 = vmatpush1.bf16.msra.mxu0 %v3399_v5  ;;  %2184 = vmatprep.subr.bf16.mxu1 %v3404_v6  ;;  %v3495_v5 = vld [vmem:[%s4669_s1 + $0x764] ss:$8 sps:$4 sm:$0xff]   ;;  %v3490_v6 = vld [vmem:[%s4669_s1 + $0x360] ss:$8 sps:$4 sm:$0xff]  }
  0xa9   :  { %2428 = vmatprep.subr.bf16.mxu0 %v3407_v7  ;;  %v3493_v7 = vld [vmem:[%s4669_s1 + $0x760] ss:$8 sps:$4 sm:$0xff]  }
  0xab   :  { %2185 = vmatpush1.bf16.msra.mxu1 %v3402_v8  ;;  %v3498_v8 = vld [vmem:[%s4669_s1 + $0x374] ss:$8 sps:$4 sm:$0xff]  }
  0xac   :  { %2429 = vmatpush1.bf16.msra.mxu0 %v3405_v9  ;;  %2186 = vmatprep.subr.bf16.mxu1 %v3410_v10  ;;  %v3501_v9 = vld [vmem:[%s4669_s1 + $0x774] ss:$8 sps:$4 sm:$0xff]   ;;  %v3496_v10 = vld [vmem:[%s4669_s1 + $0x370] ss:$8 sps:$4 sm:$0xff]  }
  0xad   :  { %2430 = vmatprep.subr.bf16.mxu0 %v3413_v11  ;;  %v3499_v11 = vld [vmem:[%s4669_s1 + $0x770] ss:$8 sps:$4 sm:$0xff]  }
  0xaf   :  { %2187 = vmatpush1.bf16.msra.mxu1 %v3408_v12  ;;  %v3504_v12 = vld [vmem:[%s4669_s1 + $0x384] ss:$8 sps:$4 sm:$0xff]  }
  0xb0   :  { %2431 = vmatpush1.bf16.msra.mxu0 %v3411_v13  ;;  %2188 = vmatprep.subr.bf16.mxu1 %v3418_v14  ;;  %v3507_v13 = vld [vmem:[%s4669_s1 + $0x784] ss:$8 sps:$4 sm:$0xff]   ;;  %v3502_v14 = vld [vmem:[%s4669_s1 + $0x380] ss:$8 sps:$4 sm:$0xff]  }
  0xb1   :  { %2432 = vmatprep.subr.bf16.mxu0 %v3423_v15  ;;  %v3505_v15 = vld [vmem:[%s4669_s1 + $0x780] ss:$8 sps:$4 sm:$0xff]  }
  0xb3   :  { %2189 = vmatpush1.bf16.msra.mxu1 %v3416_v16  ;;  %v3510_v16 = vld [vmem:[%s4669_s1 + $0x394] ss:$8 sps:$4 sm:$0xff]  }
  0xb4   :  { %2433 = vmatpush1.bf16.msra.mxu0 %v3421_v17  ;;  %2190 = vmatprep.subr.bf16.mxu1 %v3428_v18  ;;  %v3513_v17 = vld [vmem:[%s4669_s1 + $0x794] ss:$8 sps:$4 sm:$0xff]   ;;  %v3508_v18 = vld [vmem:[%s4669_s1 + $0x390] ss:$8 sps:$4 sm:$0xff]  }
  0xb5   :  { %2434 = vmatprep.subr.bf16.mxu0 %v3431_v19  ;;  %v3511_v19 = vld [vmem:[%s4669_s1 + $0x790] ss:$8 sps:$4 sm:$0xff]  }
  0xb7   :  { %2191 = vmatpush1.bf16.msra.mxu1 %v3426_v20  ;;  %v3516_v20 = vld [vmem:[%s4669_s1 + $0x3a4] ss:$8 sps:$4 sm:$0xff]  }
  0xb8   :  { %2435 = vmatpush1.bf16.msra.mxu0 %v3429_v21  ;;  %2192 = vmatprep.subr.bf16.mxu1 %v3435_v22  ;;  %v3519_v21 = vld [vmem:[%s4669_s1 + $0x7a4] ss:$8 sps:$4 sm:$0xff]   ;;  %v3514_v22 = vld [vmem:[%s4669_s1 + $0x3a0] ss:$8 sps:$4 sm:$0xff]  }
  0xb9   :  { %2436 = vmatprep.subr.bf16.mxu0 %v3439_v23  ;;  %v3517_v23 = vld [vmem:[%s4669_s1 + $0x7a0] ss:$8 sps:$4 sm:$0xff]  }
  0xbb   :  { %2193 = vmatpush1.bf16.msra.mxu1 %v3433_v24  ;;  %v3522_v24 = vld [vmem:[%s4669_s1 + $0x3b4] ss:$8 sps:$4 sm:$0xff]  }
  0xbc   :  { %2437 = vmatpush1.bf16.msra.mxu0 %v3437_v25  ;;  %2194 = vmatprep.subr.bf16.mxu1 %v3444_v26  ;;  %v3525_v25 = vld [vmem:[%s4669_s1 + $0x7b4] ss:$8 sps:$4 sm:$0xff]   ;;  %v3520_v26 = vld [vmem:[%s4669_s1 + $0x3b0] ss:$8 sps:$4 sm:$0xff]  }
  0xbd   :  { %2438 = vmatprep.subr.bf16.mxu0 %v3447_v27  ;;  %v3523_v27 = vld [vmem:[%s4669_s1 + $0x7b0] ss:$8 sps:$4 sm:$0xff]  }
  0xbf   :  { %2195 = vmatpush1.bf16.msra.mxu1 %v3442_v28  ;;  %v3533_v28 = vld [vmem:[%s4669_s1 + $0x3c4] ss:$8 sps:$4 sm:$0xff]  }
  0xc0   :  { %2439 = vmatpush1.bf16.msra.mxu0 %v3445_v29  ;;  %2225 = vmatprep.subr.bf16.mxu1 %v3453_v31  ;;  %v3537_v29 = vld [vmem:[%s4669_s1 + $0x7c4] ss:$8 sps:$4 sm:$0xff]   ;;  %v3535_v31 = vld [vmem:[%s4669_s1 + $0x7c0] ss:$8 sps:$4 sm:$0xff]  }
  0xc1   :  { %2469 = vmatprep.subr.bf16.mxu0 %v3459_v32  ;;  %v3540_v32 = vld [vmem:[%s4669_s1 + $0x3d4] ss:$8 sps:$4 sm:$0xff]  }
  0xc2   :  { %2197 = vmatmul.mubr.bf16.vlgmr.msra.gmra.mrb[0].mxu1 %v3448_v30  ;;  %v3531_v30 = vld [vmem:[%s4669_s1 + $0x3c0] ss:$8 sps:$4 sm:$0xff]  }
  0xc3   :  { %2441 = vmatmul.mubr.bf16.vlgmr.msra.gmra.mrb[0].mxu0 %v3454_v34  ;;  %2226 = vmatpush1.bf16.msra.mxu1 %v3451_v33  ;;  %v3543_v33 = vld [vmem:[%s4669_s1 + $0x7d4] ss:$8 sps:$4 sm:$0xff]   ;;  %v3538_v34 = vld [vmem:[%s4669_s1 + $0x3d0] ss:$8 sps:$4 sm:$0xff]  }
  0xc4   :  { %2470 = vmatpush1.bf16.msra.mxu0 %v3457_v35  ;;  %2227 = vmatprep.subr.bf16.mxu1 %v3462_v36  ;;  %v3541_v35 = vld [vmem:[%s4669_s1 + $0x7d0] ss:$8 sps:$4 sm:$0xff]   ;;  %v3549_v36 = vld [vmem:[%s4669_s1 + $0x3e4] ss:$8 sps:$4 sm:$0xff]  }
  0xc5   :  { %2471 = vmatprep.subr.bf16.mxu0 %v3465_v37  ;;  %2206 = vmatprep.mubr.bf16.mxu1 %v3526_v38  ;;  %v3553_v37 = vld [vmem:[%s4669_s1 + $0x7e4] ss:$8 sps:$4 sm:$0xff]   ;;  %v3547_v38 = vld [vmem:[%s4669_s1 + $0x3e0] ss:$8 sps:$4 sm:$0xff]  }
  0xc6   :  { %2450 = vmatprep.mubr.bf16.mxu0 %v3528_v39  ;;  %v3551_v39 = vld [vmem:[%s4669_s1 + $0x7e0] ss:$8 sps:$4 sm:$0xff]  }
  0xc7   :  { %2228 = vmatpush1.bf16.msra.mxu1 %v3460_v40  ;;  %v3556_v40 = vld [vmem:[%s4669_s1 + $0x3f4] ss:$8 sps:$4 sm:$0xff]  }
  0xc8   :  { %2472 = vmatpush1.bf16.msra.mxu0 %v3463_v41  ;;  %2229 = vmatprep.subr.bf16.mxu1 %v3468_v42  ;;  %v3559_v41 = vld [vmem:[%s4669_s1 + $0x7f4] ss:$8 sps:$4 sm:$0xff]   ;;  %v3554_v42 = vld [vmem:[%s4669_s1 + $0x3f0] ss:$8 sps:$4 sm:$0xff]  }
  0xc9   :  { %2473 = vmatprep.subr.bf16.mxu0 %v3471_v43  ;;  %v3557_v43 = vld [vmem:[%s4669_s1 + $0x7f0] ss:$8 sps:$4 sm:$0xff]  }
  0xca   :  { %2207 = vmatmul.mubr.bf16.gmra.mrb[4].mxu1 %v3530_v46  ;;  %v3563_v46 = vld [vmem:[%s4670_s0 + $0x38] ss:$72 sps:$4 sm:$0xff]  }
  0xcb   :  { %2451 = vmatmul.mubr.bf16.gmra.mrb[4].mxu0 %v3534_v47  ;;  %2230 = vmatpush1.bf16.msra.mxu1 %v3466_v44  ;;  %v3568_v44 = vld [vmem:[%s4669_s1 + $0x804] ss:$8 sps:$4 sm:$0xff]   ;;  %v3566_v47 = vld [vmem:[%s4669_s1 + $0x800] ss:$8 sps:$4 sm:$0xff]  }
  0xcc   :  { %2474 = vmatpush1.bf16.msra.mxu0 %v3469_v45  ;;  %2231 = vmatprep.subr.bf16.mxu1 %v3474_v50  ;;  %v3560_v45 = vld [vmem:[%s4670_s0 + $0x18] ss:$72 sps:$4 sm:$0xff]   ;;  %v3574_v50 = vld [vmem:[%s4670_s0 + $0xcc] ss:$72 sps:$4 sm:$0xff]  }
  0xcd   :  { %2475 = vmatprep.subr.bf16.mxu0 %v3477_v51  ;;  %2216 = vmatprep.mubr.bf16.mxu1 %v2683_v52  ;;  %v3569_v51 = vld [vmem:[%s4669_s1 + $0x810] ss:$8 sps:$4 sm:$0xff]   ;;  %v3580_v52 = vld [vmem:[%s4669_s1 + $0x824] ss:$8 sps:$4 sm:$0xff]  }
  0xce   :  { %2460 = vmatprep.mubr.bf16.mxu0 %v2691_v53  ;;  %v3576_v53 = vld [vmem:[%s4670_s0 + $0xa8] ss:$72 sps:$4 sm:$0xff]  }
  0xcf   :  { %2232 = vmatpush1.bf16.msra.mxu1 %v3472_v54  ;;  %v3577_v54 = vld [vmem:[%s4670_s0 + $0xc8] ss:$72 sps:$4 sm:$0xff]  }
  0xd0   :  { %2476 = vmatpush1.bf16.msra.mxu0 %v3475_v55  ;;  %2233 = vmatprep.subr.bf16.mxu1 %v3480_v56  ;;  %v53_v55 = vld [vmem:[%s4670_s0 + $0x138] sm:$0xff] }
  0xd1   :  { %2477 = vmatprep.subr.bf16.mxu0 %v3483_v57  ;;  %v57_v56 = vld [vmem:[%s4670_s0 + $0x158] sm:$0xff]  ;;  %v3578_v57 = vld [vmem:[%s4669_s1 + $0x820] ss:$8 sps:$4 sm:$0xff]  }
  0xd2   :  { %2217 = vmatmul.mubr.bf16.gmra.mrb[8].mxu1 %v2682_v60  ;;  %v2693_v60 = vcombine.high %v57_v56, %v57_v56 }
  0xd3   :  { %2461 = vmatmul.mubr.bf16.gmra.mrb[8].mxu0 %v2690_v61  ;;  %2234 = vmatpush1.bf16.msra.mxu1 %v3478_v58  ;;  %v3583_v58 = vld [vmem:[%s4669_s1 + $0x834] ss:$8 sps:$4 sm:$0xff]   ;;  %v3581_v61 = vld [vmem:[%s4669_s1 + $0x830] ss:$8 sps:$4 sm:$0xff]  }
  0xd4   :  { %2478 = vmatpush1.bf16.msra.mxu0 %v3481_v59  ;;  %2235 = vmatprep.subr.bf16.mxu1 %v3486_v62  ;;  %v2685_v59 = vcombine.high %v53_v55, %v53_v55  ;;  %v3590_v62 = vld [vmem:[%s4669_s1 + $0x844] ss:$8 sps:$4 sm:$0xff]  }
  0xd5   :  { %2479 = vmatprep.subr.bf16.mxu0 %v3489_v63  ;;  %2257 = vmatprep.mubr.bf16.mxu1 %v3562_v0  ;;  %v2684_v63 = vcombine.low %v53_v55, %v53_v55  ;;  %v2692_v0 = vcombine.low %v57_v56, %v57_v56 }
  0xd6   :  { %2501 = vmatprep.mubr.bf16.mxu0 %v3565_v1  ;;  %v3588_v1 = vld [vmem:[%s4669_s1 + $0x840] ss:$8 sps:$4 sm:$0xff]  }
  0xd7   :  { %2236 = vmatpush1.bf16.msra.mxu1 %v3484_v2  ;;  %v3593_v2 = vld [vmem:[%s4669_s1 + $0x854] ss:$8 sps:$4 sm:$0xff]  }
  0xd8   :  { %2480 = vmatpush1.bf16.msra.mxu0 %v3487_v3  ;;  %2237 = vmatprep.subr.bf16.mxu1 %v3492_v4  ;;  %v3626_v3 = vld [vmem:[%s4670_s0 + $0x44] ss:$72 sps:$4 sm:$0xff]   ;;  %v3629_v4 = vld [vmem:[%s4670_s0 + $0xd4] ss:$72 sps:$4 sm:$0xff]  }
  0xd9   :  { %2481 = vmatprep.subr.bf16.mxu0 %v3495_v5  ;;  %v3591_v5 = vld [vmem:[%s4669_s1 + $0x850] ss:$8 sps:$4 sm:$0xff]  }
  0xdb   :  { %2238 = vmatpush1.bf16.msra.mxu1 %v3490_v6  ;;  %v3596_v6 = vld [vmem:[%s4669_s1 + $0x864] ss:$8 sps:$4 sm:$0xff]  }
  0xdc   :  { %2482 = vmatpush1.bf16.msra.mxu0 %v3493_v7  ;;  %2239 = vmatprep.subr.bf16.mxu1 %v3498_v8  ;;  %v3594_v7 = vld [vmem:[%s4669_s1 + $0x860] ss:$8 sps:$4 sm:$0xff]   ;;  %v3599_v8 = vld [vmem:[%s4669_s1 + $0x874] ss:$8 sps:$4 sm:$0xff]  }
  0xdd   :  { %2483 = vmatprep.subr.bf16.mxu0 %v3501_v9  ;;  %v3597_v9 = vld [vmem:[%s4669_s1 + $0x870] ss:$8 sps:$4 sm:$0xff]  }
  0xdf   :  { %2240 = vmatpush1.bf16.msra.mxu1 %v3496_v10  ;;  %v3602_v10 = vld [vmem:[%s4669_s1 + $0x884] ss:$8 sps:$4 sm:$0xff]  }
  0xe0   :  { %2484 = vmatpush1.bf16.msra.mxu0 %v3499_v11  ;;  %2241 = vmatprep.subr.bf16.mxu1 %v3504_v12  ;;  %v3600_v11 = vld [vmem:[%s4669_s1 + $0x880] ss:$8 sps:$4 sm:$0xff]   ;;  %v3605_v12 = vld [vmem:[%s4669_s1 + $0x894] ss:$8 sps:$4 sm:$0xff]  }
  0xe1   :  { %2485 = vmatprep.subr.bf16.mxu0 %v3507_v13  ;;  %v3603_v13 = vld [vmem:[%s4669_s1 + $0x890] ss:$8 sps:$4 sm:$0xff]  }
  0xe3   :  { %2242 = vmatpush1.bf16.msra.mxu1 %v3502_v14  ;;  %v3608_v14 = vld [vmem:[%s4669_s1 + $0x8a4] ss:$8 sps:$4 sm:$0xff]  }
  0xe4   :  { %2486 = vmatpush1.bf16.msra.mxu0 %v3505_v15  ;;  %2243 = vmatprep.subr.bf16.mxu1 %v3510_v16  ;;  %v3606_v15 = vld [vmem:[%s4669_s1 + $0x8a0] ss:$8 sps:$4 sm:$0xff]   ;;  %v3611_v16 = vld [vmem:[%s4669_s1 + $0x8b4] ss:$8 sps:$4 sm:$0xff]  }
  0xe5   :  { %2487 = vmatprep.subr.bf16.mxu0 %v3513_v17  ;;  %v3609_v17 = vld [vmem:[%s4669_s1 + $0x8b0] ss:$8 sps:$4 sm:$0xff]  }
  0xe7   :  { %2244 = vmatpush1.bf16.msra.mxu1 %v3508_v18  ;;  %v3614_v18 = vld [vmem:[%s4669_s1 + $0x8c4] ss:$8 sps:$4 sm:$0xff]  }
  0xe8   :  { %2488 = vmatpush1.bf16.msra.mxu0 %v3511_v19  ;;  %2245 = vmatprep.subr.bf16.mxu1 %v3516_v20  ;;  %v3612_v19 = vld [vmem:[%s4669_s1 + $0x8c0] ss:$8 sps:$4 sm:$0xff]   ;;  %v3617_v20 = vld [vmem:[%s4669_s1 + $0x8d4] ss:$8 sps:$4 sm:$0xff]  }
  0xe9   :  { %2489 = vmatprep.subr.bf16.mxu0 %v3519_v21  ;;  %v3615_v21 = vld [vmem:[%s4669_s1 + $0x8d0] ss:$8 sps:$4 sm:$0xff]  }
  0xeb   :  { %2246 = vmatpush1.bf16.msra.mxu1 %v3514_v22  ;;  %v3620_v22 = vld [vmem:[%s4669_s1 + $0x8e4] ss:$8 sps:$4 sm:$0xff]  }
  0xec   :  { %2490 = vmatpush1.bf16.msra.mxu0 %v3517_v23  ;;  %2247 = vmatprep.subr.bf16.mxu1 %v3522_v24  ;;  %v3618_v23 = vld [vmem:[%s4669_s1 + $0x8e0] ss:$8 sps:$4 sm:$0xff]   ;;  %v3623_v24 = vld [vmem:[%s4669_s1 + $0x8f4] ss:$8 sps:$4 sm:$0xff]  }
  0xed   :  { %2491 = vmatprep.subr.bf16.mxu0 %v3525_v25  ;;  %v3621_v25 = vld [vmem:[%s4669_s1 + $0x8f0] ss:$8 sps:$4 sm:$0xff]  }
  0xef   :  { %2248 = vmatpush1.bf16.msra.mxu1 %v3520_v26  ;;  %v58_v26 = vld [vmem:[%s4670_s0 + $0x160] sm:$0xff] }
  0xf0   :  { %2492 = vmatpush1.bf16.msra.mxu0 %v3523_v27  ;;  %2249 = vmatprep.subr.bf16.mxu1 %v3533_v28  ;;  %v3624_v27 = vld [vmem:[%s4670_s0 + $0x40] ss:$72 sps:$4 sm:$0xff]   ;;  %v3627_v28 = vld [vmem:[%s4670_s0 + $0xd0] ss:$72 sps:$4 sm:$0xff]  }
  0xf1   :  { %2493 = vmatprep.subr.bf16.mxu0 %v3537_v29  ;;  %v2695_v29 = vcombine.high %v58_v26, %v58_v26 }
  0xf3   :  { %2250 = vmatpush1.bf16.msra.mxu1 %v3531_v30  ;;  %v2694_v30 = vcombine.low %v58_v26, %v58_v26 }
  0xf4   :  { %2494 = vmatpush1.bf16.msra.mxu0 %v3535_v31  ;;  %2251 = vmatprep.subr.bf16.mxu1 %v3540_v32  ;;  %v349_v31 = vlaneseq }
  0xf5   :  { %2495 = vmatprep.subr.bf16.mxu0 %v3543_v33 }
  0xf6   :  { %v350_v32 = vshrl.u32 %v349_v31, 7 }
  0xf7   :  { %2252 = vmatpush1.bf16.msra.mxu1 %v3538_v34 }
  0xf8   :  { %2496 = vmatpush1.bf16.msra.mxu0 %v3541_v35  ;;  %2253 = vmatprep.subr.bf16.mxu1 %v3549_v36  ;;  %v351_v36 = vsub.s32 0, %v350_v32 }
  0xf9   :  { %2497 = vmatprep.subr.bf16.mxu0 %v3553_v37 }
  0xfb   :  { %2254 = vmatpush1.bf16.msra.mxu1 %v3547_v38  ;;  %v347_v38 = vld [vmem:[%s4671_s2] sm:$0x3] }
  0xfc   :  { %2498 = vmatpush1.bf16.msra.mxu0 %v3551_v39  ;;  %2255 = vmatprep.subr.bf16.mxu1 %v3556_v40  ;;  %v355_v39 = vsub.s32 1, %v350_v32  ;;  %v352_v40 = vrot.slane %v347_v38, %v351_v36 }
  0xfd   :  { %2499 = vmatprep.subr.bf16.mxu0 %v3559_v41 }
  0xfe   :  { %v356_v41 = vrot.slane %v347_v38, %v355_v39 }
  0xff   :  { %2256 = vmatpush1.bf16.msra.mxu1 %v3554_v42 }
 0x100   :  { %2500 = vmatpush1.bf16.msra.mxu0 %v3557_v43  ;;  %2994 = vmatprep.subr.bf16.mxu1 %v3568_v44 }
 0x101   :  { %2530 = vmatprep.subr.bf16.mxu0 %v3568_v44 }
 0x102   :  { %2258 = vmatmul.mubr.bf16.vlgmr.msra.gmra.mrb[0].mxu1 %v3560_v45 }
 0x103   :  { %2502 = vmatmul.mubr.bf16.vlgmr.msra.gmra.mrb[0].mxu0 %v3563_v46  ;;  %3010 = vmatpush1.bf16.msra.mxu1 %v3566_v47 }
 0x104   :  { %2531 = vmatpush1.bf16.msra.mxu0 %v3566_v47  ;;  %2995 = vmatprep.subr.bf16.mxu1 %v3571_v48 }
 0x105   :  { %2532 = vmatprep.subr.bf16.mxu0 %v3571_v48  ;;  %2267 = vmatprep.mubr.bf16.mxu1 %v3572_v49 }
 0x106   :  { %2511 = vmatprep.mubr.bf16.mxu0 %v3574_v50 }
 0x107   :  { %3011 = vmatpush1.bf16.msra.mxu1 %v3569_v51 }
 0x108   :  { %2533 = vmatpush1.bf16.msra.mxu0 %v3569_v51  ;;  %2996 = vmatprep.subr.bf16.mxu1 %v3580_v52 }
 0x109   :  { %2534 = vmatprep.subr.bf16.mxu0 %v3580_v52 }
 0x10a   :  { %2268 = vmatmul.mubr.bf16.gmra.mrb[4].mxu1 %v3576_v53 }
 0x10b   :  { %2512 = vmatmul.mubr.bf16.gmra.mrb[4].mxu0 %v3577_v54  ;;  %3012 = vmatpush1.bf16.msra.mxu1 %v3578_v57 }
 0x10c   :  { %2535 = vmatpush1.bf16.msra.mxu0 %v3578_v57  ;;  %2997 = vmatprep.subr.bf16.mxu1 %v3583_v58 }
 0x10d   :  { %2536 = vmatprep.subr.bf16.mxu0 %v3583_v58  ;;  %2277 = vmatprep.mubr.bf16.mxu1 %v2685_v59 }
 0x10e   :  { %2521 = vmatprep.mubr.bf16.mxu0 %v2693_v60 }
 0x10f   :  { %3013 = vmatpush1.bf16.msra.mxu1 %v3581_v61 }
 0x110   :  { %2537 = vmatpush1.bf16.msra.mxu0 %v3581_v61  ;;  %2998 = vmatprep.subr.bf16.mxu1 %v3590_v62 }
 0x111   :  { %2538 = vmatprep.subr.bf16.mxu0 %v3590_v62 }
 0x112   :  { %2278 = vmatmul.mubr.bf16.gmra.mrb[8].mxu1 %v2684_v63 }
 0x113   :  { %2522 = vmatmul.mubr.bf16.gmra.mrb[8].mxu0 %v2692_v0  ;;  %3014 = vmatpush1.bf16.msra.mxu1 %v3588_v1 }
 0x114   :  { %2539 = vmatpush1.bf16.msra.mxu0 %v3588_v1  ;;  %2999 = vmatprep.subr.bf16.mxu1 %v3593_v2 }
 0x115   :  { %2540 = vmatprep.subr.bf16.mxu0 %v3593_v2  ;;  %2562 = vmatprep.mubr.bf16.mxu0 %v3626_v3 }
 0x116   :  { %2572 = vmatprep.mubr.bf16.mxu1 %v3629_v4 }
 0x117   :  { %3015 = vmatpush1.bf16.msra.mxu1 %v3591_v5 }
 0x118   :  { %2541 = vmatpush1.bf16.msra.mxu0 %v3591_v5  ;;  %3000 = vmatprep.subr.bf16.mxu1 %v3596_v6 }
 0x119   :  { %2542 = vmatprep.subr.bf16.mxu0 %v3596_v6 }
 0x11b   :  { %3016 = vmatpush1.bf16.msra.mxu1 %v3594_v7 }
 0x11c   :  { %2543 = vmatpush1.bf16.msra.mxu0 %v3594_v7  ;;  %3001 = vmatprep.subr.bf16.mxu1 %v3599_v8 }
 0x11d   :  { %2544 = vmatprep.subr.bf16.mxu0 %v3599_v8 }
 0x11f   :  { %3017 = vmatpush1.bf16.msra.mxu1 %v3597_v9 }
 0x120   :  { %2545 = vmatpush1.bf16.msra.mxu0 %v3597_v9  ;;  %3002 = vmatprep.subr.bf16.mxu1 %v3602_v10 }
 0x121   :  { %2546 = vmatprep.subr.bf16.mxu0 %v3602_v10 }
 0x123   :  { %3018 = vmatpush1.bf16.msra.mxu1 %v3600_v11 }
 0x124   :  { %2547 = vmatpush1.bf16.msra.mxu0 %v3600_v11  ;;  %3003 = vmatprep.subr.bf16.mxu1 %v3605_v12 }
 0x125   :  { %2548 = vmatprep.subr.bf16.mxu0 %v3605_v12 }
 0x127   :  { %3019 = vmatpush1.bf16.msra.mxu1 %v3603_v13 }
 0x128   :  { %2549 = vmatpush1.bf16.msra.mxu0 %v3603_v13  ;;  %3004 = vmatprep.subr.bf16.mxu1 %v3608_v14 }
 0x129   :  { %2550 = vmatprep.subr.bf16.mxu0 %v3608_v14 }
 0x12b   :  { %3020 = vmatpush1.bf16.msra.mxu1 %v3606_v15 }
 0x12c   :  { %2551 = vmatpush1.bf16.msra.mxu0 %v3606_v15  ;;  %3005 = vmatprep.subr.bf16.mxu1 %v3611_v16 }
 0x12d   :  { %2552 = vmatprep.subr.bf16.mxu0 %v3611_v16 }
 0x12f   :  { %3021 = vmatpush1.bf16.msra.mxu1 %v3609_v17 }
 0x130   :  { %2553 = vmatpush1.bf16.msra.mxu0 %v3609_v17  ;;  %3006 = vmatprep.subr.bf16.mxu1 %v3614_v18 }
 0x131   :  { %2554 = vmatprep.subr.bf16.mxu0 %v3614_v18 }
 0x133   :  { %3022 = vmatpush1.bf16.msra.mxu1 %v3612_v19 }
 0x134   :  { %2555 = vmatpush1.bf16.msra.mxu0 %v3612_v19  ;;  %3007 = vmatprep.subr.bf16.mxu1 %v3617_v20 }
 0x135   :  { %2556 = vmatprep.subr.bf16.mxu0 %v3617_v20 }
 0x137   :  { %3023 = vmatpush1.bf16.msra.mxu1 %v3615_v21 }
 0x138   :  { %2557 = vmatpush1.bf16.msra.mxu0 %v3615_v21  ;;  %3008 = vmatprep.subr.bf16.mxu1 %v3620_v22 }
 0x139   :  { %2558 = vmatprep.subr.bf16.mxu0 %v3620_v22 }
 0x13b   :  { %3024 = vmatpush1.bf16.msra.mxu1 %v3618_v23 }
 0x13c   :  { %2559 = vmatpush1.bf16.msra.mxu0 %v3618_v23  ;;  %3009 = vmatprep.subr.bf16.mxu1 %v3623_v24 }
 0x13d   :  { %2560 = vmatprep.subr.bf16.mxu0 %v3623_v24 }
 0x13f   :  { %3025 = vmatpush1.bf16.msra.mxu1 %v3621_v25 }
 0x140   :  { %2561 = vmatpush1.bf16.msra.mxu0 %v3621_v25 }
 0x142   :  { %2573 = vmatmul.mubr.bf16.vlgmr.msra.gmra.mrb[12].mxu1 %v3627_v28 }
 0x143   :  { %2563 = vmatmul.mubr.bf16.vlgmr.msra.gmra.mrb[0].mxu0 %v3624_v27  ;;  %2582 = vmatprep.mubr.bf16.mxu1 %v2695_v29 }
 0x14a   :  { %2583 = vmatmul.mubr.bf16.gmra.mrb[16].mxu1 %v2694_v30 }
 0x1d5   :  { %v2259_v33 = vpop.f32.mrb[0].mxu1 }
 0x1d6   :  { %v2261_v34 = vpop.f32.mrb[1].mxu1  ;;  %v3026_v6 = vadd.f32 %v2259_v33, %v352_v40 }
 0x1d7   :  { %v2263_v35 = vpop.f32.mrb[2].mxu1  ;;  %v3028_v7 = vadd.f32 %v2261_v34, %v356_v41 }
 0x1d8   :  { %v2265_v37 = vpop.f32.mrb[3].mxu1  ;;  %v3030_v10 = vadd.f32 %v2263_v35, %v352_v40 }
 0x1d9   :  { %v3032_v15 = vadd.f32 %v2265_v37, %v356_v41 }
 0x1dd   :  { %v2269_v42 = vpop.f32.mrb[4].mxu1 }
 0x1de   :  { %v2513_v43 = vpop.f32.mrb[4].mxu0  ;;  %v3034_v44 = vadd.f32 %v2269_v42, %v352_v40  ;;  %v2271_v45 = vpop.f32.mrb[5].mxu1 }
 0x1df   :  { %v2515_v46 = vpop.f32.mrb[5].mxu0  ;;  %v3037_v47 = vadd.f32 %v2271_v45, %v356_v41  ;;  %v2273_v48 = vpop.f32.mrb[6].mxu1 }
 0x1e0   :  { %v2517_v49 = vpop.f32.mrb[6].mxu0  ;;  %v3035_v50 = vadd.f32 %v3034_v44, %v2513_v43  ;;  %v3040_v51 = vadd.f32 %v2273_v48, %v352_v40  ;;  %v2275_v52 = vpop.f32.mrb[7].mxu1 }
 0x1e1   :  { %v2519_v53 = vpop.f32.mrb[7].mxu0  ;;  %v3038_v54 = vadd.f32 %v3037_v47, %v2515_v46  ;;  %v3043_v55 = vadd.f32 %v2275_v52, %v356_v41 }
 0x1e2   :  { %v3041_v56 = vadd.f32 %v3040_v51, %v2517_v49 }
 0x1e3   :  { %v3044_v57 = vadd.f32 %v3043_v55, %v2519_v53 }
 0x1e5   :  { %v2279_v58 = vpop.f32.mrb[8].mxu1 }
 0x1e6   :  { %v2523_v59 = vpop.f32.mrb[8].mxu0  ;;  %v3046_v60 = vadd.f32 %v2279_v58, %v352_v40  ;;  %v2281_v61 = vpop.f32.mrb[9].mxu1 }
 0x1e7   :  { %v2525_v62 = vpop.f32.mrb[9].mxu0  ;;  %v3049_v63 = vadd.f32 %v2281_v61, %v356_v41  ;;  %v2283_v0 = vpop.f32.mrb[10].mxu1 }
 0x1e8   :  { %v2527_v1 = vpop.f32.mrb[10].mxu0  ;;  %v3047_v2 = vadd.f32 %v3046_v60, %v2523_v59  ;;  %v2284_v3 = vpop.f32.mrb[11].mxu1 }
 0x1e9   :  { %v2528_v4 = vpop.f32.mrb[11].mxu0  ;;  %v3050_v5 = vadd.f32 %v3049_v63, %v2525_v62 }
 0x215   :  { %v2574_v9 = vpop.f32.mrb[12].mxu1 }
 0x216   :  { %v2564_v8 = vpop.f32.mrb[0].mxu0  ;;  %v3036_v12 = vadd.f32 %v3035_v50, %v2574_v9  ;;  %v2576_v14 = vpop.f32.mrb[13].mxu1 }
 0x217   :  { %v3027_v11 = vadd.f32 %v3026_v6, %v2564_v8  ;;  %v2566_v13 = vpop.f32.mrb[1].mxu0  ;;  %v3039_v17 = vadd.f32 %v3038_v54, %v2576_v14  ;;  %v2578_v19 = vpop.f32.mrb[14].mxu1 }
 0x218   :  { %v3029_v16 = vadd.f32 %v3028_v7, %v2566_v13  ;;  %v2568_v18 = vpop.f32.mrb[2].mxu0  ;;  %v2595_v21 = vmax.f32 %v3036_v12, 0.0  ;;  %v3042_v23 = vadd.f32 %v3041_v56, %v2578_v19  ;;  %v2580_v25 = vpop.f32.mrb[15].mxu1 }
 0x219   :  { %v2591_v20 = vmax.f32 %v3027_v11, 0.0  ;;  %v3031_v22 = vadd.f32 %v3030_v10, %v2568_v18  ;;  %v2570_v24 = vpop.f32.mrb[3].mxu0  ;;  %v2596_v27 = vmax.f32 %v3039_v17, 0.0  ;;  %v3045_v29 = vadd.f32 %v3044_v57, %v2580_v25 }
 0x21a   :  { %v2592_v26 = vmax.f32 %v3029_v16, 0.0  ;;  %v3033_v28 = vadd.f32 %v3032_v15, %v2570_v24  ;;  %v2597_v31 = vmax.f32 %v3042_v23, 0.0 }
 0x21b   :  { %v2593_v30 = vmax.f32 %v3031_v22, 0.0  ;;  %v2991_v33 = vpack.c.bf16 %v2596_v27, %v2595_v21  ;;  %v2598_v35 = vmax.f32 %v3045_v29, 0.0 }
 0x21c   :  { %v2989_v32 = vpack.c.bf16 %v2592_v26, %v2591_v20  ;;  %v2594_v34 = vmax.f32 %v3033_v28, 0.0 }
 0x21d   :  { %2635 = vst [vmem:[%s4672_s3 + $0x10] sm:$0xff] %v2991_v33  ;;  %v2992_v37 = vpack.c.bf16 %v2598_v35, %v2597_v31  ;;  %v2584_v38 = vpop.f32.mrb[16].mxu1 }
 0x21e   :  { %2633 = vst [vmem:[%s4672_s3] sm:$0xff] %v2989_v32  ;;  %v2990_v36 = vpack.c.bf16 %v2594_v34, %v2593_v30  ;;  %v3048_v39 = vadd.f32 %v3047_v2, %v2584_v38  ;;  %v2586_v40 = vpop.f32.mrb[17].mxu1 }
 0x21f   :  { %2636 = vst [vmem:[%s4672_s3 + $0x18] sm:$0xff] %v2992_v37  ;;  %v3051_v41 = vadd.f32 %v3050_v5, %v2586_v40  ;;  %v2588_v42 = vpop.f32.mrb[18].mxu1 }
 0x220   :  { %2634 = vst [vmem:[%s4672_s3 + $0x8] sm:$0xff] %v2990_v36  ;;  %v2599_v43 = vmax.f32 %v3048_v39, 0.0  ;;  %v2589_v44 = vpop.f32.mrb[19].mxu1 }
 0x221   :  { %v2600_v45 = vmax.f32 %v3051_v41, 0.0 }
 0x223   :  { %v2993_v46 = vpack.c.bf16 %v2600_v45, %v2599_v43 }
 0x225   :  { %2637 = vst [vmem:[%s4672_s3 + $0x20] sm:$0xff] %v2993_v46 }

// kernel: _lambda_.11
= control target key start
LH: loop header
LB: loop body
LE: loop exit
PB: predicated region body
PF: predicated region fallthrough
CT: control target
= control target key end

     0   :  { %s2697_s0 = inlined_call_operand.vmem [shape: s32[8], index: 0, kind: input, shape index: {}]   ;;  %s2698_s1 = inlined_call_operand.vmem [shape: bf16[1024,384], index: 1, kind: input, shape index: {}]   ;;  %s2699_s2 = inlined_call_operand.vmem [shape: bf16[1024,384], index: 2, kind: input, shape index: {}]   ;;  %s2700_s3 = inlined_call_operand.vmem [shape: f32[40,384], index: 3, kind: input, shape index: {}]   ;;  %s2701_s4 = inlined_call_operand.hbm [shape: f32[1,1], index: 4, kind: output, shape index: {}]  }
   0x1   :  { %s9_s17 = sshll.u32 %s2697_s0, 4  ;;  %s10_s17 = int_to_ptr.vmem [resolvable:$true] %s9_s17 }
   0x2   :  { %s1476_s18 = scalar_lea.vmem %s10_s17, 16  ;;  %p1481_p1 = scmp.lt.s32.totalorder %s10_s17, %s10_s17 }
   0x3   :  { %p1477_p0 = scmp.ne.s32.totalorder %s10_s17, %s1476_s18  ;;  %p1482_p2 = scmp.lt.s32.totalorder %s1476_s18, %s1476_s18 }
   0x5   :  { %p1483_p3 = por %p1482_p2, %p1481_p1 }
   0x7   :  { %p1484_p4 = pnand %p1483_p3, %p1477_p0 }
   0x9   :  { %1487 = shalt.err (!%p1484_p4)  }
   0xa   :  { %s1528_s19 = smov [#allocation3]  }
   0xb   :  { %12 = dma.vmem_to_smem %s10_s17, 16, %s1528_s19, [#allocation2] }
   0xc   :  { %1518 = dma.done.wait [#allocation2], 16 }
   0xd   :  { %1519 = vsyncadd [#allocation2], 4294967280 }
   0xe   :  { %14 = sfence }
   0xf   :  { %15 = vsyncpa [#allocation5], 0  ;;  %s1559_s20 = smov 0  }
  0x10 LB: > { %s1565_s0 = sadd.s32 4294967295, %s1526_s20   ;;  %p1318_p5 = scmp.ge.s32.totalorder %s1526_s20, 1  ;;  %s1526_s20 = sphi %s1559_s20, %s21_s20  }
  0x11   : > { %p168_p6 = scmp.lt.s32.totalorder %s1526_s20, 9 }
  0x13   : > { %p169_p7 = pnand %p1318_p5, %p168_p6 }
  0x15   : > { %172 = sbr.rel (%p169_p7) target bundleno = 517 (0x205), region = 32 }
  0x1c   : > { %s1319_s21 = sshll.u32 %s1565_s0, 4  ;;  %s214_s22 = sld [smem:[#allocation3 + %s1565_s0]] }
  0x1d   : > { %p201_p8 = scmp.lt.s32.totalorder %s1319_s21, 127  ;;  %p1324_p10 = scmp.ne.s32.totalorder %s1565_s0, 0 }
  0x1e   : > { %vm225_vm0 = vcmask (!%p1324_p10), 0   ;;  %v1529_v0 = vmov (!%p1324_p10), 0.0  }
  0x1f   : > { %s2913_s21 = smov (!%p201_p8, %s1319_s21), 127  ;;  %226 = vst.msk [vmem:[#allocation4] sm:$0x1] (!%p1324_p10), %vm225_vm0, %v1529_v0 }
  0x20   : > { %s1329_s23 = smul.u32 12, %s2913_s21 }
  0x21   : > { %224 = sbr.rel (%p1324_p10) target bundleno = 40 (0x28), region = 36 }
  0x22   : > { %p215_p9 = scmp.lt.s32.totalorder %s214_s22, 4  ;;  %s1574_s26 = scalar_lea.vmem %s2698_s1, %s1329_s23 }
  0x23   : > { %s1579_s29 = scalar_lea.vmem %s2699_s2, %s1329_s23 }
  0x24   : > { %s2915_s22 = smov (!%p215_p9, %s214_s22), 4 }
  0x25   : > { %s1330_s30 = smul.u32 24, %s2915_s22 }
  0x27   : > { %s1584_s7 = scalar_lea.vmem %s2700_s3, %s1330_s30 }
  0x28 PF: > { %v307_v1 = vld [vmem:[%s1579_s29] sm:$0xff]  ;;  %v308_v2 = vld [vmem:[%s1579_s29 + $0x8] ss:$12 sps:$4 sm:$0xff]   ;;  %v309_v9 = vld [vmem:[%s1579_s29 + $0xc] sm:$0xff]  ;;  %s1530_s8 = smov [#allocation4]   ;;  %p1335_p11 = scmp.eq.s32.totalorder %s1565_s0, 7 }
  0x29   : > { %v227_v3 = vld [vmem:[%s1574_s26] sm:$0xff]  ;;  %v1590_v4 = vunpack.c.l.bf16 %v307_v1  ;;  %v1592_v5 = vunpack.c.h.bf16 %v307_v1  ;;  %v1594_v6 = vunpack.c.l.bf16 %v308_v2  ;;  %v228_v7 = vld [vmem:[%s1574_s26 + $0x8] ss:$12 sps:$4 sm:$0xff]   ;;  %v1604_v12 = vunpack.c.l.bf16 %v309_v9  ;;  %v229_v14 = vld [vmem:[%s1574_s26 + $0xc] sm:$0xff]  ;;  %s1252_s9 = sshll.u32 %s1530_s8, 4  ;;  %s1253_s9 = int_to_ptr.vmem [resolvable:$true] %s1252_s9 }
  0x2a   : > { %v1597_v8 = vunpack.c.l.bf16 %v227_v3  ;;  %v1600_v10 = vunpack.c.h.bf16 %v227_v3  ;;  %v1602_v11 = vunpack.c.l.bf16 %v228_v7  ;;  %v1606_v13 = vunpack.c.h.bf16 %v309_v9  ;;  %v311_v19 = vld [vmem:[%s1579_s29 + $0x18] sm:$0xff]  ;;  %v312_v28 = vld [vmem:[%s1579_s29 + $0x20] ss:$12 sps:$4 sm:$0xff]   ;;  %v313_v43 = vld [vmem:[%s1579_s29 + $0x24] sm:$0xff]  ;;  %s1488_s10 = scalar_lea.vmem %s1253_s9, 16  ;;  %s1494_s11 = scalar_lea.vmem %s1253_s9, 32 }
  0x2b   : > { %v643_v15 = vmul.f32 %v1590_v4, %v1590_v4  ;;  %v644_v16 = vmul.f32 %v1592_v5, %v1592_v5  ;;  %v645_v17 = vmul.f32 %v1594_v6, %v1594_v6  ;;  %v1622_v22 = vunpack.c.h.bf16 %v308_v2  ;;  %v231_v33 = vld [vmem:[%s1574_s26 + $0x18] sm:$0xff]  ;;  %v232_v38 = vld [vmem:[%s1574_s26 + $0x20] ss:$12 sps:$4 sm:$0xff]   ;;  %v233_v52 = vld [vmem:[%s1574_s26 + $0x24] sm:$0xff]  ;;  %p1489_p12 = scmp.ne.s32.totalorder %s1253_s9, %s1488_s10  ;;  %p1495_p1 = scmp.lt.s32.totalorder %s1253_s9, %s1253_s9 }
  0x2c   : > { %v387_v18 = vmul.f32 %v1597_v8, %v1597_v8  ;;  %v388_v20 = vmul.f32 %v1600_v10, %v1600_v10  ;;  %v389_v21 = vmul.f32 %v1602_v11, %v1602_v11  ;;  %v646_v23 = vmul.f32 %v1604_v12, %v1604_v12  ;;  %v315_v61 = vld [vmem:[%s1579_s29 + $0x30] sm:$0xff]  ;;  %v316_v2 = vld [vmem:[%s1579_s29 + $0x38] ss:$12 sps:$4 sm:$0xff]   ;;  %p1496_p2 = scmp.lt.s32.totalorder %s1494_s11, %s1488_s10 }
  0x2d   : > { %v691_v24 = vadd.f32 %v644_v16, %v643_v15  ;;  %v647_v25 = vmul.f32 %v1606_v13, %v1606_v13  ;;  %v1628_v26 = vunpack.c.l.bf16 %v229_v14  ;;  %v1630_v27 = vunpack.c.h.bf16 %v229_v14  ;;  %v235_v15 = vld [vmem:[%s1574_s26 + $0x30] sm:$0xff]  ;;  %p1490_p13 = pnand %p1489_p12, %p1335_p11 }
  0x2e   : > { %v435_v29 = vadd.f32 %v388_v20, %v387_v18  ;;  %v648_v30 = vmul.f32 %v1622_v22, %v1622_v22  ;;  %v1635_v31 = vunpack.c.h.bf16 %v228_v7  ;;  %v1637_v32 = vunpack.c.l.bf16 %v311_v19  ;;  %v236_v20 = vld [vmem:[%s1574_s26 + $0x38] ss:$12 sps:$4 sm:$0xff]   ;;  %p1497_p3 = por %p1496_p2, %p1495_p1 }
  0x2f   : > { %v692_v34 = vadd.f32 %v691_v24, %v645_v17  ;;  %v695_v35 = vadd.f32 %v647_v25, %v646_v23  ;;  %v390_v36 = vmul.f32 %v1628_v26, %v1628_v26  ;;  %v391_v37 = vmul.f32 %v1630_v27, %v1630_v27  ;;  %p1491_p0 = pneg %p1490_p13 }
  0x30   : > { %v436_v39 = vadd.f32 %v435_v29, %v389_v21  ;;  %v392_v40 = vmul.f32 %v1635_v31, %v1635_v31  ;;  %v1647_v41 = vunpack.c.h.bf16 %v311_v19  ;;  %v1649_v42 = vunpack.c.l.bf16 %v312_v28 }
  0x31   : > { %693 = vadd.xlane.f32.xlu1 %v692_v34  ;;  %v696_v44 = vadd.f32 %v695_v35, %v648_v30  ;;  %v439_v45 = vadd.f32 %v391_v37, %v390_v36  ;;  %v649_v46 = vmul.f32 %v1637_v32, %v1637_v32  ;;  %v1654_v47 = vunpack.c.l.bf16 %v231_v33  ;;  %p1498_p4 = pnand %p1497_p3, %p1491_p0 }
  0x32   : > { %437 = vadd.xlane.f32.xlu0 %v436_v39  ;;  %v650_v48 = vmul.f32 %v1647_v41, %v1647_v41  ;;  %v651_v49 = vmul.f32 %v1649_v42, %v1649_v42  ;;  %v1660_v50 = vunpack.c.h.bf16 %v231_v33  ;;  %v1662_v51 = vunpack.c.l.bf16 %v232_v38  ;;  %v237_v39 = vld [vmem:[%s1574_s26 + $0x3c] sm:$0xff] }
  0x33   : > { %v440_v53 = vadd.f32 %v439_v45, %v392_v40  ;;  %v393_v54 = vmul.f32 %v1654_v47, %v1654_v47  ;;  %v1667_v55 = vunpack.c.l.bf16 %v313_v43  ;;  %v1669_v56 = vunpack.c.h.bf16 %v313_v43 }
  0x34   : > { %v699_v57 = vadd.f32 %v650_v48, %v649_v46  ;;  %v394_v58 = vmul.f32 %v1660_v50, %v1660_v50  ;;  %v395_v59 = vmul.f32 %v1662_v51, %v1662_v51  ;;  %v1675_v60 = vunpack.c.h.bf16 %v312_v28  ;;  %v317_v28 = vld [vmem:[%s1579_s29 + $0x3c] sm:$0xff] }
  0x35   : > { %697 = vadd.xlane.f32.xlu1 %v696_v44  ;;  %v652_v62 = vmul.f32 %v1667_v55, %v1667_v55  ;;  %v653_v63 = vmul.f32 %v1669_v56, %v1669_v56  ;;  %v1682_v0 = vunpack.c.l.bf16 %v233_v52  ;;  %v1684_v1 = vunpack.c.h.bf16 %v233_v52 }
  0x36   : > { %441 = vadd.xlane.f32.xlu0 %v440_v53  ;;  %v700_v3 = vadd.f32 %v699_v57, %v651_v49  ;;  %v443_v7 = vadd.f32 %v394_v58, %v393_v54  ;;  %v654_v9 = vmul.f32 %v1675_v60, %v1675_v60  ;;  %v1689_v14 = vunpack.c.h.bf16 %v232_v38  ;;  %v319_v53 = vld [vmem:[%s1579_s29 + $0x48] sm:$0xff] }
  0x37   : > { %v703_v16 = vadd.f32 %v653_v63, %v652_v62  ;;  %v396_v17 = vmul.f32 %v1682_v0, %v1682_v0  ;;  %v397_v18 = vmul.f32 %v1684_v1, %v1684_v1  ;;  %v1696_v19 = vunpack.c.l.bf16 %v315_v61 }
  0x38   : > { %v444_v21 = vadd.f32 %v443_v7, %v395_v59  ;;  %v398_v23 = vmul.f32 %v1689_v14, %v1689_v14  ;;  %v1701_v24 = vunpack.c.h.bf16 %v315_v61  ;;  %v1703_v25 = vunpack.c.l.bf16 %v316_v2  ;;  %v320_v61 = vld [vmem:[%s1579_s29 + $0x50] ss:$12 sps:$4 sm:$0xff]   ;;  %v239_v7 = vld [vmem:[%s1574_s26 + $0x48] sm:$0xff] }
  0x39   : > { %2772 = vst [vmem:[#allocation8_spill] sm:$0xff] %v1696_v19  ;;  %701 = vadd.xlane.f32.xlu1 %v700_v3  ;;  %v704_v29 = vadd.f32 %v703_v16, %v654_v9  ;;  %v447_v30 = vadd.f32 %v397_v18, %v396_v17  ;;  %v655_v33 = vmul.f32 %v1696_v19, %v1696_v19  ;;  %v1708_v34 = vunpack.c.l.bf16 %v235_v15  ;;  %v240_v18 = vld [vmem:[%s1574_s26 + $0x50] ss:$12 sps:$4 sm:$0xff]  }
  0x3a   : > { %2773 = vst [vmem:[#allocation9_spill] sm:$0xff] %v1701_v24  ;;  %2774 = vst [vmem:[#allocation10_spill] sm:$0xff] %v1703_v25  ;;  %445 = vadd.xlane.f32.xlu0 %v444_v21  ;;  %v656_v35 = vmul.f32 %v1701_v24, %v1701_v24  ;;  %v657_v36 = vmul.f32 %v1703_v25, %v1703_v25  ;;  %v1714_v37 = vunpack.c.h.bf16 %v235_v15  ;;  %v1716_v38 = vunpack.c.l.bf16 %v236_v20 }
  0x3b   : > { %v448_v40 = vadd.f32 %v447_v30, %v398_v23  ;;  %v399_v43 = vmul.f32 %v1708_v34, %v1708_v34  ;;  %v1721_v44 = vunpack.c.l.bf16 %v317_v28  ;;  %v1723_v45 = vunpack.c.h.bf16 %v317_v28 }
  0x3c   : > { %2775 = vst [vmem:[#allocation11_spill] sm:$0xff] %v1716_v38  ;;  %v707_v46 = vadd.f32 %v656_v35, %v655_v33  ;;  %v400_v48 = vmul.f32 %v1714_v37, %v1714_v37  ;;  %v401_v49 = vmul.f32 %v1716_v38, %v1716_v38  ;;  %v1729_v52 = vunpack.c.h.bf16 %v316_v2 }
  0x3d   : > { %2776 = vst [vmem:[#allocation12_spill] sm:$0xff] %v1721_v44  ;;  %2777 = vst [vmem:[#allocation13_spill] sm:$0xff] %v1723_v45  ;;  %705 = vadd.xlane.f32.xlu1 %v704_v29  ;;  %v658_v54 = vmul.f32 %v1721_v44, %v1721_v44  ;;  %v659_v57 = vmul.f32 %v1723_v45, %v1723_v45  ;;  %v1736_v58 = vunpack.c.l.bf16 %v237_v39  ;;  %v1738_v59 = vunpack.c.h.bf16 %v237_v39  ;;  %v321_v29 = vld [vmem:[%s1579_s29 + $0x54] sm:$0xff] }
  0x3e   : > { %2778 = vst [vmem:[#allocation14_spill] sm:$0xff] %v1729_v52  ;;  %449 = vadd.xlane.f32.xlu0 %v448_v40  ;;  %v708_v62 = vadd.f32 %v707_v46, %v657_v36  ;;  %v451_v63 = vadd.f32 %v400_v48, %v399_v43  ;;  %v660_v2 = vmul.f32 %v1729_v52, %v1729_v52  ;;  %v1743_v3 = vunpack.c.h.bf16 %v236_v20  ;;  %v241_v48 = vld [vmem:[%s1574_s26 + $0x54] sm:$0xff] }
  0x3f   : > { %2779 = vst [vmem:[#allocation15_spill] sm:$0xff] %v1736_v58  ;;  %2780 = vst [vmem:[#allocation16_spill] sm:$0xff] %v1738_v59  ;;  %v711_v9 = vadd.f32 %v659_v57, %v658_v54  ;;  %v402_v15 = vmul.f32 %v1736_v58, %v1736_v58  ;;  %v403_v16 = vmul.f32 %v1738_v59, %v1738_v59  ;;  %v1750_v17 = vunpack.c.l.bf16 %v319_v53 }
  0x40   : > { %2781 = vst [vmem:[#allocation17_spill] sm:$0xff] %v1743_v3  ;;  %v452_v21 = vadd.f32 %v451_v63, %v401_v49  ;;  %v404_v23 = vmul.f32 %v1743_v3, %v1743_v3  ;;  %v1755_v28 = vunpack.c.h.bf16 %v319_v53  ;;  %v1757_v20 = vunpack.c.l.bf16 %v320_v61 }
  0x41   : > { %2782 = vst [vmem:[#allocation18_spill] sm:$0xff] %v1750_v17  ;;  %709 = vadd.xlane.f32.xlu1 %v708_v62  ;;  %v712_v30 = vadd.f32 %v711_v9, %v660_v2  ;;  %v455_v33 = vadd.f32 %v403_v16, %v402_v15  ;;  %v661_v35 = vmul.f32 %v1750_v17, %v1750_v17  ;;  %v1762_v36 = vunpack.c.l.bf16 %v239_v7  ;;  %v323_v9 = vld [vmem:[%s1579_s29 + $0x60] sm:$0xff] }
  0x42   : > { %2783 = vst [vmem:[#allocation19_spill] sm:$0xff] %v1755_v28  ;;  %2784 = vst [vmem:[#allocation20_spill] sm:$0xff] %v1757_v20  ;;  %453 = vadd.xlane.f32.xlu0 %v452_v21  ;;  %v662_v39 = vmul.f32 %v1755_v28, %v1755_v28  ;;  %v663_v40 = vmul.f32 %v1757_v20, %v1757_v20  ;;  %v1768_v43 = vunpack.c.h.bf16 %v239_v7  ;;  %v1770_v46 = vunpack.c.l.bf16 %v240_v18  ;;  %v244_v28 = vld [vmem:[%s1574_s26 + $0x68] ss:$12 sps:$4 sm:$0xff]  }
  0x43   : > { %2785 = vst [vmem:[#allocation21_spill] sm:$0xff] %v1762_v36  ;;  %v456_v49 = vadd.f32 %v455_v33, %v404_v23  ;;  %v405_v53 = vmul.f32 %v1762_v36, %v1762_v36  ;;  %v1775_v54 = vunpack.c.l.bf16 %v321_v29  ;;  %v1777_v57 = vunpack.c.h.bf16 %v321_v29  ;;  %v324_v29 = vld [vmem:[%s1579_s29 + $0x68] ss:$12 sps:$4 sm:$0xff]  }
  0x44   : > { %2786 = vst [vmem:[#allocation22_spill] sm:$0xff] %v1768_v43  ;;  %2787 = vst [vmem:[#allocation23_spill] sm:$0xff] %v1770_v46  ;;  %v715_v62 = vadd.f32 %v662_v39, %v661_v35  ;;  %v406_v63 = vmul.f32 %v1768_v43, %v1768_v43  ;;  %v407_v2 = vmul.f32 %v1770_v46, %v1770_v46  ;;  %v1783_v7 = vunpack.c.h.bf16 %v320_v61  ;;  %v243_v39 = vld [vmem:[%s1574_s26 + $0x60] sm:$0xff] }
  0x45   : > { %2788 = vst [vmem:[#allocation24_spill] sm:$0xff] %v1775_v54  ;;  %2789 = vst [vmem:[#allocation25_spill] sm:$0xff] %v1777_v57  ;;  %713 = vadd.xlane.f32.xlu1 %v712_v30  ;;  %v664_v15 = vmul.f32 %v1775_v54, %v1775_v54  ;;  %v665_v16 = vmul.f32 %v1777_v57, %v1777_v57  ;;  %v1790_v21 = vunpack.c.l.bf16 %v241_v48  ;;  %v1792_v23 = vunpack.c.h.bf16 %v241_v48 }
  0x46   : > { %2790 = vst [vmem:[#allocation26_spill] sm:$0xff] %v1783_v7  ;;  %457 = vadd.xlane.f32.xlu0 %v456_v49  ;;  %v716_v33 = vadd.f32 %v715_v62, %v663_v40  ;;  %v459_v35 = vadd.f32 %v406_v63, %v405_v53  ;;  %v666_v61 = vmul.f32 %v1783_v7, %v1783_v7  ;;  %v1797_v30 = vunpack.c.h.bf16 %v240_v18  ;;  %v325_v62 = vld [vmem:[%s1579_s29 + $0x6c] sm:$0xff] }
  0x47   : > { %2791 = vst [vmem:[#allocation27_spill] sm:$0xff] %v1790_v21  ;;  %2792 = vst [vmem:[#allocation28_spill] sm:$0xff] %v1792_v23  ;;  %v719_v20 = vadd.f32 %v665_v16, %v664_v15  ;;  %v408_v54 = vmul.f32 %v1790_v21, %v1790_v21  ;;  %v409_v57 = vmul.f32 %v1792_v23, %v1792_v23  ;;  %v1804_v48 = vunpack.c.l.bf16 %v323_v9  ;;  %v248_v21 = vld [vmem:[%s1574_s26 + $0x80] ss:$12 sps:$4 sm:$0xff]  }
  0x48   : > { %2793 = vst [vmem:[#allocation29_spill] sm:$0xff] %v1797_v30  ;;  %v460_v49 = vadd.f32 %v459_v35, %v407_v2  ;;  %v410_v40 = vmul.f32 %v1797_v30, %v1797_v30  ;;  %v1809_v53 = vunpack.c.h.bf16 %v323_v9  ;;  %v1811_v18 = vunpack.c.l.bf16 %v324_v29 }
  0x49   : > { %2794 = vst [vmem:[#allocation30_spill] sm:$0xff] %v1804_v48  ;;  %717 = vadd.xlane.f32.xlu1 %v716_v33  ;;  %v720_v63 = vadd.f32 %v719_v20, %v666_v61  ;;  %v463_v15 = vadd.f32 %v409_v57, %v408_v54  ;;  %v667_v16 = vmul.f32 %v1804_v48, %v1804_v48  ;;  %v1816_v7 = vunpack.c.l.bf16 %v243_v39  ;;  %v245_v20 = vld [vmem:[%s1574_s26 + $0x6c] sm:$0xff]  ;;  %v327_v48 = vld [vmem:[%s1579_s29 + $0x78] sm:$0xff] }
  0x4a   : > { %2795 = vst [vmem:[#allocation31_spill] sm:$0xff] %v1809_v53  ;;  %2796 = vst [vmem:[#allocation32_spill] sm:$0xff] %v1811_v18  ;;  %461 = vadd.xlane.f32.xlu0 %v460_v49  ;;  %v668_v2 = vmul.f32 %v1809_v53, %v1809_v53  ;;  %v669_v9 = vmul.f32 %v1811_v18, %v1811_v18  ;;  %v1822_v35 = vunpack.c.h.bf16 %v243_v39  ;;  %v1824_v30 = vunpack.c.l.bf16 %v244_v28 }
  0x4b   : > { %2797 = vst [vmem:[#allocation33_spill] sm:$0xff] %v1816_v7  ;;  %v464_v54 = vadd.f32 %v463_v15, %v410_v40  ;;  %v411_v57 = vmul.f32 %v1816_v7, %v1816_v7  ;;  %v1829_v33 = vunpack.c.l.bf16 %v325_v62  ;;  %v1831_v61 = vunpack.c.h.bf16 %v325_v62  ;;  %v247_v7 = vld [vmem:[%s1574_s26 + $0x78] sm:$0xff] }
  0x4c   : > { %2798 = vst [vmem:[#allocation34_spill] sm:$0xff] %v1822_v35  ;;  %2799 = vst [vmem:[#allocation35_spill] sm:$0xff] %v1824_v30  ;;  %v723_v49 = vadd.f32 %v668_v2, %v667_v16  ;;  %v412_v53 = vmul.f32 %v1822_v35, %v1822_v35  ;;  %v413_v39 = vmul.f32 %v1824_v30, %v1824_v30  ;;  %v1837_v18 = vunpack.c.h.bf16 %v324_v29  ;;  %v328_v2 = vld [vmem:[%s1579_s29 + $0x80] ss:$12 sps:$4 sm:$0xff]  }
  0x4d   : > { %2800 = vst [vmem:[#allocation36_spill] sm:$0xff] %v1829_v33  ;;  %2801 = vst [vmem:[#allocation37_spill] sm:$0xff] %v1831_v61  ;;  %721 = vadd.xlane.f32.xlu1 %v720_v63  ;;  %v670_v40 = vmul.f32 %v1829_v33, %v1829_v33  ;;  %v671_v62 = vmul.f32 %v1831_v61, %v1831_v61  ;;  %v1844_v15 = vunpack.c.l.bf16 %v245_v20  ;;  %v1846_v16 = vunpack.c.h.bf16 %v245_v20 }
  0x4e   : > { %2802 = vst [vmem:[#allocation38_spill] sm:$0xff] %v1837_v18  ;;  %465 = vadd.xlane.f32.xlu0 %v464_v54  ;;  %v724_v35 = vadd.f32 %v723_v49, %v669_v9  ;;  %v467_v30 = vadd.f32 %v412_v53, %v411_v57  ;;  %v672_v29 = vmul.f32 %v1837_v18, %v1837_v18  ;;  %v1851_v63 = vunpack.c.h.bf16 %v244_v28  ;;  %v329_v57 = vld [vmem:[%s1579_s29 + $0x84] sm:$0xff] }
  0x4f   : > { %2803 = vst [vmem:[#allocation39_spill] sm:$0xff] %v1844_v15  ;;  %2804 = vst [vmem:[#allocation40_spill] sm:$0xff] %v1846_v16  ;;  %v727_v23 = vadd.f32 %v671_v62, %v670_v40  ;;  %v414_v33 = vmul.f32 %v1844_v15, %v1844_v15  ;;  %v415_v61 = vmul.f32 %v1846_v16, %v1846_v16  ;;  %v1858_v20 = vunpack.c.l.bf16 %v327_v48  ;;  %v252_v15 = vld [vmem:[%s1574_s26 + $0x98] ss:$12 sps:$4 sm:$0xff]  }
  0x50   : > { %2805 = vst [vmem:[#allocation41_spill] sm:$0xff] %v1851_v63  ;;  %v468_v54 = vadd.f32 %v467_v30, %v413_v39  ;;  %v416_v53 = vmul.f32 %v1851_v63, %v1851_v63  ;;  %v1863_v9 = vunpack.c.h.bf16 %v327_v48  ;;  %v1865_v28 = vunpack.c.l.bf16 %v328_v2 }
  0x51   : > { %2806 = vst [vmem:[#allocation42_spill] sm:$0xff] %v1858_v20  ;;  %725 = vadd.xlane.f32.xlu1 %v724_v35  ;;  %v728_v49 = vadd.f32 %v727_v23, %v672_v29  ;;  %v471_v40 = vadd.f32 %v415_v61, %v414_v33  ;;  %v673_v62 = vmul.f32 %v1858_v20, %v1858_v20  ;;  %v1870_v18 = vunpack.c.l.bf16 %v247_v7  ;;  %v249_v23 = vld [vmem:[%s1574_s26 + $0x84] sm:$0xff]  ;;  %v331_v20 = vld [vmem:[%s1579_s29 + $0x90] sm:$0xff] }
  0x52   : > { %2807 = vst [vmem:[#allocation43_spill] sm:$0xff] %v1863_v9  ;;  %2808 = vst [vmem:[#allocation44_spill] sm:$0xff] %v1865_v28  ;;  %469 = vadd.xlane.f32.xlu0 %v468_v54  ;;  %v674_v30 = vmul.f32 %v1863_v9, %v1863_v9  ;;  %v675_v48 = vmul.f32 %v1865_v28, %v1865_v28  ;;  %v1876_v39 = vunpack.c.h.bf16 %v247_v7  ;;  %v1878_v63 = vunpack.c.l.bf16 %v248_v21 }
  0x53   : > { %2809 = vst [vmem:[#allocation45_spill] sm:$0xff] %v1870_v18  ;;  %v472_v35 = vadd.f32 %v471_v40, %v416_v53  ;;  %v417_v33 = vmul.f32 %v1870_v18, %v1870_v18  ;;  %v1883_v61 = vunpack.c.l.bf16 %v329_v57  ;;  %v1885_v29 = vunpack.c.h.bf16 %v329_v57  ;;  %v251_v18 = vld [vmem:[%s1574_s26 + $0x90] sm:$0xff] }
  0x54   : > { %2810 = vst [vmem:[#allocation46_spill] sm:$0xff] %v1876_v39  ;;  %2811 = vst [vmem:[#allocation47_spill] sm:$0xff] %v1878_v63  ;;  %v731_v54 = vadd.f32 %v674_v30, %v673_v62  ;;  %v418_v9 = vmul.f32 %v1876_v39, %v1876_v39  ;;  %v419_v7 = vmul.f32 %v1878_v63, %v1878_v63  ;;  %v1891_v28 = vunpack.c.h.bf16 %v328_v2  ;;  %v332_v30 = vld [vmem:[%s1579_s29 + $0x98] ss:$12 sps:$4 sm:$0xff]  }
  0x55   : > { %2812 = vst [vmem:[#allocation48_spill] sm:$0xff] %v1883_v61  ;;  %2813 = vst [vmem:[#allocation49_spill] sm:$0xff] %v1885_v29  ;;  %729 = vadd.xlane.f32.xlu1 %v728_v49  ;;  %v676_v53 = vmul.f32 %v1883_v61, %v1883_v61  ;;  %v677_v57 = vmul.f32 %v1885_v29, %v1885_v29  ;;  %v1898_v40 = vunpack.c.l.bf16 %v249_v23  ;;  %v1900_v62 = vunpack.c.h.bf16 %v249_v23 }
  0x56   : > { %2814 = vst [vmem:[#allocation50_spill] sm:$0xff] %v1891_v28  ;;  %473 = vadd.xlane.f32.xlu0 %v472_v35  ;;  %v732_v39 = vadd.f32 %v731_v54, %v675_v48  ;;  %v475_v63 = vadd.f32 %v418_v9, %v417_v33  ;;  %v678_v2 = vmul.f32 %v1891_v28, %v1891_v28  ;;  %v1905_v49 = vunpack.c.h.bf16 %v248_v21  ;;  %v333_v33 = vld [vmem:[%s1579_s29 + $0x9c] sm:$0xff] }
  0x57   : > { %2815 = vst [vmem:[#allocation51_spill] sm:$0xff] %v1898_v40  ;;  %2816 = vst [vmem:[#allocation52_spill] sm:$0xff] %v1900_v62  ;;  %v735_v16 = vadd.f32 %v677_v57, %v676_v53  ;;  %v420_v61 = vmul.f32 %v1898_v40, %v1898_v40  ;;  %v421_v29 = vmul.f32 %v1900_v62, %v1900_v62  ;;  %v1912_v23 = vunpack.c.l.bf16 %v331_v20  ;;  %v256_v40 = vld [vmem:[%s1574_s26 + $0xb0] ss:$12 sps:$4 sm:$0xff]  }
  0x58   : > { %2817 = vst [vmem:[#allocation53_spill] sm:$0xff] %v1905_v49  ;;  %v476_v35 = vadd.f32 %v475_v63, %v419_v7  ;;  %v422_v9 = vmul.f32 %v1905_v49, %v1905_v49  ;;  %v1917_v48 = vunpack.c.h.bf16 %v331_v20  ;;  %v1919_v21 = vunpack.c.l.bf16 %v332_v30 }
  0x59   : > { %2818 = vst [vmem:[#allocation54_spill] sm:$0xff] %v1912_v23  ;;  %733 = vadd.xlane.f32.xlu1 %v732_v39  ;;  %v736_v54 = vadd.f32 %v735_v16, %v678_v2  ;;  %v479_v53 = vadd.f32 %v421_v29, %v420_v61  ;;  %v679_v57 = vmul.f32 %v1912_v23, %v1912_v23  ;;  %v1924_v28 = vunpack.c.l.bf16 %v251_v18  ;;  %v253_v16 = vld [vmem:[%s1574_s26 + $0x9c] sm:$0xff]  ;;  %v335_v23 = vld [vmem:[%s1579_s29 + $0xa8] sm:$0xff] }
  0x5a   : > { %2819 = vst [vmem:[#allocation55_spill] sm:$0xff] %v1917_v48  ;;  %2820 = vst [vmem:[#allocation56_spill] sm:$0xff] %v1919_v21  ;;  %477 = vadd.xlane.f32.xlu0 %v476_v35  ;;  %v680_v63 = vmul.f32 %v1917_v48, %v1917_v48  ;;  %v681_v20 = vmul.f32 %v1919_v21, %v1919_v21  ;;  %v1930_v7 = vunpack.c.h.bf16 %v251_v18  ;;  %v1932_v49 = vunpack.c.l.bf16 %v252_v15 }
  0x5b   : > { %2821 = vst [vmem:[#allocation57_spill] sm:$0xff] %v1924_v28  ;;  %v480_v39 = vadd.f32 %v479_v53, %v422_v9  ;;  %v423_v61 = vmul.f32 %v1924_v28, %v1924_v28  ;;  %v1937_v29 = vunpack.c.l.bf16 %v333_v33  ;;  %v1939_v2 = vunpack.c.h.bf16 %v333_v33  ;;  %v255_v28 = vld [vmem:[%s1574_s26 + $0xa8] sm:$0xff] }
  0x5c   : > { %2822 = vst [vmem:[#allocation58_spill] sm:$0xff] %v1930_v7  ;;  %2823 = vst [vmem:[#allocation59_spill] sm:$0xff] %v1932_v49  ;;  %v739_v35 = vadd.f32 %v680_v63, %v679_v57  ;;  %v424_v48 = vmul.f32 %v1930_v7, %v1930_v7  ;;  %v425_v18 = vmul.f32 %v1932_v49, %v1932_v49  ;;  %v1945_v21 = vunpack.c.h.bf16 %v332_v30  ;;  %v336_v63 = vld [vmem:[%s1579_s29 + $0xb0] ss:$12 sps:$4 sm:$0xff]  }
  0x5d   : > { %2824 = vst [vmem:[#allocation60_spill] sm:$0xff] %v1937_v29  ;;  %2825 = vst [vmem:[#allocation61_spill] sm:$0xff] %v1939_v2  ;;  %737 = vadd.xlane.f32.xlu1 %v736_v54  ;;  %v682_v9 = vmul.f32 %v1937_v29, %v1937_v29  ;;  %v683_v33 = vmul.f32 %v1939_v2, %v1939_v2  ;;  %v1952_v53 = vunpack.c.l.bf16 %v253_v16  ;;  %v1954_v57 = vunpack.c.h.bf16 %v253_v16 }
  0x5e   : > { %2826 = vst [vmem:[#allocation62_spill] sm:$0xff] %v1945_v21  ;;  %481 = vadd.xlane.f32.xlu0 %v480_v39  ;;  %v740_v7 = vadd.f32 %v739_v35, %v681_v20  ;;  %v483_v49 = vadd.f32 %v424_v48, %v423_v61  ;;  %v684_v30 = vmul.f32 %v1945_v21, %v1945_v21  ;;  %v1959_v54 = vunpack.c.h.bf16 %v252_v15  ;;  %v337_v61 = vld [vmem:[%s1579_s29 + $0xb4] sm:$0xff] }
  0x5f   : > { %2827 = vst [vmem:[#allocation63_spill] sm:$0xff] %v1952_v53  ;;  %2828 = vst [vmem:[#allocation64_spill] sm:$0xff] %v1954_v57  ;;  %v743_v62 = vadd.f32 %v683_v33, %v682_v9  ;;  %v426_v29 = vmul.f32 %v1952_v53, %v1952_v53  ;;  %v427_v2 = vmul.f32 %v1954_v57, %v1954_v57  ;;  %v1966_v16 = vunpack.c.l.bf16 %v335_v23  ;;  %v257_v57 = vld [vmem:[%s1574_s26 + $0xb4] sm:$0xff] }
  0x60   : > { %2829 = vst [vmem:[#allocation65_spill] sm:$0xff] %v1959_v54  ;;  %v484_v39 = vadd.f32 %v483_v49, %v425_v18  ;;  %v428_v48 = vmul.f32 %v1959_v54, %v1959_v54  ;;  %v1971_v20 = vunpack.c.h.bf16 %v335_v23  ;;  %v1973_v15 = vunpack.c.l.bf16 %v336_v63 }
  0x61   : > { %2830 = vst [vmem:[#allocation66_spill] sm:$0xff] %v1966_v16  ;;  %741 = vadd.xlane.f32.xlu1 %v740_v7  ;;  %v744_v35 = vadd.f32 %v743_v62, %v684_v30  ;;  %v487_v9 = vadd.f32 %v427_v2, %v426_v29  ;;  %v685_v33 = vmul.f32 %v1966_v16, %v1966_v16  ;;  %v1978_v21 = vunpack.c.l.bf16 %v255_v28 }
  0x62   : > { %2831 = vst [vmem:[#allocation67_spill] sm:$0xff] %v1971_v20  ;;  %2832 = vst [vmem:[#allocation68_spill] sm:$0xff] %v1973_v15  ;;  %485 = vadd.xlane.f32.xlu0 %v484_v39  ;;  %v686_v49 = vmul.f32 %v1971_v20, %v1971_v20  ;;  %v687_v18 = vmul.f32 %v1973_v15, %v1973_v15  ;;  %v1984_v23 = vunpack.c.h.bf16 %v255_v28  ;;  %v1986_v54 = vunpack.c.l.bf16 %v256_v40 }
  0x63   : > { %2833 = vst [vmem:[#allocation69_spill] sm:$0xff] %v1978_v21  ;;  %v488_v7 = vadd.f32 %v487_v9, %v428_v48  ;;  %v429_v62 = vmul.f32 %v1978_v21, %v1978_v21  ;;  %v1991_v29 = vunpack.c.l.bf16 %v337_v61  ;;  %v1993_v2 = vunpack.c.h.bf16 %v337_v61 }
  0x64   : > { %2834 = vst [vmem:[#allocation70_spill] sm:$0xff] %v1984_v23  ;;  %2835 = vst [vmem:[#allocation71_spill] sm:$0xff] %v1986_v54  ;;  %v747_v30 = vadd.f32 %v686_v49, %v685_v33  ;;  %v430_v39 = vmul.f32 %v1984_v23, %v1984_v23  ;;  %v431_v15 = vmul.f32 %v1986_v54, %v1986_v54  ;;  %v1999_v28 = vunpack.c.h.bf16 %v336_v63 }
  0x65   : > { %2836 = vst [vmem:[#allocation72_spill] sm:$0xff] %v1991_v29  ;;  %2837 = vst [vmem:[#allocation73_spill] sm:$0xff] %v1993_v2  ;;  %745 = vadd.xlane.f32.xlu1 %v744_v35  ;;  %v688_v48 = vmul.f32 %v1991_v29, %v1991_v29  ;;  %v689_v9 = vmul.f32 %v1993_v2, %v1993_v2  ;;  %v2005_v20 = vunpack.c.l.bf16 %v257_v57  ;;  %v2007_v61 = vunpack.c.h.bf16 %v257_v57 }
  0x66   : > { %2838 = vst [vmem:[#allocation74_spill] sm:$0xff] %v1999_v28  ;;  %489 = vadd.xlane.f32.xlu0 %v488_v7  ;;  %v748_v33 = vadd.f32 %v747_v30, %v687_v18  ;;  %v491_v49 = vadd.f32 %v430_v39, %v429_v62  ;;  %v690_v16 = vmul.f32 %v1999_v28, %v1999_v28  ;;  %v2011_v54 = vunpack.c.h.bf16 %v256_v40 }
  0x67   : > { %2839 = vst [vmem:[#allocation75_spill] sm:$0xff] %v2005_v20  ;;  %2840 = vst [vmem:[#allocation76_spill] sm:$0xff] %v2007_v61  ;;  %v751_v63 = vadd.f32 %v689_v9, %v688_v48  ;;  %v432_v35 = vmul.f32 %v2005_v20, %v2005_v20  ;;  %v433_v29 = vmul.f32 %v2007_v61, %v2007_v61  ;;  %v1093_v40 = vlaneseq }
  0x68   : > { %2841 = vst [vmem:[#allocation77_spill] sm:$0xff] %v2011_v54  ;;  %v492_v2 = vadd.f32 %v491_v49, %v431_v15  ;;  %v434_v57 = vmul.f32 %v2011_v54, %v2011_v54 }
  0x69   : > { %749 = vadd.xlane.f32.xlu1 %v748_v33  ;;  %v752_v7 = vadd.f32 %v751_v63, %v690_v16  ;;  %v495_v18 = vadd.f32 %v433_v29, %v432_v35  ;;  %v1094_v48 = vshrl.u32 %v1093_v40, 7  ;;  %v1091_v16 = vld [vmem:[%s1584_s7] ss:$8 sm:$0x7] }
  0x6a   : > { %493 = vadd.xlane.f32.xlu0 %v492_v2 }
  0x6b   : > { %v496_v62 = vadd.f32 %v495_v18, %v434_v57  ;;  %v1095_v49 = vsub.s32 0, %v1094_v48  ;;  %v1099_v28 = vsub.s32 1, %v1094_v48  ;;  %v1103_v33 = vsub.s32 2, %v1094_v48 }
  0x6d   : > { %753 = vadd.xlane.f32.xlu1 %v752_v7  ;;  %v2026_v63 = vrot.slane %v1091_v16, %v1095_v49  ;;  %v2028_v35 = vrot.slane %v1091_v16, %v1099_v28  ;;  %v2030_v57 = vrot.slane %v1091_v16, %v1103_v33 }
  0x6e   : > { %497 = vadd.xlane.f32.xlu0 %v496_v62 }
  0xbe   : > { %v694_v30 = vpop.xlane.xlu1 %693 }
  0xbf   : > { %1348 = vrsqrt.f32 %v694_v30  ;;  %v438_v39 = vpop.xlane.xlu0 %437  ;;  %vm757_vm1 = vcmp.eq.f32.partialorder %v694_v30, inf  ;;  %vm759_vm2 = vcmp.eq.f32.partialorder %v694_v30, 0.0  ;;  %v760_v18 = vand.u32 2147483648, %v694_v30 }
  0xc0   : > { %1350 = vrsqrt.f32 %v438_v39  ;;  %vm501_vm3 = vcmp.eq.f32.partialorder %v438_v39, inf  ;;  %vm503_vm4 = vcmp.eq.f32.partialorder %v438_v39, 0.0  ;;  %v504_v48 = vand.u32 2147483648, %v438_v39 }
  0xc2   : > { %v698_v9 = vpop.xlane.xlu1 %697 }
  0xc3   : > { %1352 = vrsqrt.f32 %v698_v9  ;;  %v442_v15 = vpop.xlane.xlu0 %441  ;;  %vm764_vm5 = vcmp.eq.f32.partialorder %v698_v9, inf  ;;  %vm766_vm6 = vcmp.eq.f32.partialorder %v698_v9, 0.0  ;;  %v767_v49 = vand.u32 2147483648, %v698_v9 }
  0xc4   : > { %1354 = vrsqrt.f32 %v442_v15  ;;  %vm508_vm7 = vcmp.eq.f32.partialorder %v442_v15, inf  ;;  %vm510_vm8 = vcmp.eq.f32.partialorder %v442_v15, 0.0  ;;  %v511_v23 = vand.u32 2147483648, %v442_v15 }
  0xc6   : > { %v2020_v29 = vpop.xlane.xlu1 %701 }
  0xc7   : > { %1356 = vrsqrt.f32 %v2020_v29  ;;  %v2023_v2 = vpop.xlane.xlu0 %445  ;;  %vm771_vm9 = vcmp.eq.f32.partialorder %v2020_v29, inf  ;;  %vm773_vm10 = vcmp.eq.f32.partialorder %v2020_v29, 0.0 }
  0xc8   : > { %1358 = vrsqrt.f32 %v2023_v2  ;;  %vm515_vm11 = vcmp.eq.f32.partialorder %v2023_v2, inf  ;;  %vm517_vm12 = vcmp.eq.f32.partialorder %v2023_v2, 0.0 }
  0xc9   : > { %v1349_v7 = vpop.eup %1348 }
  0xca   : > { %v1351_v62 = vpop.eup %1350  ;;  %v756_v40 = vmul.f32 %v1349_v7, %v694_v30  ;;  %v2032_v54 = vpop.xlane.xlu1 %705 }
  0xcb   : > { %v500_v61 = vmul.f32 %v1351_v62, %v438_v39  ;;  %1360 = vrsqrt.f32 %v2032_v54  ;;  %v2035_v28 = vpop.xlane.xlu0 %449  ;;  %vm778_vm13 = vcmp.eq.f32.partialorder %v2032_v54, inf  ;;  %vm780_vm14 = vcmp.eq.f32.partialorder %v2032_v54, 0.0 }
  0xcc   : > { %v758_v33 = vsel %vm757_vm1, %v694_v30, %v756_v40  ;;  %1362 = vrsqrt.f32 %v2035_v28  ;;  %v774_v40 = vand.u32 2147483648, %v2020_v29  ;;  %vm522_vm15 = vcmp.eq.f32.partialorder %v2035_v28, inf }
  0xcd   : > { %v1353_v16 = vpop.eup %1352  ;;  %v761_v7 = vsel %vm759_vm2, %v760_v18, %v758_v33  ;;  %v502_v20 = vsel %vm501_vm3, %v438_v39, %v500_v61  ;;  %vm524_vm0 = vcmp.eq.f32.partialorder %v2035_v28, 0.0 }
  0xce   : > { %v1355_v62 = vpop.eup %1354  ;;  %v505_v21 = vsel %vm503_vm4, %v504_v48, %v502_v20  ;;  %v763_v53 = vmul.f32 %v1353_v16, %v698_v9  ;;  %v2044_v17 = vpop.xlane.xlu1 %709  ;;  %v867_v46 = vadd.f32 1e-10, %v761_v7  ;;  %v518_v20 = vand.u32 2147483648, %v2023_v2 }
  0xcf   : > { %v507_v43 = vmul.f32 %v1355_v62, %v442_v15  ;;  %1364 = vrsqrt.f32 %v2044_v17  ;;  %v2048_v61 = vpop.xlane.xlu0 %453  ;;  %v611_v30 = vadd.f32 1e-10, %v505_v21  ;;  %vm785_vm1 = vcmp.eq.f32.partialorder %v2044_v17, inf }
  0xd0   : > { %v765_v18 = vsel %vm764_vm5, %v698_v9, %v763_v53  ;;  %1366 = vrsqrt.f32 %v2048_v61  ;;  %vm787_vm2 = vcmp.eq.f32.partialorder %v2044_v17, 0.0  ;;  %vm529_vm3 = vcmp.eq.f32.partialorder %v2048_v61, inf }
  0xd1   : > { %v1357_v39 = vpop.eup %1356  ;;  %v768_v48 = vsel %vm766_vm6, %v767_v49, %v765_v18  ;;  %v509_v33 = vsel %vm508_vm7, %v442_v15, %v507_v43  ;;  %1368 = vrcp.f32 %v867_v46  ;;  %v781_v49 = vand.u32 2147483648, %v2032_v54 }
  0xd2   : > { %v1359_v16 = vpop.eup %1358  ;;  %v868_v7 = vadd.f32 1e-10, %v768_v48  ;;  %v512_v62 = vsel %vm510_vm8, %v511_v23, %v509_v33  ;;  %v770_v21 = vmul.f32 %v1357_v39, %v2020_v29  ;;  %v2060_v53 = vpop.xlane.xlu1 %713  ;;  %1370 = vrcp.f32 %v611_v30 }
  0xd3   : > { %v514_v9 = vmul.f32 %v1359_v16, %v2023_v2  ;;  %v2065_v43 = vpop.xlane.xlu0 %457  ;;  %v612_v18 = vadd.f32 1e-10, %v512_v62  ;;  %v525_v48 = vand.u32 2147483648, %v2035_v28  ;;  %vm531_vm4 = vcmp.eq.f32.partialorder %v2048_v61, 0.0 }
  0xd4   : > { %v772_v23 = vsel %vm771_vm9, %v2020_v29, %v770_v21  ;;  %1372 = vrcp.f32 %v868_v7  ;;  %vm792_vm5 = vcmp.eq.f32.partialorder %v2060_v53, inf  ;;  %vm794_vm6 = vcmp.eq.f32.partialorder %v2060_v53, 0.0 }
  0xd5   : > { %v1361_v15 = vpop.eup %1360  ;;  %v775_v46 = vsel %vm773_vm10, %v774_v40, %v772_v23  ;;  %v516_v39 = vsel %vm515_vm11, %v2023_v2, %v514_v9  ;;  %1374 = vrsqrt.f32 %v2060_v53  ;;  %vm536_vm7 = vcmp.eq.f32.partialorder %v2065_v43, inf }
  0xd6   : > { %v1363_v33 = vpop.eup %1362  ;;  %v869_v30 = vadd.f32 1e-10, %v775_v46  ;;  %v519_v16 = vsel %vm517_vm12, %v518_v20, %v516_v39  ;;  %v777_v62 = vmul.f32 %v1361_v15, %v2032_v54  ;;  %v2081_v21 = vpop.xlane.xlu1 %717  ;;  %1376 = vrsqrt.f32 %v2065_v43 }
  0xd7   : > { %v521_v29 = vmul.f32 %v1363_v33, %v2035_v28  ;;  %v2087_v40 = vpop.xlane.xlu0 %461  ;;  %1378 = vrcp.f32 %v612_v18  ;;  %v613_v7 = vadd.f32 1e-10, %v519_v16  ;;  %v788_v20 = vand.u32 2147483648, %v2044_v17 }
  0xd8   : > { %v779_v2 = vsel %vm778_vm13, %v2032_v54, %v777_v62  ;;  %1380 = vrcp.f32 %v869_v30  ;;  %v532_v54 = vand.u32 2147483648, %v2048_v61  ;;  %vm538_vm8 = vcmp.eq.f32.partialorder %v2065_v43, 0.0 }
  0xd9   : > { %v1365_v9 = vpop.eup %1364  ;;  %v782_v23 = vsel %vm780_vm14, %v781_v49, %v779_v2  ;;  %v523_v15 = vsel %vm522_vm15, %v2035_v28, %v521_v29  ;;  %1382 = vrsqrt.f32 %v2081_v21  ;;  %v795_v2 = vand.u32 2147483648, %v2060_v53 }
  0xda   : > { %v870_v46 = vadd.f32 1e-10, %v782_v23  ;;  %v526_v18 = vsel %vm524_vm0, %v525_v48, %v523_v15  ;;  %v784_v39 = vmul.f32 %v1365_v9, %v2044_v17  ;;  %v2103_v33 = vpop.xlane.xlu1 %721  ;;  %1384 = vrsqrt.f32 %v2087_v40  ;;  %v1367_v30 = vpop.eup %1366 }
  0xdb   : > { %v2109_v49 = vpop.xlane.xlu0 %465  ;;  %1386 = vrcp.f32 %v613_v7  ;;  %v614_v28 = vadd.f32 1e-10, %v526_v18  ;;  %v2115_v16 = vpop.eup %1368  ;;  %v528_v29 = vmul.f32 %v1367_v30, %v2048_v61  ;;  %v539_v7 = vand.u32 2147483648, %v2065_v43 }
  0xdc   : > { %v786_v48 = vsel %vm785_vm1, %v2044_v17, %v784_v39  ;;  %1388 = vrcp.f32 %v870_v46  ;;  %v2121_v9 = vpop.eup %1370  ;;  %vm799_vm9 = vcmp.eq.f32.partialorder %v2081_v21, inf  ;;  %vm801_vm10 = vcmp.eq.f32.partialorder %v2081_v21, 0.0 }
  0xdd   : > { %v789_v62 = vsel %vm787_vm2, %v788_v20, %v786_v48  ;;  %1390 = vrsqrt.f32 %v2103_v33  ;;  %v530_v20 = vsel %vm529_vm3, %v2048_v61, %v528_v29  ;;  %v802_v30 = vand.u32 2147483648, %v2081_v21 }
  0xde   : > { %v2127_v23 = vpop.xlane.xlu1 %725  ;;  %v2129_v15 = vpop.eup %1372  ;;  %v871_v17 = vadd.f32 1e-10, %v789_v62  ;;  %1392 = vrsqrt.f32 %v2109_v49  ;;  %v533_v39 = vsel %vm531_vm4, %v532_v54, %v530_v20  ;;  %vm543_vm11 = vcmp.eq.f32.partialorder %v2087_v40, inf }
  0xdf   : > { %v2136_v46 = vpop.xlane.xlu0 %469  ;;  %v1375_v18 = vpop.eup %1374  ;;  %1394 = vrcp.f32 %v614_v28  ;;  %vm545_vm12 = vcmp.eq.f32.partialorder %v2087_v40, 0.0  ;;  %v546_v61 = vand.u32 2147483648, %v2087_v40  ;;  %vm806_vm13 = vcmp.eq.f32.partialorder %v2103_v33, inf }
  0xe0   : > { %v1377_v48 = vpop.eup %1376  ;;  %v791_v62 = vmul.f32 %v1375_v18, %v2060_v53  ;;  %1396 = vrsqrt.f32 %v2127_v23  ;;  %v615_v18 = vadd.f32 1e-10, %v533_v39  ;;  %vm808_vm14 = vcmp.eq.f32.partialorder %v2103_v33, 0.0 }
  0xe1   : > { %v2146_v29 = vpop.eup %1378  ;;  %v535_v28 = vmul.f32 %v1377_v48, %v2065_v43  ;;  %1398 = vrsqrt.f32 %v2136_v46  ;;  %v809_v48 = vand.u32 2147483648, %v2103_v33  ;;  %vm550_vm15 = vcmp.eq.f32.partialorder %v2109_v49, inf }
  0xe2   : > { %v2152_v54 = vpop.xlane.xlu1 %729  ;;  %v2154_v20 = vpop.eup %1380  ;;  %1400 = vrcp.f32 %v871_v17  ;;  %v793_v36 = vsel %vm792_vm5, %v2060_v53, %v791_v62  ;;  %vm552_vm0 = vcmp.eq.f32.partialorder %v2109_v49, 0.0  ;;  %vm813_vm1 = vcmp.eq.f32.partialorder %v2127_v23, inf }
  0xe3   : > { %v1383_v52 = vpop.eup %1382  ;;  %v796_v45 = vsel %vm794_vm6, %v795_v2, %v793_v36  ;;  %v537_v44 = vsel %vm536_vm7, %v2065_v43, %v535_v28  ;;  %1402 = vrsqrt.f32 %v2152_v54  ;;  %v2168_v17 = vpop.xlane.xlu0 %473  ;;  %v553_v2 = vand.u32 2147483648, %v2109_v49 }
  0xe4   : > { %v1385_v39 = vpop.eup %1384  ;;  %v872_v62 = vadd.f32 1e-10, %v796_v45  ;;  %v540_v3 = vsel %vm538_vm8, %v539_v7, %v537_v44  ;;  %v798_v59 = vmul.f32 %v1383_v52, %v2081_v21  ;;  %vm815_vm2 = vcmp.eq.f32.partialorder %v2127_v23, 0.0 }
  0xe5   : > { %v2174_v36 = vpop.eup %1386  ;;  %v542_v53 = vmul.f32 %v1385_v39, %v2087_v40  ;;  %1404 = vrcp.f32 %v615_v18  ;;  %v616_v45 = vadd.f32 1e-10, %v540_v3  ;;  %v816_v52 = vand.u32 2147483648, %v2127_v23 }
  0xe6   : > { %v2180_v28 = vpop.eup %1388  ;;  %v800_v44 = vsel %vm799_vm9, %v2081_v21, %v798_v59  ;;  %v2186_v43 = vpop.xlane.xlu1 %733  ;;  %1406 = vrcp.f32 %v872_v62  ;;  %vm557_vm3 = vcmp.eq.f32.partialorder %v2136_v46, inf  ;;  %vm559_vm4 = vcmp.eq.f32.partialorder %v2136_v46, 0.0 }
  0xe7   : > { %v1391_v7 = vpop.eup %1390  ;;  %v803_v39 = vsel %vm801_vm10, %v802_v30, %v800_v44  ;;  %v544_v58 = vsel %vm543_vm11, %v2087_v40, %v542_v53  ;;  %v560_v25 = vand.u32 2147483648, %v2136_v46  ;;  %1408 = vrsqrt.f32 %v2168_v17  ;;  %v2205_v53 = vpop.xlane.xlu0 %477 }
  0xe8   : > { %v1393_v3 = vpop.eup %1392  ;;  %v547_v18 = vsel %vm545_vm12, %v546_v61, %v544_v58  ;;  %v805_v59 = vmul.f32 %v1391_v7, %v2103_v33  ;;  %v873_v30 = vadd.f32 1e-10, %v803_v39  ;;  %vm820_vm5 = vcmp.eq.f32.partialorder %v2152_v54, inf }
  0xe9   : > { %v2200_v21 = vpop.eup %1394  ;;  %v549_v62 = vmul.f32 %v1393_v3, %v2109_v49  ;;  %1410 = vrsqrt.f32 %v2186_v43  ;;  %vm822_vm6 = vcmp.eq.f32.partialorder %v2152_v54, 0.0  ;;  %v823_v61 = vand.u32 2147483648, %v2152_v54 }
  0xea   : > { %v1397_v58 = vpop.eup %1396  ;;  %1412 = vrcp.f32 %v616_v45  ;;  %v807_v40 = vsel %vm806_vm13, %v2103_v33, %v805_v59  ;;  %v617_v7 = vadd.f32 1e-10, %v547_v18  ;;  %vm564_vm7 = vcmp.eq.f32.partialorder %v2168_v17, inf }
  0xeb   : > { %v1399_v44 = vpop.eup %1398  ;;  %v810_v39 = vsel %vm808_vm14, %v809_v48, %v807_v40  ;;  %v551_v3 = vsel %vm550_vm15, %v2109_v49, %v549_v62  ;;  %v812_v24 = vmul.f32 %v1397_v58, %v2127_v23  ;;  %1414 = vrsqrt.f32 %v2205_v53  ;;  %v2248_v40 = vpop.xlane.xlu1 %737 }
  0xec   : > { %v2218_v45 = vpop.eup %1400  ;;  %v874_v19 = vadd.f32 1e-10, %v810_v39  ;;  %v554_v59 = vsel %vm552_vm0, %v553_v2, %v551_v3  ;;  %v556_v38 = vmul.f32 %v1399_v44, %v2136_v46  ;;  %1416 = vrcp.f32 %v873_v30 }
  0xed   : > { %v1403_v33 = vpop.eup %1402  ;;  %v814_v48 = vsel %vm813_vm1, %v2127_v23, %v812_v24  ;;  %vm566_vm8 = vcmp.eq.f32.partialorder %v2168_v17, 0.0  ;;  %v567_v18 = vand.u32 2147483648, %v2168_v17  ;;  %v618_v62 = vadd.f32 1e-10, %v554_v59 }
  0xee   : > { %v817_v49 = vsel %vm815_vm2, %v816_v52, %v814_v48  ;;  %v558_v2 = vsel %vm557_vm3, %v2136_v46, %v556_v38  ;;  %v819_v58 = vmul.f32 %v1403_v33, %v2152_v54  ;;  %1418 = vrcp.f32 %v617_v7 }
  0xef   : > { %vm827_vm9 = vcmp.eq.f32.partialorder %v2186_v43, inf  ;;  %vm829_vm10 = vcmp.eq.f32.partialorder %v2186_v43, 0.0  ;;  %v830_v24 = vand.u32 2147483648, %v2186_v43  ;;  %v2239_v30 = vpop.eup %1404  ;;  %1420 = vrcp.f32 %v874_v19 }
  0xf0   : > { %v821_v23 = vsel %vm820_vm5, %v2152_v54, %v819_v58  ;;  %v899_v52 = vmul.f32 %v2121_v9, %v1597_v8  ;;  %v900_v38 = vmul.f32 %v2121_v9, %v1600_v10  ;;  %v2250_v44 = vpop.eup %1406  ;;  %v875_v7 = vadd.f32 1e-10, %v817_v49 }
  0xf1   : > { %v561_v39 = vsel %vm559_vm4, %v560_v25, %v558_v2  ;;  %v901_v19 = vmul.f32 %v2121_v9, %v1602_v11  ;;  %v947_v3 = vmul.f32 %v2115_v16, %v1590_v4  ;;  %v1409_v59 = vpop.eup %1408  ;;  %1422 = vrcp.f32 %v618_v62  ;;  %v2273_v62 = vpop.xlane.xlu0 %481 }
  0xf2   : > { %v824_v8 = vsel %vm822_vm6, %v823_v61, %v821_v23  ;;  %v948_v10 = vmul.f32 %v2115_v16, %v1592_v5  ;;  %v949_v33 = vmul.f32 %v2115_v16, %v1594_v6  ;;  %v563_v25 = vmul.f32 %v1409_v59, %v2168_v17 }
  0xf3   : > { %v1411_v48 = vpop.eup %1410  ;;  %vm571_vm11 = vcmp.eq.f32.partialorder %v2205_v53, inf  ;;  %v995_v11 = vsub.f32 %v899_v52, %v947_v3  ;;  %1424 = vrsqrt.f32 %v2248_v40  ;;  %v619_v9 = vadd.f32 1e-10, %v561_v39 }
  0xf4   : > { %v2267_v4 = vpop.eup %1412  ;;  %v826_v46 = vmul.f32 %v1411_v48, %v2186_v43  ;;  %v996_v54 = vsub.f32 %v900_v38, %v948_v10  ;;  %v997_v61 = vsub.f32 %v901_v19, %v949_v33  ;;  %1426 = vrcp.f32 %v875_v7 }
  0xf5   : > { %v876_v5 = vadd.f32 1e-10, %v824_v8  ;;  %v565_v6 = vsel %vm564_vm7, %v2168_v17, %v563_v25  ;;  %v1043_v16 = vmul.f32 %v995_v11, %v995_v11  ;;  %v1415_v49 = vpop.eup %1414  ;;  %vm573_vm12 = vcmp.eq.f32.partialorder %v2205_v53, 0.0 }
  0xf6   : > { %v568_v2 = vsel %vm566_vm8, %v567_v18, %v565_v6  ;;  %v828_v58 = vsel %vm827_vm9, %v2186_v43, %v826_v46  ;;  %v1044_v23 = vmul.f32 %v996_v54, %v996_v54  ;;  %v1045_v52 = vmul.f32 %v997_v61, %v997_v61  ;;  %v2280_v38 = vpop.eup %1416  ;;  %v2313_v6 = vpop.xlane.xlu1 %741 }
  0xf7   : > { %v620_v7 = vadd.f32 1e-10, %v568_v2  ;;  %v831_v39 = vsel %vm829_vm10, %v830_v24, %v828_v58  ;;  %v570_v19 = vmul.f32 %v1415_v49, %v2205_v53  ;;  %v1108_v3 = vmul.f32 %v2026_v63, %v1043_v16  ;;  %v2318_v2 = vpop.xlane.xlu0 %485 }
  0xf8   : > { %v574_v17 = vand.u32 2147483648, %v2205_v53  ;;  %v1109_v18 = vmul.f32 %v2028_v35, %v1044_v23  ;;  %1428 = vrsqrt.f32 %v2273_v62  ;;  %v2290_v59 = vpop.eup %1418  ;;  %v877_v8 = vadd.f32 1e-10, %v831_v39 }
  0xf9   : > { %1430 = vrcp.f32 %v619_v9  ;;  %v572_v43 = vsel %vm571_vm11, %v2205_v53, %v570_v19  ;;  %vm834_vm13 = vcmp.eq.f32.partialorder %v2248_v40, inf  ;;  %v2296_v24 = vpop.eup %1420  ;;  %v1110_v33 = vmul.f32 %v2030_v57, %v1045_v52 }
  0xfa   : > { %1432 = vrcp.f32 %v876_v5  ;;  %v575_v10 = vsel %vm573_vm12, %v574_v17, %v572_v43  ;;  %v1156_v48 = vadd.f32 %v1109_v18, %v1108_v3  ;;  %v902_v25 = vmul.f32 %v2146_v29, %v1628_v26  ;;  %v2338_v43 = vpop.xlane.xlu1 %745 }
  0xfb   : > { %1434 = vrcp.f32 %v620_v7  ;;  %v903_v11 = vmul.f32 %v2146_v29, %v1630_v27  ;;  %v904_v9 = vmul.f32 %v2146_v29, %v1635_v31  ;;  %v2305_v53 = vpop.eup %1422  ;;  %v950_v54 = vmul.f32 %v2129_v15, %v1604_v12 }
  0xfc   : > { %v1157_v46 = vadd.f32 %v1156_v48, %v1110_v33  ;;  %v951_v61 = vmul.f32 %v2129_v15, %v1606_v13  ;;  %v952_v5 = vmul.f32 %v2129_v15, %v1622_v22  ;;  %1436 = vrcp.f32 %v877_v8 }
  0xfd   : > { %v1425_v26 = vpop.eup %1424  ;;  %v621_v27 = vadd.f32 1e-10, %v575_v10  ;;  %vm836_vm14 = vcmp.eq.f32.partialorder %v2248_v40, 0.0  ;;  %v837_v31 = vand.u32 2147483648, %v2248_v40  ;;  %v998_v16 = vsub.f32 %v902_v25, %v950_v54 }
  0xfe   : > { %1158 = vadd.xlane.f32.xlu0 %v1157_v46  ;;  %v833_v29 = vmul.f32 %v1425_v26, %v2248_v40  ;;  %v999_v12 = vsub.f32 %v903_v11, %v951_v61  ;;  %v1000_v49 = vsub.f32 %v904_v9, %v952_v5  ;;  %v2320_v13 = vpop.eup %1426  ;;  %vm578_vm15 = vcmp.eq.f32.partialorder %v2273_v62, inf }
  0xff   : > { %vm580_vm0 = vcmp.eq.f32.partialorder %v2273_v62, 0.0  ;;  %v581_v22 = vand.u32 2147483648, %v2273_v62  ;;  %1438 = vrsqrt.f32 %v2313_v6  ;;  %v1046_v58 = vmul.f32 %v998_v16, %v998_v16 }
 0x100   : > { %v835_v15 = vsel %vm834_vm13, %v2248_v40, %v833_v29  ;;  %v1047_v23 = vmul.f32 %v999_v12, %v999_v12  ;;  %v1048_v52 = vmul.f32 %v1000_v49, %v1000_v49  ;;  %1440 = vrsqrt.f32 %v2318_v2 }
 0x101   : > { %v838_v7 = vsel %vm836_vm14, %v837_v31, %v835_v15  ;;  %v905_v39 = vmul.f32 %v2174_v36, %v1654_v47  ;;  %v906_v19 = vmul.f32 %v2174_v36, %v1660_v50  ;;  %1442 = vrcp.f32 %v621_v27  ;;  %v2377_v15 = vpop.xlane.xlu1 %749 }
 0x102   : > { %v1429_v3 = vpop.eup %1428  ;;  %v878_v17 = vadd.f32 1e-10, %v838_v7  ;;  %v1111_v18 = vmul.f32 %v2026_v63, %v1046_v58  ;;  %v1112_v8 = vmul.f32 %v2028_v35, %v1047_v23  ;;  %vm841_vm1 = vcmp.eq.f32.partialorder %v2313_v6, inf }
 0x103   : > { %v2340_v10 = vpop.eup %1430  ;;  %v577_v40 = vmul.f32 %v1429_v3, %v2273_v62  ;;  %v907_v47 = vmul.f32 %v2174_v36, %v1662_v51  ;;  %v953_v50 = vmul.f32 %v2154_v20, %v1637_v32  ;;  %v954_v33 = vmul.f32 %v2154_v20, %v1647_v41  ;;  %v2362_v41 = vpop.xlane.xlu0 %489 }
 0x104   : > { %v2350_v48 = vpop.eup %1432  ;;  %v1113_v25 = vmul.f32 %v2030_v57, %v1048_v52  ;;  %v1160_v11 = vadd.f32 %v1112_v8, %v1111_v18  ;;  %vm843_vm2 = vcmp.eq.f32.partialorder %v2313_v6, 0.0  ;;  %v955_v9 = vmul.f32 %v2154_v20, %v1649_v42 }
 0x105   : > { %v2356_v46 = vpop.eup %1434  ;;  %v579_v51 = vsel %vm578_vm15, %v2273_v62, %v577_v40  ;;  %v1001_v32 = vsub.f32 %v905_v39, %v953_v50  ;;  %v1002_v36 = vsub.f32 %v906_v19, %v954_v33  ;;  %1444 = vrsqrt.f32 %v2338_v43 }
 0x106   : > { %v582_v54 = vsel %vm580_vm0, %v581_v22, %v579_v51  ;;  %v1161_v61 = vadd.f32 %v1160_v11, %v1113_v25  ;;  %v844_v5 = vand.u32 2147483648, %v2313_v6  ;;  %v1003_v26 = vsub.f32 %v907_v47, %v955_v9  ;;  %v2367_v42 = vpop.eup %1436 }
 0x107   : > { %1446 = vrcp.f32 %v878_v17  ;;  %vm585_vm3 = vcmp.eq.f32.partialorder %v2318_v2, inf  ;;  %v1049_v20 = vmul.f32 %v1001_v32, %v1001_v32  ;;  %v1050_v27 = vmul.f32 %v1002_v36, %v1002_v36  ;;  %v2407_v25 = vpop.xlane.xlu0 %493 }
 0x108   : > { %1162 = vadd.xlane.f32.xlu1 %v1161_v61  ;;  %vm587_vm4 = vcmp.eq.f32.partialorder %v2318_v2, 0.0  ;;  %v588_v31 = vand.u32 2147483648, %v2318_v2  ;;  %v1051_v29 = vmul.f32 %v1003_v26, %v1003_v26  ;;  %1448 = vrsqrt.f32 %v2362_v41 }
 0x109   : > { %v1439_v62 = vpop.eup %1438  ;;  %v622_v16 = vadd.f32 1e-10, %v582_v54  ;;  %v1114_v12 = vmul.f32 %v2026_v63, %v1049_v20  ;;  %v1115_v49 = vmul.f32 %v2028_v35, %v1050_v27  ;;  %vm848_vm5 = vcmp.eq.f32.partialorder %v2338_v43, inf }
 0x10a   : > { %v851_v22 = vand.u32 2147483648, %v2338_v43  ;;  %v840_v58 = vmul.f32 %v1439_v62, %v2313_v6  ;;  %v1116_v23 = vmul.f32 %v2030_v57, %v1051_v29  ;;  %vm850_vm6 = vcmp.eq.f32.partialorder %v2338_v43, 0.0  ;;  %v1441_v39 = vpop.eup %1440 }
 0x10b   : > { %v908_v52 = vmul.f32 %v2200_v21, %v1682_v0  ;;  %v909_v7 = vmul.f32 %v2200_v21, %v1684_v1  ;;  %v1164_v19 = vadd.f32 %v1115_v49, %v1114_v12  ;;  %v910_v3 = vmul.f32 %v2200_v21, %v1689_v14  ;;  %v2392_v8 = vpop.eup %1442 }
 0x10c   : > { %v956_v17 = vmul.f32 %v2180_v28, %v1667_v55  ;;  %v957_v18 = vmul.f32 %v2180_v28, %v1669_v56  ;;  %v842_v0 = vsel %vm841_vm1, %v2313_v6, %v840_v58  ;;  %v584_v40 = vmul.f32 %v1441_v39, %v2318_v2  ;;  %v2433_v58 = vpop.xlane.xlu1 %753 }
 0x10d   : > { %v958_v1 = vmul.f32 %v2180_v28, %v1675_v60  ;;  %1450 = vrsqrt.f32 %v2377_v15  ;;  %v845_v14 = vsel %vm843_vm2, %v844_v5, %v842_v0  ;;  %v1165_v55 = vadd.f32 %v1164_v19, %v1116_v23  ;;  %v2842_v23 = vld [vmem:[#allocation11_spill] sm:$0xff] }
 0x10e   : > { %v1004_v21 = vsub.f32 %v908_v52, %v956_v17  ;;  %v1005_v47 = vsub.f32 %v909_v7, %v957_v18  ;;  %v879_v56 = vadd.f32 1e-10, %v845_v14  ;;  %v586_v50 = vsel %vm585_vm3, %v2318_v2, %v584_v40  ;;  %v2843_v7 = vld [vmem:[#allocation8_spill] sm:$0xff]  ;;  %v2845_v17 = vld [vmem:[#allocation10_spill] sm:$0xff] }
 0x10f   : > { %vm592_vm7 = vcmp.eq.f32.partialorder %v2362_v41, inf  ;;  %v1006_v33 = vsub.f32 %v910_v3, %v958_v1  ;;  %v1445_v11 = vpop.eup %1444  ;;  %v589_v60 = vsel %vm587_vm4, %v588_v31, %v586_v50  ;;  %1166 = vadd.xlane.f32.xlu0 %v1165_v55  ;;  %vm594_vm8 = vcmp.eq.f32.partialorder %v2362_v41, 0.0  ;;  %v2844_v3 = vld [vmem:[#allocation9_spill] sm:$0xff] }
 0x110   : > { %v1052_v28 = vmul.f32 %v1004_v21, %v1004_v21  ;;  %v1053_v6 = vmul.f32 %v1005_v47, %v1005_v47  ;;  %1452 = vrcp.f32 %v622_v16  ;;  %v847_v9 = vmul.f32 %v1445_v11, %v2338_v43 }
 0x111   : > { %v595_v51 = vand.u32 2147483648, %v2362_v41  ;;  %v1054_v32 = vmul.f32 %v1006_v33, %v1006_v33  ;;  %v2414_v36 = vpop.eup %1446  ;;  %vm855_vm9 = vcmp.eq.f32.partialorder %v2377_v15, inf  ;;  %1454 = vrsqrt.f32 %v2407_v25 }
 0x112   : > { %v1117_v54 = vmul.f32 %v2026_v63, %v1052_v28  ;;  %v1118_v61 = vmul.f32 %v2028_v35, %v1053_v6  ;;  %v1449_v2 = vpop.eup %1448  ;;  %1456 = vrcp.f32 %v879_v56  ;;  %v623_v5 = vadd.f32 1e-10, %v589_v60 }
 0x113   : > { %v849_v26 = vsel %vm848_vm5, %v2338_v43, %v847_v9  ;;  %vm857_vm10 = vcmp.eq.f32.partialorder %v2377_v15, 0.0  ;;  %v591_v27 = vmul.f32 %v1449_v2, %v2362_v41  ;;  %v1119_v31 = vmul.f32 %v2030_v57, %v1054_v32 }
 0x114   : > { %v852_v20 = vsel %vm850_vm6, %v851_v22, %v849_v26  ;;  %v1168_v29 = vadd.f32 %v1118_v61, %v1117_v54  ;;  %v858_v16 = vand.u32 2147483648, %v2377_v15  ;;  %v911_v12 = vmul.f32 %v2239_v30, %v1708_v34  ;;  %v2846_v61 = vld [vmem:[#allocation15_spill] sm:$0xff] }
 0x115   : > { %v880_v62 = vadd.f32 1e-10, %v852_v20  ;;  %v912_v49 = vmul.f32 %v2239_v30, %v1714_v37  ;;  %v593_v43 = vsel %vm592_vm7, %v2362_v41, %v591_v27  ;;  %v913_v52 = vmul.f32 %v2239_v30, %v2842_v23  ;;  %v2450_v30 = vpop.xlane.xlu0 %497  ;;  %v2848_v20 = vld [vmem:[#allocation17_spill] sm:$0xff] }
 0x116   : > { %v1169_v22 = vadd.f32 %v1168_v29, %v1119_v31  ;;  %v959_v39 = vmul.f32 %v2218_v45, %v2843_v7  ;;  %1458 = vrcp.f32 %v623_v5  ;;  %v596_v34 = vsel %vm594_vm8, %v595_v51, %v593_v43  ;;  %v2847_v5 = vld [vmem:[#allocation16_spill] sm:$0xff]  ;;  %v2852_v23 = vld [vmem:[#allocation21_spill] sm:$0xff]  ;;  %v2853_v7 = vld [vmem:[#allocation22_spill] sm:$0xff] }
 0x117   : > { %v1451_v19 = vpop.eup %1450  ;;  %v960_v37 = vmul.f32 %v2218_v45, %v2844_v3  ;;  %v961_v18 = vmul.f32 %v2218_v45, %v2845_v17  ;;  %v624_v0 = vadd.f32 1e-10, %v596_v34  ;;  %1460 = vrsqrt.f32 %v2433_v58 }
 0x118   : > { %1170 = vadd.xlane.f32.xlu1 %v1169_v22  ;;  %v854_v40 = vmul.f32 %v1451_v19, %v2377_v15  ;;  %v1007_v1 = vsub.f32 %v911_v12, %v959_v39  ;;  %vm599_vm11 = vcmp.eq.f32.partialorder %v2407_v25, inf  ;;  %vm601_vm12 = vcmp.eq.f32.partialorder %v2407_v25, 0.0  ;;  %v2850_v12 = vld [vmem:[#allocation13_spill] sm:$0xff]  ;;  %v2851_v22 = vld [vmem:[#allocation14_spill] sm:$0xff] }
 0x119   : > { %v1008_v41 = vsub.f32 %v912_v49, %v960_v37  ;;  %v1009_v14 = vsub.f32 %v913_v52, %v961_v18  ;;  %1462 = vrcp.f32 %v880_v62  ;;  %v602_v55 = vand.u32 2147483648, %v2407_v25  ;;  %v2849_v62 = vld [vmem:[#allocation12_spill] sm:$0xff] }
 0x11a   : > { %v856_v45 = vsel %vm855_vm9, %v2377_v15, %v854_v40  ;;  %v1055_v21 = vmul.f32 %v1007_v1, %v1007_v1  ;;  %v2458_v47 = vpop.eup %1452  ;;  %1464 = vrsqrt.f32 %v2450_v30  ;;  %vm862_vm13 = vcmp.eq.f32.partialorder %v2433_v58, inf  ;;  %v2855_v1 = vld [vmem:[#allocation18_spill] sm:$0xff] }
 0x11b   : > { %v859_v56 = vsel %vm857_vm10, %v858_v16, %v856_v45  ;;  %v1056_v50 = vmul.f32 %v1008_v41, %v1008_v41  ;;  %v1057_v33 = vmul.f32 %v1009_v14, %v1009_v14  ;;  %v1455_v11 = vpop.eup %1454  ;;  %1466 = vrcp.f32 %v624_v0  ;;  %v2854_v0 = vld [vmem:[#allocation23_spill] sm:$0xff] }
 0x11c   : > { %v881_v60 = vadd.f32 1e-10, %v859_v56  ;;  %v1120_v28 = vmul.f32 %v2026_v63, %v1055_v21  ;;  %v865_v6 = vand.u32 2147483648, %v2433_v58  ;;  %v2466_v9 = vpop.eup %1456  ;;  %v598_v51 = vmul.f32 %v1455_v11, %v2407_v25  ;;  %v2856_v41 = vld [vmem:[#allocation19_spill] sm:$0xff] }
 0x11d   : > { %v1121_v15 = vmul.f32 %v2028_v35, %v1056_v50  ;;  %v1122_v32 = vmul.f32 %v2030_v57, %v1057_v33  ;;  %vm864_vm14 = vcmp.eq.f32.partialorder %v2433_v58, 0.0  ;;  %v609_v54 = vand.u32 2147483648, %v2450_v30  ;;  %v2857_v33 = vld [vmem:[#allocation20_spill] sm:$0xff] }
 0x11e   : > { %1468 = vrcp.f32 %v881_v60  ;;  %v914_v2 = vmul.f32 %v2267_v4, %v2846_v61  ;;  %v915_v26 = vmul.f32 %v2267_v4, %v2847_v5  ;;  %v916_v27 = vmul.f32 %v2267_v4, %v2848_v20  ;;  %v2858_v61 = vld [vmem:[#allocation27_spill] sm:$0xff] }
 0x11f   : > { %v600_v31 = vsel %vm599_vm11, %v2407_v25, %v598_v51  ;;  %v1172_v29 = vadd.f32 %v1121_v15, %v1120_v28  ;;  %vm606_vm15 = vcmp.eq.f32.partialorder %v2450_v30, inf  ;;  %v962_v16 = vmul.f32 %v2250_v44, %v2849_v62 }
 0x120   : > { %v963_v49 = vmul.f32 %v2250_v44, %v2850_v12  ;;  %v603_v43 = vsel %vm601_vm12, %v602_v55, %v600_v31  ;;  %vm608_vm0 = vcmp.eq.f32.partialorder %v2450_v30, 0.0  ;;  %v964_v4 = vmul.f32 %v2250_v44, %v2851_v22  ;;  %v2496_v19 = vpop.eup %1458  ;;  %v2859_v22 = vld [vmem:[#allocation28_spill] sm:$0xff] }
 0x121   : > { %v917_v52 = vmul.f32 %v2290_v59, %v2852_v23  ;;  %v918_v39 = vmul.f32 %v2290_v59, %v2853_v7  ;;  %v625_v34 = vadd.f32 1e-10, %v603_v43  ;;  %v1173_v3 = vadd.f32 %v1172_v29, %v1122_v32  ;;  %v1461_v18 = vpop.eup %1460 }
 0x122   : > { %v1010_v37 = vsub.f32 %v914_v2, %v962_v16  ;;  %v1011_v17 = vsub.f32 %v915_v26, %v963_v49  ;;  %v1012_v25 = vsub.f32 %v916_v27, %v964_v4  ;;  %v919_v40 = vmul.f32 %v2290_v59, %v2854_v0 }
 0x123   : > { %v965_v44 = vmul.f32 %v2280_v38, %v2855_v1  ;;  %v966_v14 = vmul.f32 %v2280_v38, %v2856_v41  ;;  %1470 = vrcp.f32 %v625_v34  ;;  %1174 = vadd.xlane.f32.xlu0 %v1173_v3  ;;  %v861_v45 = vmul.f32 %v1461_v18, %v2433_v58  ;;  %v2505_v56 = vpop.eup %1462  ;;  %v2862_v18 = vld [vmem:[#allocation25_spill] sm:$0xff] }
 0x124   : > { %v1058_v55 = vmul.f32 %v1010_v37, %v1010_v37  ;;  %v1059_v21 = vmul.f32 %v1011_v17, %v1011_v17  ;;  %v1060_v50 = vmul.f32 %v1012_v25, %v1012_v25  ;;  %v967_v11 = vmul.f32 %v2280_v38, %v2857_v33  ;;  %v1465_v28 = vpop.eup %1464  ;;  %v2861_v37 = vld [vmem:[#allocation24_spill] sm:$0xff]  ;;  %v2867_v33 = vld [vmem:[#allocation30_spill] sm:$0xff] }
 0x125   : > { %v1013_v60 = vsub.f32 %v917_v52, %v965_v44  ;;  %v1014_v59 = vsub.f32 %v918_v39, %v966_v14  ;;  %v863_v51 = vsel %vm862_vm13, %v2433_v58, %v861_v45  ;;  %v920_v2 = vmul.f32 %v2305_v53, %v2858_v61  ;;  %v2516_v5 = vpop.eup %1466  ;;  %v2866_v14 = vld [vmem:[#allocation35_spill] sm:$0xff] }
 0x126   : > { %v1123_v15 = vmul.f32 %v2026_v63, %v1058_v55  ;;  %v1124_v32 = vmul.f32 %v2028_v35, %v1059_v21  ;;  %v866_v26 = vsel %vm864_vm14, %v865_v6, %v863_v51  ;;  %v605_v38 = vmul.f32 %v1465_v28, %v2450_v30  ;;  %v2860_v6 = vld [vmem:[#allocation29_spill] sm:$0xff]  ;;  %v2869_v51 = vld [vmem:[#allocation32_spill] sm:$0xff] }
 0x127   : > { %v1125_v20 = vmul.f32 %v2030_v57, %v1060_v50  ;;  %v1015_v27 = vsub.f32 %v919_v40, %v967_v11  ;;  %v882_v31 = vadd.f32 1e-10, %v866_v26  ;;  %v1061_v62 = vmul.f32 %v1013_v60, %v1013_v60  ;;  %v2865_v40 = vld [vmem:[#allocation34_spill] sm:$0xff] }
 0x128   : > { %v1176_v29 = vadd.f32 %v1124_v32, %v1123_v15  ;;  %v1062_v16 = vmul.f32 %v1014_v59, %v1014_v59  ;;  %v2522_v12 = vpop.eup %1468  ;;  %v607_v49 = vsel %vm606_vm15, %v2450_v30, %v605_v38  ;;  %v921_v58 = vmul.f32 %v2305_v53, %v2859_v22  ;;  %v2864_v30 = vld [vmem:[#allocation33_spill] sm:$0xff]  ;;  %v2870_v32 = vld [vmem:[#allocation39_spill] sm:$0xff] }
 0x129   : > { %v1063_v43 = vmul.f32 %v1015_v27, %v1015_v27  ;;  %v922_v4 = vmul.f32 %v2305_v53, %v2860_v6  ;;  %1472 = vrcp.f32 %v882_v31  ;;  %v610_v23 = vsel %vm608_vm0, %v609_v54, %v607_v49  ;;  %v2863_v53 = vld [vmem:[#allocation26_spill] sm:$0xff]  ;;  %v2871_v31 = vld [vmem:[#allocation40_spill] sm:$0xff] }
 0x12a   : > { %v1177_v52 = vadd.f32 %v1176_v29, %v1125_v20  ;;  %v1126_v7 = vmul.f32 %v2026_v63, %v1061_v62  ;;  %v626_v39 = vadd.f32 1e-10, %v610_v23  ;;  %v1127_v34 = vmul.f32 %v2028_v35, %v1062_v16  ;;  %v2872_v62 = vld [vmem:[#allocation41_spill] sm:$0xff]  ;;  %v2873_v6 = vld [vmem:[#allocation36_spill] sm:$0xff] }
 0x12b   : > { %v1128_v3 = vmul.f32 %v2030_v57, %v1063_v43  ;;  %v968_v17 = vmul.f32 %v2296_v24, %v2861_v37  ;;  %v969_v25 = vmul.f32 %v2296_v24, %v2862_v18  ;;  %v970_v0 = vmul.f32 %v2296_v24, %v2863_v53  ;;  %v2868_v24 = vld [vmem:[#allocation31_spill] sm:$0xff]  ;;  %v2874_v23 = vld [vmem:[#allocation37_spill] sm:$0xff] }
 0x12c   : > { %1178 = vadd.xlane.f32.xlu1 %v1177_v52  ;;  %v923_v54 = vmul.f32 %v2340_v10, %v2864_v30  ;;  %v924_v1 = vmul.f32 %v2340_v10, %v2865_v40  ;;  %1474 = vrcp.f32 %v626_v39  ;;  %v1180_v44 = vadd.f32 %v1127_v34, %v1126_v7  ;;  %v2875_v7 = vld [vmem:[#allocation38_spill] sm:$0xff] }
 0x12d   : > { %v1016_v41 = vsub.f32 %v920_v2, %v968_v17  ;;  %v925_v45 = vmul.f32 %v2340_v10, %v2866_v14  ;;  %v2548_v55 = vpop.eup %1470  ;;  %v1017_v21 = vsub.f32 %v921_v58, %v969_v25  ;;  %v1018_v50 = vsub.f32 %v922_v4, %v970_v0  ;;  %v2876_v17 = vld [vmem:[#allocation45_spill] sm:$0xff] }
 0x12e   : > { %v971_v11 = vmul.f32 %v2320_v13, %v2867_v33  ;;  %v972_v60 = vmul.f32 %v2320_v13, %v2868_v24  ;;  %v1181_v59 = vadd.f32 %v1180_v44, %v1128_v3  ;;  %v973_v15 = vmul.f32 %v2320_v13, %v2869_v51  ;;  %v2878_v44 = vld [vmem:[#allocation47_spill] sm:$0xff]  ;;  %v2879_v33 = vld [vmem:[#allocation42_spill] sm:$0xff] }
 0x12f   : > { %v1064_v28 = vmul.f32 %v1016_v41, %v1016_v41  ;;  %v926_v61 = vmul.f32 %v2356_v46, %v2870_v32  ;;  %v1065_v2 = vmul.f32 %v1017_v21, %v1017_v21  ;;  %v1066_v10 = vmul.f32 %v1018_v50, %v1018_v50 }
 0x130   : > { %v1019_v26 = vsub.f32 %v923_v54, %v971_v11  ;;  %v1020_v38 = vsub.f32 %v924_v1, %v972_v60  ;;  %1182 = vadd.xlane.f32.xlu0 %v1181_v59  ;;  %v1021_v27 = vsub.f32 %v925_v45, %v973_v15  ;;  %v927_v29 = vmul.f32 %v2356_v46, %v2871_v31  ;;  %v2877_v1 = vld [vmem:[#allocation46_spill] sm:$0xff]  ;;  %v2880_v60 = vld [vmem:[#allocation43_spill] sm:$0xff]  ;;  %v2884_v31 = vld [vmem:[#allocation53_spill] sm:$0xff] }
 0x131   : > { %v1129_v20 = vmul.f32 %v2026_v63, %v1064_v28  ;;  %v928_v16 = vmul.f32 %v2356_v46, %v2872_v62  ;;  %v1130_v49 = vmul.f32 %v2028_v35, %v1065_v2  ;;  %v1131_v13 = vmul.f32 %v2030_v57, %v1066_v10  ;;  %v2881_v28 = vld [vmem:[#allocation44_spill] sm:$0xff]  ;;  %v2882_v15 = vld [vmem:[#allocation51_spill] sm:$0xff] }
 0x132   : > { %v1067_v43 = vmul.f32 %v1019_v26, %v1019_v26  ;;  %v1068_v22 = vmul.f32 %v1020_v38, %v1020_v38  ;;  %v1069_v58 = vmul.f32 %v1021_v27, %v1021_v27  ;;  %v974_v4 = vmul.f32 %v2350_v48, %v2873_v6  ;;  %v2887_v6 = vld [vmem:[#allocation50_spill] sm:$0xff] }
 0x133   : > { %v975_v52 = vmul.f32 %v2350_v48, %v2874_v23  ;;  %v976_v39 = vmul.f32 %v2350_v48, %v2875_v7  ;;  %v2571_v34 = vpop.eup %1472  ;;  %v1184_v3 = vadd.f32 %v1130_v49, %v1129_v20  ;;  %v929_v18 = vmul.f32 %v2392_v8, %v2876_v17  ;;  %v2883_v20 = vld [vmem:[#allocation52_spill] sm:$0xff]  ;;  %v2888_v23 = vld [vmem:[#allocation57_spill] sm:$0xff] }
 0x134   : > { %v1132_v46 = vmul.f32 %v2026_v63, %v1067_v43  ;;  %v1133_v37 = vmul.f32 %v2028_v35, %v1068_v22  ;;  %v1134_v25 = vmul.f32 %v2030_v57, %v1069_v58  ;;  %v1022_v53 = vsub.f32 %v926_v61, %v974_v4 }
 0x135   : > { %v1023_v0 = vsub.f32 %v927_v29, %v975_v52  ;;  %v1024_v30 = vsub.f32 %v928_v16, %v976_v39  ;;  %v1185_v54 = vadd.f32 %v1184_v3, %v1131_v13  ;;  %v930_v48 = vmul.f32 %v2392_v8, %v2877_v1  ;;  %v2885_v16 = vld [vmem:[#allocation48_spill] sm:$0xff]  ;;  %v2886_v13 = vld [vmem:[#allocation49_spill] sm:$0xff] }
 0x136   : > { %v1188_v40 = vadd.f32 %v1133_v37, %v1132_v46  ;;  %v931_v41 = vmul.f32 %v2392_v8, %v2878_v44  ;;  %v2582_v14 = vpop.eup %1474  ;;  %v1070_v45 = vmul.f32 %v1022_v53, %v1022_v53  ;;  %v977_v11 = vmul.f32 %v2367_v42, %v2879_v33  ;;  %v2892_v44 = vld [vmem:[#allocation55_spill] sm:$0xff] }
 0x137   : > { %v1071_v21 = vmul.f32 %v1023_v0, %v1023_v0  ;;  %v1072_v50 = vmul.f32 %v1024_v30, %v1024_v30  ;;  %1186 = vadd.xlane.f32.xlu1 %v1185_v54  ;;  %v978_v59 = vmul.f32 %v2367_v42, %v2880_v60  ;;  %v979_v51 = vmul.f32 %v2367_v42, %v2881_v28  ;;  %v2891_v54 = vld [vmem:[#allocation54_spill] sm:$0xff] }
 0x138   : > { %v1189_v24 = vadd.f32 %v1188_v40, %v1134_v25  ;;  %v932_v32 = vmul.f32 %v2458_v47, %v2882_v15  ;;  %v1135_v8 = vmul.f32 %v2026_v63, %v1070_v45  ;;  %v1025_v10 = vsub.f32 %v929_v18, %v977_v11  ;;  %v2889_v18 = vld [vmem:[#allocation58_spill] sm:$0xff]  ;;  %v2893_v45 = vld [vmem:[#allocation56_spill] sm:$0xff] }
 0x139   : > { %v1136_v61 = vmul.f32 %v2028_v35, %v1071_v21  ;;  %v1137_v2 = vmul.f32 %v2030_v57, %v1072_v50  ;;  %v1026_v26 = vsub.f32 %v930_v48, %v978_v59  ;;  %v1027_v38 = vsub.f32 %v931_v41, %v979_v51 }
 0x13a   : > { %1190 = vadd.xlane.f32.xlu0 %v1189_v24  ;;  %v933_v27 = vmul.f32 %v2458_v47, %v2883_v20  ;;  %v934_v29 = vmul.f32 %v2458_v47, %v2884_v31  ;;  %v1073_v62 = vmul.f32 %v1025_v10, %v1025_v10  ;;  %v980_v49 = vmul.f32 %v2414_v36, %v2885_v16  ;;  %v2894_v24 = vld [vmem:[#allocation63_spill] sm:$0xff] }
 0x13b   : > { %v1192_v42 = vadd.f32 %v1136_v61, %v1135_v8  ;;  %v981_v43 = vmul.f32 %v2414_v36, %v2886_v13  ;;  %v1074_v22 = vmul.f32 %v1026_v26, %v1026_v26  ;;  %v1075_v58 = vmul.f32 %v1027_v38, %v1027_v38  ;;  %v2895_v8 = vld [vmem:[#allocation64_spill] sm:$0xff] }
 0x13c   : > { %v982_v4 = vmul.f32 %v2414_v36, %v2887_v6  ;;  %v935_v52 = vmul.f32 %v2496_v19, %v2888_v23  ;;  %v1138_v39 = vmul.f32 %v2026_v63, %v1073_v62  ;;  %v1028_v47 = vsub.f32 %v932_v32, %v980_v49  ;;  %v2890_v36 = vld [vmem:[#allocation59_spill] sm:$0xff]  ;;  %v2897_v38 = vld [vmem:[#allocation60_spill] sm:$0xff]  ;;  %v2899_v62 = vld [vmem:[#allocation62_spill] sm:$0xff] }
 0x13d   : > { %v1193_v7 = vadd.f32 %v1192_v42, %v1137_v2  ;;  %v1029_v3 = vsub.f32 %v933_v27, %v981_v43  ;;  %v1139_v46 = vmul.f32 %v2028_v35, %v1074_v22  ;;  %v1140_v37 = vmul.f32 %v2030_v57, %v1075_v58  ;;  %v2896_v2 = vld [vmem:[#allocation65_spill] sm:$0xff] }
 0x13e   : > { %v1030_v17 = vsub.f32 %v934_v29, %v982_v4  ;;  %v936_v25 = vmul.f32 %v2496_v19, %v2889_v18  ;;  %v1076_v53 = vmul.f32 %v1028_v47, %v1028_v47  ;;  %v937_v30 = vmul.f32 %v2496_v19, %v2890_v36  ;;  %v2898_v27 = vld [vmem:[#allocation61_spill] sm:$0xff]  ;;  %v2901_v4 = vld [vmem:[#allocation70_spill] sm:$0xff]  ;;  %v2906_v36 = vld [vmem:[#allocation75_spill] sm:$0xff] }
 0x13f   : > { %1194 = vadd.xlane.f32.xlu1 %v1193_v7  ;;  %v1077_v0 = vmul.f32 %v1029_v3, %v1029_v3  ;;  %v983_v40 = vmul.f32 %v2466_v9, %v2891_v54  ;;  %v1196_v1 = vadd.f32 %v1139_v46, %v1138_v39  ;;  %v984_v41 = vmul.f32 %v2466_v9, %v2892_v44  ;;  %v2900_v49 = vld [vmem:[#allocation69_spill] sm:$0xff]  ;;  %v2903_v39 = vld [vmem:[#allocation66_spill] sm:$0xff] }
 0x140   : > { %v1078_v48 = vmul.f32 %v1030_v17, %v1030_v17  ;;  %v985_v21 = vmul.f32 %v2466_v9, %v2893_v45  ;;  %v1141_v50 = vmul.f32 %v2026_v63, %v1076_v53  ;;  %v938_v60 = vmul.f32 %v2516_v5, %v2894_v24  ;;  %v2907_v45 = vld [vmem:[#allocation76_spill] sm:$0xff] }
 0x141   : > { %v1142_v33 = vmul.f32 %v2028_v35, %v1077_v0  ;;  %v1031_v11 = vsub.f32 %v935_v52, %v983_v40  ;;  %v1197_v19 = vadd.f32 %v1196_v1, %v1140_v37  ;;  %v1032_v28 = vsub.f32 %v936_v25, %v984_v41  ;;  %v2902_v52 = vld [vmem:[#allocation71_spill] sm:$0xff]  ;;  %v2905_v25 = vld [vmem:[#allocation68_spill] sm:$0xff] }
 0x142   : > { %v1143_v59 = vmul.f32 %v2030_v57, %v1078_v48  ;;  %v1033_v51 = vsub.f32 %v937_v30, %v985_v21  ;;  %v939_v61 = vmul.f32 %v2516_v5, %v2895_v8  ;;  %v940_v9 = vmul.f32 %v2516_v5, %v2896_v2  ;;  %v2904_v37 = vld [vmem:[#allocation67_spill] sm:$0xff]  ;;  %v2909_v24 = vld [vmem:[#allocation72_spill] sm:$0xff] }
 0x143   : > { %v1200_v15 = vadd.f32 %v1142_v33, %v1141_v50  ;;  %v1079_v32 = vmul.f32 %v1031_v11, %v1031_v11  ;;  %1198 = vadd.xlane.f32.xlu0 %v1197_v19  ;;  %v1080_v10 = vmul.f32 %v1032_v28, %v1032_v28  ;;  %v986_v20 = vmul.f32 %v2505_v56, %v2897_v38  ;;  %v2908_v33 = vld [vmem:[#allocation77_spill] sm:$0xff] }
 0x144   : > { %v1081_v26 = vmul.f32 %v1033_v51, %v1033_v51  ;;  %v987_v31 = vmul.f32 %v2505_v56, %v2898_v27  ;;  %v988_v16 = vmul.f32 %v2505_v56, %v2899_v62  ;;  %v941_v13 = vmul.f32 %v2548_v55, %v2900_v49  ;;  %v2910_v28 = vld [vmem:[#allocation73_spill] sm:$0xff] }
 0x145   : > { %v1201_v29 = vadd.f32 %v1200_v15, %v1143_v59  ;;  %v1144_v42 = vmul.f32 %v2026_v63, %v1079_v32  ;;  %v1145_v5 = vmul.f32 %v2028_v35, %v1080_v10  ;;  %v1034_v22 = vsub.f32 %v938_v60, %v986_v20  ;;  %v2911_v15 = vld [vmem:[#allocation74_spill] sm:$0xff] }
 0x146   : > { %v1146_v43 = vmul.f32 %v2030_v57, %v1081_v26  ;;  %v1035_v58 = vsub.f32 %v939_v61, %v987_v31  ;;  %v1036_v6 = vsub.f32 %v940_v9, %v988_v16  ;;  %v942_v23 = vmul.f32 %v2548_v55, %v2901_v4 }
 0x147   : > { %1202 = vadd.xlane.f32.xlu1 %v1201_v29  ;;  %v943_v7 = vmul.f32 %v2548_v55, %v2902_v52  ;;  %v989_v56 = vmul.f32 %v2522_v12, %v2903_v39  ;;  %v1204_v47 = vadd.f32 %v1145_v5, %v1144_v42  ;;  %v1082_v3 = vmul.f32 %v1034_v22, %v1034_v22 }
 0x148   : > { %v1083_v46 = vmul.f32 %v1035_v58, %v1035_v58  ;;  %v990_v17 = vmul.f32 %v2522_v12, %v2904_v37  ;;  %v1084_v18 = vmul.f32 %v1036_v6, %v1036_v6  ;;  %v991_v53 = vmul.f32 %v2522_v12, %v2905_v25 }
 0x149   : > { %v1037_v0 = vsub.f32 %v941_v13, %v989_v56  ;;  %v944_v30 = vmul.f32 %v2582_v14, %v2906_v36  ;;  %v1205_v54 = vadd.f32 %v1204_v47, %v1146_v43  ;;  %v1147_v55 = vmul.f32 %v2026_v63, %v1082_v3 }
 0x14a   : > { %v1148_v40 = vmul.f32 %v2028_v35, %v1083_v46  ;;  %v1038_v1 = vsub.f32 %v942_v23, %v990_v17  ;;  %v1149_v48 = vmul.f32 %v2030_v57, %v1084_v18  ;;  %v1039_v44 = vsub.f32 %v943_v7, %v991_v53 }
 0x14b   : > { %v1085_v41 = vmul.f32 %v1037_v0, %v1037_v0  ;;  %v945_v21 = vmul.f32 %v2582_v14, %v2907_v45  ;;  %1206 = vadd.xlane.f32.xlu0 %v1205_v54  ;;  %v946_v11 = vmul.f32 %v2582_v14, %v2908_v33  ;;  %v992_v60 = vmul.f32 %v2571_v34, %v2909_v24 }
 0x14c   : > { %v1208_v50 = vadd.f32 %v1148_v40, %v1147_v55  ;;  %v1086_v12 = vmul.f32 %v1038_v1, %v1038_v1  ;;  %v1087_v19 = vmul.f32 %v1039_v44, %v1039_v44  ;;  %v993_v51 = vmul.f32 %v2571_v34, %v2910_v28 }
 0x14d   : > { %v1150_v59 = vmul.f32 %v2026_v63, %v1085_v41  ;;  %v994_v32 = vmul.f32 %v2571_v34, %v2911_v15  ;;  %v1040_v2 = vsub.f32 %v944_v30, %v992_v60  ;;  %vm1243_vm1 = vcmask 0  }
 0x14e   : > { %v1209_v8 = vadd.f32 %v1208_v50, %v1149_v48  ;;  %v1151_v61 = vmul.f32 %v2028_v35, %v1086_v12  ;;  %v1041_v9 = vsub.f32 %v945_v21, %v993_v51  ;;  %v1152_v14 = vmul.f32 %v2030_v57, %v1087_v19  ;;  %v1220_v50 = vld [vmem:[#allocation4] sm:$0x1] }
 0x14f   : > { %v1042_v10 = vsub.f32 %v946_v11, %v994_v32  ;;  %v1088_v38 = vmul.f32 %v1040_v2, %v1040_v2 }
 0x150   : > { %1210 = vadd.xlane.f32.xlu1 %v1209_v8  ;;  %v1212_v26 = vadd.f32 %v1151_v61, %v1150_v59  ;;  %v1089_v20 = vmul.f32 %v1041_v9, %v1041_v9 }
 0x151   : > { %v1090_v27 = vmul.f32 %v1042_v10, %v1042_v10  ;;  %v1153_v29 = vmul.f32 %v2026_v63, %v1088_v38 }
 0x152   : > { %v1213_v31 = vadd.f32 %v1212_v26, %v1152_v14  ;;  %v1154_v42 = vmul.f32 %v2028_v35, %v1089_v20 }
 0x153   : > { %v1155_v34 = vmul.f32 %v2030_v57, %v1090_v27 }
 0x154   : > { %1214 = vadd.xlane.f32.xlu0 %v1213_v31  ;;  %v1216_v62 = vadd.f32 %v1154_v42, %v1153_v29 }
 0x156   : > { %v1217_v16 = vadd.f32 %v1216_v62, %v1155_v34 }
 0x158   : > { %1218 = vadd.xlane.f32.xlu1 %v1217_v16 }
 0x18b   : > { %v1159_v49 = vpop.xlane.xlu0 %1158 }
 0x195   : > { %v1163_v13 = vpop.xlane.xlu1 %1162 }
 0x196   : > { %v1221_v43 = vadd.f32 %v1163_v13, %v1159_v49 }
 0x19c   : > { %v1167_v5 = vpop.xlane.xlu0 %1166 }
 0x19d   : > { %v1222_v58 = vadd.f32 %v1221_v43, %v1167_v5 }
 0x1a5   : > { %v1171_v22 = vpop.xlane.xlu1 %1170 }
 0x1a6   : > { %v1223_v4 = vadd.f32 %v1222_v58, %v1171_v22 }
 0x1b0   : > { %v1175_v6 = vpop.xlane.xlu0 %1174 }
 0x1b1   : > { %v1224_v52 = vadd.f32 %v1223_v4, %v1175_v6 }
 0x1b9   : > { %v1179_v23 = vpop.xlane.xlu1 %1178 }
 0x1ba   : > { %v1225_v63 = vadd.f32 %v1224_v52, %v1179_v23 }
 0x1bd   : > { %v1183_v7 = vpop.xlane.xlu0 %1182 }
 0x1be   : > { %v1226_v35 = vadd.f32 %v1225_v63, %v1183_v7 }
 0x1c4   : > { %v1187_v39 = vpop.xlane.xlu1 %1186 }
 0x1c5   : > { %v1227_v47 = vadd.f32 %v1226_v35, %v1187_v39 }
 0x1c7   : > { %v1191_v56 = vpop.xlane.xlu0 %1190 }
 0x1c8   : > { %v1228_v3 = vadd.f32 %v1227_v47, %v1191_v56 }
 0x1cc   : > { %v1195_v57 = vpop.xlane.xlu1 %1194 }
 0x1cd   : > { %v1229_v37 = vadd.f32 %v1228_v3, %v1195_v57 }
 0x1d0   : > { %v1199_v46 = vpop.xlane.xlu0 %1198 }
 0x1d1   : > { %v1230_v18 = vadd.f32 %v1229_v37, %v1199_v46 }
 0x1d4   : > { %v1203_v17 = vpop.xlane.xlu1 %1202 }
 0x1d5   : > { %v1231_v53 = vadd.f32 %v1230_v18, %v1203_v17 }
 0x1d8   : > { %v1207_v25 = vpop.xlane.xlu0 %1206 }
 0x1d9   : > { %v1232_v36 = vadd.f32 %v1231_v53, %v1207_v25 }
 0x1dd   : > { %v1211_v0 = vpop.xlane.xlu1 %1210 }
 0x1de   : > { %v1233_v54 = vadd.f32 %v1232_v36, %v1211_v0 }
 0x1e1   : > { %v1215_v30 = vpop.xlane.xlu0 %1214 }
 0x1e2   : > { %v1234_v55 = vadd.f32 %v1233_v54, %v1215_v30 }
 0x1e5   : > { %v1219_v40 = vpop.xlane.xlu1 %1218 }
 0x1e6   : > { %v1235_v1 = vadd.f32 %v1234_v55, %v1219_v40 }
 0x1e8   : > { %v1236_v48 = vrot.slane %v1235_v1, 4 }
 0x1ea   : > { %v1237_v44 = vadd.f32 %v1236_v48, %v1235_v1 }
 0x1ec   : > { %v1238_v41 = vrot.slane %v1237_v44, 2 }
 0x1ee   : > { %v1239_v45 = vadd.f32 %v1238_v41, %v1237_v44 }
 0x1f0   : > { %v1240_v21 = vrot.slane %v1239_v45, 1 }
 0x1f2   : > { %v1241_v12 = vadd.f32 %v1240_v21, %v1239_v45 }
 0x1f4   : > { %v1242_v33 = vadd.f32 %v1241_v12, %v1220_v50 }
 0x1f6   : > { %1244 = vst.msk [vmem:[#allocation4] sm:$0x1] %vm1243_vm1, %v1242_v33 }
 0x1f7   : > { %1501 = shalt.err (!%p1498_p4)
}
 0x1f8   : > { %s1502_s14 = scalar_lea.hbm %s2701_s4, 16 }
 0x1f9   : > { %p1503_p5 = scmp.ne.s32.totalorder %s2701_s4, %s1502_s14  ;;  %p1508_p8 = scmp.lt.u32.totalorder %s1502_s14, %s2701_s4 }
 0x1fb   : > { %p1504_p6 = pnand %p1503_p5, %p1335_p11 }
 0x1fd   : > { %p1505_p7 = pneg %p1504_p6 }
 0x1ff   : > { %p1510_p9 = pnand %p1508_p8, %p1505_p7 }
 0x201   : > { %1513 = shalt.err (!%p1510_p9)
}
 0x202   : > { %1332 = dma.vmem_to_hbm [thread:$0]  (%p1335_p11), %s1253_s9, 16, %s2701_s4, [#allocation5]  }
 0x203   : > { %1521 = dma.done.wait (%p1335_p11), [#allocation5], 16  }
 0x204   : > { %1523 = vsyncadd (%p1335_p11), [#allocation5], 4294967280 }
 0x205 PF: > { %s21_s20 = sadd.s32 1, %s1526_s20  }
 0x206   : > { %p18_p10 = scmp.ge.s32.totalorder %s21_s20, 10  }
 0x208   :  { %20 = sbr.rel (!%p18_p10) target bundleno = 16 (0x10), region = 69 }
 0x20f   :  { %1265 = vsyncpa [#allocation5], 1 }
 0x210   :  { %1267 = vsyncpa [#allocation5 + $0x1], 1 }

</bundles_post_ra>
